<compile_context>
chip_gen: v7x
topology: tpu7x:2x2x1
jax: 0.10.0
libtpu: 0.0.40
codegen_flags: <defaults>
</compile_context>

<pallas_src>
import numpy as np
import jax
import jax.numpy as jnp
from jax.experimental import pallas as pl
from jax.experimental.pallas import tpu as pltpu

# Problem dims (PyTorch NCHW input (2, 4, 16, 16), n_feats = 4).
N, C, H, W = 2, 4, 16, 16
HW = H * W          # 256 -> lane-dense minor dim (multiple of 128)
NC = N * C          # 8   -> one full f32 sublane tile
K = 7               # merged stencil size (7x7 covers the 7/5/3 kernels)
R = K // 2          # 3
PAD = R * W + R     # 51: zero halo on the flattened H*W axis
EPS = 1e-6


# ----------------------------------------------------------------------------
# Kernel
# ----------------------------------------------------------------------------
def mab_kernel(x_ref,
               wm1_ref, bp1_ref,      # MLKA merged 7x7 stencil (scale folded) + bias plane
               wm2_ref, bp2_ref,      # GSAU DWConv1 7x7 stencil + bias plane
               wm3_ref, bp3_ref,      # AMSCM merged 7x7 stencil (scale_weights folded) + bias plane
               wmix_ref, bmix_ref,    # SMEM: four stacked 1x1 mixes, (4*C, C) / (4, C)
               lng_ref, lnb_ref,      # SMEM: LayerNorm gamma / beta, (2, C)
               o_ref):
    zpad = jnp.zeros((NC, PAD), dtype=jnp.float32)

    def split(v2):
        # (NC, HW) -> list of C per-channel planes, each (N, HW)
        v3 = v2.reshape(N, C, HW)
        return [v3[:, c, :] for c in range(C)]

    def merge(chs):
        # list of C (N, HW) planes -> packed (NC, HW)
        return jnp.stack(chs, axis=1).reshape(NC, HW)

    def layer_norm(v2, idx):
        # channels_first LayerNorm; gamma/beta are per-channel SMEM scalars.
        ch = split(v2)
        u = sum(ch) * (1.0 / C)
        d = [c - u for c in ch]
        var = sum(di * di for di in d) * (1.0 / C)
        inv = jax.lax.rsqrt(var + EPS)              # EUP, reuses (x - u)
        return [d[c] * inv * lng_ref[idx, c] + lnb_ref[idx, c] for c in range(C)]

    def conv_mix(chs, k):
        # 1x1 conv over channels: out[co] = b[co] + sum_ci W[co, ci] * x[ci]
        # cin = 4 -> unrolled scalar-broadcast VPU FMAs (no MXU, no reshape).
        outs = []
        for co in range(C):
            acc = bmix_ref[k, co] + chs[0] * wmix_ref[k * C + 0, co]
            for ci in range(1, C):
                acc = acc + chs[ci] * wmix_ref[k * C + ci, co]
            outs.append(acc)
        return outs

    def dwconv(v2, wm_ref, bias_ref):
        # Merged 7x7 depthwise conv on the flattened (NC, HW) slab.
        # Border masks are pre-folded into wm_ref, so every tap is a static
        # lane-shifted window of one zero-extended value times a dense plane.
        xp = jnp.concatenate([zpad, v2, zpad], axis=1)      # (NC, HW + 2*PAD), stays in vregs
        acc = bias_ref[...]
        for di in range(K):
            for dj in range(K):
                off = di * W + dj                            # = PAD + (di-R)*W + (dj-R)
                acc = acc + xp[:, off:off + HW] * wm_ref[di * K + dj]
        return acc

    x = x_ref[...]

    # ---------------- MLKA (LKA7 + LKA5 + LKA3 merged, scale folded) --------
    ln = layer_norm(x, 0)
    x = x + dwconv(merge(ln), wm1_ref, bp1_ref)

    # ---------------- GSAU --------------------------------------------------
    sc = x
    ln = layer_norm(x, 1)
    a = conv_mix(ln, 0)                      # Conv1, first  n_feats channels
    v = conv_mix(ln, 1)                      # Conv1, second n_feats channels
    gate = split(dwconv(merge(a), wm2_ref, bp2_ref))
    v = [v[c] * gate[c] for c in range(C)]
    v = conv_mix(v, 2)                       # Conv2 (GSAU scale folded in)
    x = sc + merge(v)

    # ---------------- AMSCM (3/5/7 merged, scale_weights folded) ------------
    y = conv_mix(split(x), 3)                # conv1 (1x1)
    x = x + dwconv(merge(y), wm3_ref, bp3_ref)

    o_ref[...] = x


# ----------------------------------------------------------------------------
# Host-side weight prep: merge kernels, fold scales, fold border masks,
# pre-broadcast per-channel values to kernel-layout planes.
# ----------------------------------------------------------------------------
def _mask_table():
    idx = np.arange(HW)
    hh, ww = idx // W, idx % W
    m = np.zeros((K * K, HW), np.float32)
    for di in range(K):
        for dj in range(K):
            oi, oj = di - R, dj - R
            valid = (hh + oi >= 0) & (hh + oi < H) & (ww + oj >= 0) & (ww + oj < W)
            m[di * K + dj] = valid.astype(np.float32)
    return m


def prepare_kernel_params(params):
    masks = _mask_table()                                   # (49, HW)
    g = lambda name: np.asarray(params[name], np.float32)

    def center_pad(wk):                                     # (C,k,k) -> (C,7,7)
        k = wk.shape[-1]
        p = (K - k) // 2
        out = np.zeros((C, K, K), np.float32)
        out[:, p:p + k, p:p + k] = wk
        return out

    def stencil(w77):                                       # (C,7,7) -> (49, NC, HW)
        wt = w77.reshape(C, K * K).T                        # [tap, c]
        wm = wt[:, :, None] * masks[:, None, :]             # (49, C, HW)
        wm = np.ascontiguousarray(
            np.broadcast_to(wm[:, None], (K * K, N, C, HW))).reshape(K * K, NC, HW)
        return jnp.asarray(wm, dtype=jnp.float32)

    def plane(bc):                                          # (C,) -> (NC, HW)
        p = np.ascontiguousarray(
            np.broadcast_to(np.asarray(bc, np.float32)[None, :, None], (N, C, HW)))
        return jnp.asarray(p.reshape(NC, HW), dtype=jnp.float32)

    s1, s2, sw = g("mlka_scale"), g("gsau_scale"), g("ams_sw")

    # MLKA: merge 7/5/3 and fold the MLKA scale into weights + bias.
    w_mlka = (g("lka7_w")[:, 0] + center_pad(g("lka5_w")[:, 0])
              + center_pad(g("lka3_w")[:, 0])) * s1[:, None, None]
    b_mlka = s1 * (g("lka7_b") + g("lka5_b") + g("lka3_b"))

    # AMSCM: merge 3/5/7 and fold scale_weights (scales order = (3, 5, 7)).
    w_ams = (sw[2] * g("ams7_w")[:, 0] + sw[1] * center_pad(g("ams5_w")[:, 0])
             + sw[0] * center_pad(g("ams3_w")[:, 0]))
    b_ams = sw[0] * g("ams3_b") + sw[1] * g("ams5_b") + sw[2] * g("ams7_b")

    out = {
        "wm1": stencil(w_mlka), "bp1": plane(b_mlka),
        "wm2": stencil(g("gsau_dw_w")[:, 0]), "bp2": plane(g("gsau_dw_b")),
        "wm3": stencil(w_ams), "bp3": plane(b_ams),
    }

    # 1x1 mixes as SMEM scalars: wmix[k*C + ci, co] = W_k[co, ci].
    c1w, c1b = g("gsau_c1_w")[:, :, 0, 0], g("gsau_c1_b")
    mats = [c1w[:C], c1w[C:],
            g("gsau_c2_w")[:, :, 0, 0] * s2[:, None],       # GSAU scale folded
            g("ams_c1_w")[:, :, 0, 0]]
    biases = [c1b[:C], c1b[C:], g("gsau_c2_b") * s2, g("ams_c1_b")]
    wmix = np.zeros((4 * C, C), np.float32)
    for k, Wk in enumerate(mats):
        wmix[k * C:(k + 1) * C, :] = Wk.T
    out["wmix"] = jnp.asarray(wmix)
    out["bmix"] = jnp.asarray(np.stack(biases).astype(np.float32))      # (4, C)
    out["ln_g"] = jnp.asarray(np.stack([g("ln1_g"), g("ln2_g")]))        # (2, C)
    out["ln_b"] = jnp.asarray(np.stack([g("ln1_b"), g("ln2_b")]))        # (2, C)
    return out


def mab_pallas(x_nchw, params):
    assert x_nchw.shape == (N, C, H, W)
    kp = prepare_kernel_params(params)
    x2 = x_nchw.reshape(NC, HW).astype(jnp.float32)          # lane-dense slab

    vmem = lambda: pl.BlockSpec(memory_space=pltpu.MemorySpace.VMEM)
    smem = lambda: pl.BlockSpec(memory_space=pltpu.MemorySpace.SMEM)

    out = pl.pallas_call(
        mab_kernel,
        out_shape=jax.ShapeDtypeStruct((NC, HW), jnp.float32),
        in_specs=[vmem() for _ in range(7)] + [smem() for _ in range(4)],
        out_specs=vmem(),
    )(x2, kp["wm1"], kp["bp1"], kp["wm2"], kp["bp2"], kp["wm3"], kp["bp3"],
      kp["wmix"], kp["bmix"], kp["ln_g"], kp["ln_b"])
    return out.reshape(N, C, H, W)


# ----------------------------------------------------------------------------
# Deterministic synthetic parameters (PyTorch layouts)
# ----------------------------------------------------------------------------
def init_params(key):
    keys = iter(jax.random.split(key, 32))

    def rnd(shape, scale=0.1):
        return (scale * jax.random.normal(next(keys), shape)).astype(jnp.float32)

    P = {}
    P["ln1_g"] = 1.0 + rnd((C,), 0.05); P["ln1_b"] = rnd((C,), 0.05)
    P["lka7_w"] = rnd((C, 1, 7, 7));    P["lka7_b"] = rnd((C,), 0.05)
    P["lka5_w"] = rnd((C, 1, 5, 5));    P["lka5_b"] = rnd((C,), 0.05)
    P["lka3_w"] = rnd((C, 1, 3, 3));    P["lka3_b"] = rnd((C,), 0.05)
    # NOTE: PyTorch initializes the MLKA/GSAU `scale` params to zeros (identity
    # branches); use small random values so the full path is exercised.
    P["mlka_scale"] = rnd((C,), 0.1)
    P["ln2_g"] = 1.0 + rnd((C,), 0.05); P["ln2_b"] = rnd((C,), 0.05)
    P["gsau_c1_w"] = rnd((2 * C, C, 1, 1)); P["gsau_c1_b"] = rnd((2 * C,), 0.05)
    P["gsau_dw_w"] = rnd((C, 1, 7, 7));     P["gsau_dw_b"] = rnd((C,), 0.05)
    P["gsau_c2_w"] = rnd((C, C, 1, 1));     P["gsau_c2_b"] = rnd((C,), 0.05)
    P["gsau_scale"] = rnd((C,), 0.1)
    P["ams_c1_w"] = rnd((C, C, 1, 1));  P["ams_c1_b"] = rnd((C,), 0.05)
    P["ams3_w"] = rnd((C, 1, 3, 3));    P["ams3_b"] = rnd((C,), 0.05)
    P["ams5_w"] = rnd((C, 1, 5, 5));    P["ams5_b"] = rnd((C,), 0.05)
    P["ams7_w"] = rnd((C, 1, 7, 7));    P["ams7_b"] = rnd((C,), 0.05)
    P["ams_sw"] = 1.0 + rnd((3,), 0.1)
    return P


# ----------------------------------------------------------------------------
# Independent pure-JAX reference (XLA convs, NCHW like PyTorch)
# ----------------------------------------------------------------------------
def ref_forward(x, P):
    def ln_cf(v, gam, bet):
        u = v.mean(axis=1, keepdims=True)
        s = ((v - u) ** 2).mean(axis=1, keepdims=True)
        return gam[None, :, None, None] * ((v - u) / jnp.sqrt(s + EPS)) + bet[None, :, None, None]

    def dw(v, w, b, k):
        y = jax.lax.conv_general_dilated(
            v, w, window_strides=(1, 1), padding=[(k // 2, k // 2)] * 2,
            dimension_numbers=("NCHW", "OIHW", "NCHW"), feature_group_count=C)
        return y + b[None, :, None, None]

    def c1x1(v, w, b):
        y = jax.lax.conv_general_dilated(
            v, w, window_strides=(1, 1), padding="VALID",
            dimension_numbers=("NCHW", "OIHW", "NCHW"))
        return y + b[None, :, None, None]

    # MLKA
    sc = x
    xn = ln_cf(x, P["ln1_g"], P["ln1_b"])
    y = (dw(xn, P["lka7_w"], P["lka7_b"], 7) + dw(xn, P["lka5_w"], P["lka5_b"], 5)
         + dw(xn, P["lka3_w"], P["lka3_b"], 3))
    x = y * P["mlka_scale"][None, :, None, None] + sc
    # GSAU
    sc = x
    xn = ln_cf(x, P["ln2_g"], P["ln2_b"])
    t = c1x1(xn, P["gsau_c1_w"], P["gsau_c1_b"])
    a, v = t[:, :C], t[:, C:]
    v = v * dw(a, P["gsau_dw_w"], P["gsau_dw_b"], 7)
    v = c1x1(v, P["gsau_c2_w"], P["gsau_c2_b"])
    x = v * P["gsau_scale"][None, :, None, None] + sc
    # AMSCM
    sc = x
    y = c1x1(x, P["ams_c1_w"], P["ams_c1_b"])
    o3 = dw(y, P["ams3_w"], P["ams3_b"], 3)
    o5 = dw(y, P["ams5_w"], P["ams5_b"], 5)
    o7 = dw(y, P["ams7_w"], P["ams7_b"], 7)
    return (P["ams_sw"][0] * o3 + P["ams_sw"][1] * o5 + P["ams_sw"][2] * o7 + sc)


if __name__ == "__main__":
    key = jax.random.PRNGKey(0)
    kx, kparam = jax.random.split(key)
    x = jax.random.normal(kx, (N, C, H, W), dtype=jnp.float32)     # NCHW, like PyTorch
    params = init_params(kparam)

    out = jax.block_until_ready(mab_pallas(x, params))
    ref = jax.block_until_ready(ref_forward(x, params))

    assert out.shape == (N, C, H, W)
    np.testing.assert_allclose(np.asarray(out), np.asarray(ref), rtol=2e-3, atol=2e-3)
    print("KERNEL_OK")
</pallas_src>

<mosaic_0001>
module attributes {stable_mosaic.version = 11 : i64} {
  func.func @mab_kernel(%arg0: memref<8x256xf32, #tpu.memory_space<vmem>>, %arg1: memref<49x8x256xf32, #tpu.memory_space<vmem>>, %arg2: memref<8x256xf32, #tpu.memory_space<vmem>>, %arg3: memref<49x8x256xf32, #tpu.memory_space<vmem>>, %arg4: memref<8x256xf32, #tpu.memory_space<vmem>>, %arg5: memref<49x8x256xf32, #tpu.memory_space<vmem>>, %arg6: memref<8x256xf32, #tpu.memory_space<vmem>>, %arg7: memref<16x4xf32, #tpu.memory_space<smem>>, %arg8: memref<4x4xf32, #tpu.memory_space<smem>>, %arg9: memref<2x4xf32, #tpu.memory_space<smem>>, %arg10: memref<2x4xf32, #tpu.memory_space<smem>>, %arg11: memref<8x256xf32, #tpu.memory_space<vmem>>) attributes {dimension_semantics = [], scalar_prefetch = 0 : i64, scratch_operands = 0 : i64, tpu.core_type = #tpu.core_type<tc>} {
    %cst = arith.constant 0.000000e+00 : f32
    %0 = vector.broadcast %cst : f32 to vector<8x51xf32>
    %c0 = arith.constant 0 : index
    %c0_0 = arith.constant 0 : index
    %1 = vector.load %arg0[%c0, %c0_0] : memref<8x256xf32, #tpu.memory_space<vmem>>, vector<8x256xf32>
    %2 = vector.shape_cast %1 : vector<8x256xf32> to vector<2x4x256xf32>
    %3 = vector.extract_strided_slice %2 {offsets = [0, 0, 0], sizes = [2, 1, 256], strides = [1, 1, 1]} : vector<2x4x256xf32> to vector<2x1x256xf32>
    %4 = vector.shape_cast %3 : vector<2x1x256xf32> to vector<2x256xf32>
    %5 = vector.extract_strided_slice %2 {offsets = [0, 1, 0], sizes = [2, 1, 256], strides = [1, 1, 1]} : vector<2x4x256xf32> to vector<2x1x256xf32>
    %6 = vector.shape_cast %5 : vector<2x1x256xf32> to vector<2x256xf32>
    %7 = vector.extract_strided_slice %2 {offsets = [0, 2, 0], sizes = [2, 1, 256], strides = [1, 1, 1]} : vector<2x4x256xf32> to vector<2x1x256xf32>
    %8 = vector.shape_cast %7 : vector<2x1x256xf32> to vector<2x256xf32>
    %9 = vector.extract_strided_slice %2 {offsets = [0, 3, 0], sizes = [2, 1, 256], strides = [1, 1, 1]} : vector<2x4x256xf32> to vector<2x1x256xf32>
    %10 = vector.shape_cast %9 : vector<2x1x256xf32> to vector<2x256xf32>
    %cst_1 = arith.constant 0.000000e+00 : f32
    %11 = vector.broadcast %cst_1 : f32 to vector<2x256xf32>
    %12 = arith.addf %11, %4 : vector<2x256xf32>
    %13 = arith.addf %12, %6 : vector<2x256xf32>
    %14 = arith.addf %13, %8 : vector<2x256xf32>
    %15 = arith.addf %14, %10 : vector<2x256xf32>
    %cst_2 = arith.constant 2.500000e-01 : f32
    %16 = vector.broadcast %cst_2 : f32 to vector<2x256xf32>
    %17 = arith.mulf %15, %16 : vector<2x256xf32>
    %18 = arith.subf %4, %17 : vector<2x256xf32>
    %19 = arith.subf %6, %17 : vector<2x256xf32>
    %20 = arith.subf %8, %17 : vector<2x256xf32>
    %21 = arith.subf %10, %17 : vector<2x256xf32>
    %22 = arith.mulf %18, %18 : vector<2x256xf32>
    %cst_3 = arith.constant 0.000000e+00 : f32
    %23 = vector.broadcast %cst_3 : f32 to vector<2x256xf32>
    %24 = arith.addf %23, %22 : vector<2x256xf32>
    %25 = arith.mulf %19, %19 : vector<2x256xf32>
    %26 = arith.addf %24, %25 : vector<2x256xf32>
    %27 = arith.mulf %20, %20 : vector<2x256xf32>
    %28 = arith.addf %26, %27 : vector<2x256xf32>
    %29 = arith.mulf %21, %21 : vector<2x256xf32>
    %30 = arith.addf %28, %29 : vector<2x256xf32>
    %cst_4 = arith.constant 2.500000e-01 : f32
    %31 = vector.broadcast %cst_4 : f32 to vector<2x256xf32>
    %32 = arith.mulf %30, %31 : vector<2x256xf32>
    %cst_5 = arith.constant 9.99999997E-7 : f32
    %33 = vector.broadcast %cst_5 : f32 to vector<2x256xf32>
    %34 = arith.addf %32, %33 : vector<2x256xf32>
    %35 = math.rsqrt %34 : vector<2x256xf32>
    %36 = arith.mulf %18, %35 : vector<2x256xf32>
    %c0_6 = arith.constant 0 : index
    %c0_7 = arith.constant 0 : index
    %37 = memref.load %arg9[%c0_6, %c0_7] : memref<2x4xf32, #tpu.memory_space<smem>>
    %38 = vector.broadcast %37 : f32 to vector<2x256xf32>
    %39 = arith.mulf %36, %38 : vector<2x256xf32>
    %c0_8 = arith.constant 0 : index
    %c0_9 = arith.constant 0 : index
    %40 = memref.load %arg10[%c0_8, %c0_9] : memref<2x4xf32, #tpu.memory_space<smem>>
    %41 = vector.broadcast %40 : f32 to vector<2x256xf32>
    %42 = arith.addf %39, %41 : vector<2x256xf32>
    %43 = arith.mulf %19, %35 : vector<2x256xf32>
    %c0_10 = arith.constant 0 : index
    %c1 = arith.constant 1 : index
    %44 = memref.load %arg9[%c0_10, %c1] : memref<2x4xf32, #tpu.memory_space<smem>>
    %45 = vector.broadcast %44 : f32 to vector<2x256xf32>
    %46 = arith.mulf %43, %45 : vector<2x256xf32>
    %c0_11 = arith.constant 0 : index
    %c1_12 = arith.constant 1 : index
    %47 = memref.load %arg10[%c0_11, %c1_12] : memref<2x4xf32, #tpu.memory_space<smem>>
    %48 = vector.broadcast %47 : f32 to vector<2x256xf32>
    %49 = arith.addf %46, %48 : vector<2x256xf32>
    %50 = arith.mulf %20, %35 : vector<2x256xf32>
    %c0_13 = arith.constant 0 : index
    %c2 = arith.constant 2 : index
    %51 = memref.load %arg9[%c0_13, %c2] : memref<2x4xf32, #tpu.memory_space<smem>>
    %52 = vector.broadcast %51 : f32 to vector<2x256xf32>
    %53 = arith.mulf %50, %52 : vector<2x256xf32>
    %c0_14 = arith.constant 0 : index
    %c2_15 = arith.constant 2 : index
    %54 = memref.load %arg10[%c0_14, %c2_15] : memref<2x4xf32, #tpu.memory_space<smem>>
    %55 = vector.broadcast %54 : f32 to vector<2x256xf32>
    %56 = arith.addf %53, %55 : vector<2x256xf32>
    %57 = arith.mulf %21, %35 : vector<2x256xf32>
    %c0_16 = arith.constant 0 : index
    %c3 = arith.constant 3 : index
    %58 = memref.load %arg9[%c0_16, %c3] : memref<2x4xf32, #tpu.memory_space<smem>>
    %59 = vector.broadcast %58 : f32 to vector<2x256xf32>
    %60 = arith.mulf %57, %59 : vector<2x256xf32>
    %c0_17 = arith.constant 0 : index
    %c3_18 = arith.constant 3 : index
    %61 = memref.load %arg10[%c0_17, %c3_18] : memref<2x4xf32, #tpu.memory_space<smem>>
    %62 = vector.broadcast %61 : f32 to vector<2x256xf32>
    %63 = arith.addf %60, %62 : vector<2x256xf32>
    %64 = vector.shape_cast %42 : vector<2x256xf32> to vector<2x1x256xf32>
    %65 = vector.shape_cast %49 : vector<2x256xf32> to vector<2x1x256xf32>
    %66 = vector.shape_cast %56 : vector<2x256xf32> to vector<2x1x256xf32>
    %67 = vector.shape_cast %63 : vector<2x256xf32> to vector<2x1x256xf32>
    %68 = tpu.concatenate %64, %65, %66, %67 in 1 : vector<2x1x256xf32>, vector<2x1x256xf32>, vector<2x1x256xf32>, vector<2x1x256xf32> -> vector<2x4x256xf32>
    %69 = vector.shape_cast %68 : vector<2x4x256xf32> to vector<8x256xf32>
    %70 = tpu.concatenate %0, %69, %0 in 1 : vector<8x51xf32>, vector<8x256xf32>, vector<8x51xf32> -> vector<8x358xf32>
    %c0_19 = arith.constant 0 : index
    %c0_20 = arith.constant 0 : index
    %71 = vector.load %arg2[%c0_19, %c0_20] : memref<8x256xf32, #tpu.memory_space<vmem>>, vector<8x256xf32>
    %72 = vector.extract_strided_slice %70 {offsets = [0, 0], sizes = [8, 256], strides = [1, 1]} : vector<8x358xf32> to vector<8x256xf32>
    %c0_21 = arith.constant 0 : index
    %c0_22 = arith.constant 0 : index
    %c0_23 = arith.constant 0 : index
    %73 = vector.load %arg1[%c0_21, %c0_22, %c0_23] : memref<49x8x256xf32, #tpu.memory_space<vmem>>, vector<1x8x256xf32>
    %74 = vector.shape_cast %73 : vector<1x8x256xf32> to vector<8x256xf32>
    %75 = arith.mulf %72, %74 : vector<8x256xf32>
    %76 = arith.addf %71, %75 : vector<8x256xf32>
    %77 = vector.extract_strided_slice %70 {offsets = [0, 1], sizes = [8, 256], strides = [1, 1]} : vector<8x358xf32> to vector<8x256xf32>
    %c1_24 = arith.constant 1 : index
    %c0_25 = arith.constant 0 : index
    %c0_26 = arith.constant 0 : index
    %78 = vector.load %arg1[%c1_24, %c0_25, %c0_26] : memref<49x8x256xf32, #tpu.memory_space<vmem>>, vector<1x8x256xf32>
    %79 = vector.shape_cast %78 : vector<1x8x256xf32> to vector<8x256xf32>
    %80 = arith.mulf %77, %79 : vector<8x256xf32>
    %81 = arith.addf %76, %80 : vector<8x256xf32>
    %82 = vector.extract_strided_slice %70 {offsets = [0, 2], sizes = [8, 256], strides = [1, 1]} : vector<8x358xf32> to vector<8x256xf32>
    %c2_27 = arith.constant 2 : index
    %c0_28 = arith.constant 0 : index
    %c0_29 = arith.constant 0 : index
    %83 = vector.load %arg1[%c2_27, %c0_28, %c0_29] : memref<49x8x256xf32, #tpu.memory_space<vmem>>, vector<1x8x256xf32>
    %84 = vector.shape_cast %83 : vector<1x8x256xf32> to vector<8x256xf32>
    %85 = arith.mulf %82, %84 : vector<8x256xf32>
    %86 = arith.addf %81, %85 : vector<8x256xf32>
    %87 = vector.extract_strided_slice %70 {offsets = [0, 3], sizes = [8, 256], strides = [1, 1]} : vector<8x358xf32> to vector<8x256xf32>
    %c3_30 = arith.constant 3 : index
    %c0_31 = arith.constant 0 : index
    %c0_32 = arith.constant 0 : index
    %88 = vector.load %arg1[%c3_30, %c0_31, %c0_32] : memref<49x8x256xf32, #tpu.memory_space<vmem>>, vector<1x8x256xf32>
    %89 = vector.shape_cast %88 : vector<1x8x256xf32> to vector<8x256xf32>
    %90 = arith.mulf %87, %89 : vector<8x256xf32>
    %91 = arith.addf %86, %90 : vector<8x256xf32>
    %92 = vector.extract_strided_slice %70 {offsets = [0, 4], sizes = [8, 256], strides = [1, 1]} : vector<8x358xf32> to vector<8x256xf32>
    %c4 = arith.constant 4 : index
    %c0_33 = arith.constant 0 : index
    %c0_34 = arith.constant 0 : index
    %93 = vector.load %arg1[%c4, %c0_33, %c0_34] : memref<49x8x256xf32, #tpu.memory_space<vmem>>, vector<1x8x256xf32>
    %94 = vector.shape_cast %93 : vector<1x8x256xf32> to vector<8x256xf32>
    %95 = arith.mulf %92, %94 : vector<8x256xf32>
    %96 = arith.addf %91, %95 : vector<8x256xf32>
    %97 = vector.extract_strided_slice %70 {offsets = [0, 5], sizes = [8, 256], strides = [1, 1]} : vector<8x358xf32> to vector<8x256xf32>
    %c5 = arith.constant 5 : index
    %c0_35 = arith.constant 0 : index
    %c0_36 = arith.constant 0 : index
    %98 = vector.load %arg1[%c5, %c0_35, %c0_36] : memref<49x8x256xf32, #tpu.memory_space<vmem>>, vector<1x8x256xf32>
    %99 = vector.shape_cast %98 : vector<1x8x256xf32> to vector<8x256xf32>
    %100 = arith.mulf %97, %99 : vector<8x256xf32>
    %101 = arith.addf %96, %100 : vector<8x256xf32>
    %102 = vector.extract_strided_slice %70 {offsets = [0, 6], sizes = [8, 256], strides = [1, 1]} : vector<8x358xf32> to vector<8x256xf32>
    %c6 = arith.constant 6 : index
    %c0_37 = arith.constant 0 : index
    %c0_38 = arith.constant 0 : index
    %103 = vector.load %arg1[%c6, %c0_37, %c0_38] : memref<49x8x256xf32, #tpu.memory_space<vmem>>, vector<1x8x256xf32>
    %104 = vector.shape_cast %103 : vector<1x8x256xf32> to vector<8x256xf32>
    %105 = arith.mulf %102, %104 : vector<8x256xf32>
    %106 = arith.addf %101, %105 : vector<8x256xf32>
    %107 = vector.extract_strided_slice %70 {offsets = [0, 16], sizes = [8, 256], strides = [1, 1]} : vector<8x358xf32> to vector<8x256xf32>
    %c7 = arith.constant 7 : index
    %c0_39 = arith.constant 0 : index
    %c0_40 = arith.constant 0 : index
    %108 = vector.load %arg1[%c7, %c0_39, %c0_40] : memref<49x8x256xf32, #tpu.memory_space<vmem>>, vector<1x8x256xf32>
    %109 = vector.shape_cast %108 : vector<1x8x256xf32> to vector<8x256xf32>
    %110 = arith.mulf %107, %109 : vector<8x256xf32>
    %111 = arith.addf %106, %110 : vector<8x256xf32>
    %112 = vector.extract_strided_slice %70 {offsets = [0, 17], sizes = [8, 256], strides = [1, 1]} : vector<8x358xf32> to vector<8x256xf32>
    %c8 = arith.constant 8 : index
    %c0_41 = arith.constant 0 : index
    %c0_42 = arith.constant 0 : index
    %113 = vector.load %arg1[%c8, %c0_41, %c0_42] : memref<49x8x256xf32, #tpu.memory_space<vmem>>, vector<1x8x256xf32>
    %114 = vector.shape_cast %113 : vector<1x8x256xf32> to vector<8x256xf32>
    %115 = arith.mulf %112, %114 : vector<8x256xf32>
    %116 = arith.addf %111, %115 : vector<8x256xf32>
    %117 = vector.extract_strided_slice %70 {offsets = [0, 18], sizes = [8, 256], strides = [1, 1]} : vector<8x358xf32> to vector<8x256xf32>
    %c9 = arith.constant 9 : index
    %c0_43 = arith.constant 0 : index
    %c0_44 = arith.constant 0 : index
    %118 = vector.load %arg1[%c9, %c0_43, %c0_44] : memref<49x8x256xf32, #tpu.memory_space<vmem>>, vector<1x8x256xf32>
    %119 = vector.shape_cast %118 : vector<1x8x256xf32> to vector<8x256xf32>
    %120 = arith.mulf %117, %119 : vector<8x256xf32>
    %121 = arith.addf %116, %120 : vector<8x256xf32>
    %122 = vector.extract_strided_slice %70 {offsets = [0, 19], sizes = [8, 256], strides = [1, 1]} : vector<8x358xf32> to vector<8x256xf32>
    %c10 = arith.constant 10 : index
    %c0_45 = arith.constant 0 : index
    %c0_46 = arith.constant 0 : index
    %123 = vector.load %arg1[%c10, %c0_45, %c0_46] : memref<49x8x256xf32, #tpu.memory_space<vmem>>, vector<1x8x256xf32>
    %124 = vector.shape_cast %123 : vector<1x8x256xf32> to vector<8x256xf32>
    %125 = arith.mulf %122, %124 : vector<8x256xf32>
    %126 = arith.addf %121, %125 : vector<8x256xf32>
    %127 = vector.extract_strided_slice %70 {offsets = [0, 20], sizes = [8, 256], strides = [1, 1]} : vector<8x358xf32> to vector<8x256xf32>
    %c11 = arith.constant 11 : index
    %c0_47 = arith.constant 0 : index
    %c0_48 = arith.constant 0 : index
    %128 = vector.load %arg1[%c11, %c0_47, %c0_48] : memref<49x8x256xf32, #tpu.memory_space<vmem>>, vector<1x8x256xf32>
    %129 = vector.shape_cast %128 : vector<1x8x256xf32> to vector<8x256xf32>
    %130 = arith.mulf %127, %129 : vector<8x256xf32>
    %131 = arith.addf %126, %130 : vector<8x256xf32>
    %132 = vector.extract_strided_slice %70 {offsets = [0, 21], sizes = [8, 256], strides = [1, 1]} : vector<8x358xf32> to vector<8x256xf32>
    %c12 = arith.constant 12 : index
    %c0_49 = arith.constant 0 : index
    %c0_50 = arith.constant 0 : index
    %133 = vector.load %arg1[%c12, %c0_49, %c0_50] : memref<49x8x256xf32, #tpu.memory_space<vmem>>, vector<1x8x256xf32>
    %134 = vector.shape_cast %133 : vector<1x8x256xf32> to vector<8x256xf32>
    %135 = arith.mulf %132, %134 : vector<8x256xf32>
    %136 = arith.addf %131, %135 : vector<8x256xf32>
    %137 = vector.extract_strided_slice %70 {offsets = [0, 22], sizes = [8, 256], strides = [1, 1]} : vector<8x358xf32> to vector<8x256xf32>
    %c13 = arith.constant 13 : index
    %c0_51 = arith.constant 0 : index
    %c0_52 = arith.constant 0 : index
    %138 = vector.load %arg1[%c13, %c0_51, %c0_52] : memref<49x8x256xf32, #tpu.memory_space<vmem>>, vector<1x8x256xf32>
    %139 = vector.shape_cast %138 : vector<1x8x256xf32> to vector<8x256xf32>
    %140 = arith.mulf %137, %139 : vector<8x256xf32>
    %141 = arith.addf %136, %140 : vector<8x256xf32>
    %142 = vector.extract_strided_slice %70 {offsets = [0, 32], sizes = [8, 256], strides = [1, 1]} : vector<8x358xf32> to vector<8x256xf32>
    %c14 = arith.constant 14 : index
    %c0_53 = arith.constant 0 : index
    %c0_54 = arith.constant 0 : index
    %143 = vector.load %arg1[%c14, %c0_53, %c0_54] : memref<49x8x256xf32, #tpu.memory_space<vmem>>, vector<1x8x256xf32>
    %144 = vector.shape_cast %143 : vector<1x8x256xf32> to vector<8x256xf32>
    %145 = arith.mulf %142, %144 : vector<8x256xf32>
    %146 = arith.addf %141, %145 : vector<8x256xf32>
    %147 = vector.extract_strided_slice %70 {offsets = [0, 33], sizes = [8, 256], strides = [1, 1]} : vector<8x358xf32> to vector<8x256xf32>
    %c15 = arith.constant 15 : index
    %c0_55 = arith.constant 0 : index
    %c0_56 = arith.constant 0 : index
    %148 = vector.load %arg1[%c15, %c0_55, %c0_56] : memref<49x8x256xf32, #tpu.memory_space<vmem>>, vector<1x8x256xf32>
    %149 = vector.shape_cast %148 : vector<1x8x256xf32> to vector<8x256xf32>
    %150 = arith.mulf %147, %149 : vector<8x256xf32>
    %151 = arith.addf %146, %150 : vector<8x256xf32>
    %152 = vector.extract_strided_slice %70 {offsets = [0, 34], sizes = [8, 256], strides = [1, 1]} : vector<8x358xf32> to vector<8x256xf32>
    %c16 = arith.constant 16 : index
    %c0_57 = arith.constant 0 : index
    %c0_58 = arith.constant 0 : index
    %153 = vector.load %arg1[%c16, %c0_57, %c0_58] : memref<49x8x256xf32, #tpu.memory_space<vmem>>, vector<1x8x256xf32>
    %154 = vector.shape_cast %153 : vector<1x8x256xf32> to vector<8x256xf32>
    %155 = arith.mulf %152, %154 : vector<8x256xf32>
    %156 = arith.addf %151, %155 : vector<8x256xf32>
    %157 = vector.extract_strided_slice %70 {offsets = [0, 35], sizes = [8, 256], strides = [1, 1]} : vector<8x358xf32> to vector<8x256xf32>
    %c17 = arith.constant 17 : index
    %c0_59 = arith.constant 0 : index
    %c0_60 = arith.constant 0 : index
    %158 = vector.load %arg1[%c17, %c0_59, %c0_60] : memref<49x8x256xf32, #tpu.memory_space<vmem>>, vector<1x8x256xf32>
    %159 = vector.shape_cast %158 : vector<1x8x256xf32> to vector<8x256xf32>
    %160 = arith.mulf %157, %159 : vector<8x256xf32>
    %161 = arith.addf %156, %160 : vector<8x256xf32>
    %162 = vector.extract_strided_slice %70 {offsets = [0, 36], sizes = [8, 256], strides = [1, 1]} : vector<8x358xf32> to vector<8x256xf32>
    %c18 = arith.constant 18 : index
    %c0_61 = arith.constant 0 : index
    %c0_62 = arith.constant 0 : index
    %163 = vector.load %arg1[%c18, %c0_61, %c0_62] : memref<49x8x256xf32, #tpu.memory_space<vmem>>, vector<1x8x256xf32>
    %164 = vector.shape_cast %163 : vector<1x8x256xf32> to vector<8x256xf32>
    %165 = arith.mulf %162, %164 : vector<8x256xf32>
    %166 = arith.addf %161, %165 : vector<8x256xf32>
    %167 = vector.extract_strided_slice %70 {offsets = [0, 37], sizes = [8, 256], strides = [1, 1]} : vector<8x358xf32> to vector<8x256xf32>
    %c19 = arith.constant 19 : index
    %c0_63 = arith.constant 0 : index
    %c0_64 = arith.constant 0 : index
    %168 = vector.load %arg1[%c19, %c0_63, %c0_64] : memref<49x8x256xf32, #tpu.memory_space<vmem>>, vector<1x8x256xf32>
    %169 = vector.shape_cast %168 : vector<1x8x256xf32> to vector<8x256xf32>
    %170 = arith.mulf %167, %169 : vector<8x256xf32>
    %171 = arith.addf %166, %170 : vector<8x256xf32>
    %172 = vector.extract_strided_slice %70 {offsets = [0, 38], sizes = [8, 256], strides = [1, 1]} : vector<8x358xf32> to vector<8x256xf32>
    %c20 = arith.constant 20 : index
    %c0_65 = arith.constant 0 : index
    %c0_66 = arith.constant 0 : index
    %173 = vector.load %arg1[%c20, %c0_65, %c0_66] : memref<49x8x256xf32, #tpu.memory_space<vmem>>, vector<1x8x256xf32>
    %174 = vector.shape_cast %173 : vector<1x8x256xf32> to vector<8x256xf32>
    %175 = arith.mulf %172, %174 : vector<8x256xf32>
    %176 = arith.addf %171, %175 : vector<8x256xf32>
    %177 = vector.extract_strided_slice %70 {offsets = [0, 48], sizes = [8, 256], strides = [1, 1]} : vector<8x358xf32> to vector<8x256xf32>
    %c21 = arith.constant 21 : index
    %c0_67 = arith.constant 0 : index
    %c0_68 = arith.constant 0 : index
    %178 = vector.load %arg1[%c21, %c0_67, %c0_68] : memref<49x8x256xf32, #tpu.memory_space<vmem>>, vector<1x8x256xf32>
    %179 = vector.shape_cast %178 : vector<1x8x256xf32> to vector<8x256xf32>
    %180 = arith.mulf %177, %179 : vector<8x256xf32>
    %181 = arith.addf %176, %180 : vector<8x256xf32>
    %182 = vector.extract_strided_slice %70 {offsets = [0, 49], sizes = [8, 256], strides = [1, 1]} : vector<8x358xf32> to vector<8x256xf32>
    %c22 = arith.constant 22 : index
    %c0_69 = arith.constant 0 : index
    %c0_70 = arith.constant 0 : index
    %183 = vector.load %arg1[%c22, %c0_69, %c0_70] : memref<49x8x256xf32, #tpu.memory_space<vmem>>, vector<1x8x256xf32>
    %184 = vector.shape_cast %183 : vector<1x8x256xf32> to vector<8x256xf32>
    %185 = arith.mulf %182, %184 : vector<8x256xf32>
    %186 = arith.addf %181, %185 : vector<8x256xf32>
    %187 = vector.extract_strided_slice %70 {offsets = [0, 50], sizes = [8, 256], strides = [1, 1]} : vector<8x358xf32> to vector<8x256xf32>
    %c23 = arith.constant 23 : index
    %c0_71 = arith.constant 0 : index
    %c0_72 = arith.constant 0 : index
    %188 = vector.load %arg1[%c23, %c0_71, %c0_72] : memref<49x8x256xf32, #tpu.memory_space<vmem>>, vector<1x8x256xf32>
    %189 = vector.shape_cast %188 : vector<1x8x256xf32> to vector<8x256xf32>
    %190 = arith.mulf %187, %189 : vector<8x256xf32>
    %191 = arith.addf %186, %190 : vector<8x256xf32>
    %192 = vector.extract_strided_slice %70 {offsets = [0, 51], sizes = [8, 256], strides = [1, 1]} : vector<8x358xf32> to vector<8x256xf32>
    %c24 = arith.constant 24 : index
    %c0_73 = arith.constant 0 : index
    %c0_74 = arith.constant 0 : index
    %193 = vector.load %arg1[%c24, %c0_73, %c0_74] : memref<49x8x256xf32, #tpu.memory_space<vmem>>, vector<1x8x256xf32>
    %194 = vector.shape_cast %193 : vector<1x8x256xf32> to vector<8x256xf32>
    %195 = arith.mulf %192, %194 : vector<8x256xf32>
    %196 = arith.addf %191, %195 : vector<8x256xf32>
    %197 = vector.extract_strided_slice %70 {offsets = [0, 52], sizes = [8, 256], strides = [1, 1]} : vector<8x358xf32> to vector<8x256xf32>
    %c25 = arith.constant 25 : index
    %c0_75 = arith.constant 0 : index
    %c0_76 = arith.constant 0 : index
    %198 = vector.load %arg1[%c25, %c0_75, %c0_76] : memref<49x8x256xf32, #tpu.memory_space<vmem>>, vector<1x8x256xf32>
    %199 = vector.shape_cast %198 : vector<1x8x256xf32> to vector<8x256xf32>
    %200 = arith.mulf %197, %199 : vector<8x256xf32>
    %201 = arith.addf %196, %200 : vector<8x256xf32>
    %202 = vector.extract_strided_slice %70 {offsets = [0, 53], sizes = [8, 256], strides = [1, 1]} : vector<8x358xf32> to vector<8x256xf32>
    %c26 = arith.constant 26 : index
    %c0_77 = arith.constant 0 : index
    %c0_78 = arith.constant 0 : index
    %203 = vector.load %arg1[%c26, %c0_77, %c0_78] : memref<49x8x256xf32, #tpu.memory_space<vmem>>, vector<1x8x256xf32>
    %204 = vector.shape_cast %203 : vector<1x8x256xf32> to vector<8x256xf32>
    %205 = arith.mulf %202, %204 : vector<8x256xf32>
    %206 = arith.addf %201, %205 : vector<8x256xf32>
    %207 = vector.extract_strided_slice %70 {offsets = [0, 54], sizes = [8, 256], strides = [1, 1]} : vector<8x358xf32> to vector<8x256xf32>
    %c27 = arith.constant 27 : index
    %c0_79 = arith.constant 0 : index
    %c0_80 = arith.constant 0 : index
    %208 = vector.load %arg1[%c27, %c0_79, %c0_80] : memref<49x8x256xf32, #tpu.memory_space<vmem>>, vector<1x8x256xf32>
    %209 = vector.shape_cast %208 : vector<1x8x256xf32> to vector<8x256xf32>
    %210 = arith.mulf %207, %209 : vector<8x256xf32>
    %211 = arith.addf %206, %210 : vector<8x256xf32>
    %212 = vector.extract_strided_slice %70 {offsets = [0, 64], sizes = [8, 256], strides = [1, 1]} : vector<8x358xf32> to vector<8x256xf32>
    %c28 = arith.constant 28 : index
    %c0_81 = arith.constant 0 : index
    %c0_82 = arith.constant 0 : index
    %213 = vector.load %arg1[%c28, %c0_81, %c0_82] : memref<49x8x256xf32, #tpu.memory_space<vmem>>, vector<1x8x256xf32>
    %214 = vector.shape_cast %213 : vector<1x8x256xf32> to vector<8x256xf32>
    %215 = arith.mulf %212, %214 : vector<8x256xf32>
    %216 = arith.addf %211, %215 : vector<8x256xf32>
    %217 = vector.extract_strided_slice %70 {offsets = [0, 65], sizes = [8, 256], strides = [1, 1]} : vector<8x358xf32> to vector<8x256xf32>
    %c29 = arith.constant 29 : index
    %c0_83 = arith.constant 0 : index
    %c0_84 = arith.constant 0 : index
    %218 = vector.load %arg1[%c29, %c0_83, %c0_84] : memref<49x8x256xf32, #tpu.memory_space<vmem>>, vector<1x8x256xf32>
    %219 = vector.shape_cast %218 : vector<1x8x256xf32> to vector<8x256xf32>
    %220 = arith.mulf %217, %219 : vector<8x256xf32>
    %221 = arith.addf %216, %220 : vector<8x256xf32>
    %222 = vector.extract_strided_slice %70 {offsets = [0, 66], sizes = [8, 256], strides = [1, 1]} : vector<8x358xf32> to vector<8x256xf32>
    %c30 = arith.constant 30 : index
    %c0_85 = arith.constant 0 : index
    %c0_86 = arith.constant 0 : index
    %223 = vector.load %arg1[%c30, %c0_85, %c0_86] : memref<49x8x256xf32, #tpu.memory_space<vmem>>, vector<1x8x256xf32>
    %224 = vector.shape_cast %223 : vector<1x8x256xf32> to vector<8x256xf32>
    %225 = arith.mulf %222, %224 : vector<8x256xf32>
    %226 = arith.addf %221, %225 : vector<8x256xf32>
    %227 = vector.extract_strided_slice %70 {offsets = [0, 67], sizes = [8, 256], strides = [1, 1]} : vector<8x358xf32> to vector<8x256xf32>
    %c31 = arith.constant 31 : index
    %c0_87 = arith.constant 0 : index
    %c0_88 = arith.constant 0 : index
    %228 = vector.load %arg1[%c31, %c0_87, %c0_88] : memref<49x8x256xf32, #tpu.memory_space<vmem>>, vector<1x8x256xf32>
    %229 = vector.shape_cast %228 : vector<1x8x256xf32> to vector<8x256xf32>
    %230 = arith.mulf %227, %229 : vector<8x256xf32>
    %231 = arith.addf %226, %230 : vector<8x256xf32>
    %232 = vector.extract_strided_slice %70 {offsets = [0, 68], sizes = [8, 256], strides = [1, 1]} : vector<8x358xf32> to vector<8x256xf32>
    %c32 = arith.constant 32 : index
    %c0_89 = arith.constant 0 : index
    %c0_90 = arith.constant 0 : index
    %233 = vector.load %arg1[%c32, %c0_89, %c0_90] : memref<49x8x256xf32, #tpu.memory_space<vmem>>, vector<1x8x256xf32>
    %234 = vector.shape_cast %233 : vector<1x8x256xf32> to vector<8x256xf32>
    %235 = arith.mulf %232, %234 : vector<8x256xf32>
    %236 = arith.addf %231, %235 : vector<8x256xf32>
    %237 = vector.extract_strided_slice %70 {offsets = [0, 69], sizes = [8, 256], strides = [1, 1]} : vector<8x358xf32> to vector<8x256xf32>
    %c33 = arith.constant 33 : index
    %c0_91 = arith.constant 0 : index
    %c0_92 = arith.constant 0 : index
    %238 = vector.load %arg1[%c33, %c0_91, %c0_92] : memref<49x8x256xf32, #tpu.memory_space<vmem>>, vector<1x8x256xf32>
    %239 = vector.shape_cast %238 : vector<1x8x256xf32> to vector<8x256xf32>
    %240 = arith.mulf %237, %239 : vector<8x256xf32>
    %241 = arith.addf %236, %240 : vector<8x256xf32>
    %242 = vector.extract_strided_slice %70 {offsets = [0, 70], sizes = [8, 256], strides = [1, 1]} : vector<8x358xf32> to vector<8x256xf32>
    %c34 = arith.constant 34 : index
    %c0_93 = arith.constant 0 : index
    %c0_94 = arith.constant 0 : index
    %243 = vector.load %arg1[%c34, %c0_93, %c0_94] : memref<49x8x256xf32, #tpu.memory_space<vmem>>, vector<1x8x256xf32>
    %244 = vector.shape_cast %243 : vector<1x8x256xf32> to vector<8x256xf32>
    %245 = arith.mulf %242, %244 : vector<8x256xf32>
    %246 = arith.addf %241, %245 : vector<8x256xf32>
    %247 = vector.extract_strided_slice %70 {offsets = [0, 80], sizes = [8, 256], strides = [1, 1]} : vector<8x358xf32> to vector<8x256xf32>
    %c35 = arith.constant 35 : index
    %c0_95 = arith.constant 0 : index
    %c0_96 = arith.constant 0 : index
    %248 = vector.load %arg1[%c35, %c0_95, %c0_96] : memref<49x8x256xf32, #tpu.memory_space<vmem>>, vector<1x8x256xf32>
    %249 = vector.shape_cast %248 : vector<1x8x256xf32> to vector<8x256xf32>
    %250 = arith.mulf %247, %249 : vector<8x256xf32>
    %251 = arith.addf %246, %250 : vector<8x256xf32>
    %252 = vector.extract_strided_slice %70 {offsets = [0, 81], sizes = [8, 256], strides = [1, 1]} : vector<8x358xf32> to vector<8x256xf32>
    %c36 = arith.constant 36 : index
    %c0_97 = arith.constant 0 : index
    %c0_98 = arith.constant 0 : index
    %253 = vector.load %arg1[%c36, %c0_97, %c0_98] : memref<49x8x256xf32, #tpu.memory_space<vmem>>, vector<1x8x256xf32>
    %254 = vector.shape_cast %253 : vector<1x8x256xf32> to vector<8x256xf32>
    %255 = arith.mulf %252, %254 : vector<8x256xf32>
    %256 = arith.addf %251, %255 : vector<8x256xf32>
    %257 = vector.extract_strided_slice %70 {offsets = [0, 82], sizes = [8, 256], strides = [1, 1]} : vector<8x358xf32> to vector<8x256xf32>
    %c37 = arith.constant 37 : index
    %c0_99 = arith.constant 0 : index
    %c0_100 = arith.constant 0 : index
    %258 = vector.load %arg1[%c37, %c0_99, %c0_100] : memref<49x8x256xf32, #tpu.memory_space<vmem>>, vector<1x8x256xf32>
    %259 = vector.shape_cast %258 : vector<1x8x256xf32> to vector<8x256xf32>
    %260 = arith.mulf %257, %259 : vector<8x256xf32>
    %261 = arith.addf %256, %260 : vector<8x256xf32>
    %262 = vector.extract_strided_slice %70 {offsets = [0, 83], sizes = [8, 256], strides = [1, 1]} : vector<8x358xf32> to vector<8x256xf32>
    %c38 = arith.constant 38 : index
    %c0_101 = arith.constant 0 : index
    %c0_102 = arith.constant 0 : index
    %263 = vector.load %arg1[%c38, %c0_101, %c0_102] : memref<49x8x256xf32, #tpu.memory_space<vmem>>, vector<1x8x256xf32>
    %264 = vector.shape_cast %263 : vector<1x8x256xf32> to vector<8x256xf32>
    %265 = arith.mulf %262, %264 : vector<8x256xf32>
    %266 = arith.addf %261, %265 : vector<8x256xf32>
    %267 = vector.extract_strided_slice %70 {offsets = [0, 84], sizes = [8, 256], strides = [1, 1]} : vector<8x358xf32> to vector<8x256xf32>
    %c39 = arith.constant 39 : index
    %c0_103 = arith.constant 0 : index
    %c0_104 = arith.constant 0 : index
    %268 = vector.load %arg1[%c39, %c0_103, %c0_104] : memref<49x8x256xf32, #tpu.memory_space<vmem>>, vector<1x8x256xf32>
    %269 = vector.shape_cast %268 : vector<1x8x256xf32> to vector<8x256xf32>
    %270 = arith.mulf %267, %269 : vector<8x256xf32>
    %271 = arith.addf %266, %270 : vector<8x256xf32>
    %272 = vector.extract_strided_slice %70 {offsets = [0, 85], sizes = [8, 256], strides = [1, 1]} : vector<8x358xf32> to vector<8x256xf32>
    %c40 = arith.constant 40 : index
    %c0_105 = arith.constant 0 : index
    %c0_106 = arith.constant 0 : index
    %273 = vector.load %arg1[%c40, %c0_105, %c0_106] : memref<49x8x256xf32, #tpu.memory_space<vmem>>, vector<1x8x256xf32>
    %274 = vector.shape_cast %273 : vector<1x8x256xf32> to vector<8x256xf32>
    %275 = arith.mulf %272, %274 : vector<8x256xf32>
    %276 = arith.addf %271, %275 : vector<8x256xf32>
    %277 = vector.extract_strided_slice %70 {offsets = [0, 86], sizes = [8, 256], strides = [1, 1]} : vector<8x358xf32> to vector<8x256xf32>
    %c41 = arith.constant 41 : index
    %c0_107 = arith.constant 0 : index
    %c0_108 = arith.constant 0 : index
    %278 = vector.load %arg1[%c41, %c0_107, %c0_108] : memref<49x8x256xf32, #tpu.memory_space<vmem>>, vector<1x8x256xf32>
    %279 = vector.shape_cast %278 : vector<1x8x256xf32> to vector<8x256xf32>
    %280 = arith.mulf %277, %279 : vector<8x256xf32>
    %281 = arith.addf %276, %280 : vector<8x256xf32>
    %282 = vector.extract_strided_slice %70 {offsets = [0, 96], sizes = [8, 256], strides = [1, 1]} : vector<8x358xf32> to vector<8x256xf32>
    %c42 = arith.constant 42 : index
    %c0_109 = arith.constant 0 : index
    %c0_110 = arith.constant 0 : index
    %283 = vector.load %arg1[%c42, %c0_109, %c0_110] : memref<49x8x256xf32, #tpu.memory_space<vmem>>, vector<1x8x256xf32>
    %284 = vector.shape_cast %283 : vector<1x8x256xf32> to vector<8x256xf32>
    %285 = arith.mulf %282, %284 : vector<8x256xf32>
    %286 = arith.addf %281, %285 : vector<8x256xf32>
    %287 = vector.extract_strided_slice %70 {offsets = [0, 97], sizes = [8, 256], strides = [1, 1]} : vector<8x358xf32> to vector<8x256xf32>
    %c43 = arith.constant 43 : index
    %c0_111 = arith.constant 0 : index
    %c0_112 = arith.constant 0 : index
    %288 = vector.load %arg1[%c43, %c0_111, %c0_112] : memref<49x8x256xf32, #tpu.memory_space<vmem>>, vector<1x8x256xf32>
    %289 = vector.shape_cast %288 : vector<1x8x256xf32> to vector<8x256xf32>
    %290 = arith.mulf %287, %289 : vector<8x256xf32>
    %291 = arith.addf %286, %290 : vector<8x256xf32>
    %292 = vector.extract_strided_slice %70 {offsets = [0, 98], sizes = [8, 256], strides = [1, 1]} : vector<8x358xf32> to vector<8x256xf32>
    %c44 = arith.constant 44 : index
    %c0_113 = arith.constant 0 : index
    %c0_114 = arith.constant 0 : index
    %293 = vector.load %arg1[%c44, %c0_113, %c0_114] : memref<49x8x256xf32, #tpu.memory_space<vmem>>, vector<1x8x256xf32>
    %294 = vector.shape_cast %293 : vector<1x8x256xf32> to vector<8x256xf32>
    %295 = arith.mulf %292, %294 : vector<8x256xf32>
    %296 = arith.addf %291, %295 : vector<8x256xf32>
    %297 = vector.extract_strided_slice %70 {offsets = [0, 99], sizes = [8, 256], strides = [1, 1]} : vector<8x358xf32> to vector<8x256xf32>
    %c45 = arith.constant 45 : index
    %c0_115 = arith.constant 0 : index
    %c0_116 = arith.constant 0 : index
    %298 = vector.load %arg1[%c45, %c0_115, %c0_116] : memref<49x8x256xf32, #tpu.memory_space<vmem>>, vector<1x8x256xf32>
    %299 = vector.shape_cast %298 : vector<1x8x256xf32> to vector<8x256xf32>
    %300 = arith.mulf %297, %299 : vector<8x256xf32>
    %301 = arith.addf %296, %300 : vector<8x256xf32>
    %302 = vector.extract_strided_slice %70 {offsets = [0, 100], sizes = [8, 256], strides = [1, 1]} : vector<8x358xf32> to vector<8x256xf32>
    %c46 = arith.constant 46 : index
    %c0_117 = arith.constant 0 : index
    %c0_118 = arith.constant 0 : index
    %303 = vector.load %arg1[%c46, %c0_117, %c0_118] : memref<49x8x256xf32, #tpu.memory_space<vmem>>, vector<1x8x256xf32>
    %304 = vector.shape_cast %303 : vector<1x8x256xf32> to vector<8x256xf32>
    %305 = arith.mulf %302, %304 : vector<8x256xf32>
    %306 = arith.addf %301, %305 : vector<8x256xf32>
    %307 = vector.extract_strided_slice %70 {offsets = [0, 101], sizes = [8, 256], strides = [1, 1]} : vector<8x358xf32> to vector<8x256xf32>
    %c47 = arith.constant 47 : index
    %c0_119 = arith.constant 0 : index
    %c0_120 = arith.constant 0 : index
    %308 = vector.load %arg1[%c47, %c0_119, %c0_120] : memref<49x8x256xf32, #tpu.memory_space<vmem>>, vector<1x8x256xf32>
    %309 = vector.shape_cast %308 : vector<1x8x256xf32> to vector<8x256xf32>
    %310 = arith.mulf %307, %309 : vector<8x256xf32>
    %311 = arith.addf %306, %310 : vector<8x256xf32>
    %312 = vector.extract_strided_slice %70 {offsets = [0, 102], sizes = [8, 256], strides = [1, 1]} : vector<8x358xf32> to vector<8x256xf32>
    %c48 = arith.constant 48 : index
    %c0_121 = arith.constant 0 : index
    %c0_122 = arith.constant 0 : index
    %313 = vector.load %arg1[%c48, %c0_121, %c0_122] : memref<49x8x256xf32, #tpu.memory_space<vmem>>, vector<1x8x256xf32>
    %314 = vector.shape_cast %313 : vector<1x8x256xf32> to vector<8x256xf32>
    %315 = arith.mulf %312, %314 : vector<8x256xf32>
    %316 = arith.addf %311, %315 : vector<8x256xf32>
    %317 = arith.addf %1, %316 : vector<8x256xf32>
    %318 = vector.shape_cast %317 : vector<8x256xf32> to vector<2x4x256xf32>
    %319 = vector.extract_strided_slice %318 {offsets = [0, 0, 0], sizes = [2, 1, 256], strides = [1, 1, 1]} : vector<2x4x256xf32> to vector<2x1x256xf32>
    %320 = vector.shape_cast %319 : vector<2x1x256xf32> to vector<2x256xf32>
    %321 = vector.extract_strided_slice %318 {offsets = [0, 1, 0], sizes = [2, 1, 256], strides = [1, 1, 1]} : vector<2x4x256xf32> to vector<2x1x256xf32>
    %322 = vector.shape_cast %321 : vector<2x1x256xf32> to vector<2x256xf32>
    %323 = vector.extract_strided_slice %318 {offsets = [0, 2, 0], sizes = [2, 1, 256], strides = [1, 1, 1]} : vector<2x4x256xf32> to vector<2x1x256xf32>
    %324 = vector.shape_cast %323 : vector<2x1x256xf32> to vector<2x256xf32>
    %325 = vector.extract_strided_slice %318 {offsets = [0, 3, 0], sizes = [2, 1, 256], strides = [1, 1, 1]} : vector<2x4x256xf32> to vector<2x1x256xf32>
    %326 = vector.shape_cast %325 : vector<2x1x256xf32> to vector<2x256xf32>
    %cst_123 = arith.constant 0.000000e+00 : f32
    %327 = vector.broadcast %cst_123 : f32 to vector<2x256xf32>
    %328 = arith.addf %327, %320 : vector<2x256xf32>
    %329 = arith.addf %328, %322 : vector<2x256xf32>
    %330 = arith.addf %329, %324 : vector<2x256xf32>
    %331 = arith.addf %330, %326 : vector<2x256xf32>
    %cst_124 = arith.constant 2.500000e-01 : f32
    %332 = vector.broadcast %cst_124 : f32 to vector<2x256xf32>
    %333 = arith.mulf %331, %332 : vector<2x256xf32>
    %334 = arith.subf %320, %333 : vector<2x256xf32>
    %335 = arith.subf %322, %333 : vector<2x256xf32>
    %336 = arith.subf %324, %333 : vector<2x256xf32>
    %337 = arith.subf %326, %333 : vector<2x256xf32>
    %338 = arith.mulf %334, %334 : vector<2x256xf32>
    %cst_125 = arith.constant 0.000000e+00 : f32
    %339 = vector.broadcast %cst_125 : f32 to vector<2x256xf32>
    %340 = arith.addf %339, %338 : vector<2x256xf32>
    %341 = arith.mulf %335, %335 : vector<2x256xf32>
    %342 = arith.addf %340, %341 : vector<2x256xf32>
    %343 = arith.mulf %336, %336 : vector<2x256xf32>
    %344 = arith.addf %342, %343 : vector<2x256xf32>
    %345 = arith.mulf %337, %337 : vector<2x256xf32>
    %346 = arith.addf %344, %345 : vector<2x256xf32>
    %cst_126 = arith.constant 2.500000e-01 : f32
    %347 = vector.broadcast %cst_126 : f32 to vector<2x256xf32>
    %348 = arith.mulf %346, %347 : vector<2x256xf32>
    %cst_127 = arith.constant 9.99999997E-7 : f32
    %349 = vector.broadcast %cst_127 : f32 to vector<2x256xf32>
    %350 = arith.addf %348, %349 : vector<2x256xf32>
    %351 = math.rsqrt %350 : vector<2x256xf32>
    %352 = arith.mulf %334, %351 : vector<2x256xf32>
    %c1_128 = arith.constant 1 : index
    %c0_129 = arith.constant 0 : index
    %353 = memref.load %arg9[%c1_128, %c0_129] : memref<2x4xf32, #tpu.memory_space<smem>>
    %354 = vector.broadcast %353 : f32 to vector<2x256xf32>
    %355 = arith.mulf %352, %354 : vector<2x256xf32>
    %c1_130 = arith.constant 1 : index
    %c0_131 = arith.constant 0 : index
    %356 = memref.load %arg10[%c1_130, %c0_131] : memref<2x4xf32, #tpu.memory_space<smem>>
    %357 = vector.broadcast %356 : f32 to vector<2x256xf32>
    %358 = arith.addf %355, %357 : vector<2x256xf32>
    %359 = arith.mulf %335, %351 : vector<2x256xf32>
    %c1_132 = arith.constant 1 : index
    %c1_133 = arith.constant 1 : index
    %360 = memref.load %arg9[%c1_132, %c1_133] : memref<2x4xf32, #tpu.memory_space<smem>>
    %361 = vector.broadcast %360 : f32 to vector<2x256xf32>
    %362 = arith.mulf %359, %361 : vector<2x256xf32>
    %c1_134 = arith.constant 1 : index
    %c1_135 = arith.constant 1 : index
    %363 = memref.load %arg10[%c1_134, %c1_135] : memref<2x4xf32, #tpu.memory_space<smem>>
    %364 = vector.broadcast %363 : f32 to vector<2x256xf32>
    %365 = arith.addf %362, %364 : vector<2x256xf32>
    %366 = arith.mulf %336, %351 : vector<2x256xf32>
    %c1_136 = arith.constant 1 : index
    %c2_137 = arith.constant 2 : index
    %367 = memref.load %arg9[%c1_136, %c2_137] : memref<2x4xf32, #tpu.memory_space<smem>>
    %368 = vector.broadcast %367 : f32 to vector<2x256xf32>
    %369 = arith.mulf %366, %368 : vector<2x256xf32>
    %c1_138 = arith.constant 1 : index
    %c2_139 = arith.constant 2 : index
    %370 = memref.load %arg10[%c1_138, %c2_139] : memref<2x4xf32, #tpu.memory_space<smem>>
    %371 = vector.broadcast %370 : f32 to vector<2x256xf32>
    %372 = arith.addf %369, %371 : vector<2x256xf32>
    %373 = arith.mulf %337, %351 : vector<2x256xf32>
    %c1_140 = arith.constant 1 : index
    %c3_141 = arith.constant 3 : index
    %374 = memref.load %arg9[%c1_140, %c3_141] : memref<2x4xf32, #tpu.memory_space<smem>>
    %375 = vector.broadcast %374 : f32 to vector<2x256xf32>
    %376 = arith.mulf %373, %375 : vector<2x256xf32>
    %c1_142 = arith.constant 1 : index
    %c3_143 = arith.constant 3 : index
    %377 = memref.load %arg10[%c1_142, %c3_143] : memref<2x4xf32, #tpu.memory_space<smem>>
    %378 = vector.broadcast %377 : f32 to vector<2x256xf32>
    %379 = arith.addf %376, %378 : vector<2x256xf32>
    %c0_144 = arith.constant 0 : index
    %c0_145 = arith.constant 0 : index
    %380 = memref.load %arg8[%c0_144, %c0_145] : memref<4x4xf32, #tpu.memory_space<smem>>
    %c0_146 = arith.constant 0 : index
    %c0_147 = arith.constant 0 : index
    %381 = memref.load %arg7[%c0_146, %c0_147] : memref<16x4xf32, #tpu.memory_space<smem>>
    %382 = vector.broadcast %381 : f32 to vector<2x256xf32>
    %383 = arith.mulf %358, %382 : vector<2x256xf32>
    %384 = vector.broadcast %380 : f32 to vector<2x256xf32>
    %385 = arith.addf %384, %383 : vector<2x256xf32>
    %c1_148 = arith.constant 1 : index
    %c0_149 = arith.constant 0 : index
    %386 = memref.load %arg7[%c1_148, %c0_149] : memref<16x4xf32, #tpu.memory_space<smem>>
    %387 = vector.broadcast %386 : f32 to vector<2x256xf32>
    %388 = arith.mulf %365, %387 : vector<2x256xf32>
    %389 = arith.addf %385, %388 : vector<2x256xf32>
    %c2_150 = arith.constant 2 : index
    %c0_151 = arith.constant 0 : index
    %390 = memref.load %arg7[%c2_150, %c0_151] : memref<16x4xf32, #tpu.memory_space<smem>>
    %391 = vector.broadcast %390 : f32 to vector<2x256xf32>
    %392 = arith.mulf %372, %391 : vector<2x256xf32>
    %393 = arith.addf %389, %392 : vector<2x256xf32>
    %c3_152 = arith.constant 3 : index
    %c0_153 = arith.constant 0 : index
    %394 = memref.load %arg7[%c3_152, %c0_153] : memref<16x4xf32, #tpu.memory_space<smem>>
    %395 = vector.broadcast %394 : f32 to vector<2x256xf32>
    %396 = arith.mulf %379, %395 : vector<2x256xf32>
    %397 = arith.addf %393, %396 : vector<2x256xf32>
    %c0_154 = arith.constant 0 : index
    %c1_155 = arith.constant 1 : index
    %398 = memref.load %arg8[%c0_154, %c1_155] : memref<4x4xf32, #tpu.memory_space<smem>>
    %c0_156 = arith.constant 0 : index
    %c1_157 = arith.constant 1 : index
    %399 = memref.load %arg7[%c0_156, %c1_157] : memref<16x4xf32, #tpu.memory_space<smem>>
    %400 = vector.broadcast %399 : f32 to vector<2x256xf32>
    %401 = arith.mulf %358, %400 : vector<2x256xf32>
    %402 = vector.broadcast %398 : f32 to vector<2x256xf32>
    %403 = arith.addf %402, %401 : vector<2x256xf32>
    %c1_158 = arith.constant 1 : index
    %c1_159 = arith.constant 1 : index
    %404 = memref.load %arg7[%c1_158, %c1_159] : memref<16x4xf32, #tpu.memory_space<smem>>
    %405 = vector.broadcast %404 : f32 to vector<2x256xf32>
    %406 = arith.mulf %365, %405 : vector<2x256xf32>
    %407 = arith.addf %403, %406 : vector<2x256xf32>
    %c2_160 = arith.constant 2 : index
    %c1_161 = arith.constant 1 : index
    %408 = memref.load %arg7[%c2_160, %c1_161] : memref<16x4xf32, #tpu.memory_space<smem>>
    %409 = vector.broadcast %408 : f32 to vector<2x256xf32>
    %410 = arith.mulf %372, %409 : vector<2x256xf32>
    %411 = arith.addf %407, %410 : vector<2x256xf32>
    %c3_162 = arith.constant 3 : index
    %c1_163 = arith.constant 1 : index
    %412 = memref.load %arg7[%c3_162, %c1_163] : memref<16x4xf32, #tpu.memory_space<smem>>
    %413 = vector.broadcast %412 : f32 to vector<2x256xf32>
    %414 = arith.mulf %379, %413 : vector<2x256xf32>
    %415 = arith.addf %411, %414 : vector<2x256xf32>
    %c0_164 = arith.constant 0 : index
    %c2_165 = arith.constant 2 : index
    %416 = memref.load %arg8[%c0_164, %c2_165] : memref<4x4xf32, #tpu.memory_space<smem>>
    %c0_166 = arith.constant 0 : index
    %c2_167 = arith.constant 2 : index
    %417 = memref.load %arg7[%c0_166, %c2_167] : memref<16x4xf32, #tpu.memory_space<smem>>
    %418 = vector.broadcast %417 : f32 to vector<2x256xf32>
    %419 = arith.mulf %358, %418 : vector<2x256xf32>
    %420 = vector.broadcast %416 : f32 to vector<2x256xf32>
    %421 = arith.addf %420, %419 : vector<2x256xf32>
    %c1_168 = arith.constant 1 : index
    %c2_169 = arith.constant 2 : index
    %422 = memref.load %arg7[%c1_168, %c2_169] : memref<16x4xf32, #tpu.memory_space<smem>>
    %423 = vector.broadcast %422 : f32 to vector<2x256xf32>
    %424 = arith.mulf %365, %423 : vector<2x256xf32>
    %425 = arith.addf %421, %424 : vector<2x256xf32>
    %c2_170 = arith.constant 2 : index
    %c2_171 = arith.constant 2 : index
    %426 = memref.load %arg7[%c2_170, %c2_171] : memref<16x4xf32, #tpu.memory_space<smem>>
    %427 = vector.broadcast %426 : f32 to vector<2x256xf32>
    %428 = arith.mulf %372, %427 : vector<2x256xf32>
    %429 = arith.addf %425, %428 : vector<2x256xf32>
    %c3_172 = arith.constant 3 : index
    %c2_173 = arith.constant 2 : index
    %430 = memref.load %arg7[%c3_172, %c2_173] : memref<16x4xf32, #tpu.memory_space<smem>>
    %431 = vector.broadcast %430 : f32 to vector<2x256xf32>
    %432 = arith.mulf %379, %431 : vector<2x256xf32>
    %433 = arith.addf %429, %432 : vector<2x256xf32>
    %c0_174 = arith.constant 0 : index
    %c3_175 = arith.constant 3 : index
    %434 = memref.load %arg8[%c0_174, %c3_175] : memref<4x4xf32, #tpu.memory_space<smem>>
    %c0_176 = arith.constant 0 : index
    %c3_177 = arith.constant 3 : index
    %435 = memref.load %arg7[%c0_176, %c3_177] : memref<16x4xf32, #tpu.memory_space<smem>>
    %436 = vector.broadcast %435 : f32 to vector<2x256xf32>
    %437 = arith.mulf %358, %436 : vector<2x256xf32>
    %438 = vector.broadcast %434 : f32 to vector<2x256xf32>
    %439 = arith.addf %438, %437 : vector<2x256xf32>
    %c1_178 = arith.constant 1 : index
    %c3_179 = arith.constant 3 : index
    %440 = memref.load %arg7[%c1_178, %c3_179] : memref<16x4xf32, #tpu.memory_space<smem>>
    %441 = vector.broadcast %440 : f32 to vector<2x256xf32>
    %442 = arith.mulf %365, %441 : vector<2x256xf32>
    %443 = arith.addf %439, %442 : vector<2x256xf32>
    %c2_180 = arith.constant 2 : index
    %c3_181 = arith.constant 3 : index
    %444 = memref.load %arg7[%c2_180, %c3_181] : memref<16x4xf32, #tpu.memory_space<smem>>
    %445 = vector.broadcast %444 : f32 to vector<2x256xf32>
    %446 = arith.mulf %372, %445 : vector<2x256xf32>
    %447 = arith.addf %443, %446 : vector<2x256xf32>
    %c3_182 = arith.constant 3 : index
    %c3_183 = arith.constant 3 : index
    %448 = memref.load %arg7[%c3_182, %c3_183] : memref<16x4xf32, #tpu.memory_space<smem>>
    %449 = vector.broadcast %448 : f32 to vector<2x256xf32>
    %450 = arith.mulf %379, %449 : vector<2x256xf32>
    %451 = arith.addf %447, %450 : vector<2x256xf32>
    %c1_184 = arith.constant 1 : index
    %c0_185 = arith.constant 0 : index
    %452 = memref.load %arg8[%c1_184, %c0_185] : memref<4x4xf32, #tpu.memory_space<smem>>
    %c4_186 = arith.constant 4 : index
    %c0_187 = arith.constant 0 : index
    %453 = memref.load %arg7[%c4_186, %c0_187] : memref<16x4xf32, #tpu.memory_space<smem>>
    %454 = vector.broadcast %453 : f32 to vector<2x256xf32>
    %455 = arith.mulf %358, %454 : vector<2x256xf32>
    %456 = vector.broadcast %452 : f32 to vector<2x256xf32>
    %457 = arith.addf %456, %455 : vector<2x256xf32>
    %c5_188 = arith.constant 5 : index
    %c0_189 = arith.constant 0 : index
    %458 = memref.load %arg7[%c5_188, %c0_189] : memref<16x4xf32, #tpu.memory_space<smem>>
    %459 = vector.broadcast %458 : f32 to vector<2x256xf32>
    %460 = arith.mulf %365, %459 : vector<2x256xf32>
    %461 = arith.addf %457, %460 : vector<2x256xf32>
    %c6_190 = arith.constant 6 : index
    %c0_191 = arith.constant 0 : index
    %462 = memref.load %arg7[%c6_190, %c0_191] : memref<16x4xf32, #tpu.memory_space<smem>>
    %463 = vector.broadcast %462 : f32 to vector<2x256xf32>
    %464 = arith.mulf %372, %463 : vector<2x256xf32>
    %465 = arith.addf %461, %464 : vector<2x256xf32>
    %c7_192 = arith.constant 7 : index
    %c0_193 = arith.constant 0 : index
    %466 = memref.load %arg7[%c7_192, %c0_193] : memref<16x4xf32, #tpu.memory_space<smem>>
    %467 = vector.broadcast %466 : f32 to vector<2x256xf32>
    %468 = arith.mulf %379, %467 : vector<2x256xf32>
    %469 = arith.addf %465, %468 : vector<2x256xf32>
    %c1_194 = arith.constant 1 : index
    %c1_195 = arith.constant 1 : index
    %470 = memref.load %arg8[%c1_194, %c1_195] : memref<4x4xf32, #tpu.memory_space<smem>>
    %c4_196 = arith.constant 4 : index
    %c1_197 = arith.constant 1 : index
    %471 = memref.load %arg7[%c4_196, %c1_197] : memref<16x4xf32, #tpu.memory_space<smem>>
    %472 = vector.broadcast %471 : f32 to vector<2x256xf32>
    %473 = arith.mulf %358, %472 : vector<2x256xf32>
    %474 = vector.broadcast %470 : f32 to vector<2x256xf32>
    %475 = arith.addf %474, %473 : vector<2x256xf32>
    %c5_198 = arith.constant 5 : index
    %c1_199 = arith.constant 1 : index
    %476 = memref.load %arg7[%c5_198, %c1_199] : memref<16x4xf32, #tpu.memory_space<smem>>
    %477 = vector.broadcast %476 : f32 to vector<2x256xf32>
    %478 = arith.mulf %365, %477 : vector<2x256xf32>
    %479 = arith.addf %475, %478 : vector<2x256xf32>
    %c6_200 = arith.constant 6 : index
    %c1_201 = arith.constant 1 : index
    %480 = memref.load %arg7[%c6_200, %c1_201] : memref<16x4xf32, #tpu.memory_space<smem>>
    %481 = vector.broadcast %480 : f32 to vector<2x256xf32>
    %482 = arith.mulf %372, %481 : vector<2x256xf32>
    %483 = arith.addf %479, %482 : vector<2x256xf32>
    %c7_202 = arith.constant 7 : index
    %c1_203 = arith.constant 1 : index
    %484 = memref.load %arg7[%c7_202, %c1_203] : memref<16x4xf32, #tpu.memory_space<smem>>
    %485 = vector.broadcast %484 : f32 to vector<2x256xf32>
    %486 = arith.mulf %379, %485 : vector<2x256xf32>
    %487 = arith.addf %483, %486 : vector<2x256xf32>
    %c1_204 = arith.constant 1 : index
    %c2_205 = arith.constant 2 : index
    %488 = memref.load %arg8[%c1_204, %c2_205] : memref<4x4xf32, #tpu.memory_space<smem>>
    %c4_206 = arith.constant 4 : index
    %c2_207 = arith.constant 2 : index
    %489 = memref.load %arg7[%c4_206, %c2_207] : memref<16x4xf32, #tpu.memory_space<smem>>
    %490 = vector.broadcast %489 : f32 to vector<2x256xf32>
    %491 = arith.mulf %358, %490 : vector<2x256xf32>
    %492 = vector.broadcast %488 : f32 to vector<2x256xf32>
    %493 = arith.addf %492, %491 : vector<2x256xf32>
    %c5_208 = arith.constant 5 : index
    %c2_209 = arith.constant 2 : index
    %494 = memref.load %arg7[%c5_208, %c2_209] : memref<16x4xf32, #tpu.memory_space<smem>>
    %495 = vector.broadcast %494 : f32 to vector<2x256xf32>
    %496 = arith.mulf %365, %495 : vector<2x256xf32>
    %497 = arith.addf %493, %496 : vector<2x256xf32>
    %c6_210 = arith.constant 6 : index
    %c2_211 = arith.constant 2 : index
    %498 = memref.load %arg7[%c6_210, %c2_211] : memref<16x4xf32, #tpu.memory_space<smem>>
    %499 = vector.broadcast %498 : f32 to vector<2x256xf32>
    %500 = arith.mulf %372, %499 : vector<2x256xf32>
    %501 = arith.addf %497, %500 : vector<2x256xf32>
    %c7_212 = arith.constant 7 : index
    %c2_213 = arith.constant 2 : index
    %502 = memref.load %arg7[%c7_212, %c2_213] : memref<16x4xf32, #tpu.memory_space<smem>>
    %503 = vector.broadcast %502 : f32 to vector<2x256xf32>
    %504 = arith.mulf %379, %503 : vector<2x256xf32>
    %505 = arith.addf %501, %504 : vector<2x256xf32>
    %c1_214 = arith.constant 1 : index
    %c3_215 = arith.constant 3 : index
    %506 = memref.load %arg8[%c1_214, %c3_215] : memref<4x4xf32, #tpu.memory_space<smem>>
    %c4_216 = arith.constant 4 : index
    %c3_217 = arith.constant 3 : index
    %507 = memref.load %arg7[%c4_216, %c3_217] : memref<16x4xf32, #tpu.memory_space<smem>>
    %508 = vector.broadcast %507 : f32 to vector<2x256xf32>
    %509 = arith.mulf %358, %508 : vector<2x256xf32>
    %510 = vector.broadcast %506 : f32 to vector<2x256xf32>
    %511 = arith.addf %510, %509 : vector<2x256xf32>
    %c5_218 = arith.constant 5 : index
    %c3_219 = arith.constant 3 : index
    %512 = memref.load %arg7[%c5_218, %c3_219] : memref<16x4xf32, #tpu.memory_space<smem>>
    %513 = vector.broadcast %512 : f32 to vector<2x256xf32>
    %514 = arith.mulf %365, %513 : vector<2x256xf32>
    %515 = arith.addf %511, %514 : vector<2x256xf32>
    %c6_220 = arith.constant 6 : index
    %c3_221 = arith.constant 3 : index
    %516 = memref.load %arg7[%c6_220, %c3_221] : memref<16x4xf32, #tpu.memory_space<smem>>
    %517 = vector.broadcast %516 : f32 to vector<2x256xf32>
    %518 = arith.mulf %372, %517 : vector<2x256xf32>
    %519 = arith.addf %515, %518 : vector<2x256xf32>
    %c7_222 = arith.constant 7 : index
    %c3_223 = arith.constant 3 : index
    %520 = memref.load %arg7[%c7_222, %c3_223] : memref<16x4xf32, #tpu.memory_space<smem>>
    %521 = vector.broadcast %520 : f32 to vector<2x256xf32>
    %522 = arith.mulf %379, %521 : vector<2x256xf32>
    %523 = arith.addf %519, %522 : vector<2x256xf32>
    %524 = vector.shape_cast %397 : vector<2x256xf32> to vector<2x1x256xf32>
    %525 = vector.shape_cast %415 : vector<2x256xf32> to vector<2x1x256xf32>
    %526 = vector.shape_cast %433 : vector<2x256xf32> to vector<2x1x256xf32>
    %527 = vector.shape_cast %451 : vector<2x256xf32> to vector<2x1x256xf32>
    %528 = tpu.concatenate %524, %525, %526, %527 in 1 : vector<2x1x256xf32>, vector<2x1x256xf32>, vector<2x1x256xf32>, vector<2x1x256xf32> -> vector<2x4x256xf32>
    %529 = vector.shape_cast %528 : vector<2x4x256xf32> to vector<8x256xf32>
    %530 = tpu.concatenate %0, %529, %0 in 1 : vector<8x51xf32>, vector<8x256xf32>, vector<8x51xf32> -> vector<8x358xf32>
    %c0_224 = arith.constant 0 : index
    %c0_225 = arith.constant 0 : index
    %531 = vector.load %arg4[%c0_224, %c0_225] : memref<8x256xf32, #tpu.memory_space<vmem>>, vector<8x256xf32>
    %532 = vector.extract_strided_slice %530 {offsets = [0, 0], sizes = [8, 256], strides = [1, 1]} : vector<8x358xf32> to vector<8x256xf32>
    %c0_226 = arith.constant 0 : index
    %c0_227 = arith.constant 0 : index
    %c0_228 = arith.constant 0 : index
    %533 = vector.load %arg3[%c0_226, %c0_227, %c0_228] : memref<49x8x256xf32, #tpu.memory_space<vmem>>, vector<1x8x256xf32>
    %534 = vector.shape_cast %533 : vector<1x8x256xf32> to vector<8x256xf32>
    %535 = arith.mulf %532, %534 : vector<8x256xf32>
    %536 = arith.addf %531, %535 : vector<8x256xf32>
    %537 = vector.extract_strided_slice %530 {offsets = [0, 1], sizes = [8, 256], strides = [1, 1]} : vector<8x358xf32> to vector<8x256xf32>
    %c1_229 = arith.constant 1 : index
    %c0_230 = arith.constant 0 : index
    %c0_231 = arith.constant 0 : index
    %538 = vector.load %arg3[%c1_229, %c0_230, %c0_231] : memref<49x8x256xf32, #tpu.memory_space<vmem>>, vector<1x8x256xf32>
    %539 = vector.shape_cast %538 : vector<1x8x256xf32> to vector<8x256xf32>
    %540 = arith.mulf %537, %539 : vector<8x256xf32>
    %541 = arith.addf %536, %540 : vector<8x256xf32>
    %542 = vector.extract_strided_slice %530 {offsets = [0, 2], sizes = [8, 256], strides = [1, 1]} : vector<8x358xf32> to vector<8x256xf32>
    %c2_232 = arith.constant 2 : index
    %c0_233 = arith.constant 0 : index
    %c0_234 = arith.constant 0 : index
    %543 = vector.load %arg3[%c2_232, %c0_233, %c0_234] : memref<49x8x256xf32, #tpu.memory_space<vmem>>, vector<1x8x256xf32>
    %544 = vector.shape_cast %543 : vector<1x8x256xf32> to vector<8x256xf32>
    %545 = arith.mulf %542, %544 : vector<8x256xf32>
    %546 = arith.addf %541, %545 : vector<8x256xf32>
    %547 = vector.extract_strided_slice %530 {offsets = [0, 3], sizes = [8, 256], strides = [1, 1]} : vector<8x358xf32> to vector<8x256xf32>
    %c3_235 = arith.constant 3 : index
    %c0_236 = arith.constant 0 : index
    %c0_237 = arith.constant 0 : index
    %548 = vector.load %arg3[%c3_235, %c0_236, %c0_237] : memref<49x8x256xf32, #tpu.memory_space<vmem>>, vector<1x8x256xf32>
    %549 = vector.shape_cast %548 : vector<1x8x256xf32> to vector<8x256xf32>
    %550 = arith.mulf %547, %549 : vector<8x256xf32>
    %551 = arith.addf %546, %550 : vector<8x256xf32>
    %552 = vector.extract_strided_slice %530 {offsets = [0, 4], sizes = [8, 256], strides = [1, 1]} : vector<8x358xf32> to vector<8x256xf32>
    %c4_238 = arith.constant 4 : index
    %c0_239 = arith.constant 0 : index
    %c0_240 = arith.constant 0 : index
    %553 = vector.load %arg3[%c4_238, %c0_239, %c0_240] : memref<49x8x256xf32, #tpu.memory_space<vmem>>, vector<1x8x256xf32>
    %554 = vector.shape_cast %553 : vector<1x8x256xf32> to vector<8x256xf32>
    %555 = arith.mulf %552, %554 : vector<8x256xf32>
    %556 = arith.addf %551, %555 : vector<8x256xf32>
    %557 = vector.extract_strided_slice %530 {offsets = [0, 5], sizes = [8, 256], strides = [1, 1]} : vector<8x358xf32> to vector<8x256xf32>
    %c5_241 = arith.constant 5 : index
    %c0_242 = arith.constant 0 : index
    %c0_243 = arith.constant 0 : index
    %558 = vector.load %arg3[%c5_241, %c0_242, %c0_243] : memref<49x8x256xf32, #tpu.memory_space<vmem>>, vector<1x8x256xf32>
    %559 = vector.shape_cast %558 : vector<1x8x256xf32> to vector<8x256xf32>
    %560 = arith.mulf %557, %559 : vector<8x256xf32>
    %561 = arith.addf %556, %560 : vector<8x256xf32>
    %562 = vector.extract_strided_slice %530 {offsets = [0, 6], sizes = [8, 256], strides = [1, 1]} : vector<8x358xf32> to vector<8x256xf32>
    %c6_244 = arith.constant 6 : index
    %c0_245 = arith.constant 0 : index
    %c0_246 = arith.constant 0 : index
    %563 = vector.load %arg3[%c6_244, %c0_245, %c0_246] : memref<49x8x256xf32, #tpu.memory_space<vmem>>, vector<1x8x256xf32>
    %564 = vector.shape_cast %563 : vector<1x8x256xf32> to vector<8x256xf32>
    %565 = arith.mulf %562, %564 : vector<8x256xf32>
    %566 = arith.addf %561, %565 : vector<8x256xf32>
    %567 = vector.extract_strided_slice %530 {offsets = [0, 16], sizes = [8, 256], strides = [1, 1]} : vector<8x358xf32> to vector<8x256xf32>
    %c7_247 = arith.constant 7 : index
    %c0_248 = arith.constant 0 : index
    %c0_249 = arith.constant 0 : index
    %568 = vector.load %arg3[%c7_247, %c0_248, %c0_249] : memref<49x8x256xf32, #tpu.memory_space<vmem>>, vector<1x8x256xf32>
    %569 = vector.shape_cast %568 : vector<1x8x256xf32> to vector<8x256xf32>
    %570 = arith.mulf %567, %569 : vector<8x256xf32>
    %571 = arith.addf %566, %570 : vector<8x256xf32>
    %572 = vector.extract_strided_slice %530 {offsets = [0, 17], sizes = [8, 256], strides = [1, 1]} : vector<8x358xf32> to vector<8x256xf32>
    %c8_250 = arith.constant 8 : index
    %c0_251 = arith.constant 0 : index
    %c0_252 = arith.constant 0 : index
    %573 = vector.load %arg3[%c8_250, %c0_251, %c0_252] : memref<49x8x256xf32, #tpu.memory_space<vmem>>, vector<1x8x256xf32>
    %574 = vector.shape_cast %573 : vector<1x8x256xf32> to vector<8x256xf32>
    %575 = arith.mulf %572, %574 : vector<8x256xf32>
    %576 = arith.addf %571, %575 : vector<8x256xf32>
    %577 = vector.extract_strided_slice %530 {offsets = [0, 18], sizes = [8, 256], strides = [1, 1]} : vector<8x358xf32> to vector<8x256xf32>
    %c9_253 = arith.constant 9 : index
    %c0_254 = arith.constant 0 : index
    %c0_255 = arith.constant 0 : index
    %578 = vector.load %arg3[%c9_253, %c0_254, %c0_255] : memref<49x8x256xf32, #tpu.memory_space<vmem>>, vector<1x8x256xf32>
    %579 = vector.shape_cast %578 : vector<1x8x256xf32> to vector<8x256xf32>
    %580 = arith.mulf %577, %579 : vector<8x256xf32>
    %581 = arith.addf %576, %580 : vector<8x256xf32>
    %582 = vector.extract_strided_slice %530 {offsets = [0, 19], sizes = [8, 256], strides = [1, 1]} : vector<8x358xf32> to vector<8x256xf32>
    %c10_256 = arith.constant 10 : index
    %c0_257 = arith.constant 0 : index
    %c0_258 = arith.constant 0 : index
    %583 = vector.load %arg3[%c10_256, %c0_257, %c0_258] : memref<49x8x256xf32, #tpu.memory_space<vmem>>, vector<1x8x256xf32>
    %584 = vector.shape_cast %583 : vector<1x8x256xf32> to vector<8x256xf32>
    %585 = arith.mulf %582, %584 : vector<8x256xf32>
    %586 = arith.addf %581, %585 : vector<8x256xf32>
    %587 = vector.extract_strided_slice %530 {offsets = [0, 20], sizes = [8, 256], strides = [1, 1]} : vector<8x358xf32> to vector<8x256xf32>
    %c11_259 = arith.constant 11 : index
    %c0_260 = arith.constant 0 : index
    %c0_261 = arith.constant 0 : index
    %588 = vector.load %arg3[%c11_259, %c0_260, %c0_261] : memref<49x8x256xf32, #tpu.memory_space<vmem>>, vector<1x8x256xf32>
    %589 = vector.shape_cast %588 : vector<1x8x256xf32> to vector<8x256xf32>
    %590 = arith.mulf %587, %589 : vector<8x256xf32>
    %591 = arith.addf %586, %590 : vector<8x256xf32>
    %592 = vector.extract_strided_slice %530 {offsets = [0, 21], sizes = [8, 256], strides = [1, 1]} : vector<8x358xf32> to vector<8x256xf32>
    %c12_262 = arith.constant 12 : index
    %c0_263 = arith.constant 0 : index
    %c0_264 = arith.constant 0 : index
    %593 = vector.load %arg3[%c12_262, %c0_263, %c0_264] : memref<49x8x256xf32, #tpu.memory_space<vmem>>, vector<1x8x256xf32>
    %594 = vector.shape_cast %593 : vector<1x8x256xf32> to vector<8x256xf32>
    %595 = arith.mulf %592, %594 : vector<8x256xf32>
    %596 = arith.addf %591, %595 : vector<8x256xf32>
    %597 = vector.extract_strided_slice %530 {offsets = [0, 22], sizes = [8, 256], strides = [1, 1]} : vector<8x358xf32> to vector<8x256xf32>
    %c13_265 = arith.constant 13 : index
    %c0_266 = arith.constant 0 : index
    %c0_267 = arith.constant 0 : index
    %598 = vector.load %arg3[%c13_265, %c0_266, %c0_267] : memref<49x8x256xf32, #tpu.memory_space<vmem>>, vector<1x8x256xf32>
    %599 = vector.shape_cast %598 : vector<1x8x256xf32> to vector<8x256xf32>
    %600 = arith.mulf %597, %599 : vector<8x256xf32>
    %601 = arith.addf %596, %600 : vector<8x256xf32>
    %602 = vector.extract_strided_slice %530 {offsets = [0, 32], sizes = [8, 256], strides = [1, 1]} : vector<8x358xf32> to vector<8x256xf32>
    %c14_268 = arith.constant 14 : index
    %c0_269 = arith.constant 0 : index
    %c0_270 = arith.constant 0 : index
    %603 = vector.load %arg3[%c14_268, %c0_269, %c0_270] : memref<49x8x256xf32, #tpu.memory_space<vmem>>, vector<1x8x256xf32>
    %604 = vector.shape_cast %603 : vector<1x8x256xf32> to vector<8x256xf32>
    %605 = arith.mulf %602, %604 : vector<8x256xf32>
    %606 = arith.addf %601, %605 : vector<8x256xf32>
    %607 = vector.extract_strided_slice %530 {offsets = [0, 33], sizes = [8, 256], strides = [1, 1]} : vector<8x358xf32> to vector<8x256xf32>
    %c15_271 = arith.constant 15 : index
    %c0_272 = arith.constant 0 : index
    %c0_273 = arith.constant 0 : index
    %608 = vector.load %arg3[%c15_271, %c0_272, %c0_273] : memref<49x8x256xf32, #tpu.memory_space<vmem>>, vector<1x8x256xf32>
    %609 = vector.shape_cast %608 : vector<1x8x256xf32> to vector<8x256xf32>
    %610 = arith.mulf %607, %609 : vector<8x256xf32>
    %611 = arith.addf %606, %610 : vector<8x256xf32>
    %612 = vector.extract_strided_slice %530 {offsets = [0, 34], sizes = [8, 256], strides = [1, 1]} : vector<8x358xf32> to vector<8x256xf32>
    %c16_274 = arith.constant 16 : index
    %c0_275 = arith.constant 0 : index
    %c0_276 = arith.constant 0 : index
    %613 = vector.load %arg3[%c16_274, %c0_275, %c0_276] : memref<49x8x256xf32, #tpu.memory_space<vmem>>, vector<1x8x256xf32>
    %614 = vector.shape_cast %613 : vector<1x8x256xf32> to vector<8x256xf32>
    %615 = arith.mulf %612, %614 : vector<8x256xf32>
    %616 = arith.addf %611, %615 : vector<8x256xf32>
    %617 = vector.extract_strided_slice %530 {offsets = [0, 35], sizes = [8, 256], strides = [1, 1]} : vector<8x358xf32> to vector<8x256xf32>
    %c17_277 = arith.constant 17 : index
    %c0_278 = arith.constant 0 : index
    %c0_279 = arith.constant 0 : index
    %618 = vector.load %arg3[%c17_277, %c0_278, %c0_279] : memref<49x8x256xf32, #tpu.memory_space<vmem>>, vector<1x8x256xf32>
    %619 = vector.shape_cast %618 : vector<1x8x256xf32> to vector<8x256xf32>
    %620 = arith.mulf %617, %619 : vector<8x256xf32>
    %621 = arith.addf %616, %620 : vector<8x256xf32>
    %622 = vector.extract_strided_slice %530 {offsets = [0, 36], sizes = [8, 256], strides = [1, 1]} : vector<8x358xf32> to vector<8x256xf32>
    %c18_280 = arith.constant 18 : index
    %c0_281 = arith.constant 0 : index
    %c0_282 = arith.constant 0 : index
    %623 = vector.load %arg3[%c18_280, %c0_281, %c0_282] : memref<49x8x256xf32, #tpu.memory_space<vmem>>, vector<1x8x256xf32>
    %624 = vector.shape_cast %623 : vector<1x8x256xf32> to vector<8x256xf32>
    %625 = arith.mulf %622, %624 : vector<8x256xf32>
    %626 = arith.addf %621, %625 : vector<8x256xf32>
    %627 = vector.extract_strided_slice %530 {offsets = [0, 37], sizes = [8, 256], strides = [1, 1]} : vector<8x358xf32> to vector<8x256xf32>
    %c19_283 = arith.constant 19 : index
    %c0_284 = arith.constant 0 : index
    %c0_285 = arith.constant 0 : index
    %628 = vector.load %arg3[%c19_283, %c0_284, %c0_285] : memref<49x8x256xf32, #tpu.memory_space<vmem>>, vector<1x8x256xf32>
    %629 = vector.shape_cast %628 : vector<1x8x256xf32> to vector<8x256xf32>
    %630 = arith.mulf %627, %629 : vector<8x256xf32>
    %631 = arith.addf %626, %630 : vector<8x256xf32>
    %632 = vector.extract_strided_slice %530 {offsets = [0, 38], sizes = [8, 256], strides = [1, 1]} : vector<8x358xf32> to vector<8x256xf32>
    %c20_286 = arith.constant 20 : index
    %c0_287 = arith.constant 0 : index
    %c0_288 = arith.constant 0 : index
    %633 = vector.load %arg3[%c20_286, %c0_287, %c0_288] : memref<49x8x256xf32, #tpu.memory_space<vmem>>, vector<1x8x256xf32>
    %634 = vector.shape_cast %633 : vector<1x8x256xf32> to vector<8x256xf32>
    %635 = arith.mulf %632, %634 : vector<8x256xf32>
    %636 = arith.addf %631, %635 : vector<8x256xf32>
    %637 = vector.extract_strided_slice %530 {offsets = [0, 48], sizes = [8, 256], strides = [1, 1]} : vector<8x358xf32> to vector<8x256xf32>
    %c21_289 = arith.constant 21 : index
    %c0_290 = arith.constant 0 : index
    %c0_291 = arith.constant 0 : index
    %638 = vector.load %arg3[%c21_289, %c0_290, %c0_291] : memref<49x8x256xf32, #tpu.memory_space<vmem>>, vector<1x8x256xf32>
    %639 = vector.shape_cast %638 : vector<1x8x256xf32> to vector<8x256xf32>
    %640 = arith.mulf %637, %639 : vector<8x256xf32>
    %641 = arith.addf %636, %640 : vector<8x256xf32>
    %642 = vector.extract_strided_slice %530 {offsets = [0, 49], sizes = [8, 256], strides = [1, 1]} : vector<8x358xf32> to vector<8x256xf32>
    %c22_292 = arith.constant 22 : index
    %c0_293 = arith.constant 0 : index
    %c0_294 = arith.constant 0 : index
    %643 = vector.load %arg3[%c22_292, %c0_293, %c0_294] : memref<49x8x256xf32, #tpu.memory_space<vmem>>, vector<1x8x256xf32>
    %644 = vector.shape_cast %643 : vector<1x8x256xf32> to vector<8x256xf32>
    %645 = arith.mulf %642, %644 : vector<8x256xf32>
    %646 = arith.addf %641, %645 : vector<8x256xf32>
    %647 = vector.extract_strided_slice %530 {offsets = [0, 50], sizes = [8, 256], strides = [1, 1]} : vector<8x358xf32> to vector<8x256xf32>
    %c23_295 = arith.constant 23 : index
    %c0_296 = arith.constant 0 : index
    %c0_297 = arith.constant 0 : index
    %648 = vector.load %arg3[%c23_295, %c0_296, %c0_297] : memref<49x8x256xf32, #tpu.memory_space<vmem>>, vector<1x8x256xf32>
    %649 = vector.shape_cast %648 : vector<1x8x256xf32> to vector<8x256xf32>
    %650 = arith.mulf %647, %649 : vector<8x256xf32>
    %651 = arith.addf %646, %650 : vector<8x256xf32>
    %652 = vector.extract_strided_slice %530 {offsets = [0, 51], sizes = [8, 256], strides = [1, 1]} : vector<8x358xf32> to vector<8x256xf32>
    %c24_298 = arith.constant 24 : index
    %c0_299 = arith.constant 0 : index
    %c0_300 = arith.constant 0 : index
    %653 = vector.load %arg3[%c24_298, %c0_299, %c0_300] : memref<49x8x256xf32, #tpu.memory_space<vmem>>, vector<1x8x256xf32>
    %654 = vector.shape_cast %653 : vector<1x8x256xf32> to vector<8x256xf32>
    %655 = arith.mulf %652, %654 : vector<8x256xf32>
    %656 = arith.addf %651, %655 : vector<8x256xf32>
    %657 = vector.extract_strided_slice %530 {offsets = [0, 52], sizes = [8, 256], strides = [1, 1]} : vector<8x358xf32> to vector<8x256xf32>
    %c25_301 = arith.constant 25 : index
    %c0_302 = arith.constant 0 : index
    %c0_303 = arith.constant 0 : index
    %658 = vector.load %arg3[%c25_301, %c0_302, %c0_303] : memref<49x8x256xf32, #tpu.memory_space<vmem>>, vector<1x8x256xf32>
    %659 = vector.shape_cast %658 : vector<1x8x256xf32> to vector<8x256xf32>
    %660 = arith.mulf %657, %659 : vector<8x256xf32>
    %661 = arith.addf %656, %660 : vector<8x256xf32>
    %662 = vector.extract_strided_slice %530 {offsets = [0, 53], sizes = [8, 256], strides = [1, 1]} : vector<8x358xf32> to vector<8x256xf32>
    %c26_304 = arith.constant 26 : index
    %c0_305 = arith.constant 0 : index
    %c0_306 = arith.constant 0 : index
    %663 = vector.load %arg3[%c26_304, %c0_305, %c0_306] : memref<49x8x256xf32, #tpu.memory_space<vmem>>, vector<1x8x256xf32>
    %664 = vector.shape_cast %663 : vector<1x8x256xf32> to vector<8x256xf32>
    %665 = arith.mulf %662, %664 : vector<8x256xf32>
    %666 = arith.addf %661, %665 : vector<8x256xf32>
    %667 = vector.extract_strided_slice %530 {offsets = [0, 54], sizes = [8, 256], strides = [1, 1]} : vector<8x358xf32> to vector<8x256xf32>
    %c27_307 = arith.constant 27 : index
    %c0_308 = arith.constant 0 : index
    %c0_309 = arith.constant 0 : index
    %668 = vector.load %arg3[%c27_307, %c0_308, %c0_309] : memref<49x8x256xf32, #tpu.memory_space<vmem>>, vector<1x8x256xf32>
    %669 = vector.shape_cast %668 : vector<1x8x256xf32> to vector<8x256xf32>
    %670 = arith.mulf %667, %669 : vector<8x256xf32>
    %671 = arith.addf %666, %670 : vector<8x256xf32>
    %672 = vector.extract_strided_slice %530 {offsets = [0, 64], sizes = [8, 256], strides = [1, 1]} : vector<8x358xf32> to vector<8x256xf32>
    %c28_310 = arith.constant 28 : index
    %c0_311 = arith.constant 0 : index
    %c0_312 = arith.constant 0 : index
    %673 = vector.load %arg3[%c28_310, %c0_311, %c0_312] : memref<49x8x256xf32, #tpu.memory_space<vmem>>, vector<1x8x256xf32>
    %674 = vector.shape_cast %673 : vector<1x8x256xf32> to vector<8x256xf32>
    %675 = arith.mulf %672, %674 : vector<8x256xf32>
    %676 = arith.addf %671, %675 : vector<8x256xf32>
    %677 = vector.extract_strided_slice %530 {offsets = [0, 65], sizes = [8, 256], strides = [1, 1]} : vector<8x358xf32> to vector<8x256xf32>
    %c29_313 = arith.constant 29 : index
    %c0_314 = arith.constant 0 : index
    %c0_315 = arith.constant 0 : index
    %678 = vector.load %arg3[%c29_313, %c0_314, %c0_315] : memref<49x8x256xf32, #tpu.memory_space<vmem>>, vector<1x8x256xf32>
    %679 = vector.shape_cast %678 : vector<1x8x256xf32> to vector<8x256xf32>
    %680 = arith.mulf %677, %679 : vector<8x256xf32>
    %681 = arith.addf %676, %680 : vector<8x256xf32>
    %682 = vector.extract_strided_slice %530 {offsets = [0, 66], sizes = [8, 256], strides = [1, 1]} : vector<8x358xf32> to vector<8x256xf32>
    %c30_316 = arith.constant 30 : index
    %c0_317 = arith.constant 0 : index
    %c0_318 = arith.constant 0 : index
    %683 = vector.load %arg3[%c30_316, %c0_317, %c0_318] : memref<49x8x256xf32, #tpu.memory_space<vmem>>, vector<1x8x256xf32>
    %684 = vector.shape_cast %683 : vector<1x8x256xf32> to vector<8x256xf32>
    %685 = arith.mulf %682, %684 : vector<8x256xf32>
    %686 = arith.addf %681, %685 : vector<8x256xf32>
    %687 = vector.extract_strided_slice %530 {offsets = [0, 67], sizes = [8, 256], strides = [1, 1]} : vector<8x358xf32> to vector<8x256xf32>
    %c31_319 = arith.constant 31 : index
    %c0_320 = arith.constant 0 : index
    %c0_321 = arith.constant 0 : index
    %688 = vector.load %arg3[%c31_319, %c0_320, %c0_321] : memref<49x8x256xf32, #tpu.memory_space<vmem>>, vector<1x8x256xf32>
    %689 = vector.shape_cast %688 : vector<1x8x256xf32> to vector<8x256xf32>
    %690 = arith.mulf %687, %689 : vector<8x256xf32>
    %691 = arith.addf %686, %690 : vector<8x256xf32>
    %692 = vector.extract_strided_slice %530 {offsets = [0, 68], sizes = [8, 256], strides = [1, 1]} : vector<8x358xf32> to vector<8x256xf32>
    %c32_322 = arith.constant 32 : index
    %c0_323 = arith.constant 0 : index
    %c0_324 = arith.constant 0 : index
    %693 = vector.load %arg3[%c32_322, %c0_323, %c0_324] : memref<49x8x256xf32, #tpu.memory_space<vmem>>, vector<1x8x256xf32>
    %694 = vector.shape_cast %693 : vector<1x8x256xf32> to vector<8x256xf32>
    %695 = arith.mulf %692, %694 : vector<8x256xf32>
    %696 = arith.addf %691, %695 : vector<8x256xf32>
    %697 = vector.extract_strided_slice %530 {offsets = [0, 69], sizes = [8, 256], strides = [1, 1]} : vector<8x358xf32> to vector<8x256xf32>
    %c33_325 = arith.constant 33 : index
    %c0_326 = arith.constant 0 : index
    %c0_327 = arith.constant 0 : index
    %698 = vector.load %arg3[%c33_325, %c0_326, %c0_327] : memref<49x8x256xf32, #tpu.memory_space<vmem>>, vector<1x8x256xf32>
    %699 = vector.shape_cast %698 : vector<1x8x256xf32> to vector<8x256xf32>
    %700 = arith.mulf %697, %699 : vector<8x256xf32>
    %701 = arith.addf %696, %700 : vector<8x256xf32>
    %702 = vector.extract_strided_slice %530 {offsets = [0, 70], sizes = [8, 256], strides = [1, 1]} : vector<8x358xf32> to vector<8x256xf32>
    %c34_328 = arith.constant 34 : index
    %c0_329 = arith.constant 0 : index
    %c0_330 = arith.constant 0 : index
    %703 = vector.load %arg3[%c34_328, %c0_329, %c0_330] : memref<49x8x256xf32, #tpu.memory_space<vmem>>, vector<1x8x256xf32>
    %704 = vector.shape_cast %703 : vector<1x8x256xf32> to vector<8x256xf32>
    %705 = arith.mulf %702, %704 : vector<8x256xf32>
    %706 = arith.addf %701, %705 : vector<8x256xf32>
    %707 = vector.extract_strided_slice %530 {offsets = [0, 80], sizes = [8, 256], strides = [1, 1]} : vector<8x358xf32> to vector<8x256xf32>
    %c35_331 = arith.constant 35 : index
    %c0_332 = arith.constant 0 : index
    %c0_333 = arith.constant 0 : index
    %708 = vector.load %arg3[%c35_331, %c0_332, %c0_333] : memref<49x8x256xf32, #tpu.memory_space<vmem>>, vector<1x8x256xf32>
    %709 = vector.shape_cast %708 : vector<1x8x256xf32> to vector<8x256xf32>
    %710 = arith.mulf %707, %709 : vector<8x256xf32>
    %711 = arith.addf %706, %710 : vector<8x256xf32>
    %712 = vector.extract_strided_slice %530 {offsets = [0, 81], sizes = [8, 256], strides = [1, 1]} : vector<8x358xf32> to vector<8x256xf32>
    %c36_334 = arith.constant 36 : index
    %c0_335 = arith.constant 0 : index
    %c0_336 = arith.constant 0 : index
    %713 = vector.load %arg3[%c36_334, %c0_335, %c0_336] : memref<49x8x256xf32, #tpu.memory_space<vmem>>, vector<1x8x256xf32>
    %714 = vector.shape_cast %713 : vector<1x8x256xf32> to vector<8x256xf32>
    %715 = arith.mulf %712, %714 : vector<8x256xf32>
    %716 = arith.addf %711, %715 : vector<8x256xf32>
    %717 = vector.extract_strided_slice %530 {offsets = [0, 82], sizes = [8, 256], strides = [1, 1]} : vector<8x358xf32> to vector<8x256xf32>
    %c37_337 = arith.constant 37 : index
    %c0_338 = arith.constant 0 : index
    %c0_339 = arith.constant 0 : index
    %718 = vector.load %arg3[%c37_337, %c0_338, %c0_339] : memref<49x8x256xf32, #tpu.memory_space<vmem>>, vector<1x8x256xf32>
    %719 = vector.shape_cast %718 : vector<1x8x256xf32> to vector<8x256xf32>
    %720 = arith.mulf %717, %719 : vector<8x256xf32>
    %721 = arith.addf %716, %720 : vector<8x256xf32>
    %722 = vector.extract_strided_slice %530 {offsets = [0, 83], sizes = [8, 256], strides = [1, 1]} : vector<8x358xf32> to vector<8x256xf32>
    %c38_340 = arith.constant 38 : index
    %c0_341 = arith.constant 0 : index
    %c0_342 = arith.constant 0 : index
    %723 = vector.load %arg3[%c38_340, %c0_341, %c0_342] : memref<49x8x256xf32, #tpu.memory_space<vmem>>, vector<1x8x256xf32>
    %724 = vector.shape_cast %723 : vector<1x8x256xf32> to vector<8x256xf32>
    %725 = arith.mulf %722, %724 : vector<8x256xf32>
    %726 = arith.addf %721, %725 : vector<8x256xf32>
    %727 = vector.extract_strided_slice %530 {offsets = [0, 84], sizes = [8, 256], strides = [1, 1]} : vector<8x358xf32> to vector<8x256xf32>
    %c39_343 = arith.constant 39 : index
    %c0_344 = arith.constant 0 : index
    %c0_345 = arith.constant 0 : index
    %728 = vector.load %arg3[%c39_343, %c0_344, %c0_345] : memref<49x8x256xf32, #tpu.memory_space<vmem>>, vector<1x8x256xf32>
    %729 = vector.shape_cast %728 : vector<1x8x256xf32> to vector<8x256xf32>
    %730 = arith.mulf %727, %729 : vector<8x256xf32>
    %731 = arith.addf %726, %730 : vector<8x256xf32>
    %732 = vector.extract_strided_slice %530 {offsets = [0, 85], sizes = [8, 256], strides = [1, 1]} : vector<8x358xf32> to vector<8x256xf32>
    %c40_346 = arith.constant 40 : index
    %c0_347 = arith.constant 0 : index
    %c0_348 = arith.constant 0 : index
    %733 = vector.load %arg3[%c40_346, %c0_347, %c0_348] : memref<49x8x256xf32, #tpu.memory_space<vmem>>, vector<1x8x256xf32>
    %734 = vector.shape_cast %733 : vector<1x8x256xf32> to vector<8x256xf32>
    %735 = arith.mulf %732, %734 : vector<8x256xf32>
    %736 = arith.addf %731, %735 : vector<8x256xf32>
    %737 = vector.extract_strided_slice %530 {offsets = [0, 86], sizes = [8, 256], strides = [1, 1]} : vector<8x358xf32> to vector<8x256xf32>
    %c41_349 = arith.constant 41 : index
    %c0_350 = arith.constant 0 : index
    %c0_351 = arith.constant 0 : index
    %738 = vector.load %arg3[%c41_349, %c0_350, %c0_351] : memref<49x8x256xf32, #tpu.memory_space<vmem>>, vector<1x8x256xf32>
    %739 = vector.shape_cast %738 : vector<1x8x256xf32> to vector<8x256xf32>
    %740 = arith.mulf %737, %739 : vector<8x256xf32>
    %741 = arith.addf %736, %740 : vector<8x256xf32>
    %742 = vector.extract_strided_slice %530 {offsets = [0, 96], sizes = [8, 256], strides = [1, 1]} : vector<8x358xf32> to vector<8x256xf32>
    %c42_352 = arith.constant 42 : index
    %c0_353 = arith.constant 0 : index
    %c0_354 = arith.constant 0 : index
    %743 = vector.load %arg3[%c42_352, %c0_353, %c0_354] : memref<49x8x256xf32, #tpu.memory_space<vmem>>, vector<1x8x256xf32>
    %744 = vector.shape_cast %743 : vector<1x8x256xf32> to vector<8x256xf32>
    %745 = arith.mulf %742, %744 : vector<8x256xf32>
    %746 = arith.addf %741, %745 : vector<8x256xf32>
    %747 = vector.extract_strided_slice %530 {offsets = [0, 97], sizes = [8, 256], strides = [1, 1]} : vector<8x358xf32> to vector<8x256xf32>
    %c43_355 = arith.constant 43 : index
    %c0_356 = arith.constant 0 : index
    %c0_357 = arith.constant 0 : index
    %748 = vector.load %arg3[%c43_355, %c0_356, %c0_357] : memref<49x8x256xf32, #tpu.memory_space<vmem>>, vector<1x8x256xf32>
    %749 = vector.shape_cast %748 : vector<1x8x256xf32> to vector<8x256xf32>
    %750 = arith.mulf %747, %749 : vector<8x256xf32>
    %751 = arith.addf %746, %750 : vector<8x256xf32>
    %752 = vector.extract_strided_slice %530 {offsets = [0, 98], sizes = [8, 256], strides = [1, 1]} : vector<8x358xf32> to vector<8x256xf32>
    %c44_358 = arith.constant 44 : index
    %c0_359 = arith.constant 0 : index
    %c0_360 = arith.constant 0 : index
    %753 = vector.load %arg3[%c44_358, %c0_359, %c0_360] : memref<49x8x256xf32, #tpu.memory_space<vmem>>, vector<1x8x256xf32>
    %754 = vector.shape_cast %753 : vector<1x8x256xf32> to vector<8x256xf32>
    %755 = arith.mulf %752, %754 : vector<8x256xf32>
    %756 = arith.addf %751, %755 : vector<8x256xf32>
    %757 = vector.extract_strided_slice %530 {offsets = [0, 99], sizes = [8, 256], strides = [1, 1]} : vector<8x358xf32> to vector<8x256xf32>
    %c45_361 = arith.constant 45 : index
    %c0_362 = arith.constant 0 : index
    %c0_363 = arith.constant 0 : index
    %758 = vector.load %arg3[%c45_361, %c0_362, %c0_363] : memref<49x8x256xf32, #tpu.memory_space<vmem>>, vector<1x8x256xf32>
    %759 = vector.shape_cast %758 : vector<1x8x256xf32> to vector<8x256xf32>
    %760 = arith.mulf %757, %759 : vector<8x256xf32>
    %761 = arith.addf %756, %760 : vector<8x256xf32>
    %762 = vector.extract_strided_slice %530 {offsets = [0, 100], sizes = [8, 256], strides = [1, 1]} : vector<8x358xf32> to vector<8x256xf32>
    %c46_364 = arith.constant 46 : index
    %c0_365 = arith.constant 0 : index
    %c0_366 = arith.constant 0 : index
    %763 = vector.load %arg3[%c46_364, %c0_365, %c0_366] : memref<49x8x256xf32, #tpu.memory_space<vmem>>, vector<1x8x256xf32>
    %764 = vector.shape_cast %763 : vector<1x8x256xf32> to vector<8x256xf32>
    %765 = arith.mulf %762, %764 : vector<8x256xf32>
    %766 = arith.addf %761, %765 : vector<8x256xf32>
    %767 = vector.extract_strided_slice %530 {offsets = [0, 101], sizes = [8, 256], strides = [1, 1]} : vector<8x358xf32> to vector<8x256xf32>
    %c47_367 = arith.constant 47 : index
    %c0_368 = arith.constant 0 : index
    %c0_369 = arith.constant 0 : index
    %768 = vector.load %arg3[%c47_367, %c0_368, %c0_369] : memref<49x8x256xf32, #tpu.memory_space<vmem>>, vector<1x8x256xf32>
    %769 = vector.shape_cast %768 : vector<1x8x256xf32> to vector<8x256xf32>
    %770 = arith.mulf %767, %769 : vector<8x256xf32>
    %771 = arith.addf %766, %770 : vector<8x256xf32>
    %772 = vector.extract_strided_slice %530 {offsets = [0, 102], sizes = [8, 256], strides = [1, 1]} : vector<8x358xf32> to vector<8x256xf32>
    %c48_370 = arith.constant 48 : index
    %c0_371 = arith.constant 0 : index
    %c0_372 = arith.constant 0 : index
    %773 = vector.load %arg3[%c48_370, %c0_371, %c0_372] : memref<49x8x256xf32, #tpu.memory_space<vmem>>, vector<1x8x256xf32>
    %774 = vector.shape_cast %773 : vector<1x8x256xf32> to vector<8x256xf32>
    %775 = arith.mulf %772, %774 : vector<8x256xf32>
    %776 = arith.addf %771, %775 : vector<8x256xf32>
    %777 = vector.shape_cast %776 : vector<8x256xf32> to vector<2x4x256xf32>
    %778 = vector.extract_strided_slice %777 {offsets = [0, 0, 0], sizes = [2, 1, 256], strides = [1, 1, 1]} : vector<2x4x256xf32> to vector<2x1x256xf32>
    %779 = vector.shape_cast %778 : vector<2x1x256xf32> to vector<2x256xf32>
    %780 = vector.extract_strided_slice %777 {offsets = [0, 1, 0], sizes = [2, 1, 256], strides = [1, 1, 1]} : vector<2x4x256xf32> to vector<2x1x256xf32>
    %781 = vector.shape_cast %780 : vector<2x1x256xf32> to vector<2x256xf32>
    %782 = vector.extract_strided_slice %777 {offsets = [0, 2, 0], sizes = [2, 1, 256], strides = [1, 1, 1]} : vector<2x4x256xf32> to vector<2x1x256xf32>
    %783 = vector.shape_cast %782 : vector<2x1x256xf32> to vector<2x256xf32>
    %784 = vector.extract_strided_slice %777 {offsets = [0, 3, 0], sizes = [2, 1, 256], strides = [1, 1, 1]} : vector<2x4x256xf32> to vector<2x1x256xf32>
    %785 = vector.shape_cast %784 : vector<2x1x256xf32> to vector<2x256xf32>
    %786 = arith.mulf %469, %779 : vector<2x256xf32>
    %787 = arith.mulf %487, %781 : vector<2x256xf32>
    %788 = arith.mulf %505, %783 : vector<2x256xf32>
    %789 = arith.mulf %523, %785 : vector<2x256xf32>
    %c2_373 = arith.constant 2 : index
    %c0_374 = arith.constant 0 : index
    %790 = memref.load %arg8[%c2_373, %c0_374] : memref<4x4xf32, #tpu.memory_space<smem>>
    %c8_375 = arith.constant 8 : index
    %c0_376 = arith.constant 0 : index
    %791 = memref.load %arg7[%c8_375, %c0_376] : memref<16x4xf32, #tpu.memory_space<smem>>
    %792 = vector.broadcast %791 : f32 to vector<2x256xf32>
    %793 = arith.mulf %786, %792 : vector<2x256xf32>
    %794 = vector.broadcast %790 : f32 to vector<2x256xf32>
    %795 = arith.addf %794, %793 : vector<2x256xf32>
    %c9_377 = arith.constant 9 : index
    %c0_378 = arith.constant 0 : index
    %796 = memref.load %arg7[%c9_377, %c0_378] : memref<16x4xf32, #tpu.memory_space<smem>>
    %797 = vector.broadcast %796 : f32 to vector<2x256xf32>
    %798 = arith.mulf %787, %797 : vector<2x256xf32>
    %799 = arith.addf %795, %798 : vector<2x256xf32>
    %c10_379 = arith.constant 10 : index
    %c0_380 = arith.constant 0 : index
    %800 = memref.load %arg7[%c10_379, %c0_380] : memref<16x4xf32, #tpu.memory_space<smem>>
    %801 = vector.broadcast %800 : f32 to vector<2x256xf32>
    %802 = arith.mulf %788, %801 : vector<2x256xf32>
    %803 = arith.addf %799, %802 : vector<2x256xf32>
    %c11_381 = arith.constant 11 : index
    %c0_382 = arith.constant 0 : index
    %804 = memref.load %arg7[%c11_381, %c0_382] : memref<16x4xf32, #tpu.memory_space<smem>>
    %805 = vector.broadcast %804 : f32 to vector<2x256xf32>
    %806 = arith.mulf %789, %805 : vector<2x256xf32>
    %807 = arith.addf %803, %806 : vector<2x256xf32>
    %c2_383 = arith.constant 2 : index
    %c1_384 = arith.constant 1 : index
    %808 = memref.load %arg8[%c2_383, %c1_384] : memref<4x4xf32, #tpu.memory_space<smem>>
    %c8_385 = arith.constant 8 : index
    %c1_386 = arith.constant 1 : index
    %809 = memref.load %arg7[%c8_385, %c1_386] : memref<16x4xf32, #tpu.memory_space<smem>>
    %810 = vector.broadcast %809 : f32 to vector<2x256xf32>
    %811 = arith.mulf %786, %810 : vector<2x256xf32>
    %812 = vector.broadcast %808 : f32 to vector<2x256xf32>
    %813 = arith.addf %812, %811 : vector<2x256xf32>
    %c9_387 = arith.constant 9 : index
    %c1_388 = arith.constant 1 : index
    %814 = memref.load %arg7[%c9_387, %c1_388] : memref<16x4xf32, #tpu.memory_space<smem>>
    %815 = vector.broadcast %814 : f32 to vector<2x256xf32>
    %816 = arith.mulf %787, %815 : vector<2x256xf32>
    %817 = arith.addf %813, %816 : vector<2x256xf32>
    %c10_389 = arith.constant 10 : index
    %c1_390 = arith.constant 1 : index
    %818 = memref.load %arg7[%c10_389, %c1_390] : memref<16x4xf32, #tpu.memory_space<smem>>
    %819 = vector.broadcast %818 : f32 to vector<2x256xf32>
    %820 = arith.mulf %788, %819 : vector<2x256xf32>
    %821 = arith.addf %817, %820 : vector<2x256xf32>
    %c11_391 = arith.constant 11 : index
    %c1_392 = arith.constant 1 : index
    %822 = memref.load %arg7[%c11_391, %c1_392] : memref<16x4xf32, #tpu.memory_space<smem>>
    %823 = vector.broadcast %822 : f32 to vector<2x256xf32>
    %824 = arith.mulf %789, %823 : vector<2x256xf32>
    %825 = arith.addf %821, %824 : vector<2x256xf32>
    %c2_393 = arith.constant 2 : index
    %c2_394 = arith.constant 2 : index
    %826 = memref.load %arg8[%c2_393, %c2_394] : memref<4x4xf32, #tpu.memory_space<smem>>
    %c8_395 = arith.constant 8 : index
    %c2_396 = arith.constant 2 : index
    %827 = memref.load %arg7[%c8_395, %c2_396] : memref<16x4xf32, #tpu.memory_space<smem>>
    %828 = vector.broadcast %827 : f32 to vector<2x256xf32>
    %829 = arith.mulf %786, %828 : vector<2x256xf32>
    %830 = vector.broadcast %826 : f32 to vector<2x256xf32>
    %831 = arith.addf %830, %829 : vector<2x256xf32>
    %c9_397 = arith.constant 9 : index
    %c2_398 = arith.constant 2 : index
    %832 = memref.load %arg7[%c9_397, %c2_398] : memref<16x4xf32, #tpu.memory_space<smem>>
    %833 = vector.broadcast %832 : f32 to vector<2x256xf32>
    %834 = arith.mulf %787, %833 : vector<2x256xf32>
    %835 = arith.addf %831, %834 : vector<2x256xf32>
    %c10_399 = arith.constant 10 : index
    %c2_400 = arith.constant 2 : index
    %836 = memref.load %arg7[%c10_399, %c2_400] : memref<16x4xf32, #tpu.memory_space<smem>>
    %837 = vector.broadcast %836 : f32 to vector<2x256xf32>
    %838 = arith.mulf %788, %837 : vector<2x256xf32>
    %839 = arith.addf %835, %838 : vector<2x256xf32>
    %c11_401 = arith.constant 11 : index
    %c2_402 = arith.constant 2 : index
    %840 = memref.load %arg7[%c11_401, %c2_402] : memref<16x4xf32, #tpu.memory_space<smem>>
    %841 = vector.broadcast %840 : f32 to vector<2x256xf32>
    %842 = arith.mulf %789, %841 : vector<2x256xf32>
    %843 = arith.addf %839, %842 : vector<2x256xf32>
    %c2_403 = arith.constant 2 : index
    %c3_404 = arith.constant 3 : index
    %844 = memref.load %arg8[%c2_403, %c3_404] : memref<4x4xf32, #tpu.memory_space<smem>>
    %c8_405 = arith.constant 8 : index
    %c3_406 = arith.constant 3 : index
    %845 = memref.load %arg7[%c8_405, %c3_406] : memref<16x4xf32, #tpu.memory_space<smem>>
    %846 = vector.broadcast %845 : f32 to vector<2x256xf32>
    %847 = arith.mulf %786, %846 : vector<2x256xf32>
    %848 = vector.broadcast %844 : f32 to vector<2x256xf32>
    %849 = arith.addf %848, %847 : vector<2x256xf32>
    %c9_407 = arith.constant 9 : index
    %c3_408 = arith.constant 3 : index
    %850 = memref.load %arg7[%c9_407, %c3_408] : memref<16x4xf32, #tpu.memory_space<smem>>
    %851 = vector.broadcast %850 : f32 to vector<2x256xf32>
    %852 = arith.mulf %787, %851 : vector<2x256xf32>
    %853 = arith.addf %849, %852 : vector<2x256xf32>
    %c10_409 = arith.constant 10 : index
    %c3_410 = arith.constant 3 : index
    %854 = memref.load %arg7[%c10_409, %c3_410] : memref<16x4xf32, #tpu.memory_space<smem>>
    %855 = vector.broadcast %854 : f32 to vector<2x256xf32>
    %856 = arith.mulf %788, %855 : vector<2x256xf32>
    %857 = arith.addf %853, %856 : vector<2x256xf32>
    %c11_411 = arith.constant 11 : index
    %c3_412 = arith.constant 3 : index
    %858 = memref.load %arg7[%c11_411, %c3_412] : memref<16x4xf32, #tpu.memory_space<smem>>
    %859 = vector.broadcast %858 : f32 to vector<2x256xf32>
    %860 = arith.mulf %789, %859 : vector<2x256xf32>
    %861 = arith.addf %857, %860 : vector<2x256xf32>
    %862 = vector.shape_cast %807 : vector<2x256xf32> to vector<2x1x256xf32>
    %863 = vector.shape_cast %825 : vector<2x256xf32> to vector<2x1x256xf32>
    %864 = vector.shape_cast %843 : vector<2x256xf32> to vector<2x1x256xf32>
    %865 = vector.shape_cast %861 : vector<2x256xf32> to vector<2x1x256xf32>
    %866 = tpu.concatenate %862, %863, %864, %865 in 1 : vector<2x1x256xf32>, vector<2x1x256xf32>, vector<2x1x256xf32>, vector<2x1x256xf32> -> vector<2x4x256xf32>
    %867 = vector.shape_cast %866 : vector<2x4x256xf32> to vector<8x256xf32>
    %868 = arith.addf %317, %867 : vector<8x256xf32>
    %869 = vector.shape_cast %868 : vector<8x256xf32> to vector<2x4x256xf32>
    %870 = vector.extract_strided_slice %869 {offsets = [0, 0, 0], sizes = [2, 1, 256], strides = [1, 1, 1]} : vector<2x4x256xf32> to vector<2x1x256xf32>
    %871 = vector.shape_cast %870 : vector<2x1x256xf32> to vector<2x256xf32>
    %872 = vector.extract_strided_slice %869 {offsets = [0, 1, 0], sizes = [2, 1, 256], strides = [1, 1, 1]} : vector<2x4x256xf32> to vector<2x1x256xf32>
    %873 = vector.shape_cast %872 : vector<2x1x256xf32> to vector<2x256xf32>
    %874 = vector.extract_strided_slice %869 {offsets = [0, 2, 0], sizes = [2, 1, 256], strides = [1, 1, 1]} : vector<2x4x256xf32> to vector<2x1x256xf32>
    %875 = vector.shape_cast %874 : vector<2x1x256xf32> to vector<2x256xf32>
    %876 = vector.extract_strided_slice %869 {offsets = [0, 3, 0], sizes = [2, 1, 256], strides = [1, 1, 1]} : vector<2x4x256xf32> to vector<2x1x256xf32>
    %877 = vector.shape_cast %876 : vector<2x1x256xf32> to vector<2x256xf32>
    %c3_413 = arith.constant 3 : index
    %c0_414 = arith.constant 0 : index
    %878 = memref.load %arg8[%c3_413, %c0_414] : memref<4x4xf32, #tpu.memory_space<smem>>
    %c12_415 = arith.constant 12 : index
    %c0_416 = arith.constant 0 : index
    %879 = memref.load %arg7[%c12_415, %c0_416] : memref<16x4xf32, #tpu.memory_space<smem>>
    %880 = vector.broadcast %879 : f32 to vector<2x256xf32>
    %881 = arith.mulf %871, %880 : vector<2x256xf32>
    %882 = vector.broadcast %878 : f32 to vector<2x256xf32>
    %883 = arith.addf %882, %881 : vector<2x256xf32>
    %c13_417 = arith.constant 13 : index
    %c0_418 = arith.constant 0 : index
    %884 = memref.load %arg7[%c13_417, %c0_418] : memref<16x4xf32, #tpu.memory_space<smem>>
    %885 = vector.broadcast %884 : f32 to vector<2x256xf32>
    %886 = arith.mulf %873, %885 : vector<2x256xf32>
    %887 = arith.addf %883, %886 : vector<2x256xf32>
    %c14_419 = arith.constant 14 : index
    %c0_420 = arith.constant 0 : index
    %888 = memref.load %arg7[%c14_419, %c0_420] : memref<16x4xf32, #tpu.memory_space<smem>>
    %889 = vector.broadcast %888 : f32 to vector<2x256xf32>
    %890 = arith.mulf %875, %889 : vector<2x256xf32>
    %891 = arith.addf %887, %890 : vector<2x256xf32>
    %c15_421 = arith.constant 15 : index
    %c0_422 = arith.constant 0 : index
    %892 = memref.load %arg7[%c15_421, %c0_422] : memref<16x4xf32, #tpu.memory_space<smem>>
    %893 = vector.broadcast %892 : f32 to vector<2x256xf32>
    %894 = arith.mulf %877, %893 : vector<2x256xf32>
    %895 = arith.addf %891, %894 : vector<2x256xf32>
    %c3_423 = arith.constant 3 : index
    %c1_424 = arith.constant 1 : index
    %896 = memref.load %arg8[%c3_423, %c1_424] : memref<4x4xf32, #tpu.memory_space<smem>>
    %c12_425 = arith.constant 12 : index
    %c1_426 = arith.constant 1 : index
    %897 = memref.load %arg7[%c12_425, %c1_426] : memref<16x4xf32, #tpu.memory_space<smem>>
    %898 = vector.broadcast %897 : f32 to vector<2x256xf32>
    %899 = arith.mulf %871, %898 : vector<2x256xf32>
    %900 = vector.broadcast %896 : f32 to vector<2x256xf32>
    %901 = arith.addf %900, %899 : vector<2x256xf32>
    %c13_427 = arith.constant 13 : index
    %c1_428 = arith.constant 1 : index
    %902 = memref.load %arg7[%c13_427, %c1_428] : memref<16x4xf32, #tpu.memory_space<smem>>
    %903 = vector.broadcast %902 : f32 to vector<2x256xf32>
    %904 = arith.mulf %873, %903 : vector<2x256xf32>
    %905 = arith.addf %901, %904 : vector<2x256xf32>
    %c14_429 = arith.constant 14 : index
    %c1_430 = arith.constant 1 : index
    %906 = memref.load %arg7[%c14_429, %c1_430] : memref<16x4xf32, #tpu.memory_space<smem>>
    %907 = vector.broadcast %906 : f32 to vector<2x256xf32>
    %908 = arith.mulf %875, %907 : vector<2x256xf32>
    %909 = arith.addf %905, %908 : vector<2x256xf32>
    %c15_431 = arith.constant 15 : index
    %c1_432 = arith.constant 1 : index
    %910 = memref.load %arg7[%c15_431, %c1_432] : memref<16x4xf32, #tpu.memory_space<smem>>
    %911 = vector.broadcast %910 : f32 to vector<2x256xf32>
    %912 = arith.mulf %877, %911 : vector<2x256xf32>
    %913 = arith.addf %909, %912 : vector<2x256xf32>
    %c3_433 = arith.constant 3 : index
    %c2_434 = arith.constant 2 : index
    %914 = memref.load %arg8[%c3_433, %c2_434] : memref<4x4xf32, #tpu.memory_space<smem>>
    %c12_435 = arith.constant 12 : index
    %c2_436 = arith.constant 2 : index
    %915 = memref.load %arg7[%c12_435, %c2_436] : memref<16x4xf32, #tpu.memory_space<smem>>
    %916 = vector.broadcast %915 : f32 to vector<2x256xf32>
    %917 = arith.mulf %871, %916 : vector<2x256xf32>
    %918 = vector.broadcast %914 : f32 to vector<2x256xf32>
    %919 = arith.addf %918, %917 : vector<2x256xf32>
    %c13_437 = arith.constant 13 : index
    %c2_438 = arith.constant 2 : index
    %920 = memref.load %arg7[%c13_437, %c2_438] : memref<16x4xf32, #tpu.memory_space<smem>>
    %921 = vector.broadcast %920 : f32 to vector<2x256xf32>
    %922 = arith.mulf %873, %921 : vector<2x256xf32>
    %923 = arith.addf %919, %922 : vector<2x256xf32>
    %c14_439 = arith.constant 14 : index
    %c2_440 = arith.constant 2 : index
    %924 = memref.load %arg7[%c14_439, %c2_440] : memref<16x4xf32, #tpu.memory_space<smem>>
    %925 = vector.broadcast %924 : f32 to vector<2x256xf32>
    %926 = arith.mulf %875, %925 : vector<2x256xf32>
    %927 = arith.addf %923, %926 : vector<2x256xf32>
    %c15_441 = arith.constant 15 : index
    %c2_442 = arith.constant 2 : index
    %928 = memref.load %arg7[%c15_441, %c2_442] : memref<16x4xf32, #tpu.memory_space<smem>>
    %929 = vector.broadcast %928 : f32 to vector<2x256xf32>
    %930 = arith.mulf %877, %929 : vector<2x256xf32>
    %931 = arith.addf %927, %930 : vector<2x256xf32>
    %c3_443 = arith.constant 3 : index
    %c3_444 = arith.constant 3 : index
    %932 = memref.load %arg8[%c3_443, %c3_444] : memref<4x4xf32, #tpu.memory_space<smem>>
    %c12_445 = arith.constant 12 : index
    %c3_446 = arith.constant 3 : index
    %933 = memref.load %arg7[%c12_445, %c3_446] : memref<16x4xf32, #tpu.memory_space<smem>>
    %934 = vector.broadcast %933 : f32 to vector<2x256xf32>
    %935 = arith.mulf %871, %934 : vector<2x256xf32>
    %936 = vector.broadcast %932 : f32 to vector<2x256xf32>
    %937 = arith.addf %936, %935 : vector<2x256xf32>
    %c13_447 = arith.constant 13 : index
    %c3_448 = arith.constant 3 : index
    %938 = memref.load %arg7[%c13_447, %c3_448] : memref<16x4xf32, #tpu.memory_space<smem>>
    %939 = vector.broadcast %938 : f32 to vector<2x256xf32>
    %940 = arith.mulf %873, %939 : vector<2x256xf32>
    %941 = arith.addf %937, %940 : vector<2x256xf32>
    %c14_449 = arith.constant 14 : index
    %c3_450 = arith.constant 3 : index
    %942 = memref.load %arg7[%c14_449, %c3_450] : memref<16x4xf32, #tpu.memory_space<smem>>
    %943 = vector.broadcast %942 : f32 to vector<2x256xf32>
    %944 = arith.mulf %875, %943 : vector<2x256xf32>
    %945 = arith.addf %941, %944 : vector<2x256xf32>
    %c15_451 = arith.constant 15 : index
    %c3_452 = arith.constant 3 : index
    %946 = memref.load %arg7[%c15_451, %c3_452] : memref<16x4xf32, #tpu.memory_space<smem>>
    %947 = vector.broadcast %946 : f32 to vector<2x256xf32>
    %948 = arith.mulf %877, %947 : vector<2x256xf32>
    %949 = arith.addf %945, %948 : vector<2x256xf32>
    %950 = vector.shape_cast %895 : vector<2x256xf32> to vector<2x1x256xf32>
    %951 = vector.shape_cast %913 : vector<2x256xf32> to vector<2x1x256xf32>
    %952 = vector.shape_cast %931 : vector<2x256xf32> to vector<2x1x256xf32>
    %953 = vector.shape_cast %949 : vector<2x256xf32> to vector<2x1x256xf32>
    %954 = tpu.concatenate %950, %951, %952, %953 in 1 : vector<2x1x256xf32>, vector<2x1x256xf32>, vector<2x1x256xf32>, vector<2x1x256xf32> -> vector<2x4x256xf32>
    %955 = vector.shape_cast %954 : vector<2x4x256xf32> to vector<8x256xf32>
    %956 = tpu.concatenate %0, %955, %0 in 1 : vector<8x51xf32>, vector<8x256xf32>, vector<8x51xf32> -> vector<8x358xf32>
    %c0_453 = arith.constant 0 : index
    %c0_454 = arith.constant 0 : index
    %957 = vector.load %arg6[%c0_453, %c0_454] : memref<8x256xf32, #tpu.memory_space<vmem>>, vector<8x256xf32>
    %958 = vector.extract_strided_slice %956 {offsets = [0, 0], sizes = [8, 256], strides = [1, 1]} : vector<8x358xf32> to vector<8x256xf32>
    %c0_455 = arith.constant 0 : index
    %c0_456 = arith.constant 0 : index
    %c0_457 = arith.constant 0 : index
    %959 = vector.load %arg5[%c0_455, %c0_456, %c0_457] : memref<49x8x256xf32, #tpu.memory_space<vmem>>, vector<1x8x256xf32>
    %960 = vector.shape_cast %959 : vector<1x8x256xf32> to vector<8x256xf32>
    %961 = arith.mulf %958, %960 : vector<8x256xf32>
    %962 = arith.addf %957, %961 : vector<8x256xf32>
    %963 = vector.extract_strided_slice %956 {offsets = [0, 1], sizes = [8, 256], strides = [1, 1]} : vector<8x358xf32> to vector<8x256xf32>
    %c1_458 = arith.constant 1 : index
    %c0_459 = arith.constant 0 : index
    %c0_460 = arith.constant 0 : index
    %964 = vector.load %arg5[%c1_458, %c0_459, %c0_460] : memref<49x8x256xf32, #tpu.memory_space<vmem>>, vector<1x8x256xf32>
    %965 = vector.shape_cast %964 : vector<1x8x256xf32> to vector<8x256xf32>
    %966 = arith.mulf %963, %965 : vector<8x256xf32>
    %967 = arith.addf %962, %966 : vector<8x256xf32>
    %968 = vector.extract_strided_slice %956 {offsets = [0, 2], sizes = [8, 256], strides = [1, 1]} : vector<8x358xf32> to vector<8x256xf32>
    %c2_461 = arith.constant 2 : index
    %c0_462 = arith.constant 0 : index
    %c0_463 = arith.constant 0 : index
    %969 = vector.load %arg5[%c2_461, %c0_462, %c0_463] : memref<49x8x256xf32, #tpu.memory_space<vmem>>, vector<1x8x256xf32>
    %970 = vector.shape_cast %969 : vector<1x8x256xf32> to vector<8x256xf32>
    %971 = arith.mulf %968, %970 : vector<8x256xf32>
    %972 = arith.addf %967, %971 : vector<8x256xf32>
    %973 = vector.extract_strided_slice %956 {offsets = [0, 3], sizes = [8, 256], strides = [1, 1]} : vector<8x358xf32> to vector<8x256xf32>
    %c3_464 = arith.constant 3 : index
    %c0_465 = arith.constant 0 : index
    %c0_466 = arith.constant 0 : index
    %974 = vector.load %arg5[%c3_464, %c0_465, %c0_466] : memref<49x8x256xf32, #tpu.memory_space<vmem>>, vector<1x8x256xf32>
    %975 = vector.shape_cast %974 : vector<1x8x256xf32> to vector<8x256xf32>
    %976 = arith.mulf %973, %975 : vector<8x256xf32>
    %977 = arith.addf %972, %976 : vector<8x256xf32>
    %978 = vector.extract_strided_slice %956 {offsets = [0, 4], sizes = [8, 256], strides = [1, 1]} : vector<8x358xf32> to vector<8x256xf32>
    %c4_467 = arith.constant 4 : index
    %c0_468 = arith.constant 0 : index
    %c0_469 = arith.constant 0 : index
    %979 = vector.load %arg5[%c4_467, %c0_468, %c0_469] : memref<49x8x256xf32, #tpu.memory_space<vmem>>, vector<1x8x256xf32>
    %980 = vector.shape_cast %979 : vector<1x8x256xf32> to vector<8x256xf32>
    %981 = arith.mulf %978, %980 : vector<8x256xf32>
    %982 = arith.addf %977, %981 : vector<8x256xf32>
    %983 = vector.extract_strided_slice %956 {offsets = [0, 5], sizes = [8, 256], strides = [1, 1]} : vector<8x358xf32> to vector<8x256xf32>
    %c5_470 = arith.constant 5 : index
    %c0_471 = arith.constant 0 : index
    %c0_472 = arith.constant 0 : index
    %984 = vector.load %arg5[%c5_470, %c0_471, %c0_472] : memref<49x8x256xf32, #tpu.memory_space<vmem>>, vector<1x8x256xf32>
    %985 = vector.shape_cast %984 : vector<1x8x256xf32> to vector<8x256xf32>
    %986 = arith.mulf %983, %985 : vector<8x256xf32>
    %987 = arith.addf %982, %986 : vector<8x256xf32>
    %988 = vector.extract_strided_slice %956 {offsets = [0, 6], sizes = [8, 256], strides = [1, 1]} : vector<8x358xf32> to vector<8x256xf32>
    %c6_473 = arith.constant 6 : index
    %c0_474 = arith.constant 0 : index
    %c0_475 = arith.constant 0 : index
    %989 = vector.load %arg5[%c6_473, %c0_474, %c0_475] : memref<49x8x256xf32, #tpu.memory_space<vmem>>, vector<1x8x256xf32>
    %990 = vector.shape_cast %989 : vector<1x8x256xf32> to vector<8x256xf32>
    %991 = arith.mulf %988, %990 : vector<8x256xf32>
    %992 = arith.addf %987, %991 : vector<8x256xf32>
    %993 = vector.extract_strided_slice %956 {offsets = [0, 16], sizes = [8, 256], strides = [1, 1]} : vector<8x358xf32> to vector<8x256xf32>
    %c7_476 = arith.constant 7 : index
    %c0_477 = arith.constant 0 : index
    %c0_478 = arith.constant 0 : index
    %994 = vector.load %arg5[%c7_476, %c0_477, %c0_478] : memref<49x8x256xf32, #tpu.memory_space<vmem>>, vector<1x8x256xf32>
    %995 = vector.shape_cast %994 : vector<1x8x256xf32> to vector<8x256xf32>
    %996 = arith.mulf %993, %995 : vector<8x256xf32>
    %997 = arith.addf %992, %996 : vector<8x256xf32>
    %998 = vector.extract_strided_slice %956 {offsets = [0, 17], sizes = [8, 256], strides = [1, 1]} : vector<8x358xf32> to vector<8x256xf32>
    %c8_479 = arith.constant 8 : index
    %c0_480 = arith.constant 0 : index
    %c0_481 = arith.constant 0 : index
    %999 = vector.load %arg5[%c8_479, %c0_480, %c0_481] : memref<49x8x256xf32, #tpu.memory_space<vmem>>, vector<1x8x256xf32>
    %1000 = vector.shape_cast %999 : vector<1x8x256xf32> to vector<8x256xf32>
    %1001 = arith.mulf %998, %1000 : vector<8x256xf32>
    %1002 = arith.addf %997, %1001 : vector<8x256xf32>
    %1003 = vector.extract_strided_slice %956 {offsets = [0, 18], sizes = [8, 256], strides = [1, 1]} : vector<8x358xf32> to vector<8x256xf32>
    %c9_482 = arith.constant 9 : index
    %c0_483 = arith.constant 0 : index
    %c0_484 = arith.constant 0 : index
    %1004 = vector.load %arg5[%c9_482, %c0_483, %c0_484] : memref<49x8x256xf32, #tpu.memory_space<vmem>>, vector<1x8x256xf32>
    %1005 = vector.shape_cast %1004 : vector<1x8x256xf32> to vector<8x256xf32>
    %1006 = arith.mulf %1003, %1005 : vector<8x256xf32>
    %1007 = arith.addf %1002, %1006 : vector<8x256xf32>
    %1008 = vector.extract_strided_slice %956 {offsets = [0, 19], sizes = [8, 256], strides = [1, 1]} : vector<8x358xf32> to vector<8x256xf32>
    %c10_485 = arith.constant 10 : index
    %c0_486 = arith.constant 0 : index
    %c0_487 = arith.constant 0 : index
    %1009 = vector.load %arg5[%c10_485, %c0_486, %c0_487] : memref<49x8x256xf32, #tpu.memory_space<vmem>>, vector<1x8x256xf32>
    %1010 = vector.shape_cast %1009 : vector<1x8x256xf32> to vector<8x256xf32>
    %1011 = arith.mulf %1008, %1010 : vector<8x256xf32>
    %1012 = arith.addf %1007, %1011 : vector<8x256xf32>
    %1013 = vector.extract_strided_slice %956 {offsets = [0, 20], sizes = [8, 256], strides = [1, 1]} : vector<8x358xf32> to vector<8x256xf32>
    %c11_488 = arith.constant 11 : index
    %c0_489 = arith.constant 0 : index
    %c0_490 = arith.constant 0 : index
    %1014 = vector.load %arg5[%c11_488, %c0_489, %c0_490] : memref<49x8x256xf32, #tpu.memory_space<vmem>>, vector<1x8x256xf32>
    %1015 = vector.shape_cast %1014 : vector<1x8x256xf32> to vector<8x256xf32>
    %1016 = arith.mulf %1013, %1015 : vector<8x256xf32>
    %1017 = arith.addf %1012, %1016 : vector<8x256xf32>
    %1018 = vector.extract_strided_slice %956 {offsets = [0, 21], sizes = [8, 256], strides = [1, 1]} : vector<8x358xf32> to vector<8x256xf32>
    %c12_491 = arith.constant 12 : index
    %c0_492 = arith.constant 0 : index
    %c0_493 = arith.constant 0 : index
    %1019 = vector.load %arg5[%c12_491, %c0_492, %c0_493] : memref<49x8x256xf32, #tpu.memory_space<vmem>>, vector<1x8x256xf32>
    %1020 = vector.shape_cast %1019 : vector<1x8x256xf32> to vector<8x256xf32>
    %1021 = arith.mulf %1018, %1020 : vector<8x256xf32>
    %1022 = arith.addf %1017, %1021 : vector<8x256xf32>
    %1023 = vector.extract_strided_slice %956 {offsets = [0, 22], sizes = [8, 256], strides = [1, 1]} : vector<8x358xf32> to vector<8x256xf32>
    %c13_494 = arith.constant 13 : index
    %c0_495 = arith.constant 0 : index
    %c0_496 = arith.constant 0 : index
    %1024 = vector.load %arg5[%c13_494, %c0_495, %c0_496] : memref<49x8x256xf32, #tpu.memory_space<vmem>>, vector<1x8x256xf32>
    %1025 = vector.shape_cast %1024 : vector<1x8x256xf32> to vector<8x256xf32>
    %1026 = arith.mulf %1023, %1025 : vector<8x256xf32>
    %1027 = arith.addf %1022, %1026 : vector<8x256xf32>
    %1028 = vector.extract_strided_slice %956 {offsets = [0, 32], sizes = [8, 256], strides = [1, 1]} : vector<8x358xf32> to vector<8x256xf32>
    %c14_497 = arith.constant 14 : index
    %c0_498 = arith.constant 0 : index
    %c0_499 = arith.constant 0 : index
    %1029 = vector.load %arg5[%c14_497, %c0_498, %c0_499] : memref<49x8x256xf32, #tpu.memory_space<vmem>>, vector<1x8x256xf32>
    %1030 = vector.shape_cast %1029 : vector<1x8x256xf32> to vector<8x256xf32>
    %1031 = arith.mulf %1028, %1030 : vector<8x256xf32>
    %1032 = arith.addf %1027, %1031 : vector<8x256xf32>
    %1033 = vector.extract_strided_slice %956 {offsets = [0, 33], sizes = [8, 256], strides = [1, 1]} : vector<8x358xf32> to vector<8x256xf32>
    %c15_500 = arith.constant 15 : index
    %c0_501 = arith.constant 0 : index
    %c0_502 = arith.constant 0 : index
    %1034 = vector.load %arg5[%c15_500, %c0_501, %c0_502] : memref<49x8x256xf32, #tpu.memory_space<vmem>>, vector<1x8x256xf32>
    %1035 = vector.shape_cast %1034 : vector<1x8x256xf32> to vector<8x256xf32>
    %1036 = arith.mulf %1033, %1035 : vector<8x256xf32>
    %1037 = arith.addf %1032, %1036 : vector<8x256xf32>
    %1038 = vector.extract_strided_slice %956 {offsets = [0, 34], sizes = [8, 256], strides = [1, 1]} : vector<8x358xf32> to vector<8x256xf32>
    %c16_503 = arith.constant 16 : index
    %c0_504 = arith.constant 0 : index
    %c0_505 = arith.constant 0 : index
    %1039 = vector.load %arg5[%c16_503, %c0_504, %c0_505] : memref<49x8x256xf32, #tpu.memory_space<vmem>>, vector<1x8x256xf32>
    %1040 = vector.shape_cast %1039 : vector<1x8x256xf32> to vector<8x256xf32>
    %1041 = arith.mulf %1038, %1040 : vector<8x256xf32>
    %1042 = arith.addf %1037, %1041 : vector<8x256xf32>
    %1043 = vector.extract_strided_slice %956 {offsets = [0, 35], sizes = [8, 256], strides = [1, 1]} : vector<8x358xf32> to vector<8x256xf32>
    %c17_506 = arith.constant 17 : index
    %c0_507 = arith.constant 0 : index
    %c0_508 = arith.constant 0 : index
    %1044 = vector.load %arg5[%c17_506, %c0_507, %c0_508] : memref<49x8x256xf32, #tpu.memory_space<vmem>>, vector<1x8x256xf32>
    %1045 = vector.shape_cast %1044 : vector<1x8x256xf32> to vector<8x256xf32>
    %1046 = arith.mulf %1043, %1045 : vector<8x256xf32>
    %1047 = arith.addf %1042, %1046 : vector<8x256xf32>
    %1048 = vector.extract_strided_slice %956 {offsets = [0, 36], sizes = [8, 256], strides = [1, 1]} : vector<8x358xf32> to vector<8x256xf32>
    %c18_509 = arith.constant 18 : index
    %c0_510 = arith.constant 0 : index
    %c0_511 = arith.constant 0 : index
    %1049 = vector.load %arg5[%c18_509, %c0_510, %c0_511] : memref<49x8x256xf32, #tpu.memory_space<vmem>>, vector<1x8x256xf32>
    %1050 = vector.shape_cast %1049 : vector<1x8x256xf32> to vector<8x256xf32>
    %1051 = arith.mulf %1048, %1050 : vector<8x256xf32>
    %1052 = arith.addf %1047, %1051 : vector<8x256xf32>
    %1053 = vector.extract_strided_slice %956 {offsets = [0, 37], sizes = [8, 256], strides = [1, 1]} : vector<8x358xf32> to vector<8x256xf32>
    %c19_512 = arith.constant 19 : index
    %c0_513 = arith.constant 0 : index
    %c0_514 = arith.constant 0 : index
    %1054 = vector.load %arg5[%c19_512, %c0_513, %c0_514] : memref<49x8x256xf32, #tpu.memory_space<vmem>>, vector<1x8x256xf32>
    %1055 = vector.shape_cast %1054 : vector<1x8x256xf32> to vector<8x256xf32>
    %1056 = arith.mulf %1053, %1055 : vector<8x256xf32>
    %1057 = arith.addf %1052, %1056 : vector<8x256xf32>
    %1058 = vector.extract_strided_slice %956 {offsets = [0, 38], sizes = [8, 256], strides = [1, 1]} : vector<8x358xf32> to vector<8x256xf32>
    %c20_515 = arith.constant 20 : index
    %c0_516 = arith.constant 0 : index
    %c0_517 = arith.constant 0 : index
    %1059 = vector.load %arg5[%c20_515, %c0_516, %c0_517] : memref<49x8x256xf32, #tpu.memory_space<vmem>>, vector<1x8x256xf32>
    %1060 = vector.shape_cast %1059 : vector<1x8x256xf32> to vector<8x256xf32>
    %1061 = arith.mulf %1058, %1060 : vector<8x256xf32>
    %1062 = arith.addf %1057, %1061 : vector<8x256xf32>
    %1063 = vector.extract_strided_slice %956 {offsets = [0, 48], sizes = [8, 256], strides = [1, 1]} : vector<8x358xf32> to vector<8x256xf32>
    %c21_518 = arith.constant 21 : index
    %c0_519 = arith.constant 0 : index
    %c0_520 = arith.constant 0 : index
    %1064 = vector.load %arg5[%c21_518, %c0_519, %c0_520] : memref<49x8x256xf32, #tpu.memory_space<vmem>>, vector<1x8x256xf32>
    %1065 = vector.shape_cast %1064 : vector<1x8x256xf32> to vector<8x256xf32>
    %1066 = arith.mulf %1063, %1065 : vector<8x256xf32>
    %1067 = arith.addf %1062, %1066 : vector<8x256xf32>
    %1068 = vector.extract_strided_slice %956 {offsets = [0, 49], sizes = [8, 256], strides = [1, 1]} : vector<8x358xf32> to vector<8x256xf32>
    %c22_521 = arith.constant 22 : index
    %c0_522 = arith.constant 0 : index
    %c0_523 = arith.constant 0 : index
    %1069 = vector.load %arg5[%c22_521, %c0_522, %c0_523] : memref<49x8x256xf32, #tpu.memory_space<vmem>>, vector<1x8x256xf32>
    %1070 = vector.shape_cast %1069 : vector<1x8x256xf32> to vector<8x256xf32>
    %1071 = arith.mulf %1068, %1070 : vector<8x256xf32>
    %1072 = arith.addf %1067, %1071 : vector<8x256xf32>
    %1073 = vector.extract_strided_slice %956 {offsets = [0, 50], sizes = [8, 256], strides = [1, 1]} : vector<8x358xf32> to vector<8x256xf32>
    %c23_524 = arith.constant 23 : index
    %c0_525 = arith.constant 0 : index
    %c0_526 = arith.constant 0 : index
    %1074 = vector.load %arg5[%c23_524, %c0_525, %c0_526] : memref<49x8x256xf32, #tpu.memory_space<vmem>>, vector<1x8x256xf32>
    %1075 = vector.shape_cast %1074 : vector<1x8x256xf32> to vector<8x256xf32>
    %1076 = arith.mulf %1073, %1075 : vector<8x256xf32>
    %1077 = arith.addf %1072, %1076 : vector<8x256xf32>
    %1078 = vector.extract_strided_slice %956 {offsets = [0, 51], sizes = [8, 256], strides = [1, 1]} : vector<8x358xf32> to vector<8x256xf32>
    %c24_527 = arith.constant 24 : index
    %c0_528 = arith.constant 0 : index
    %c0_529 = arith.constant 0 : index
    %1079 = vector.load %arg5[%c24_527, %c0_528, %c0_529] : memref<49x8x256xf32, #tpu.memory_space<vmem>>, vector<1x8x256xf32>
    %1080 = vector.shape_cast %1079 : vector<1x8x256xf32> to vector<8x256xf32>
    %1081 = arith.mulf %1078, %1080 : vector<8x256xf32>
    %1082 = arith.addf %1077, %1081 : vector<8x256xf32>
    %1083 = vector.extract_strided_slice %956 {offsets = [0, 52], sizes = [8, 256], strides = [1, 1]} : vector<8x358xf32> to vector<8x256xf32>
    %c25_530 = arith.constant 25 : index
    %c0_531 = arith.constant 0 : index
    %c0_532 = arith.constant 0 : index
    %1084 = vector.load %arg5[%c25_530, %c0_531, %c0_532] : memref<49x8x256xf32, #tpu.memory_space<vmem>>, vector<1x8x256xf32>
    %1085 = vector.shape_cast %1084 : vector<1x8x256xf32> to vector<8x256xf32>
    %1086 = arith.mulf %1083, %1085 : vector<8x256xf32>
    %1087 = arith.addf %1082, %1086 : vector<8x256xf32>
    %1088 = vector.extract_strided_slice %956 {offsets = [0, 53], sizes = [8, 256], strides = [1, 1]} : vector<8x358xf32> to vector<8x256xf32>
    %c26_533 = arith.constant 26 : index
    %c0_534 = arith.constant 0 : index
    %c0_535 = arith.constant 0 : index
    %1089 = vector.load %arg5[%c26_533, %c0_534, %c0_535] : memref<49x8x256xf32, #tpu.memory_space<vmem>>, vector<1x8x256xf32>
    %1090 = vector.shape_cast %1089 : vector<1x8x256xf32> to vector<8x256xf32>
    %1091 = arith.mulf %1088, %1090 : vector<8x256xf32>
    %1092 = arith.addf %1087, %1091 : vector<8x256xf32>
    %1093 = vector.extract_strided_slice %956 {offsets = [0, 54], sizes = [8, 256], strides = [1, 1]} : vector<8x358xf32> to vector<8x256xf32>
    %c27_536 = arith.constant 27 : index
    %c0_537 = arith.constant 0 : index
    %c0_538 = arith.constant 0 : index
    %1094 = vector.load %arg5[%c27_536, %c0_537, %c0_538] : memref<49x8x256xf32, #tpu.memory_space<vmem>>, vector<1x8x256xf32>
    %1095 = vector.shape_cast %1094 : vector<1x8x256xf32> to vector<8x256xf32>
    %1096 = arith.mulf %1093, %1095 : vector<8x256xf32>
    %1097 = arith.addf %1092, %1096 : vector<8x256xf32>
    %1098 = vector.extract_strided_slice %956 {offsets = [0, 64], sizes = [8, 256], strides = [1, 1]} : vector<8x358xf32> to vector<8x256xf32>
    %c28_539 = arith.constant 28 : index
    %c0_540 = arith.constant 0 : index
    %c0_541 = arith.constant 0 : index
    %1099 = vector.load %arg5[%c28_539, %c0_540, %c0_541] : memref<49x8x256xf32, #tpu.memory_space<vmem>>, vector<1x8x256xf32>
    %1100 = vector.shape_cast %1099 : vector<1x8x256xf32> to vector<8x256xf32>
    %1101 = arith.mulf %1098, %1100 : vector<8x256xf32>
    %1102 = arith.addf %1097, %1101 : vector<8x256xf32>
    %1103 = vector.extract_strided_slice %956 {offsets = [0, 65], sizes = [8, 256], strides = [1, 1]} : vector<8x358xf32> to vector<8x256xf32>
    %c29_542 = arith.constant 29 : index
    %c0_543 = arith.constant 0 : index
    %c0_544 = arith.constant 0 : index
    %1104 = vector.load %arg5[%c29_542, %c0_543, %c0_544] : memref<49x8x256xf32, #tpu.memory_space<vmem>>, vector<1x8x256xf32>
    %1105 = vector.shape_cast %1104 : vector<1x8x256xf32> to vector<8x256xf32>
    %1106 = arith.mulf %1103, %1105 : vector<8x256xf32>
    %1107 = arith.addf %1102, %1106 : vector<8x256xf32>
    %1108 = vector.extract_strided_slice %956 {offsets = [0, 66], sizes = [8, 256], strides = [1, 1]} : vector<8x358xf32> to vector<8x256xf32>
    %c30_545 = arith.constant 30 : index
    %c0_546 = arith.constant 0 : index
    %c0_547 = arith.constant 0 : index
    %1109 = vector.load %arg5[%c30_545, %c0_546, %c0_547] : memref<49x8x256xf32, #tpu.memory_space<vmem>>, vector<1x8x256xf32>
    %1110 = vector.shape_cast %1109 : vector<1x8x256xf32> to vector<8x256xf32>
    %1111 = arith.mulf %1108, %1110 : vector<8x256xf32>
    %1112 = arith.addf %1107, %1111 : vector<8x256xf32>
    %1113 = vector.extract_strided_slice %956 {offsets = [0, 67], sizes = [8, 256], strides = [1, 1]} : vector<8x358xf32> to vector<8x256xf32>
    %c31_548 = arith.constant 31 : index
    %c0_549 = arith.constant 0 : index
    %c0_550 = arith.constant 0 : index
    %1114 = vector.load %arg5[%c31_548, %c0_549, %c0_550] : memref<49x8x256xf32, #tpu.memory_space<vmem>>, vector<1x8x256xf32>
    %1115 = vector.shape_cast %1114 : vector<1x8x256xf32> to vector<8x256xf32>
    %1116 = arith.mulf %1113, %1115 : vector<8x256xf32>
    %1117 = arith.addf %1112, %1116 : vector<8x256xf32>
    %1118 = vector.extract_strided_slice %956 {offsets = [0, 68], sizes = [8, 256], strides = [1, 1]} : vector<8x358xf32> to vector<8x256xf32>
    %c32_551 = arith.constant 32 : index
    %c0_552 = arith.constant 0 : index
    %c0_553 = arith.constant 0 : index
    %1119 = vector.load %arg5[%c32_551, %c0_552, %c0_553] : memref<49x8x256xf32, #tpu.memory_space<vmem>>, vector<1x8x256xf32>
    %1120 = vector.shape_cast %1119 : vector<1x8x256xf32> to vector<8x256xf32>
    %1121 = arith.mulf %1118, %1120 : vector<8x256xf32>
    %1122 = arith.addf %1117, %1121 : vector<8x256xf32>
    %1123 = vector.extract_strided_slice %956 {offsets = [0, 69], sizes = [8, 256], strides = [1, 1]} : vector<8x358xf32> to vector<8x256xf32>
    %c33_554 = arith.constant 33 : index
    %c0_555 = arith.constant 0 : index
    %c0_556 = arith.constant 0 : index
    %1124 = vector.load %arg5[%c33_554, %c0_555, %c0_556] : memref<49x8x256xf32, #tpu.memory_space<vmem>>, vector<1x8x256xf32>
    %1125 = vector.shape_cast %1124 : vector<1x8x256xf32> to vector<8x256xf32>
    %1126 = arith.mulf %1123, %1125 : vector<8x256xf32>
    %1127 = arith.addf %1122, %1126 : vector<8x256xf32>
    %1128 = vector.extract_strided_slice %956 {offsets = [0, 70], sizes = [8, 256], strides = [1, 1]} : vector<8x358xf32> to vector<8x256xf32>
    %c34_557 = arith.constant 34 : index
    %c0_558 = arith.constant 0 : index
    %c0_559 = arith.constant 0 : index
    %1129 = vector.load %arg5[%c34_557, %c0_558, %c0_559] : memref<49x8x256xf32, #tpu.memory_space<vmem>>, vector<1x8x256xf32>
    %1130 = vector.shape_cast %1129 : vector<1x8x256xf32> to vector<8x256xf32>
    %1131 = arith.mulf %1128, %1130 : vector<8x256xf32>
    %1132 = arith.addf %1127, %1131 : vector<8x256xf32>
    %1133 = vector.extract_strided_slice %956 {offsets = [0, 80], sizes = [8, 256], strides = [1, 1]} : vector<8x358xf32> to vector<8x256xf32>
    %c35_560 = arith.constant 35 : index
    %c0_561 = arith.constant 0 : index
    %c0_562 = arith.constant 0 : index
    %1134 = vector.load %arg5[%c35_560, %c0_561, %c0_562] : memref<49x8x256xf32, #tpu.memory_space<vmem>>, vector<1x8x256xf32>
    %1135 = vector.shape_cast %1134 : vector<1x8x256xf32> to vector<8x256xf32>
    %1136 = arith.mulf %1133, %1135 : vector<8x256xf32>
    %1137 = arith.addf %1132, %1136 : vector<8x256xf32>
    %1138 = vector.extract_strided_slice %956 {offsets = [0, 81], sizes = [8, 256], strides = [1, 1]} : vector<8x358xf32> to vector<8x256xf32>
    %c36_563 = arith.constant 36 : index
    %c0_564 = arith.constant 0 : index
    %c0_565 = arith.constant 0 : index
    %1139 = vector.load %arg5[%c36_563, %c0_564, %c0_565] : memref<49x8x256xf32, #tpu.memory_space<vmem>>, vector<1x8x256xf32>
    %1140 = vector.shape_cast %1139 : vector<1x8x256xf32> to vector<8x256xf32>
    %1141 = arith.mulf %1138, %1140 : vector<8x256xf32>
    %1142 = arith.addf %1137, %1141 : vector<8x256xf32>
    %1143 = vector.extract_strided_slice %956 {offsets = [0, 82], sizes = [8, 256], strides = [1, 1]} : vector<8x358xf32> to vector<8x256xf32>
    %c37_566 = arith.constant 37 : index
    %c0_567 = arith.constant 0 : index
    %c0_568 = arith.constant 0 : index
    %1144 = vector.load %arg5[%c37_566, %c0_567, %c0_568] : memref<49x8x256xf32, #tpu.memory_space<vmem>>, vector<1x8x256xf32>
    %1145 = vector.shape_cast %1144 : vector<1x8x256xf32> to vector<8x256xf32>
    %1146 = arith.mulf %1143, %1145 : vector<8x256xf32>
    %1147 = arith.addf %1142, %1146 : vector<8x256xf32>
    %1148 = vector.extract_strided_slice %956 {offsets = [0, 83], sizes = [8, 256], strides = [1, 1]} : vector<8x358xf32> to vector<8x256xf32>
    %c38_569 = arith.constant 38 : index
    %c0_570 = arith.constant 0 : index
    %c0_571 = arith.constant 0 : index
    %1149 = vector.load %arg5[%c38_569, %c0_570, %c0_571] : memref<49x8x256xf32, #tpu.memory_space<vmem>>, vector<1x8x256xf32>
    %1150 = vector.shape_cast %1149 : vector<1x8x256xf32> to vector<8x256xf32>
    %1151 = arith.mulf %1148, %1150 : vector<8x256xf32>
    %1152 = arith.addf %1147, %1151 : vector<8x256xf32>
    %1153 = vector.extract_strided_slice %956 {offsets = [0, 84], sizes = [8, 256], strides = [1, 1]} : vector<8x358xf32> to vector<8x256xf32>
    %c39_572 = arith.constant 39 : index
    %c0_573 = arith.constant 0 : index
    %c0_574 = arith.constant 0 : index
    %1154 = vector.load %arg5[%c39_572, %c0_573, %c0_574] : memref<49x8x256xf32, #tpu.memory_space<vmem>>, vector<1x8x256xf32>
    %1155 = vector.shape_cast %1154 : vector<1x8x256xf32> to vector<8x256xf32>
    %1156 = arith.mulf %1153, %1155 : vector<8x256xf32>
    %1157 = arith.addf %1152, %1156 : vector<8x256xf32>
    %1158 = vector.extract_strided_slice %956 {offsets = [0, 85], sizes = [8, 256], strides = [1, 1]} : vector<8x358xf32> to vector<8x256xf32>
    %c40_575 = arith.constant 40 : index
    %c0_576 = arith.constant 0 : index
    %c0_577 = arith.constant 0 : index
    %1159 = vector.load %arg5[%c40_575, %c0_576, %c0_577] : memref<49x8x256xf32, #tpu.memory_space<vmem>>, vector<1x8x256xf32>
    %1160 = vector.shape_cast %1159 : vector<1x8x256xf32> to vector<8x256xf32>
    %1161 = arith.mulf %1158, %1160 : vector<8x256xf32>
    %1162 = arith.addf %1157, %1161 : vector<8x256xf32>
    %1163 = vector.extract_strided_slice %956 {offsets = [0, 86], sizes = [8, 256], strides = [1, 1]} : vector<8x358xf32> to vector<8x256xf32>
    %c41_578 = arith.constant 41 : index
    %c0_579 = arith.constant 0 : index
    %c0_580 = arith.constant 0 : index
    %1164 = vector.load %arg5[%c41_578, %c0_579, %c0_580] : memref<49x8x256xf32, #tpu.memory_space<vmem>>, vector<1x8x256xf32>
    %1165 = vector.shape_cast %1164 : vector<1x8x256xf32> to vector<8x256xf32>
    %1166 = arith.mulf %1163, %1165 : vector<8x256xf32>
    %1167 = arith.addf %1162, %1166 : vector<8x256xf32>
    %1168 = vector.extract_strided_slice %956 {offsets = [0, 96], sizes = [8, 256], strides = [1, 1]} : vector<8x358xf32> to vector<8x256xf32>
    %c42_581 = arith.constant 42 : index
    %c0_582 = arith.constant 0 : index
    %c0_583 = arith.constant 0 : index
    %1169 = vector.load %arg5[%c42_581, %c0_582, %c0_583] : memref<49x8x256xf32, #tpu.memory_space<vmem>>, vector<1x8x256xf32>
    %1170 = vector.shape_cast %1169 : vector<1x8x256xf32> to vector<8x256xf32>
    %1171 = arith.mulf %1168, %1170 : vector<8x256xf32>
    %1172 = arith.addf %1167, %1171 : vector<8x256xf32>
    %1173 = vector.extract_strided_slice %956 {offsets = [0, 97], sizes = [8, 256], strides = [1, 1]} : vector<8x358xf32> to vector<8x256xf32>
    %c43_584 = arith.constant 43 : index
    %c0_585 = arith.constant 0 : index
    %c0_586 = arith.constant 0 : index
    %1174 = vector.load %arg5[%c43_584, %c0_585, %c0_586] : memref<49x8x256xf32, #tpu.memory_space<vmem>>, vector<1x8x256xf32>
    %1175 = vector.shape_cast %1174 : vector<1x8x256xf32> to vector<8x256xf32>
    %1176 = arith.mulf %1173, %1175 : vector<8x256xf32>
    %1177 = arith.addf %1172, %1176 : vector<8x256xf32>
    %1178 = vector.extract_strided_slice %956 {offsets = [0, 98], sizes = [8, 256], strides = [1, 1]} : vector<8x358xf32> to vector<8x256xf32>
    %c44_587 = arith.constant 44 : index
    %c0_588 = arith.constant 0 : index
    %c0_589 = arith.constant 0 : index
    %1179 = vector.load %arg5[%c44_587, %c0_588, %c0_589] : memref<49x8x256xf32, #tpu.memory_space<vmem>>, vector<1x8x256xf32>
    %1180 = vector.shape_cast %1179 : vector<1x8x256xf32> to vector<8x256xf32>
    %1181 = arith.mulf %1178, %1180 : vector<8x256xf32>
    %1182 = arith.addf %1177, %1181 : vector<8x256xf32>
    %1183 = vector.extract_strided_slice %956 {offsets = [0, 99], sizes = [8, 256], strides = [1, 1]} : vector<8x358xf32> to vector<8x256xf32>
    %c45_590 = arith.constant 45 : index
    %c0_591 = arith.constant 0 : index
    %c0_592 = arith.constant 0 : index
    %1184 = vector.load %arg5[%c45_590, %c0_591, %c0_592] : memref<49x8x256xf32, #tpu.memory_space<vmem>>, vector<1x8x256xf32>
    %1185 = vector.shape_cast %1184 : vector<1x8x256xf32> to vector<8x256xf32>
    %1186 = arith.mulf %1183, %1185 : vector<8x256xf32>
    %1187 = arith.addf %1182, %1186 : vector<8x256xf32>
    %1188 = vector.extract_strided_slice %956 {offsets = [0, 100], sizes = [8, 256], strides = [1, 1]} : vector<8x358xf32> to vector<8x256xf32>
    %c46_593 = arith.constant 46 : index
    %c0_594 = arith.constant 0 : index
    %c0_595 = arith.constant 0 : index
    %1189 = vector.load %arg5[%c46_593, %c0_594, %c0_595] : memref<49x8x256xf32, #tpu.memory_space<vmem>>, vector<1x8x256xf32>
    %1190 = vector.shape_cast %1189 : vector<1x8x256xf32> to vector<8x256xf32>
    %1191 = arith.mulf %1188, %1190 : vector<8x256xf32>
    %1192 = arith.addf %1187, %1191 : vector<8x256xf32>
    %1193 = vector.extract_strided_slice %956 {offsets = [0, 101], sizes = [8, 256], strides = [1, 1]} : vector<8x358xf32> to vector<8x256xf32>
    %c47_596 = arith.constant 47 : index
    %c0_597 = arith.constant 0 : index
    %c0_598 = arith.constant 0 : index
    %1194 = vector.load %arg5[%c47_596, %c0_597, %c0_598] : memref<49x8x256xf32, #tpu.memory_space<vmem>>, vector<1x8x256xf32>
    %1195 = vector.shape_cast %1194 : vector<1x8x256xf32> to vector<8x256xf32>
    %1196 = arith.mulf %1193, %1195 : vector<8x256xf32>
    %1197 = arith.addf %1192, %1196 : vector<8x256xf32>
    %1198 = vector.extract_strided_slice %956 {offsets = [0, 102], sizes = [8, 256], strides = [1, 1]} : vector<8x358xf32> to vector<8x256xf32>
    %c48_599 = arith.constant 48 : index
    %c0_600 = arith.constant 0 : index
    %c0_601 = arith.constant 0 : index
    %1199 = vector.load %arg5[%c48_599, %c0_600, %c0_601] : memref<49x8x256xf32, #tpu.memory_space<vmem>>, vector<1x8x256xf32>
    %1200 = vector.shape_cast %1199 : vector<1x8x256xf32> to vector<8x256xf32>
    %1201 = arith.mulf %1198, %1200 : vector<8x256xf32>
    %1202 = arith.addf %1197, %1201 : vector<8x256xf32>
    %1203 = arith.addf %868, %1202 : vector<8x256xf32>
    %c0_602 = arith.constant 0 : index
    %c0_603 = arith.constant 0 : index
    %1204 = vector.load %arg11[%c0_602, %c0_603] : memref<8x256xf32, #tpu.memory_space<vmem>>, vector<8x256xf32>
    tpu.vector_store %arg11[%c0_602, %c0_603], %1203 {strides = array<i32>} : memref<8x256xf32, #tpu.memory_space<vmem>>, vector<8x256xf32>,
    return
  }
}

</mosaic_0001>

<bundles_post_ra>
// kernel: tpu_custom_call.1
= control target key start
LH: loop header
LB: loop body
LE: loop exit
PB: predicated region body
PF: predicated region fallthrough
CT: control target
= control target key end

     0   :  { %s10901_s0 = inlined_call_operand.vmem [shape: f32[8,256], index: 0, kind: input, shape index: {}]   ;;  %s10902_s1 = inlined_call_operand.hbm [shape: f32[49,8,256], index: 1, kind: input, shape index: {}]   ;;  %s10903_s2 = inlined_call_operand.hbm [shape: f32[8,256], index: 2, kind: input, shape index: {}]   ;;  %s10904_s3 = inlined_call_operand.hbm [shape: f32[49,8,256], index: 3, kind: input, shape index: {}]   ;;  %s10905_s4 = inlined_call_operand.vmem [shape: f32[8,256], index: 4, kind: input, shape index: {}]   ;;  %s10906_s5 = inlined_call_operand.hbm [shape: f32[49,8,256], index: 5, kind: input, shape index: {}]   ;;  %s10907_s6 = inlined_call_operand.hbm [shape: f32[8,256], index: 6, kind: input, shape index: {}]   ;;  %s10908_s7 = inlined_call_operand.vmem [shape: f32[16,4], index: 7, kind: input, shape index: {}]   ;;  %s10909_s8 = inlined_call_operand.vmem [shape: f32[4,4], index: 8, kind: input, shape index: {}]   ;;  %s10910_s9 = inlined_call_operand.vmem [shape: f32[2,4], index: 9, kind: input, shape index: {}]   ;;  %s10911_s10 = inlined_call_operand.vmem [shape: f32[2,4], index: 10, kind: input, shape index: {}]   ;;  %s10912_s11 = inlined_call_operand.hbm [shape: f32[8,256], index: 11, kind: output, shape index: {}]  }
   0x1   :  { %11401 = sst [smem:[#allocation161_spill]] %s10905_s4 }
   0x2   :  { %11402 = sst [smem:[#allocation162_spill]] %s10912_s11 }
   0x3   :  { %16 = vsyncpa [#allocation3], 0 }
   0x4   :  { %17 = vsyncpa [#allocation7], 0 }
   0x5   :  { %18 = vsyncpa [#allocation10], 0 }
   0x6   :  { %19 = vsyncpa [#allocation5], 0 }
   0x7   :  { %20 = vsyncpa [#allocation14], 0 }
   0x8   :  { %21 = vsyncpa [#allocation17], 0 }
   0x9   :  { %22 = vsyncpa [#allocation4], 0  ;;  %s6795_s17 = smov [#allocation6]   ;;  %s6601_s21 = scalar_lea.hbm %s10903_s2, 256 }
   0xa   :  { %s43_s18 = sshll.u32 %s6795_s17, 4  ;;  %p6602_p0 = scmp.ne.s32.totalorder %s10903_s2, %s6601_s21  ;;  %s44_s18 = int_to_ptr.vmem [resolvable:$true] %s43_s18 }
   0xb   :  { %p6605_p1 = scmp.lt.u32.totalorder %s6601_s21, %s10903_s2 }
   0xd   :  { %p6607_p2 = pnand %p6605_p1, %p6602_p0 }
   0xf   :  { %6610 = shalt.err (!%p6607_p2)
}
  0x10   :  { %s6611_s26 = scalar_lea.vmem %s44_s18, 256  ;;  %p6616_p4 = scmp.lt.s32.totalorder %s44_s18, %s44_s18 }
  0x11   :  { %p6612_p3 = scmp.ne.s32.totalorder %s44_s18, %s6611_s26  ;;  %p6617_p5 = scmp.lt.s32.totalorder %s6611_s26, %s6611_s26 }
  0x13   :  { %p6618_p6 = por %p6617_p5, %p6616_p4 }
  0x15   :  { %p6619_p7 = pnand %p6618_p6, %p6612_p3 }
  0x17   :  { %6622 = shalt.err (!%p6619_p7)
}
  0x18   :  { %46 = dma.hbm_to_vmem [thread:$0]  %s10903_s2, 256, %s44_s18, [#allocation7]  }
  0x19   :  { %s6796_s29 = smov [#allocation9]   ;;  %s101_s14 = sshll.u32 %s10909_s8, 4  ;;  %s102_s14 = int_to_ptr.vmem [resolvable:$true] %s101_s14 }
  0x1a   :  { %s66_s30 = sshll.u32 %s6796_s29, 4  ;;  %s6623_s17 = scalar_lea.hbm %s10906_s5, 12544  ;;  %s67_s30 = int_to_ptr.vmem [resolvable:$true] %s66_s30 }
  0x1b   :  { %p6624_p8 = scmp.ne.s32.totalorder %s10906_s5, %s6623_s17  ;;  %p6627_p9 = scmp.lt.u32.totalorder %s6623_s17, %s10906_s5 }
  0x1d   :  { %p6629_p10 = pnand %p6627_p9, %p6624_p8 }
  0x1f   :  { %6632 = shalt.err (!%p6629_p10)
}
  0x20   :  { %s6633_s2 = scalar_lea.vmem %s67_s30, 12544  ;;  %p6638_p12 = scmp.lt.s32.totalorder %s67_s30, %s67_s30 }
  0x21   :  { %p6634_p11 = scmp.ne.s32.totalorder %s67_s30, %s6633_s2  ;;  %p6639_p13 = scmp.lt.s32.totalorder %s6633_s2, %s6633_s2 }
  0x23   :  { %p6640_p0 = por %p6639_p13, %p6638_p12 }
  0x25   :  { %p6641_p1 = pnand %p6640_p0, %p6634_p11 }
  0x27   :  { %6644 = shalt.err (!%p6641_p1)
}
  0x28   :  { %s6797_s8 = smov 256   ;;  %s11191_s18 = smov 16  }
  0x29   :  { %72 = dma.hbm_to_vmem [thread:$0]  %s10906_s5, 12544, %s67_s30, [#allocation10], %s6797_s8, %s6797_s8, %s11191_s18  }
  0x2a   :  { %s6645_s25 = scalar_lea.vmem %s102_s14, 64  ;;  %p6650_p3 = scmp.lt.s32.totalorder %s102_s14, %s102_s14 }
  0x2b   :  { %p6646_p2 = scmp.ne.s32.totalorder %s102_s14, %s6645_s25  ;;  %p6651_p4 = scmp.lt.s32.totalorder %s6645_s25, %s6645_s25 }
  0x2d   :  { %p6652_p5 = por %p6651_p4, %p6650_p3 }
  0x2f   :  { %p6653_p6 = pnand %p6652_p5, %p6646_p2 }
  0x31   :  { %6656 = shalt.err (!%p6653_p6)
}
  0x32   :  { %s6799_s26 = smov [#allocation13]   ;;  %s6800_s27 = smov [#allocation2]  }
  0x33   :  { %104 = dma.vmem_to_smem %s102_s14, 64, %s6799_s26, [#allocation14]  }
  0x34   :  { %s30_s28 = sshll.u32 %s6800_s27, 4  ;;  %s6801_s29 = smov [#allocation8]   ;;  %s31_s28 = int_to_ptr.vmem [resolvable:$true] %s30_s28 }
  0x35   :  { %s52_s12 = sshll.u32 %s6801_s29, 4  ;;  %s6657_s16 = scalar_lea.hbm %s10902_s1, 12544  ;;  %s53_s12 = int_to_ptr.vmem [resolvable:$true] %s52_s12 }
  0x36   :  { %p6658_p7 = scmp.ne.s32.totalorder %s10902_s1, %s6657_s16  ;;  %p6661_p8 = scmp.lt.u32.totalorder %s6657_s16, %s10902_s1 }
  0x38   :  { %p6663_p9 = pnand %p6661_p8, %p6658_p7 }
  0x3a   :  { %6666 = shalt.err (!%p6663_p9)
}
  0x3b   :  { %s6667_s14 = scalar_lea.vmem %s31_s28, 12544  ;;  %p6672_p11 = scmp.lt.s32.totalorder %s31_s28, %s31_s28 }
  0x3c   :  { %p6668_p10 = scmp.ne.s32.totalorder %s31_s28, %s6667_s14  ;;  %p6673_p12 = scmp.lt.s32.totalorder %s6667_s14, %s6667_s14 }
  0x3e   :  { %p6674_p13 = por %p6673_p12, %p6672_p11 }
  0x40   :  { %p6675_p0 = pnand %p6674_p13, %p6668_p10 }
  0x42   :  { %6678 = shalt.err (!%p6675_p0)
}
  0x43   :  { %36 = dma.hbm_to_vmem [thread:$0]  %s10902_s1, 12544, %s31_s28, [#allocation3], %s6797_s8, %s6797_s8, %s11191_s18  }
  0x44   :  { %s6679_s23 = scalar_lea.hbm %s10904_s3, 12544 }
  0x45   :  { %p6680_p1 = scmp.ne.s32.totalorder %s10904_s3, %s6679_s23  ;;  %p6683_p2 = scmp.lt.u32.totalorder %s6679_s23, %s10904_s3 }
  0x47   :  { %p6685_p3 = pnand %p6683_p2, %p6680_p1 }
  0x49   :  { %6688 = shalt.err (!%p6685_p3)
}
  0x4a   :  { %s6689_s29 = scalar_lea.vmem %s53_s12, 12544  ;;  %p6694_p5 = scmp.lt.s32.totalorder %s53_s12, %s53_s12 }
  0x4b   :  { %p6690_p4 = scmp.ne.s32.totalorder %s53_s12, %s6689_s29  ;;  %p6695_p6 = scmp.lt.s32.totalorder %s6689_s29, %s6689_s29 }
  0x4d   :  { %p6696_p7 = por %p6695_p6, %p6694_p5 }
  0x4f   :  { %p6697_p8 = pnand %p6696_p7, %p6690_p4 }
  0x51   :  { %6700 = shalt.err (!%p6697_p8)
}
  0x52   :  { %58 = dma.hbm_to_vmem [thread:$0]  %s10904_s3, 12544, %s53_s12, [#allocation7], %s6797_s8, %s6797_s8, %s11191_s18  }
  0x53   :  { %s6802_s13 = smov [#allocation11]   ;;  %s88_s5 = sshll.u32 %s10908_s7, 4  ;;  %s89_s5 = int_to_ptr.vmem [resolvable:$true] %s88_s5 }
  0x54   :  { %s79_s15 = sshll.u32 %s6802_s13, 4  ;;  %s6701_s14 = scalar_lea.hbm %s10907_s6, 256  ;;  %s80_s15 = int_to_ptr.vmem [resolvable:$true] %s79_s15 }
  0x55   :  { %p6702_p9 = scmp.ne.s32.totalorder %s10907_s6, %s6701_s14  ;;  %p6705_p10 = scmp.lt.u32.totalorder %s6701_s14, %s10907_s6 }
  0x57   :  { %p6707_p11 = pnand %p6705_p10, %p6702_p9 }
  0x59   :  { %6710 = shalt.err (!%p6707_p11)
}
  0x5a   :  { %s6711_s3 = scalar_lea.vmem %s80_s15, 256  ;;  %p6716_p13 = scmp.lt.s32.totalorder %s80_s15, %s80_s15 }
  0x5b   :  { %p6712_p12 = scmp.ne.s32.totalorder %s80_s15, %s6711_s3  ;;  %p6717_p0 = scmp.lt.s32.totalorder %s6711_s3, %s6711_s3 }
  0x5d   :  { %p6718_p1 = por %p6717_p0, %p6716_p13 }
  0x5f   :  { %p6719_p2 = pnand %p6718_p1, %p6712_p12 }
  0x61   :  { %6722 = shalt.err (!%p6719_p2)
}
  0x62   :  { %82 = dma.hbm_to_vmem [thread:$0]  %s10907_s6, 256, %s80_s15, [#allocation10]  }
  0x63   :  { %s111_s24 = sshll.u32 %s10910_s9, 4  ;;  %s6723_s25 = scalar_lea.vmem %s89_s5, 256  ;;  %s112_s24 = int_to_ptr.vmem [resolvable:$true] %s111_s24 }
  0x64   :  { %p6724_p3 = scmp.ne.s32.totalorder %s89_s5, %s6723_s25  ;;  %p6728_p4 = scmp.lt.s32.totalorder %s89_s5, %s89_s5 }
  0x65   :  { %p6729_p5 = scmp.lt.s32.totalorder %s6723_s25, %s6723_s25 }
  0x67   :  { %p6730_p6 = por %p6729_p5, %p6728_p4 }
  0x69   :  { %p6731_p7 = pnand %p6730_p6, %p6724_p3 }
  0x6b   :  { %6734 = shalt.err (!%p6731_p7)
}
  0x6c   :  { %s6803_s26 = smov [#allocation12]   ;;  %s6804_s27 = smov 128  }
  0x6d   :  { %s6805_s29 = smov 8   ;;  %s6735_s1 = scalar_lea.vmem %s112_s24, 32 }
  0x6e   :  { %94 = dma.vmem_to_smem %s89_s5, 256, %s6803_s26, [#allocation5], %s6804_s27, %s6804_s27, %s6805_s29  }
  0x6f   :  { %p6736_p8 = scmp.ne.s32.totalorder %s112_s24, %s6735_s1  ;;  %p6740_p9 = scmp.lt.s32.totalorder %s112_s24, %s112_s24 }
  0x70   :  { %p6741_p10 = scmp.lt.s32.totalorder %s6735_s1, %s6735_s1 }
  0x72   :  { %p6742_p11 = por %p6741_p10, %p6740_p9 }
  0x74   :  { %p6743_p12 = pnand %p6742_p11, %p6736_p8 }
  0x76   :  { %6746 = shalt.err (!%p6743_p12)
}
  0x77   :  { %s6806_s6 = smov [#allocation15]   ;;  %s121_s13 = sshll.u32 %s10911_s10, 4  ;;  %s122_s13 = int_to_ptr.vmem [resolvable:$true] %s121_s13 }
  0x78   :  { %114 = dma.vmem_to_smem %s112_s24, 32, %s6806_s6, [#allocation14]  }
  0x79   :  { %s6747_s15 = scalar_lea.vmem %s122_s13, 32  ;;  %p6752_p0 = scmp.lt.s32.totalorder %s122_s13, %s122_s13 }
  0x7a   :  { %p6748_p13 = scmp.ne.s32.totalorder %s122_s13, %s6747_s15  ;;  %p6753_p1 = scmp.lt.s32.totalorder %s6747_s15, %s6747_s15 }
  0x7c   :  { %p6754_p2 = por %p6753_p1, %p6752_p0 }
  0x7e   :  { %p6755_p3 = pnand %p6754_p2, %p6748_p13 }
  0x80   :  { %6758 = shalt.err (!%p6755_p3)
}
  0x81   :  { %s6807_s16 = smov [#allocation16]  }
  0x82   :  { %124 = dma.vmem_to_smem %s122_s13, 32, %s6807_s16, [#allocation17]  }
  0x83   :  { %6781 = dma.done.wait [#allocation3], 12544  }
  0x84   :  { %6782 = vsyncadd [#allocation3], 4294954752 }
  0x85   :  { %6783 = dma.done.wait [#allocation7], 12800  }
  0x86   :  { %6784 = vsyncadd [#allocation7], 4294954496 }
  0x87   :  { %6785 = dma.done.wait [#allocation10], 12800  }
  0x88   :  { %6786 = vsyncadd [#allocation10], 4294954496 }
  0x89   :  { %6787 = dma.done.wait [#allocation5], 256  }
  0x8a   :  { %6788 = vsyncadd [#allocation5], 4294967040 }
  0x8b   :  { %6789 = dma.done.wait [#allocation14], 96  }
  0x8c   :  { %6790 = vsyncadd [#allocation14], 4294967200 }
  0x8d   :  { %6791 = dma.done.wait [#allocation17], 32  }
  0x8e   :  { %6792 = vsyncadd [#allocation17], 4294967264 }
  0x8f   :  { %152 = sfence }
  0x90   :  { %v442_v0 = vld [vmem:[#allocation2 + $0x10] sm:$0xff]  ;;  %v476_v1 = vld [vmem:[#allocation2 + $0x28] sm:$0xff]  ;;  %s11203_s10 = smov 1   ;;  %s11201_s17 = smov 2   ;;  %v443_v2 = vld [vmem:[#allocation2 + $0x18] sm:$0xff]  ;;  %vm399_vm0 = vcmask 1040384  }
  0x91   :  { %446 = vrot.lane.b32.xlu1 %v442_v0, %s11203_s10  ;;  %481 = vrot.lane.b32.xlu0 %v476_v1, %s11201_s17  ;;  %v508_v3 = vld [vmem:[#allocation2 + $0x30] sm:$0xff]  ;;  %s11199_s5 = smov 3   ;;  %v475_v4 = vld [vmem:[#allocation2 + $0x20] sm:$0xff]  ;;  %v542_v5 = vld [vmem:[#allocation2 + $0x48] sm:$0xff]  ;;  %s11197_s30 = smov 4   ;;  %vm404_vm1 = vcmask 1041408  }
  0x92   :  { %v153_v6 = vld [vmem:[%s10901_s0] sm:$0xff]  ;;  %v154_v7 = vld [vmem:[%s10901_s0 + $0x8] sm:$0xff]  ;;  %v509_v8 = vld [vmem:[#allocation2 + $0x38] sm:$0xff]  ;;  %s11195_s22 = smov 5   ;;  %s11193_s2 = smov 6   ;;  %vm11370_vm2 = vcmask 1042432  }
  0x93   :  { %v574_v9 = vld [vmem:[#allocation2 + $0x50] sm:$0xff]  ;;  %v157_v10 = vcombine.low %v153_v6, %v154_v7  ;;  %v158_v11 = vcombine.high %v153_v6, %v154_v7  ;;  %v541_v16 = vld [vmem:[#allocation2 + $0x40] sm:$0xff]  ;;  %v608_v17 = vld [vmem:[#allocation2 + $0x68] sm:$0xff]  ;;  %s11189_s3 = smov 17   ;;  %s11187_s7 = smov 18   ;;  %vm11369_vm3 = vcmask 416768  }
  0x94   :  { %v575_v24 = vld [vmem:[#allocation2 + $0x58] sm:$0xff]  ;;  %v640_v25 = vld [vmem:[#allocation2 + $0x70] sm:$0xff]  ;;  %v607_v30 = vld [vmem:[#allocation2 + $0x60] sm:$0xff]  ;;  %s11167_s8 = smov 19   ;;  %s10982_s12 = smov 20   ;;  %vm11368_vm4 = vcmask 7168  }
  0x95   :  { %448 = vrot.lane.b32.xlu1 %v443_v2, %s11203_s10  ;;  %512 = vrot.lane.b32.xlu0 %v508_v3, %s11199_s5  ;;  %v6283_v12 = vrot.slane %v157_v10, 9  ;;  %v6284_v13 = vrot.slane %v158_v11, 9  ;;  %v6285_v14 = vrot.slane %v157_v10, 10  ;;  %v6286_v15 = vrot.slane %v158_v11, 10  ;;  %v674_v31 = vld [vmem:[#allocation2 + $0x88] sm:$0xff]  ;;  %v641_v46 = vld [vmem:[#allocation2 + $0x78] sm:$0xff] }
  0x96   :  { %v6287_v20 = vrot.slane %v157_v10, 11  ;;  %v6288_v21 = vrot.slane %v158_v11, 11  ;;  %v706_v47 = vld [vmem:[#allocation2 + $0x90] sm:$0xff]  ;;  %v673_v60 = vld [vmem:[#allocation2 + $0x80] sm:$0xff]  ;;  %v740_v61 = vld [vmem:[#allocation2 + $0xa8] sm:$0xff]  ;;  %s7098_s23 = sld [smem:[#allocation15]] }
  0x97   :  { %v169_v18 = vadd.f32 %v6283_v12, %v157_v10  ;;  %v170_v19 = vadd.f32 %v6284_v13, %v158_v11  ;;  %s7100_s24 = sld [smem:[#allocation16]]  ;;  %s7102_s25 = sld [smem:[#allocation15 + $0x1]]  ;;  %vm11267_vm5 = vcmask 15360   ;;  %vm11268_vm6 = vcmask 23552  }
  0x98   :  { %s7104_s26 = sld [smem:[#allocation16 + $0x1]]  ;;  %s10923_s27 = smov 21   ;;  %vm11111_vm7 = vcmask 31744   ;;  %vm11109_vm8 = vcmask 39936   ;;  %vm11107_vm9 = vcmask 48128   ;;  %vm11073_vm10 = vcmask 130048  }
  0x99   :  { %479 = vrot.lane.b32.xlu1 %v475_v4, %s11201_s17  ;;  %547 = vrot.lane.b32.xlu0 %v542_v5, %s11197_s30  ;;  %v177_v22 = vadd.f32 %v6285_v14, %v169_v18  ;;  %v178_v23 = vadd.f32 %v6286_v15, %v170_v19  ;;  %v707_v4 = vld [vmem:[#allocation2 + $0x98] sm:$0xff]  ;;  %v772_v5 = vld [vmem:[#allocation2 + $0xb0] sm:$0xff]  ;;  %v313_v14 = vlaneseq  ;;  %s7108_s29 = sld [smem:[#allocation15 + $0x2]]  ;;  %s7112_s6 = sld [smem:[#allocation15 + $0x3]]  ;;  %v805_v18 = vld [vmem:[#allocation2 + $0xc0] sm:$0xff]  ;;  %vm11035_vm11 = vcmask 138240  }
  0x9a   :  { %s7110_s1 = sld [smem:[#allocation16 + $0x2]]  ;;  %v773_v15 = vld [vmem:[#allocation2 + $0xb8] sm:$0xff]  ;;  %s7114_s9 = sld [smem:[#allocation16 + $0x3]]  ;;  %v872_v19 = vld [vmem:[#allocation2 + $0xe8] sm:$0xff]  ;;  %vm10997_vm12 = vcmask 146432   ;;  %vm10926_vm13 = vcmask 154624  }
  0x9b   :  { %v185_v26 = vadd.f32 %v6287_v20, %v177_v22  ;;  %v186_v27 = vadd.f32 %v6288_v21, %v178_v23  ;;  %s10919_s28 = smov 22   ;;  %s11163_s13 = smov 32   ;;  %vm10922_vm14 = vcmask 162816   ;;  %vm10921_vm15 = vcmask 171008  }
  0x9c   :  { %s10917_s15 = smov 33   ;;  %s10915_s16 = smov 34  }
  0x9d   :  { %514 = vrot.lane.b32.xlu1 %v509_v8, %s11199_s5  ;;  %578 = vrot.lane.b32.xlu0 %v574_v9, %s11195_s22  ;;  %v187_v28 = vmul.f32 0.25, %v185_v26  ;;  %v188_v29 = vmul.f32 0.25, %v186_v27  ;;  %s11205_s19 = smov 51   ;;  %s10913_s14 = smov 35  }
  0x9e   :  { %s10937_s20 = smov 36   ;;  %s11185_s21 = smov 127  }
  0x9f   :  { %v7058_v32 = vsub.f32 %v157_v10, %v187_v28  ;;  %v7060_v33 = vsub.f32 %v158_v11, %v188_v29  ;;  %v193_v34 = vrot.slane %v187_v28, 7  ;;  %v194_v35 = vrot.slane %v188_v29, 7  ;;  %s8307_s5 = sld [smem:[#allocation12 + $0x83]]  ;;  %s8315_s11 = sld [smem:[#allocation12 + $0x200]] }
  0xa0   :  { %v199_v36 = vrot.slane %v187_v28, 6  ;;  %v200_v37 = vrot.slane %v188_v29, 6  ;;  %v205_v38 = vrot.slane %v187_v28, 5  ;;  %v206_v39 = vrot.slane %v188_v29, 5  ;;  %s8309_s17 = sld [smem:[#allocation12 + $0x103]]  ;;  %s8317_s4 = sld [smem:[#allocation12 + $0x201]] }
  0xa1   :  { %545 = vrot.lane.b32.xlu1 %v541_v16, %s11197_s30  ;;  %613 = vrot.lane.b32.xlu0 %v608_v17, %s11193_s2  ;;  %v7062_v40 = vsub.f32 %v157_v10, %v193_v34  ;;  %v7064_v41 = vsub.f32 %v158_v11, %v194_v35  ;;  %v211_v42 = vmul.f32 %v7058_v32, %v7058_v32  ;;  %v838_v16 = vld [vmem:[#allocation2 + $0xd0] sm:$0xff]  ;;  %v7116_v17 = vshrl.u32 %v313_v14, 7  ;;  %v839_v35 = vld [vmem:[#allocation2 + $0xd8] sm:$0xff]  ;;  %s8305_s30 = sld [smem:[#allocation13 + $0x3]] }
  0xa2   :  { %v7070_v43 = vsub.f32 %v157_v10, %v199_v36  ;;  %v7072_v44 = vsub.f32 %v158_v11, %v200_v37  ;;  %v7074_v45 = vsub.f32 %v157_v10, %v205_v38  ;;  %v7076_v48 = vsub.f32 %v158_v11, %v206_v39  ;;  %v739_v10 = vld [vmem:[#allocation2 + $0xa0] sm:$0xff]  ;;  %v806_v11 = vld [vmem:[#allocation2 + $0xc8] sm:$0xff]  ;;  %s8311_s10 = sld [smem:[#allocation12 + $0x183]] }
  0xa3   :  { %v212_v49 = vmul.f32 %v7060_v33, %v7060_v33  ;;  %v215_v50 = vmul.f32 %v7062_v40, %v7062_v40  ;;  %v216_v51 = vmul.f32 %v7064_v41, %v7064_v41  ;;  %v7121_v20 = vsub.s32 0, %v7116_v17 }
  0xa4   :  { %v227_v52 = vmul.f32 %v7070_v43, %v7070_v43  ;;  %v228_v53 = vmul.f32 %v7072_v44, %v7072_v44  ;;  %v239_v54 = vmul.f32 %v7074_v45, %v7074_v45  ;;  %v240_v57 = vmul.f32 %v7076_v48, %v7076_v48 }
  0xa5   :  { %580 = vrot.lane.b32.xlu1 %v575_v24, %s11195_s22  ;;  %644 = vrot.lane.b32.xlu0 %v640_v25, %s11191_s18  ;;  %v6289_v55 = vrot.slane %v215_v50, 9  ;;  %v6290_v56 = vrot.slane %v216_v51, 9  ;;  %11403 = vst [vmem:[#allocation26_spill] sm:$0xff] %v7121_v20  ;;  %v7124_v21 = vsub.s32 4, %v7116_v17  ;;  %v337_v22 = vsub.s32 1, %v7116_v17  ;;  %s8303_s22 = sld [smem:[#allocation12 + $0x182]] }
  0xa6   :  { %v6291_v58 = vrot.slane %v227_v52, 10  ;;  %v6292_v59 = vrot.slane %v228_v53, 10  ;;  %v6293_v0 = vrot.slane %v239_v54, 11  ;;  %v6294_v1 = vrot.slane %v240_v57, 11  ;;  %11609 = sst [smem:[#allocation138_spill]] %s8307_s5  ;;  %s8319_s5 = sld [smem:[#allocation12 + $0x280]] }
  0xa7   :  { %v225_v62 = vadd.f32 %v6289_v55, %v211_v42  ;;  %v226_v63 = vadd.f32 %v6290_v56, %v212_v49  ;;  %11404 = vst [vmem:[#allocation27_spill] sm:$0xff] %v7124_v21  ;;  %v359_v23 = vsub.s32 2, %v7116_v17  ;;  %v260_v24 = vstv %s7098_s23  ;;  %s11183_s23 = smov 126   ;;  %11608 = sst [smem:[#allocation137_spill]] %s8305_s30 }
  0xa8   :  { %v264_v25 = vstv %s7100_s24  ;;  %v381_v26 = vsub.s32 3, %v7116_v17  ;;  %v341_v27 = vsub.s32 5, %v7116_v17  ;;  %v276_v28 = vstv %s7102_s25  ;;  %s11181_s24 = smov 125   ;;  %s11179_s25 = smov 124  }
  0xa9   :  { %611 = vrot.lane.b32.xlu1 %v607_v30, %s11193_s2  ;;  %679 = vrot.lane.b32.xlu0 %v674_v31, %s11189_s3  ;;  %v237_v2 = vadd.f32 %v6291_v58, %v225_v62  ;;  %v238_v3 = vadd.f32 %v6292_v59, %v226_v63  ;;  %v280_v29 = vstv %s7104_s26  ;;  %v363_v30 = vsub.s32 6, %v7116_v17  ;;  %s11177_s26 = smov 123   ;;  %s8301_s2 = sld [smem:[#allocation12 + $0x102]] }
  0xaa   :  { %v385_v31 = vsub.s32 7, %v7116_v17  ;;  %v290_v36 = vstv %s7108_s29  ;;  %v294_v37 = vstv %s7110_s1  ;;  %v304_v38 = vstv %s7112_s6  ;;  %v971_v17 = vld [vmem:[#allocation2 + $0x118] sm:$0xff]  ;;  %s11175_s29 = smov 122   ;;  %s11173_s1 = smov 112  }
  0xab   :  { %v249_v6 = vadd.f32 %v6293_v0, %v237_v2  ;;  %v250_v7 = vadd.f32 %v6294_v1, %v238_v3  ;;  %v308_v39 = vstv %s7114_s9  ;;  %s11171_s6 = smov 111   ;;  %s11169_s9 = smov 110  }
  0xac   :  { %11610 = sst [smem:[#allocation139_spill]] %s8309_s17  ;;  %s8321_s17 = sld [smem:[#allocation12 + $0x300]] }
  0xad   :  { %646 = vrot.lane.b32.xlu1 %v641_v46, %s11191_s18  ;;  %710 = vrot.lane.b32.xlu0 %v706_v47, %s11187_s7  ;;  %v251_v8 = vmul.f32 0.25, %v249_v6  ;;  %v252_v9 = vmul.f32 0.25, %v250_v7  ;;  %s8299_s18 = sld [smem:[#allocation12 + $0x82]]  ;;  %11611 = sst [smem:[#allocation140_spill]] %s8311_s10 }
  0xae   :  { %11613 = sst [smem:[#allocation142_spill]] %s8315_s11  ;;  %s8323_s30 = sld [smem:[#allocation12 + $0x380]] }
  0xaf   :  { %v253_v12 = vadd.f32 1e-06, %v251_v8  ;;  %v254_v13 = vadd.f32 1e-06, %v252_v9  ;;  %v905_v8 = vld [vmem:[#allocation2 + $0xf8] sm:$0xff]  ;;  %11614 = sst [smem:[#allocation143_spill]] %s8317_s4 }
  0xb0   :  { %11615 = sst [smem:[#allocation144_spill]] %s8319_s5  ;;  %s8325_s10 = sld [smem:[#allocation13 + $0x81]] }
  0xb1   :  { %677 = vrot.lane.b32.xlu1 %v673_v60, %s11189_s3  ;;  %745 = vrot.lane.b32.xlu0 %v740_v61, %s11167_s8  ;;  %6591 = vrsqrt.f32 %v253_v12  ;;  %s8297_s3 = sld [smem:[#allocation13 + $0x2]]  ;;  %s8329_s4 = sld [smem:[#allocation12 + $0x301]] }
  0xb2   :  { %6593 = vrsqrt.f32 %v254_v13  ;;  %s8331_s11 = sld [smem:[#allocation12 + $0x381]]  ;;  %s8333_s5 = sld [smem:[#allocation12 + $0x202]] }
  0xb5   :  { %712 = vrot.lane.b32.xlu1 %v707_v4, %s11187_s7  ;;  %776 = vrot.lane.b32.xlu0 %v772_v5, %s10982_s12  ;;  %s8295_s7 = sld [smem:[#allocation12 + $0x181]] }
  0xb6   :  { %11616 = sst [smem:[#allocation145_spill]] %s8325_s10  ;;  %s8337_s10 = sld [smem:[#allocation13 + $0x82]] }
  0xb7   :  { %11607 = sst [smem:[#allocation136_spill]] %s8297_s3 }
  0xb8   :  { %11617 = sst [smem:[#allocation146_spill]] %s8329_s4 }
  0xb9   :  { %743 = vrot.lane.b32.xlu1 %v739_v10, %s11167_s8  ;;  %811 = vrot.lane.b32.xlu0 %v806_v11, %s10923_s27  ;;  %s8247_s8 = sld [smem:[#allocation12]]  ;;  %11618 = sst [smem:[#allocation147_spill]] %s8331_s11 }
  0xba   :  { %11619 = sst [smem:[#allocation148_spill]] %s8333_s5  ;;  %s8343_s4 = sld [smem:[#allocation12 + $0x282]] }
  0xbb   :  { %v6592_v34 = vpop.eup %6591  ;;  %s8345_s11 = sld [smem:[#allocation12 + $0x302]] }
  0xbc   :  { %v6594_v42 = vpop.eup %6593  ;;  %v257_v46 = vmul.f32 %v6592_v34, %v7058_v32  ;;  %v269_v47 = vrot.slane %v6592_v34, 7  ;;  %v283_v49 = vrot.slane %v6592_v34, 6  ;;  %v297_v50 = vrot.slane %v6592_v34, 5  ;;  %v871_v32 = vld [vmem:[#allocation2 + $0xe0] sm:$0xff] }
  0xbd   :  { %778 = vrot.lane.b32.xlu1 %v773_v15, %s10982_s12  ;;  %842 = vrot.lane.b32.xlu0 %v838_v16, %s10919_s28  ;;  %v258_v51 = vmul.f32 %v6594_v42, %v7060_v33  ;;  %v270_v52 = vrot.slane %v6594_v42, 7  ;;  %v284_v53 = vrot.slane %v6594_v42, 6  ;;  %v298_v54 = vrot.slane %v6594_v42, 5  ;;  %s10989_s12 = smov 75  }
  0xbe   :  { %v261_v55 = vmul.f32 %v260_v24, %v257_v46  ;;  %v273_v56 = vmul.f32 %v269_v47, %v7062_v40  ;;  %v287_v57 = vmul.f32 %v283_v49, %v7070_v43  ;;  %v301_v58 = vmul.f32 %v297_v50, %v7074_v45  ;;  %v1003_v49 = vld [vmem:[#allocation2 + $0x120] sm:$0xff]  ;;  %v904_v50 = vld [vmem:[#allocation2 + $0xf0] sm:$0xff] }
  0xbf   :  { %v262_v59 = vmul.f32 %v260_v24, %v258_v51  ;;  %v274_v60 = vmul.f32 %v270_v52, %v7064_v41  ;;  %v288_v61 = vmul.f32 %v284_v53, %v7072_v44  ;;  %v302_v33 = vmul.f32 %v298_v54, %v7076_v48  ;;  %v938_v51 = vld [vmem:[#allocation2 + $0x108] sm:$0xff]  ;;  %v970_v52 = vld [vmem:[#allocation2 + $0x110] sm:$0xff]  ;;  %11600 = sst [smem:[#allocation129_spill]] %s8247_s8 }
  0xc0   :  { %v265_v62 = vadd.f32 %v264_v25, %v261_v55  ;;  %v277_v63 = vmul.f32 %v276_v28, %v273_v56  ;;  %v291_v0 = vmul.f32 %v290_v36, %v287_v57  ;;  %v305_v1 = vmul.f32 %v304_v38, %v301_v58 }
  0xc1   :  { %809 = vrot.lane.b32.xlu1 %v805_v18, %s10923_s27  ;;  %877 = vrot.lane.b32.xlu0 %v872_v19, %s11163_s13  ;;  %v266_v2 = vadd.f32 %v264_v25, %v262_v59  ;;  %v278_v3 = vmul.f32 %v276_v28, %v274_v60  ;;  %v292_v4 = vmul.f32 %v290_v36, %v288_v61  ;;  %s11161_s27 = smov 96   ;;  %11620 = sst [smem:[#allocation149_spill]] %s8345_s11 }
  0xc2   :  { %v306_v40 = vmul.f32 %v304_v38, %v302_v33  ;;  %v281_v43 = vadd.f32 %v280_v29, %v277_v63  ;;  %v295_v45 = vadd.f32 %v294_v37, %v291_v0  ;;  %v309_v5 = vadd.f32 %v308_v39, %v305_v1  ;;  %s11713_s11 = smov 112  }
  0xc3   :  { %v316_v6 = vrot.slane %v265_v62, %v7121_v20  ;;  %v282_v41 = vadd.f32 %v280_v29, %v278_v3  ;;  %v296_v7 = vadd.f32 %v294_v37, %v292_v4  ;;  %v324_v48 = vrot.slane %v266_v2, %v7121_v20  ;;  %v937_v29 = vld [vmem:[#allocation2 + $0x100] sm:$0xff] }
  0xc4   :  { %v310_v44 = vadd.f32 %v308_v39, %v306_v40  ;;  %v338_v9 = vrot.slane %v281_v43, %v337_v22  ;;  %v360_v10 = vrot.slane %v295_v45, %v359_v23  ;;  %v382_v11 = vrot.slane %v309_v5, %v381_v26 }
  0xc5   :  { %844 = vrot.lane.b32.xlu1 %v839_v35, %s10919_s28  ;;  %v320_v12 = vrot.slane %v265_v62, %v7124_v21  ;;  %v346_v13 = vrot.slane %v282_v41, %v337_v22  ;;  %v368_v14 = vrot.slane %v296_v7, %v359_v23  ;;  %v328_v16 = vrot.slane %v266_v2, %v7124_v21  ;;  %s10929_s28 = smov 106   ;;  %v1069_v21 = vld [vmem:[#allocation2 + $0x140] sm:$0xff] }
  0xc6   :  { %v390_v15 = vrot.slane %v310_v44, %v381_v26  ;;  %v400_v18 = vsel %vm399_vm0, %v316_v6, %v338_v9  ;;  %v342_v19 = vrot.slane %v281_v43, %v341_v27  ;;  %v350_v24 = vrot.slane %v282_v41, %v341_v27 }
  0xc7   :  { %v364_v22 = vrot.slane %v295_v45, %v363_v30  ;;  %v402_v25 = vsel %vm399_vm0, %v324_v48, %v346_v13  ;;  %v405_v23 = vsel %vm404_vm1, %v400_v18, %v360_v10  ;;  %v372_v26 = vrot.slane %v296_v7, %v363_v30 }
  0xc8   :  { %v386_v28 = vrot.slane %v309_v5, %v385_v31  ;;  %v407_v34 = vsel %vm404_vm1, %v402_v25, %v368_v14  ;;  %v410_v35 = vsel %vm11370_vm2, %v405_v23, %v382_v11  ;;  %v394_v27 = vrot.slane %v310_v44, %v385_v31 }
  0xc9   :  { %875 = vrot.lane.b32.xlu1 %v871_v32, %s11163_s13  ;;  %v401_v36 = vsel %vm399_vm0, %v320_v12, %v342_v19  ;;  %v412_v37 = vsel %vm11370_vm2, %v407_v34, %v390_v15  ;;  %v403_v38 = vsel %vm399_vm0, %v328_v16, %v350_v24 }
  0xca   :  { %v406_v39 = vsel %vm404_vm1, %v401_v36, %v364_v22  ;;  %v6301_v30 = vcombine.low %v410_v35, %v412_v37  ;;  %v408_v42 = vsel %vm404_vm1, %v403_v38, %v372_v26 }
  0xcb   :  { %v411_v46 = vsel %vm11370_vm2, %v406_v39, %v386_v28  ;;  %v413_v47 = vsel %vm11370_vm2, %v408_v42, %v394_v27 }
  0xcc   :  { %422 = vrot.lane.b32.xlu0 %v6301_v30, %s11205_s19  ;;  %v6302_v31 = vcombine.low %v411_v46, %v413_v47 }
  0xcd   :  { %910 = vrot.lane.b32.xlu1 %v905_v8, %s10917_s15 }
  0xd0   :  { %424 = vrot.lane.b32.xlu0 %v6302_v31, %s11205_s19 }
  0xd1   :  { %941 = vrot.lane.b32.xlu1 %v937_v29, %s10915_s16 }
  0xd4   :  { %908 = vrot.lane.b32.xlu0 %v904_v50, %s10917_s15  ;;  %s10927_s15 = smov 107  }
  0xd5   :  { %976 = vrot.lane.b32.xlu1 %v971_v17, %s10913_s14 }
  0xd8   :  { %943 = vrot.lane.b32.xlu0 %v938_v51, %s10915_s16  ;;  %s10932_s16 = smov 108  }
  0xd9   :  { %1007 = vrot.lane.b32.xlu1 %v1003_v49, %s10937_s20 }
  0xdc   :  { %974 = vrot.lane.b32.xlu0 %v970_v52, %s10913_s14  ;;  %s11165_s14 = smov 109  }
 0x103   :  { %v482_v53 = vpop.permute.xlu0 %481  ;;  %v447_v0 = vpop.permute.xlu1 %446 }
 0x107   :  { %v513_v54 = vpop.permute.xlu0 %512  ;;  %v449_v2 = vpop.permute.xlu1 %448 }
 0x108   :  { %v451_v41 = vsel %vm11368_vm4, %v447_v0, %v449_v2 }
 0x10b   :  { %v548_v55 = vpop.permute.xlu0 %547  ;;  %v480_v5 = vpop.permute.xlu1 %479 }
 0x10c   :  { %v484_v7 = vsel %vm11267_vm5, %v480_v5, %v482_v53 }
 0x10f   :  { %v7197_v56 = vpop.permute.xlu0 %578  ;;  %v515_v8 = vpop.permute.xlu1 %514 }
 0x110   :  { %v517_v14 = vsel %vm11268_vm6, %v513_v54, %v515_v8 }
 0x113   :  { %v7199_v57 = vpop.permute.xlu0 %613  ;;  %v546_v12 = vpop.permute.xlu1 %545 }
 0x114   :  { %v550_v15 = vsel %vm11111_vm7, %v546_v12, %v548_v55  ;;  %vm11115_vm7 = vcmask 1014784  }
 0x117   :  { %v7201_v58 = vpop.permute.xlu0 %644  ;;  %v581_v19 = vpop.permute.xlu1 %580 }
 0x118   :  { %v583_v28 = vsel %vm11109_vm8, %v7197_v56, %v581_v19  ;;  %vm11113_vm8 = vcmask 1031168  }
 0x11b   :  { %v7203_v32 = vpop.permute.xlu0 %679  ;;  %v612_v23 = vpop.permute.xlu1 %611 }
 0x11c   :  { %v616_v29 = vsel %vm11107_vm9, %v612_v23, %v7199_v57  ;;  %vm11112_vm9 = vcmask 1039360  }
 0x11f   :  { %v7205_v59 = vpop.permute.xlu0 %710  ;;  %v647_v27 = vpop.permute.xlu1 %646 }
 0x120   :  { %v649_v42 = vsel %vm11073_vm10, %v7201_v58, %v647_v27  ;;  %vm11079_vm10 = vcmask 793600  }
 0x123   :  { %v7207_v60 = vpop.permute.xlu0 %745  ;;  %v678_v39 = vpop.permute.xlu1 %677 }
 0x124   :  { %v682_v46 = vsel %vm11035_vm11, %v678_v39, %v7203_v32  ;;  %vm11041_vm11 = vcmask 662528  }
 0x127   :  { %v7209_v61 = vpop.permute.xlu0 %776  ;;  %v713_v31 = vpop.permute.xlu1 %712 }
 0x12b   :  { %v7211_v33 = vpop.permute.xlu0 %811  ;;  %v744_v52 = vpop.permute.xlu1 %743 }
 0x12f   :  { %v7213_v62 = vpop.permute.xlu0 %842 }
 0x133   :  { %v7215_v63 = vpop.permute.xlu0 %877 }
 0x13e   :  { %v423_v1 = vpop.permute.xlu0 %422 }
 0x13f   :  { %v7218_v3 = vsel %vm11369_vm3, 0.0, %v423_v1 }
 0x140   :  { %v455_v4 = vmul.f32 %v447_v0, %v7218_v3  ;;  %v488_v9 = vmul.f32 %v480_v5, %v7218_v3  ;;  %v521_v10 = vmul.f32 %v513_v54, %v7218_v3  ;;  %v554_v24 = vmul.f32 %v546_v12, %v7218_v3 }
 0x141   :  { %v587_v22 = vmul.f32 %v7197_v56, %v7218_v3  ;;  %v620_v36 = vmul.f32 %v612_v23, %v7218_v3  ;;  %v653_v37 = vmul.f32 %v7201_v58, %v7218_v3  ;;  %v686_v49 = vmul.f32 %v678_v39, %v7218_v3  ;;  %v779_v58 = vpop.permute.xlu1 %778 }
 0x142   :  { %461 = vrot.lane.b32.xlu0 %v455_v4, %s11185_s21  ;;  %v425_v40 = vpop.permute.xlu0 %424  ;;  %v719_v50 = vmul.f32 %v7205_v59, %v7218_v3  ;;  %v715_v54 = vsel %vm10997_vm12, %v7205_v59, %v713_v31  ;;  %v785_v59 = vmul.f32 %v7209_v61, %v7218_v3  ;;  %v781_v4 = vsel %vm10922_vm14, %v7209_v61, %v779_v58 }
 0x143   :  { %v7223_v43 = vsel %vm11369_vm3, %v425_v40, 0.0  ;;  %v7227_v6 = vsel %vm11369_vm3, %v423_v1, %v425_v40  ;;  %v851_v61 = vmul.f32 %v7213_v62, %v7218_v3  ;;  %vm879_vm14 = vcmask 261120  }
 0x144   :  { %v457_v45 = vmul.f32 %v449_v2, %v7223_v43  ;;  %v456_v44 = vmul.f32 %v451_v41, %v7227_v6  ;;  %v489_v48 = vmul.f32 %v484_v7, %v7227_v6  ;;  %v490_v11 = vmul.f32 %v482_v53, %v7223_v43 }
 0x145   :  { %v523_v13 = vmul.f32 %v515_v8, %v7223_v43  ;;  %v522_v16 = vmul.f32 %v517_v14, %v7227_v6  ;;  %v555_v18 = vmul.f32 %v550_v15, %v7227_v6  ;;  %v556_v25 = vmul.f32 %v548_v55, %v7223_v43  ;;  %v810_v1 = vpop.permute.xlu1 %809 }
 0x146   :  { %465 = vrot.lane.b32.xlu0 %v457_v45, %s11185_s21  ;;  %463 = vrot.lane.b32.xlu1 %v456_v44, %s11185_s21  ;;  %v589_v26 = vmul.f32 %v581_v19, %v7223_v43  ;;  %v588_v34 = vmul.f32 %v583_v28, %v7227_v6  ;;  %v621_v35 = vmul.f32 %v616_v29, %v7227_v6  ;;  %vm11003_vm12 = vcmask 531456   ;;  %s8289_s21 = sld [smem:[#allocation12 + $0x101]] }
 0x147   :  { %v622_v38 = vmul.f32 %v7199_v57, %v7223_v43  ;;  %v655_v30 = vmul.f32 %v647_v27, %v7223_v43  ;;  %v654_v47 = vmul.f32 %v649_v42, %v7227_v6  ;;  %v687_v17 = vmul.f32 %v682_v46, %v7227_v6 }
 0x148   :  { %v688_v51 = vmul.f32 %v7203_v32, %v7223_v43  ;;  %v721_v53 = vmul.f32 %v713_v31, %v7223_v43  ;;  %v748_v55 = vsel %vm10926_vm13, %v744_v52, %v7207_v60  ;;  %v720_v56 = vmul.f32 %v715_v54, %v7227_v6 }
 0x149   :  { %v753_v57 = vmul.f32 %v748_v55, %v7227_v6  ;;  %v752_v32 = vmul.f32 %v744_v52, %v7218_v3  ;;  %v754_v0 = vmul.f32 %v7207_v60, %v7223_v43  ;;  %v787_v2 = vmul.f32 %v779_v58, %v7223_v43  ;;  %v845_v60 = vpop.permute.xlu1 %844 }
 0x14a   :  { %496 = vrot.lane.b32.xlu0 %v489_v48, %s11183_s23  ;;  %494 = vrot.lane.b32.xlu1 %v488_v9, %s11183_s23  ;;  %v814_v40 = vsel %vm10921_vm15, %v810_v1, %v7211_v33  ;;  %v786_v45 = vmul.f32 %v781_v4, %v7227_v6  ;;  %v818_v41 = vmul.f32 %v810_v1, %v7218_v3  ;;  %vm10925_vm15 = vcmask 179200  }
 0x14b   :  { %v819_v5 = vmul.f32 %v814_v40, %v7227_v6  ;;  %v820_v7 = vmul.f32 %v7211_v33, %v7223_v43  ;;  %v853_v48 = vmul.f32 %v845_v60, %v7223_v43  ;;  %v847_v8 = vsel %vm10925_vm15, %v7213_v62, %v845_v60 }
 0x14c   :  { %vm10960_vm15 = vcmask 269312   ;;  %vm10931_vm13 = vcmask 277504   ;;  %v886_v15 = vmul.f32 %v7215_v63, %v7223_v43 }
 0x14d   :  { %v876_v44 = vpop.permute.xlu1 %875 }
 0x14e   :  { %527 = vrot.lane.b32.xlu0 %v521_v10, %s11181_s24  ;;  %498 = vrot.lane.b32.xlu1 %v490_v11, %s11183_s23  ;;  %v880_v9 = vsel %vm879_vm14, %v876_v44, %v7215_v63  ;;  %v852_v10 = vmul.f32 %v847_v8, %v7227_v6  ;;  %v909_v11 = vpop.permute.xlu0 %908  ;;  %s8287_s23 = sld [smem:[#allocation12 + $0x81]] }
 0x14f   :  { %v885_v12 = vmul.f32 %v880_v9, %v7227_v6  ;;  %v917_v62 = vmul.f32 %v909_v11, %v7218_v3 }
 0x151   :  { %v911_v33 = vpop.permute.xlu1 %910 }
 0x152   :  { %531 = vrot.lane.b32.xlu0 %v523_v13, %s11181_s24  ;;  %529 = vrot.lane.b32.xlu1 %v522_v16, %s11181_s24  ;;  %v884_v13 = vmul.f32 %v876_v44, %v7218_v3  ;;  %v944_v14 = vpop.permute.xlu0 %943  ;;  %v919_v16 = vmul.f32 %v911_v33, %v7223_v43  ;;  %v913_v19 = vsel %vm10960_vm15, %v909_v11, %v911_v33  ;;  %v1037_v33 = vld [vmem:[#allocation2 + $0x138] sm:$0xff]  ;;  %vm10966_vm15 = vcmask 400384   ;;  %s8277_s24 = sld [smem:[#allocation13 + $0x1]] }
 0x153   :  { %v952_v29 = vmul.f32 %v944_v14, %v7223_v43 }
 0x154   :  { %11606 = sst [smem:[#allocation135_spill]] %s8287_s23 }
 0x156   :  { %562 = vrot.lane.b32.xlu0 %v555_v18, %s11179_s25  ;;  %560 = vrot.lane.b32.xlu1 %v554_v24, %s11179_s25  ;;  %v942_v18 = vpop.permute.xlu1 %941  ;;  %v975_v23 = vpop.permute.xlu0 %974 }
 0x157   :  { %v946_v24 = vsel %vm10931_vm13, %v942_v18, %v944_v14  ;;  %v950_v63 = vmul.f32 %v942_v18, %v7218_v3  ;;  %vm10936_vm13 = vcmask 285696  }
 0x15a   :  { %593 = vrot.lane.b32.xlu0 %v587_v22, %s11177_s26  ;;  %564 = vrot.lane.b32.xlu1 %v556_v25, %s11179_s25  ;;  %v918_v22 = vmul.f32 %v913_v19, %v7227_v6  ;;  %v951_v25 = vmul.f32 %v946_v24, %v7227_v6  ;;  %v977_v28 = vpop.permute.xlu1 %976  ;;  %s8275_s25 = sld [smem:[#allocation12 + $0x180]] }
 0x15e   :  { %597 = vrot.lane.b32.xlu0 %v589_v26, %s11177_s26  ;;  %595 = vrot.lane.b32.xlu1 %v588_v34, %s11177_s26  ;;  %v983_v26 = vmul.f32 %v975_v23, %v7218_v3  ;;  %v985_v34 = vmul.f32 %v977_v28, %v7223_v43  ;;  %s8269_s26 = sld [smem:[#allocation12 + $0x3]] }
 0x160   :  { %11605 = sst [smem:[#allocation134_spill]] %s8275_s25 }
 0x162   :  { %628 = vrot.lane.b32.xlu0 %v621_v35, %s11175_s29  ;;  %626 = vrot.lane.b32.xlu1 %v620_v36, %s11175_s29  ;;  %v979_v35 = vsel %vm10936_vm13, %v975_v23, %v977_v28  ;;  %v1004_v36 = vld [vmem:[#allocation2 + $0x128] sm:$0xff]  ;;  %vm10939_vm13 = vcmask 293888  }
 0x163   :  { %v984_v27 = vmul.f32 %v979_v35, %v7227_v6 }
 0x164   :  { %11604 = sst [smem:[#allocation133_spill]] %s8269_s26 }
 0x166   :  { %659 = vrot.lane.b32.xlu0 %v653_v37, %s11173_s1  ;;  %630 = vrot.lane.b32.xlu1 %v622_v38, %s11175_s29  ;;  %v1008_v37 = vpop.permute.xlu1 %1007  ;;  %s8267_s29 = sld [smem:[#allocation12 + $0x100]] }
 0x167   :  { %v1016_v38 = vmul.f32 %v1008_v37, %v7218_v3 }
 0x16a   :  { %663 = vrot.lane.b32.xlu0 %v655_v30, %s11173_s1  ;;  %661 = vrot.lane.b32.xlu1 %v654_v47, %s11173_s1  ;;  %s8257_s1 = sld [smem:[#allocation12 + $0x2]] }
 0x16e   :  { %694 = vrot.lane.b32.xlu0 %v687_v17, %s11171_s6  ;;  %692 = vrot.lane.b32.xlu1 %v686_v49, %s11171_s6 }
 0x170   :  { %11603 = sst [smem:[#allocation132_spill]] %s8257_s1 }
 0x172   :  { %725 = vrot.lane.b32.xlu0 %v719_v50, %s11169_s9  ;;  %696 = vrot.lane.b32.xlu1 %v688_v51, %s11171_s6  ;;  %s8255_s6 = sld [smem:[#allocation12 + $0x1]] }
 0x176   :  { %729 = vrot.lane.b32.xlu0 %v721_v53, %s11169_s9  ;;  %727 = vrot.lane.b32.xlu1 %v720_v56, %s11169_s9  ;;  %s8249_s9 = sld [smem:[#allocation12 + $0x80]] }
 0x178   :  { %11602 = sst [smem:[#allocation131_spill]] %s8255_s6 }
 0x17a   :  { %760 = vrot.lane.b32.xlu0 %v753_v57, %s11165_s14  ;;  %758 = vrot.lane.b32.xlu1 %v752_v32, %s11165_s14 }
 0x17c   :  { %11601 = sst [smem:[#allocation130_spill]] %s8249_s9 }
 0x17e   :  { %791 = vrot.lane.b32.xlu0 %v785_v59, %s10932_s16  ;;  %762 = vrot.lane.b32.xlu1 %v754_v0, %s11165_s14  ;;  %s8245_s14 = sld [smem:[#allocation13]] }
 0x182   :  { %795 = vrot.lane.b32.xlu0 %v787_v2, %s10932_s16  ;;  %793 = vrot.lane.b32.xlu1 %v786_v45, %s10932_s16  ;;  %s10949_s16 = smov 93  }
 0x184   :  { %11599 = sst [smem:[#allocation128_spill]] %s8245_s14 }
 0x186   :  { %826 = vrot.lane.b32.xlu0 %v819_v5, %s10927_s15  ;;  %824 = vrot.lane.b32.xlu1 %v818_v41, %s10927_s15 }
 0x18a   :  { %857 = vrot.lane.b32.xlu0 %v851_v61, %s10929_s28  ;;  %828 = vrot.lane.b32.xlu1 %v820_v7, %s10927_s15  ;;  %s10934_s15 = smov 95  }
 0x18e   :  { %861 = vrot.lane.b32.xlu0 %v853_v48, %s10929_s28  ;;  %859 = vrot.lane.b32.xlu1 %v852_v10, %s10929_s28  ;;  %s10961_s28 = smov 94  }
 0x192   :  { %892 = vrot.lane.b32.xlu0 %v885_v12, %s11161_s27  ;;  %890 = vrot.lane.b32.xlu1 %v884_v13, %s11161_s27 }
 0x196   :  { %923 = vrot.lane.b32.xlu0 %v917_v62, %s10934_s15  ;;  %894 = vrot.lane.b32.xlu1 %v886_v15, %s11161_s27  ;;  %v1036_v62 = vld [vmem:[#allocation2 + $0x130] sm:$0xff] }
 0x19a   :  { %927 = vrot.lane.b32.xlu0 %v919_v16, %s10934_s15  ;;  %925 = vrot.lane.b32.xlu1 %v918_v22, %s10934_s15  ;;  %s10946_s15 = smov 92  }
 0x19e   :  { %958 = vrot.lane.b32.xlu0 %v951_v25, %s10961_s28  ;;  %956 = vrot.lane.b32.xlu1 %v950_v63, %s10961_s28 }
 0x1a2   :  { %989 = vrot.lane.b32.xlu0 %v983_v26, %s10949_s16  ;;  %960 = vrot.lane.b32.xlu1 %v952_v29, %s10961_s28  ;;  %s10968_s28 = smov 79  }
 0x1a6   :  { %993 = vrot.lane.b32.xlu0 %v985_v34, %s10949_s16  ;;  %991 = vrot.lane.b32.xlu1 %v984_v27, %s10949_s16  ;;  %s10956_s16 = smov 90  }
 0x1aa   :  { %1009 = vrot.lane.b32.xlu0 %v1004_v36, %s10937_s20  ;;  %1022 = vrot.lane.b32.xlu1 %v1016_v38, %s10946_s15  ;;  %s10940_s20 = smov 37  }
 0x1b4   :  { %v7368_v39 = vpop.permute.xlu0 %461 }
 0x1b8   :  { %v7370_v30 = vpop.permute.xlu0 %465  ;;  %v7402_v32 = vpop.permute.xlu1 %463 }
 0x1bc   :  { %v7372_v42 = vpop.permute.xlu0 %496  ;;  %v7408_v1 = vpop.permute.xlu1 %494 }
 0x1c0   :  { %v7374_v46 = vpop.permute.xlu0 %527  ;;  %v7412_v4 = vpop.permute.xlu1 %498 }
 0x1c4   :  { %v7376_v47 = vpop.permute.xlu0 %531  ;;  %v7418_v5 = vpop.permute.xlu1 %529 }
 0x1c8   :  { %v7378_v17 = vpop.permute.xlu0 %562  ;;  %v7422_v41 = vpop.permute.xlu1 %560 }
 0x1cc   :  { %v7380_v31 = vpop.permute.xlu0 %593  ;;  %v7428_v44 = vpop.permute.xlu1 %564 }
 0x1d0   :  { %v7382_v49 = vpop.permute.xlu0 %597  ;;  %v7432_v8 = vpop.permute.xlu1 %595 }
 0x1d4   :  { %v7384_v50 = vpop.permute.xlu0 %628  ;;  %v7439_v13 = vpop.permute.xlu1 %626 }
 0x1d8   :  { %v7386_v51 = vpop.permute.xlu0 %659  ;;  %v7443_v14 = vpop.permute.xlu1 %630 }
 0x1dc   :  { %v7388_v52 = vpop.permute.xlu0 %663  ;;  %v7445_v15 = vpop.permute.xlu1 %661 }
 0x1e0   :  { %v7390_v53 = vpop.permute.xlu0 %694  ;;  %v7447_v16 = vpop.permute.xlu1 %692 }
 0x1e4   :  { %v7392_v54 = vpop.permute.xlu0 %725  ;;  %v7449_v18 = vpop.permute.xlu1 %696 }
 0x1e8   :  { %v7394_v55 = vpop.permute.xlu0 %729  ;;  %v7451_v19 = vpop.permute.xlu1 %727 }
 0x1ec   :  { %v7396_v56 = vpop.permute.xlu0 %760  ;;  %v7453_v24 = vpop.permute.xlu1 %758 }
 0x1f0   :  { %v7398_v57 = vpop.permute.xlu0 %791  ;;  %v7455_v22 = vpop.permute.xlu1 %762 }
 0x1f4   :  { %v7400_v58 = vpop.permute.xlu0 %795  ;;  %v7457_v25 = vpop.permute.xlu1 %793 }
 0x1f8   :  { %v7404_v59 = vpop.permute.xlu0 %826  ;;  %v7459_v23 = vpop.permute.xlu1 %824 }
 0x1fc   :  { %v7406_v0 = vpop.permute.xlu0 %857  ;;  %v7461_v63 = vpop.permute.xlu1 %828 }
 0x200   :  { %v7410_v2 = vpop.permute.xlu0 %861  ;;  %v7463_v26 = vpop.permute.xlu1 %859 }
 0x204   :  { %v7414_v40 = vpop.permute.xlu0 %892  ;;  %v7465_v28 = vpop.permute.xlu1 %890 }
 0x208   :  { %v7416_v45 = vpop.permute.xlu0 %923  ;;  %v7467_v29 = vpop.permute.xlu1 %894 }
 0x20c   :  { %v7420_v60 = vpop.permute.xlu0 %927  ;;  %v7469_v34 = vpop.permute.xlu1 %925 }
 0x210   :  { %v7424_v61 = vpop.permute.xlu0 %958  ;;  %v7471_v35 = vpop.permute.xlu1 %956 }
 0x214   :  { %v7426_v7 = vpop.permute.xlu0 %989  ;;  %v7473_v27 = vpop.permute.xlu1 %960 }
 0x215   :  { %11405 = vst [vmem:[#allocation28_spill] sm:$0xff] %v7426_v7  ;;  %v434_v7 = vld [vmem:[#allocation6 + $0x8] sm:$0xff] }
 0x218   :  { %v7430_v48 = vpop.permute.xlu0 %993  ;;  %v7475_v36 = vpop.permute.xlu1 %991 }
 0x219   :  { %11406 = vst [vmem:[#allocation29_spill] sm:$0xff] %v7430_v48  ;;  %v433_v48 = vld [vmem:[#allocation6] sm:$0xff] }
 0x21c   :  { %v1010_v9 = vpop.permute.xlu0 %1009 }
 0x21d   :  { %v1012_v10 = vsel %vm10939_vm13, %v1008_v37, %v1010_v9  ;;  %v1018_v11 = vmul.f32 %v1010_v9, %v7223_v43  ;;  %v7477_v37 = vpop.permute.xlu1 %1022  ;;  %vm10948_vm13 = vcmask 302080  }
 0x21e   :  { %v1017_v12 = vmul.f32 %v1012_v10, %v7227_v6  ;;  %11407 = vst [vmem:[#allocation30_spill] sm:$0xff] %v7477_v37 }
 0x21f   :  { %1026 = vrot.lane.b32.xlu1 %v1018_v11, %s10946_s15 }
 0x220   :  { %1024 = vrot.lane.b32.xlu0 %v1017_v12, %s10946_s15  ;;  %s10951_s15 = smov 38  }
 0x223   :  { %1042 = vrot.lane.b32.xlu1 %v1037_v33, %s10940_s20 }
 0x224   :  { %1040 = vrot.lane.b32.xlu0 %v1036_v62, %s10940_s20  ;;  %s10958_s20 = smov 91  }
 0x291   :  { %v7479_v38 = vpop.permute.xlu1 %1026 }
 0x292   :  { %11408 = vst [vmem:[#allocation31_spill] sm:$0xff] %v7479_v38  ;;  %v7481_v9 = vpop.permute.xlu0 %1024  ;;  %v1070_v38 = vld [vmem:[#allocation2 + $0x148] sm:$0xff] }
 0x293   :  { %11409 = vst [vmem:[#allocation32_spill] sm:$0xff] %v7481_v9 }
 0x295   :  { %v1043_v10 = vpop.permute.xlu1 %1042 }
 0x296   :  { %v1041_v11 = vpop.permute.xlu0 %1040  ;;  %v1051_v20 = vmul.f32 %v1043_v10, %v7223_v43 }
 0x297   :  { %v1045_v12 = vsel %vm10948_vm13, %v1041_v11, %v1043_v10  ;;  %v1049_v33 = vmul.f32 %v1041_v11, %v7218_v3  ;;  %vm10954_vm13 = vcmask 310272  }
 0x298   :  { %v1050_v62 = vmul.f32 %v1045_v12, %v7227_v6 }
 0x299   :  { %1055 = vrot.lane.b32.xlu0 %v1049_v33, %s10958_s20 }
 0x29a   :  { %1057 = vrot.lane.b32.xlu1 %v1050_v62, %s10958_s20 }
 0x29d   :  { %1059 = vrot.lane.b32.xlu0 %v1051_v20, %s10958_s20  ;;  %s10963_s20 = smov 49  }
 0x29e   :  { %1073 = vrot.lane.b32.xlu1 %v1069_v21, %s10951_s15 }
 0x2a1   :  { %1075 = vrot.lane.b32.xlu0 %v1070_v38, %s10951_s15  ;;  %s11159_s15 = smov 48  }
 0x30b   :  { %v7492_v37 = vpop.permute.xlu0 %1055 }
 0x30c   :  { %11410 = vst [vmem:[#allocation33_spill] sm:$0xff] %v7492_v37  ;;  %v7494_v11 = vpop.permute.xlu1 %1057  ;;  %v1103_v37 = vld [vmem:[#allocation2 + $0x158] sm:$0xff] }
 0x30d   :  { %11411 = vst [vmem:[#allocation34_spill] sm:$0xff] %v7494_v11 }
 0x30f   :  { %v7496_v12 = vpop.permute.xlu0 %1059 }
 0x310   :  { %11412 = vst [vmem:[#allocation35_spill] sm:$0xff] %v7496_v12  ;;  %v1074_v33 = vpop.permute.xlu1 %1073  ;;  %v1102_v12 = vld [vmem:[#allocation2 + $0x150] sm:$0xff] }
 0x311   :  { %v1082_v62 = vmul.f32 %v1074_v33, %v7218_v3 }
 0x313   :  { %v1076_v10 = vpop.permute.xlu0 %1075  ;;  %1088 = vrot.lane.b32.xlu1 %v1082_v62, %s10956_s16 }
 0x314   :  { %v1078_v20 = vsel %vm10954_vm13, %v1074_v33, %v1076_v10  ;;  %v1084_v21 = vmul.f32 %v1076_v10, %v7223_v43  ;;  %vm1110_vm13 = vcmask 392192  }
 0x315   :  { %v1083_v38 = vmul.f32 %v1078_v20, %v7227_v6 }
 0x317   :  { %1092 = vrot.lane.b32.xlu1 %v1084_v21, %s10956_s16  ;;  %1090 = vrot.lane.b32.xlu0 %v1083_v38, %s10956_s16  ;;  %s11157_s16 = smov 80  }
 0x31b   :  { %1108 = vrot.lane.b32.xlu1 %v1103_v37, %s11159_s15  ;;  %1106 = vrot.lane.b32.xlu0 %v1102_v12, %s11159_s15  ;;  %v1135_v12 = vld [vmem:[#allocation2 + $0x160] sm:$0xff] }
 0x385   :  { %v7507_v11 = vpop.permute.xlu1 %1088 }
 0x386   :  { %11413 = vst [vmem:[#allocation36_spill] sm:$0xff] %v7507_v11 }
 0x389   :  { %v7509_v62 = vpop.permute.xlu1 %1092  ;;  %v7511_v33 = vpop.permute.xlu0 %1090 }
 0x38a   :  { %11414 = vst [vmem:[#allocation37_spill] sm:$0xff] %v7509_v62  ;;  %11415 = vst [vmem:[#allocation38_spill] sm:$0xff] %v7511_v33  ;;  %v1136_v62 = vld [vmem:[#allocation2 + $0x168] sm:$0xff] }
 0x38d   :  { %v1109_v10 = vpop.permute.xlu1 %1108  ;;  %v1107_v20 = vpop.permute.xlu0 %1106 }
 0x38e   :  { %v1111_v21 = vsel %vm1110_vm13, %v1107_v20, %v1109_v10  ;;  %v1115_v38 = vmul.f32 %v1107_v20, %v7218_v3  ;;  %v1117_v37 = vmul.f32 %v1109_v10, %v7223_v43 }
 0x38f   :  { %v1116_v9 = vmul.f32 %v1111_v21, %v7227_v6 }
 0x390   :  { %1121 = vrot.lane.b32.xlu0 %v1115_v38, %s11157_s16 }
 0x391   :  { %1123 = vrot.lane.b32.xlu1 %v1116_v9, %s11157_s16 }
 0x394   :  { %1125 = vrot.lane.b32.xlu0 %v1117_v37, %s11157_s16 }
 0x395   :  { %1139 = vrot.lane.b32.xlu1 %v1135_v12, %s10963_s20 }
 0x398   :  { %1141 = vrot.lane.b32.xlu0 %v1136_v62, %s10963_s20  ;;  %s10971_s20 = smov 50  }
 0x402   :  { %v7522_v11 = vpop.permute.xlu0 %1121 }
 0x403   :  { %11416 = vst [vmem:[#allocation39_spill] sm:$0xff] %v7522_v11  ;;  %v7524_v20 = vpop.permute.xlu1 %1123  ;;  %v1169_v11 = vld [vmem:[#allocation2 + $0x178] sm:$0xff] }
 0x404   :  { %11417 = vst [vmem:[#allocation40_spill] sm:$0xff] %v7524_v20 }
 0x406   :  { %v7526_v21 = vpop.permute.xlu0 %1125 }
 0x407   :  { %11418 = vst [vmem:[#allocation41_spill] sm:$0xff] %v7526_v21  ;;  %v1140_v38 = vpop.permute.xlu1 %1139  ;;  %v1168_v21 = vld [vmem:[#allocation2 + $0x170] sm:$0xff] }
 0x408   :  { %v1148_v9 = vmul.f32 %v1140_v38, %v7218_v3 }
 0x40a   :  { %v1142_v10 = vpop.permute.xlu0 %1141  ;;  %1154 = vrot.lane.b32.xlu1 %v1148_v9, %s10968_s28 }
 0x40b   :  { %v1144_v37 = vsel %vm10966_vm15, %v1140_v38, %v1142_v10  ;;  %v1150_v12 = vmul.f32 %v1142_v10, %v7223_v43  ;;  %vm10975_vm15 = vcmask 408576  }
 0x40c   :  { %v1149_v62 = vmul.f32 %v1144_v37, %v7227_v6 }
 0x40e   :  { %1158 = vrot.lane.b32.xlu1 %v1150_v12, %s10968_s28  ;;  %1156 = vrot.lane.b32.xlu0 %v1149_v62, %s10968_s28  ;;  %s10973_s28 = smov 78  }
 0x412   :  { %1174 = vrot.lane.b32.xlu1 %v1169_v11, %s10971_s20  ;;  %1172 = vrot.lane.b32.xlu0 %v1168_v21, %s10971_s20  ;;  %v1201_v21 = vld [vmem:[#allocation2 + $0x180] sm:$0xff]  ;;  %s10977_s20 = smov 77  }
 0x47c   :  { %v7537_v20 = vpop.permute.xlu1 %1154 }
 0x47d   :  { %11419 = vst [vmem:[#allocation42_spill] sm:$0xff] %v7537_v20 }
 0x480   :  { %v7539_v9 = vpop.permute.xlu1 %1158  ;;  %v7541_v38 = vpop.permute.xlu0 %1156 }
 0x481   :  { %11420 = vst [vmem:[#allocation43_spill] sm:$0xff] %v7539_v9  ;;  %11421 = vst [vmem:[#allocation44_spill] sm:$0xff] %v7541_v38  ;;  %v1202_v9 = vld [vmem:[#allocation2 + $0x188] sm:$0xff] }
 0x484   :  { %v1175_v10 = vpop.permute.xlu1 %1174  ;;  %v1173_v37 = vpop.permute.xlu0 %1172 }
 0x485   :  { %v1177_v12 = vsel %vm10975_vm15, %v1173_v37, %v1175_v10  ;;  %v1181_v62 = vmul.f32 %v1173_v37, %v7218_v3  ;;  %v1183_v11 = vmul.f32 %v1175_v10, %v7223_v43  ;;  %vm10981_vm15 = vcmask 424960  }
 0x486   :  { %v1182_v33 = vmul.f32 %v1177_v12, %v7227_v6 }
 0x487   :  { %1187 = vrot.lane.b32.xlu0 %v1181_v62, %s10973_s28 }
 0x488   :  { %1189 = vrot.lane.b32.xlu1 %v1182_v33, %s10973_s28 }
 0x48b   :  { %1191 = vrot.lane.b32.xlu0 %v1183_v11, %s10973_s28  ;;  %s10979_s28 = smov 52  }
 0x48c   :  { %1205 = vrot.lane.b32.xlu1 %v1201_v21, %s11205_s19 }
 0x48f   :  { %1207 = vrot.lane.b32.xlu0 %v1202_v9, %s11205_s19  ;;  %v1234_v9 = vld [vmem:[#allocation2 + $0x198] sm:$0xff]  ;;  %s8313_s19 = sld [smem:[#allocation13 + $0x80]] }
 0x495   :  { %11612 = sst [smem:[#allocation141_spill]] %s8313_s19  ;;  %s8327_s19 = sld [smem:[#allocation12 + $0x281]] }
 0x4f9   :  { %v7552_v20 = vpop.permute.xlu0 %1187 }
 0x4fa   :  { %11422 = vst [vmem:[#allocation45_spill] sm:$0xff] %v7552_v20  ;;  %v7554_v37 = vpop.permute.xlu1 %1189  ;;  %v1233_v20 = vld [vmem:[#allocation2 + $0x190] sm:$0xff] }
 0x4fb   :  { %11423 = vst [vmem:[#allocation46_spill] sm:$0xff] %v7554_v37 }
 0x4fd   :  { %v7556_v12 = vpop.permute.xlu0 %1191 }
 0x4fe   :  { %11424 = vst [vmem:[#allocation47_spill] sm:$0xff] %v7556_v12  ;;  %v1206_v38 = vpop.permute.xlu1 %1205 }
 0x4ff   :  { %v1213_v62 = vmul.f32 %v1206_v38, %v7218_v3 }
 0x501   :  { %v1208_v33 = vpop.permute.xlu0 %1207  ;;  %1219 = vrot.lane.b32.xlu1 %v1213_v62, %s10977_s20 }
 0x502   :  { %v1209_v10 = vsel %vm11369_vm3, %v1206_v38, %v1208_v33  ;;  %v1215_v11 = vmul.f32 %v1208_v33, %v7223_v43 }
 0x503   :  { %v1214_v21 = vmul.f32 %v1209_v10, %v7227_v6 }
 0x505   :  { %1223 = vrot.lane.b32.xlu1 %v1215_v11, %s10977_s20  ;;  %1221 = vrot.lane.b32.xlu0 %v1214_v21, %s10977_s20  ;;  %s11004_s20 = smov 76  }
 0x509   :  { %1239 = vrot.lane.b32.xlu1 %v1234_v9, %s10979_s28  ;;  %1237 = vrot.lane.b32.xlu0 %v1233_v20, %s10979_s28  ;;  %v1266_v9 = vld [vmem:[#allocation2 + $0x1a0] sm:$0xff]  ;;  %s10984_s28 = smov 53  }
 0x573   :  { %v7567_v12 = vpop.permute.xlu1 %1219 }
 0x574   :  { %11425 = vst [vmem:[#allocation48_spill] sm:$0xff] %v7567_v12 }
 0x577   :  { %v7569_v62 = vpop.permute.xlu1 %1223  ;;  %v7571_v38 = vpop.permute.xlu0 %1221 }
 0x578   :  { %11426 = vst [vmem:[#allocation49_spill] sm:$0xff] %v7569_v62  ;;  %11427 = vst [vmem:[#allocation50_spill] sm:$0xff] %v7571_v38  ;;  %v1267_v62 = vld [vmem:[#allocation2 + $0x1a8] sm:$0xff] }
 0x57b   :  { %v1240_v33 = vpop.permute.xlu1 %1239  ;;  %v1238_v10 = vpop.permute.xlu0 %1237 }
 0x57c   :  { %v1242_v11 = vsel %vm10981_vm15, %v1238_v10, %v1240_v33  ;;  %v1246_v21 = vmul.f32 %v1238_v10, %v7218_v3  ;;  %v1248_v20 = vmul.f32 %v1240_v33, %v7223_v43  ;;  %vm10987_vm15 = vcmask 433152  }
 0x57d   :  { %v1247_v37 = vmul.f32 %v1242_v11, %v7227_v6 }
 0x57e   :  { %1252 = vrot.lane.b32.xlu0 %v1246_v21, %s11004_s20 }
 0x57f   :  { %1254 = vrot.lane.b32.xlu1 %v1247_v37, %s11004_s20 }
 0x582   :  { %1256 = vrot.lane.b32.xlu0 %v1248_v20, %s11004_s20  ;;  %s11011_s20 = smov 62  }
 0x583   :  { %1270 = vrot.lane.b32.xlu1 %v1266_v9, %s10984_s28 }
 0x586   :  { %1272 = vrot.lane.b32.xlu0 %v1267_v62, %s10984_s28  ;;  %s10991_s28 = smov 54  }
 0x5f0   :  { %v7582_v12 = vpop.permute.xlu0 %1252 }
 0x5f1   :  { %11428 = vst [vmem:[#allocation51_spill] sm:$0xff] %v7582_v12  ;;  %v7584_v10 = vpop.permute.xlu1 %1254  ;;  %v1300_v12 = vld [vmem:[#allocation2 + $0x1b8] sm:$0xff] }
 0x5f2   :  { %11429 = vst [vmem:[#allocation52_spill] sm:$0xff] %v7584_v10 }
 0x5f4   :  { %v7586_v11 = vpop.permute.xlu0 %1256 }
 0x5f5   :  { %11430 = vst [vmem:[#allocation53_spill] sm:$0xff] %v7586_v11  ;;  %v1271_v21 = vpop.permute.xlu1 %1270  ;;  %v1299_v11 = vld [vmem:[#allocation2 + $0x1b0] sm:$0xff] }
 0x5f6   :  { %v1279_v37 = vmul.f32 %v1271_v21, %v7218_v3 }
 0x5f8   :  { %v1273_v33 = vpop.permute.xlu0 %1272  ;;  %1285 = vrot.lane.b32.xlu1 %v1279_v37, %s10989_s12 }
 0x5f9   :  { %v1275_v20 = vsel %vm10987_vm15, %v1271_v21, %v1273_v33  ;;  %v1281_v9 = vmul.f32 %v1273_v33, %v7223_v43  ;;  %vm10993_vm15 = vcmask 441344  }
 0x5fa   :  { %v1280_v62 = vmul.f32 %v1275_v20, %v7227_v6 }
 0x5fc   :  { %1289 = vrot.lane.b32.xlu1 %v1281_v9, %s10989_s12  ;;  %1287 = vrot.lane.b32.xlu0 %v1280_v62, %s10989_s12  ;;  %s10995_s12 = smov 74  }
 0x600   :  { %1305 = vrot.lane.b32.xlu1 %v1300_v12, %s10991_s28  ;;  %1303 = vrot.lane.b32.xlu0 %v1299_v11, %s10991_s28  ;;  %v1332_v11 = vld [vmem:[#allocation2 + $0x1c0] sm:$0xff]  ;;  %s10999_s28 = smov 64  }
 0x66a   :  { %v7597_v10 = vpop.permute.xlu1 %1285 }
 0x66b   :  { %11431 = vst [vmem:[#allocation54_spill] sm:$0xff] %v7597_v10 }
 0x66e   :  { %v7599_v37 = vpop.permute.xlu1 %1289  ;;  %v7601_v21 = vpop.permute.xlu0 %1287 }
 0x66f   :  { %11432 = vst [vmem:[#allocation55_spill] sm:$0xff] %v7599_v37  ;;  %11433 = vst [vmem:[#allocation56_spill] sm:$0xff] %v7601_v21  ;;  %v1333_v37 = vld [vmem:[#allocation2 + $0x1c8] sm:$0xff] }
 0x672   :  { %v1306_v33 = vpop.permute.xlu1 %1305  ;;  %v1304_v20 = vpop.permute.xlu0 %1303 }
 0x673   :  { %v1308_v9 = vsel %vm10993_vm15, %v1304_v20, %v1306_v33  ;;  %v1312_v62 = vmul.f32 %v1304_v20, %v7218_v3  ;;  %v1314_v12 = vmul.f32 %v1306_v33, %v7223_v43  ;;  %vm1340_vm15 = vcmask 523264  }
 0x674   :  { %v1313_v38 = vmul.f32 %v1308_v9, %v7227_v6 }
 0x675   :  { %1318 = vrot.lane.b32.xlu0 %v1312_v62, %s10995_s12 }
 0x676   :  { %1320 = vrot.lane.b32.xlu1 %v1313_v38, %s10995_s12 }
 0x679   :  { %1322 = vrot.lane.b32.xlu0 %v1314_v12, %s10995_s12  ;;  %s11001_s12 = smov 65  }
 0x67a   :  { %1336 = vrot.lane.b32.xlu1 %v1332_v11, %s10999_s28 }
 0x67d   :  { %1338 = vrot.lane.b32.xlu0 %v1333_v37, %s10999_s28  ;;  %v1365_v37 = vld [vmem:[#allocation2 + $0x1d8] sm:$0xff] }
 0x6e7   :  { %v7612_v10 = vpop.permute.xlu0 %1318 }
 0x6e8   :  { %11434 = vst [vmem:[#allocation57_spill] sm:$0xff] %v7612_v10  ;;  %v7614_v20 = vpop.permute.xlu1 %1320  ;;  %v1364_v10 = vld [vmem:[#allocation2 + $0x1d0] sm:$0xff] }
 0x6e9   :  { %11435 = vst [vmem:[#allocation58_spill] sm:$0xff] %v7614_v20 }
 0x6eb   :  { %v7616_v9 = vpop.permute.xlu0 %1322 }
 0x6ec   :  { %11436 = vst [vmem:[#allocation59_spill] sm:$0xff] %v7616_v9  ;;  %v1337_v62 = vpop.permute.xlu1 %1336 }
 0x6ed   :  { %v1345_v38 = vmul.f32 %v1337_v62, %v7218_v3 }
 0x6ef   :  { %v1339_v33 = vpop.permute.xlu0 %1338  ;;  %1351 = vrot.lane.b32.xlu1 %v1345_v38, %s10999_s28 }
 0x6f0   :  { %v1341_v12 = vsel %vm1340_vm15, %v1337_v62, %v1339_v33  ;;  %v1347_v11 = vmul.f32 %v1339_v33, %v7223_v43 }
 0x6f1   :  { %v1346_v21 = vmul.f32 %v1341_v12, %v7227_v6 }
 0x6f3   :  { %1355 = vrot.lane.b32.xlu1 %v1347_v11, %s10999_s28  ;;  %1353 = vrot.lane.b32.xlu0 %v1346_v21, %s10999_s28  ;;  %s11016_s28 = smov 63  }
 0x6f7   :  { %1370 = vrot.lane.b32.xlu1 %v1365_v37, %s11001_s12  ;;  %1368 = vrot.lane.b32.xlu0 %v1364_v10, %s11001_s12  ;;  %v1397_v37 = vld [vmem:[#allocation2 + $0x1e0] sm:$0xff]  ;;  %s11006_s12 = smov 66  }
 0x761   :  { %v7627_v9 = vpop.permute.xlu1 %1351 }
 0x762   :  { %11437 = vst [vmem:[#allocation60_spill] sm:$0xff] %v7627_v9 }
 0x765   :  { %v7629_v38 = vpop.permute.xlu1 %1355  ;;  %v7631_v62 = vpop.permute.xlu0 %1353 }
 0x766   :  { %11438 = vst [vmem:[#allocation61_spill] sm:$0xff] %v7629_v38  ;;  %11439 = vst [vmem:[#allocation62_spill] sm:$0xff] %v7631_v62  ;;  %v1398_v38 = vld [vmem:[#allocation2 + $0x1e8] sm:$0xff] }
 0x769   :  { %v1371_v33 = vpop.permute.xlu1 %1370  ;;  %v1369_v12 = vpop.permute.xlu0 %1368 }
 0x76a   :  { %v1373_v11 = vsel %vm11003_vm12, %v1369_v12, %v1371_v33  ;;  %v1377_v21 = vmul.f32 %v1369_v12, %v7218_v3  ;;  %v1379_v10 = vmul.f32 %v1371_v33, %v7223_v43  ;;  %vm11009_vm12 = vcmask 539648  }
 0x76b   :  { %v1378_v20 = vmul.f32 %v1373_v11, %v7227_v6 }
 0x76c   :  { %1383 = vrot.lane.b32.xlu0 %v1377_v21, %s11016_s28 }
 0x76d   :  { %1385 = vrot.lane.b32.xlu1 %v1378_v20, %s11016_s28 }
 0x770   :  { %1387 = vrot.lane.b32.xlu0 %v1379_v10, %s11016_s28  ;;  %s11023_s28 = smov 60  }
 0x771   :  { %1401 = vrot.lane.b32.xlu1 %v1397_v37, %s11006_s12 }
 0x774   :  { %1403 = vrot.lane.b32.xlu0 %v1398_v38, %s11006_s12  ;;  %s11013_s12 = smov 67  }
 0x7de   :  { %v7642_v9 = vpop.permute.xlu0 %1383 }
 0x7df   :  { %11440 = vst [vmem:[#allocation63_spill] sm:$0xff] %v7642_v9  ;;  %v7644_v12 = vpop.permute.xlu1 %1385  ;;  %v1431_v9 = vld [vmem:[#allocation2 + $0x1f8] sm:$0xff] }
 0x7e0   :  { %11441 = vst [vmem:[#allocation64_spill] sm:$0xff] %v7644_v12 }
 0x7e2   :  { %v7646_v11 = vpop.permute.xlu0 %1387 }
 0x7e3   :  { %11442 = vst [vmem:[#allocation65_spill] sm:$0xff] %v7646_v11  ;;  %v1402_v21 = vpop.permute.xlu1 %1401  ;;  %v1430_v11 = vld [vmem:[#allocation2 + $0x1f0] sm:$0xff] }
 0x7e4   :  { %v1410_v20 = vmul.f32 %v1402_v21, %v7218_v3 }
 0x7e6   :  { %v1404_v33 = vpop.permute.xlu0 %1403  ;;  %1416 = vrot.lane.b32.xlu1 %v1410_v20, %s11011_s20 }
 0x7e7   :  { %v1406_v10 = vsel %vm11009_vm12, %v1402_v21, %v1404_v33  ;;  %v1412_v37 = vmul.f32 %v1404_v33, %v7223_v43  ;;  %vm11015_vm12 = vcmask 547840  }
 0x7e8   :  { %v1411_v38 = vmul.f32 %v1406_v10, %v7227_v6 }
 0x7ea   :  { %1420 = vrot.lane.b32.xlu1 %v1412_v37, %s11011_s20  ;;  %1418 = vrot.lane.b32.xlu0 %v1411_v38, %s11011_s20  ;;  %s11028_s20 = smov 61  }
 0x7ee   :  { %1436 = vrot.lane.b32.xlu1 %v1431_v9, %s11013_s12  ;;  %1434 = vrot.lane.b32.xlu0 %v1430_v11, %s11013_s12  ;;  %v1463_v11 = vld [vmem:[#allocation2 + $0x200] sm:$0xff]  ;;  %s11018_s12 = smov 68  }
 0x858   :  { %v7657_v12 = vpop.permute.xlu1 %1416 }
 0x859   :  { %11443 = vst [vmem:[#allocation66_spill] sm:$0xff] %v7657_v12 }
 0x85c   :  { %v7659_v20 = vpop.permute.xlu1 %1420  ;;  %v7661_v21 = vpop.permute.xlu0 %1418 }
 0x85d   :  { %11444 = vst [vmem:[#allocation67_spill] sm:$0xff] %v7659_v20  ;;  %11445 = vst [vmem:[#allocation68_spill] sm:$0xff] %v7661_v21  ;;  %v1464_v20 = vld [vmem:[#allocation2 + $0x208] sm:$0xff] }
 0x860   :  { %v1437_v33 = vpop.permute.xlu1 %1436  ;;  %v1435_v10 = vpop.permute.xlu0 %1434 }
 0x861   :  { %v1439_v37 = vsel %vm11015_vm12, %v1435_v10, %v1437_v33  ;;  %v1443_v38 = vmul.f32 %v1435_v10, %v7218_v3  ;;  %v1445_v9 = vmul.f32 %v1437_v33, %v7223_v43  ;;  %vm11021_vm12 = vcmask 556032  }
 0x862   :  { %v1444_v62 = vmul.f32 %v1439_v37, %v7227_v6 }
 0x863   :  { %1449 = vrot.lane.b32.xlu0 %v1443_v38, %s11028_s20 }
 0x864   :  { %1451 = vrot.lane.b32.xlu1 %v1444_v62, %s11028_s20 }
 0x867   :  { %1453 = vrot.lane.b32.xlu0 %v1445_v9, %s11028_s20  ;;  %s11033_s20 = smov 58  }
 0x868   :  { %1467 = vrot.lane.b32.xlu1 %v1463_v11, %s11018_s12 }
 0x86b   :  { %1469 = vrot.lane.b32.xlu0 %v1464_v20, %s11018_s12  ;;  %s11025_s12 = smov 69  }
 0x8d5   :  { %v7672_v12 = vpop.permute.xlu0 %1449 }
 0x8d6   :  { %11446 = vst [vmem:[#allocation69_spill] sm:$0xff] %v7672_v12  ;;  %v7674_v10 = vpop.permute.xlu1 %1451  ;;  %v1497_v12 = vld [vmem:[#allocation2 + $0x218] sm:$0xff] }
 0x8d7   :  { %11447 = vst [vmem:[#allocation70_spill] sm:$0xff] %v7674_v10 }
 0x8d9   :  { %v7676_v37 = vpop.permute.xlu0 %1453 }
 0x8da   :  { %11448 = vst [vmem:[#allocation71_spill] sm:$0xff] %v7676_v37  ;;  %v1468_v38 = vpop.permute.xlu1 %1467  ;;  %v1496_v37 = vld [vmem:[#allocation2 + $0x210] sm:$0xff] }
 0x8db   :  { %v1476_v62 = vmul.f32 %v1468_v38, %v7218_v3 }
 0x8dd   :  { %v1470_v33 = vpop.permute.xlu0 %1469  ;;  %1482 = vrot.lane.b32.xlu1 %v1476_v62, %s11023_s28 }
 0x8de   :  { %v1472_v9 = vsel %vm11021_vm12, %v1468_v38, %v1470_v33  ;;  %v1478_v11 = vmul.f32 %v1470_v33, %v7223_v43  ;;  %vm11027_vm12 = vcmask 564224  }
 0x8df   :  { %v1477_v20 = vmul.f32 %v1472_v9, %v7227_v6 }
 0x8e1   :  { %1486 = vrot.lane.b32.xlu1 %v1478_v11, %s11023_s28  ;;  %1484 = vrot.lane.b32.xlu0 %v1477_v20, %s11023_s28  ;;  %s11048_s28 = smov 59  }
 0x8e5   :  { %1502 = vrot.lane.b32.xlu1 %v1497_v12, %s11025_s12  ;;  %1500 = vrot.lane.b32.xlu0 %v1496_v37, %s11025_s12  ;;  %v1529_v37 = vld [vmem:[#allocation2 + $0x220] sm:$0xff]  ;;  %s11036_s12 = smov 70  }
 0x94f   :  { %v7687_v10 = vpop.permute.xlu1 %1482 }
 0x950   :  { %11449 = vst [vmem:[#allocation72_spill] sm:$0xff] %v7687_v10 }
 0x953   :  { %v7689_v62 = vpop.permute.xlu1 %1486  ;;  %v7691_v38 = vpop.permute.xlu0 %1484 }
 0x954   :  { %11450 = vst [vmem:[#allocation73_spill] sm:$0xff] %v7689_v62  ;;  %11451 = vst [vmem:[#allocation74_spill] sm:$0xff] %v7691_v38  ;;  %v1530_v62 = vld [vmem:[#allocation2 + $0x228] sm:$0xff] }
 0x957   :  { %v1503_v33 = vpop.permute.xlu1 %1502  ;;  %v1501_v9 = vpop.permute.xlu0 %1500 }
 0x958   :  { %v1505_v11 = vsel %vm11027_vm12, %v1501_v9, %v1503_v33  ;;  %v1509_v20 = vmul.f32 %v1501_v9, %v7218_v3  ;;  %v1511_v12 = vmul.f32 %v1503_v33, %v7223_v43  ;;  %vm11032_vm12 = vcmask 572416  }
 0x959   :  { %v1510_v21 = vmul.f32 %v1505_v11, %v7227_v6 }
 0x95a   :  { %1515 = vrot.lane.b32.xlu0 %v1509_v20, %s11048_s28 }
 0x95b   :  { %1517 = vrot.lane.b32.xlu1 %v1510_v21, %s11048_s28 }
 0x95e   :  { %1519 = vrot.lane.b32.xlu0 %v1511_v12, %s11048_s28  ;;  %s11055_s28 = smov 45  }
 0x95f   :  { %1533 = vrot.lane.b32.xlu1 %v1529_v37, %s11036_s12 }
 0x962   :  { %1535 = vrot.lane.b32.xlu0 %v1530_v62, %s11036_s12  ;;  %s11043_s12 = smov 47  }
 0x9cc   :  { %v7702_v10 = vpop.permute.xlu0 %1515 }
 0x9cd   :  { %11452 = vst [vmem:[#allocation75_spill] sm:$0xff] %v7702_v10  ;;  %v7704_v9 = vpop.permute.xlu1 %1517  ;;  %v1563_v10 = vld [vmem:[#allocation2 + $0x238] sm:$0xff] }
 0x9ce   :  { %11453 = vst [vmem:[#allocation76_spill] sm:$0xff] %v7704_v9 }
 0x9d0   :  { %v7706_v11 = vpop.permute.xlu0 %1519 }
 0x9d1   :  { %11454 = vst [vmem:[#allocation77_spill] sm:$0xff] %v7706_v11  ;;  %v1534_v20 = vpop.permute.xlu1 %1533  ;;  %v1562_v11 = vld [vmem:[#allocation2 + $0x230] sm:$0xff] }
 0x9d2   :  { %v1542_v21 = vmul.f32 %v1534_v20, %v7218_v3 }
 0x9d4   :  { %v1536_v33 = vpop.permute.xlu0 %1535  ;;  %1548 = vrot.lane.b32.xlu1 %v1542_v21, %s11033_s20 }
 0x9d5   :  { %v1538_v12 = vsel %vm11032_vm12, %v1534_v20, %v1536_v33  ;;  %v1544_v37 = vmul.f32 %v1536_v33, %v7223_v43  ;;  %vm1127_vm12 = vcmask 654336  }
 0x9d6   :  { %v1543_v62 = vmul.f32 %v1538_v12, %v7227_v6 }
 0x9d8   :  { %1552 = vrot.lane.b32.xlu1 %v1544_v37, %s11033_s20  ;;  %1550 = vrot.lane.b32.xlu0 %v1543_v62, %s11033_s20  ;;  %s11038_s20 = smov 81  }
 0x9dc   :  { %1568 = vrot.lane.b32.xlu1 %v1563_v10, %s11157_s16  ;;  %1566 = vrot.lane.b32.xlu0 %v1562_v11, %s11157_s16  ;;  %v1593_v11 = vld [vmem:[#allocation2 + $0x240] sm:$0xff]  ;;  %s8231_s16 = sld [smem:[#allocation16 + $0x81]] }
 0x9e2   :  { %11594 = sst [smem:[#allocation123_spill]] %s8231_s16 }
 0xa46   :  { %v7717_v9 = vpop.permute.xlu1 %1548 }
 0xa47   :  { %11455 = vst [vmem:[#allocation78_spill] sm:$0xff] %v7717_v9 }
 0xa4a   :  { %v7719_v38 = vpop.permute.xlu1 %1552  ;;  %v7721_v21 = vpop.permute.xlu0 %1550 }
 0xa4b   :  { %11456 = vst [vmem:[#allocation79_spill] sm:$0xff] %v7719_v38  ;;  %11457 = vst [vmem:[#allocation80_spill] sm:$0xff] %v7721_v21  ;;  %v1594_v38 = vld [vmem:[#allocation2 + $0x248] sm:$0xff] }
 0xa4e   :  { %v1569_v20 = vpop.permute.xlu1 %1568  ;;  %v1567_v33 = vpop.permute.xlu0 %1566 }
 0xa4f   :  { %v1570_v12 = vsel %vm1127_vm12, %v1567_v33, %v1569_v20  ;;  %v1574_v37 = vmul.f32 %v1567_v33, %v7218_v3  ;;  %v1576_v10 = vmul.f32 %v1569_v20, %v7223_v43 }
 0xa50   :  { %v1575_v62 = vmul.f32 %v1570_v12, %v7227_v6 }
 0xa51   :  { %1580 = vrot.lane.b32.xlu0 %v1574_v37, %s11159_s15 }
 0xa52   :  { %1582 = vrot.lane.b32.xlu1 %v1575_v62, %s11159_s15 }
 0xa55   :  { %1584 = vrot.lane.b32.xlu0 %v1576_v10, %s11159_s15  ;;  %s8235_s15 = sld [smem:[#allocation16 + $0x82]] }
 0xa56   :  { %1597 = vrot.lane.b32.xlu1 %v1593_v11, %s11038_s20 }
 0xa59   :  { %1599 = vrot.lane.b32.xlu0 %v1594_v38, %s11038_s20  ;;  %s11045_s20 = smov 82  }
 0xa5b   :  { %11596 = sst [smem:[#allocation125_spill]] %s8235_s15 }
 0xac3   :  { %v7732_v9 = vpop.permute.xlu0 %1580 }
 0xac4   :  { %11458 = vst [vmem:[#allocation81_spill] sm:$0xff] %v7732_v9  ;;  %v7734_v33 = vpop.permute.xlu1 %1582  ;;  %v1627_v9 = vld [vmem:[#allocation2 + $0x258] sm:$0xff] }
 0xac5   :  { %11459 = vst [vmem:[#allocation82_spill] sm:$0xff] %v7734_v33 }
 0xac7   :  { %v7736_v12 = vpop.permute.xlu0 %1584 }
 0xac8   :  { %11460 = vst [vmem:[#allocation83_spill] sm:$0xff] %v7736_v12  ;;  %v1598_v37 = vpop.permute.xlu1 %1597  ;;  %v1626_v12 = vld [vmem:[#allocation2 + $0x250] sm:$0xff] }
 0xac9   :  { %v1606_v62 = vmul.f32 %v1598_v37, %v7218_v3 }
 0xacb   :  { %v1600_v20 = vpop.permute.xlu0 %1599  ;;  %1612 = vrot.lane.b32.xlu1 %v1606_v62, %s11043_s12 }
 0xacc   :  { %v1602_v10 = vsel %vm11041_vm11, %v1598_v37, %v1600_v20  ;;  %v1608_v11 = vmul.f32 %v1600_v20, %v7223_v43  ;;  %vm11047_vm11 = vcmask 670720  }
 0xacd   :  { %v1607_v38 = vmul.f32 %v1602_v10, %v7227_v6 }
 0xacf   :  { %1616 = vrot.lane.b32.xlu1 %v1608_v11, %s11043_s12  ;;  %1614 = vrot.lane.b32.xlu0 %v1607_v38, %s11043_s12  ;;  %s11060_s12 = smov 46  }
 0xad3   :  { %1632 = vrot.lane.b32.xlu1 %v1627_v9, %s11045_s20  ;;  %1630 = vrot.lane.b32.xlu0 %v1626_v12, %s11045_s20  ;;  %v1659_v12 = vld [vmem:[#allocation2 + $0x260] sm:$0xff]  ;;  %s11050_s20 = smov 83  }
 0xb3d   :  { %v7747_v33 = vpop.permute.xlu1 %1612 }
 0xb3e   :  { %11461 = vst [vmem:[#allocation84_spill] sm:$0xff] %v7747_v33 }
 0xb41   :  { %v7749_v62 = vpop.permute.xlu1 %1616  ;;  %v7751_v37 = vpop.permute.xlu0 %1614 }
 0xb42   :  { %11462 = vst [vmem:[#allocation85_spill] sm:$0xff] %v7749_v62  ;;  %11463 = vst [vmem:[#allocation86_spill] sm:$0xff] %v7751_v37  ;;  %v1660_v62 = vld [vmem:[#allocation2 + $0x268] sm:$0xff] }
 0xb45   :  { %v1633_v20 = vpop.permute.xlu1 %1632  ;;  %v1631_v10 = vpop.permute.xlu0 %1630 }
 0xb46   :  { %v1635_v11 = vsel %vm11047_vm11, %v1631_v10, %v1633_v20  ;;  %v1639_v38 = vmul.f32 %v1631_v10, %v7218_v3  ;;  %v1641_v9 = vmul.f32 %v1633_v20, %v7223_v43  ;;  %vm11053_vm11 = vcmask 678912  }
 0xb47   :  { %v1640_v21 = vmul.f32 %v1635_v11, %v7227_v6 }
 0xb48   :  { %1645 = vrot.lane.b32.xlu0 %v1639_v38, %s11060_s12 }
 0xb49   :  { %1647 = vrot.lane.b32.xlu1 %v1640_v21, %s11060_s12 }
 0xb4c   :  { %1649 = vrot.lane.b32.xlu0 %v1641_v9, %s11060_s12  ;;  %s11067_s12 = smov 43  }
 0xb4d   :  { %1663 = vrot.lane.b32.xlu1 %v1659_v12, %s11050_s20 }
 0xb50   :  { %1665 = vrot.lane.b32.xlu0 %v1660_v62, %s11050_s20  ;;  %s11057_s20 = smov 84  }
 0xbba   :  { %v7762_v33 = vpop.permute.xlu0 %1645 }
 0xbbb   :  { %11464 = vst [vmem:[#allocation87_spill] sm:$0xff] %v7762_v33  ;;  %v7764_v10 = vpop.permute.xlu1 %1647  ;;  %v1693_v33 = vld [vmem:[#allocation2 + $0x278] sm:$0xff] }
 0xbbc   :  { %11465 = vst [vmem:[#allocation88_spill] sm:$0xff] %v7764_v10 }
 0xbbe   :  { %v7766_v11 = vpop.permute.xlu0 %1649 }
 0xbbf   :  { %11466 = vst [vmem:[#allocation89_spill] sm:$0xff] %v7766_v11  ;;  %v1664_v38 = vpop.permute.xlu1 %1663  ;;  %v1692_v11 = vld [vmem:[#allocation2 + $0x270] sm:$0xff] }
 0xbc0   :  { %v1672_v21 = vmul.f32 %v1664_v38, %v7218_v3 }
 0xbc2   :  { %v1666_v20 = vpop.permute.xlu0 %1665  ;;  %1678 = vrot.lane.b32.xlu1 %v1672_v21, %s11055_s28 }
 0xbc3   :  { %v1668_v9 = vsel %vm11053_vm11, %v1664_v38, %v1666_v20  ;;  %v1674_v12 = vmul.f32 %v1666_v20, %v7223_v43  ;;  %vm11059_vm11 = vcmask 687104  }
 0xbc4   :  { %v1673_v62 = vmul.f32 %v1668_v9, %v7227_v6 }
 0xbc6   :  { %1682 = vrot.lane.b32.xlu1 %v1674_v12, %s11055_s28  ;;  %1680 = vrot.lane.b32.xlu0 %v1673_v62, %s11055_s28  ;;  %s11080_s28 = smov 44  }
 0xbca   :  { %1698 = vrot.lane.b32.xlu1 %v1693_v33, %s11057_s20  ;;  %1696 = vrot.lane.b32.xlu0 %v1692_v11, %s11057_s20  ;;  %v1725_v11 = vld [vmem:[#allocation2 + $0x280] sm:$0xff]  ;;  %s11062_s20 = smov 85  }
 0xc34   :  { %v7777_v10 = vpop.permute.xlu1 %1678 }
 0xc35   :  { %11467 = vst [vmem:[#allocation90_spill] sm:$0xff] %v7777_v10 }
 0xc38   :  { %v7779_v21 = vpop.permute.xlu1 %1682  ;;  %v7781_v38 = vpop.permute.xlu0 %1680 }
 0xc39   :  { %11468 = vst [vmem:[#allocation91_spill] sm:$0xff] %v7779_v21  ;;  %11469 = vst [vmem:[#allocation92_spill] sm:$0xff] %v7781_v38  ;;  %v1726_v21 = vld [vmem:[#allocation2 + $0x288] sm:$0xff] }
 0xc3c   :  { %v1699_v20 = vpop.permute.xlu1 %1698  ;;  %v1697_v9 = vpop.permute.xlu0 %1696 }
 0xc3d   :  { %v1701_v12 = vsel %vm11059_vm11, %v1697_v9, %v1699_v20  ;;  %v1705_v62 = vmul.f32 %v1697_v9, %v7218_v3  ;;  %v1707_v33 = vmul.f32 %v1699_v20, %v7223_v43  ;;  %vm11065_vm11 = vcmask 695296  }
 0xc3e   :  { %v1706_v37 = vmul.f32 %v1701_v12, %v7227_v6 }
 0xc3f   :  { %1711 = vrot.lane.b32.xlu0 %v1705_v62, %s11080_s28 }
 0xc40   :  { %1713 = vrot.lane.b32.xlu1 %v1706_v37, %s11080_s28 }
 0xc43   :  { %1715 = vrot.lane.b32.xlu0 %v1707_v33, %s11080_s28  ;;  %s11087_s28 = smov 30  }
 0xc44   :  { %1729 = vrot.lane.b32.xlu1 %v1725_v11, %s11062_s20 }
 0xc47   :  { %1731 = vrot.lane.b32.xlu0 %v1726_v21, %s11062_s20  ;;  %s11075_s20 = smov 86  }
 0xcb1   :  { %v7792_v10 = vpop.permute.xlu0 %1711 }
 0xcb2   :  { %11470 = vst [vmem:[#allocation93_spill] sm:$0xff] %v7792_v10  ;;  %v7794_v9 = vpop.permute.xlu1 %1713  ;;  %v1759_v10 = vld [vmem:[#allocation2 + $0x298] sm:$0xff] }
 0xcb3   :  { %11471 = vst [vmem:[#allocation94_spill] sm:$0xff] %v7794_v9 }
 0xcb5   :  { %v7796_v12 = vpop.permute.xlu0 %1715 }
 0xcb6   :  { %11472 = vst [vmem:[#allocation95_spill] sm:$0xff] %v7796_v12  ;;  %v1730_v62 = vpop.permute.xlu1 %1729  ;;  %v1758_v12 = vld [vmem:[#allocation2 + $0x290] sm:$0xff] }
 0xcb7   :  { %v1738_v37 = vmul.f32 %v1730_v62, %v7218_v3 }
 0xcb9   :  { %v1732_v20 = vpop.permute.xlu0 %1731  ;;  %1744 = vrot.lane.b32.xlu1 %v1738_v37, %s11067_s12 }
 0xcba   :  { %v1734_v33 = vsel %vm11065_vm11, %v1730_v62, %v1732_v20  ;;  %v1740_v11 = vmul.f32 %v1732_v20, %v7223_v43  ;;  %vm11070_vm11 = vcmask 703488  }
 0xcbb   :  { %v1739_v21 = vmul.f32 %v1734_v33, %v7227_v6 }
 0xcbd   :  { %1748 = vrot.lane.b32.xlu1 %v1740_v11, %s11067_s12  ;;  %1746 = vrot.lane.b32.xlu0 %v1739_v21, %s11067_s12  ;;  %s11071_s12 = smov 42  }
 0xcc1   :  { %1764 = vrot.lane.b32.xlu1 %v1759_v10, %s11075_s20  ;;  %1762 = vrot.lane.b32.xlu0 %v1758_v12, %s11075_s20  ;;  %v1791_v12 = vld [vmem:[#allocation2 + $0x2a0] sm:$0xff]  ;;  %s11092_s20 = smov 31  }
 0xd2b   :  { %v7807_v9 = vpop.permute.xlu1 %1744 }
 0xd2c   :  { %11473 = vst [vmem:[#allocation96_spill] sm:$0xff] %v7807_v9 }
 0xd2f   :  { %v7809_v37 = vpop.permute.xlu1 %1748  ;;  %v7811_v62 = vpop.permute.xlu0 %1746 }
 0xd30   :  { %11474 = vst [vmem:[#allocation97_spill] sm:$0xff] %v7809_v37  ;;  %11475 = vst [vmem:[#allocation98_spill] sm:$0xff] %v7811_v62  ;;  %v1792_v37 = vld [vmem:[#allocation2 + $0x2a8] sm:$0xff] }
 0xd33   :  { %v1765_v20 = vpop.permute.xlu1 %1764  ;;  %v1763_v33 = vpop.permute.xlu0 %1762 }
 0xd34   :  { %v1767_v11 = vsel %vm11070_vm11, %v1763_v33, %v1765_v20  ;;  %v1771_v21 = vmul.f32 %v1763_v33, %v7218_v3  ;;  %v1773_v10 = vmul.f32 %v1765_v20, %v7223_v43  ;;  %vm896_vm11 = vcmask 785408  }
 0xd35   :  { %v1772_v38 = vmul.f32 %v1767_v11, %v7227_v6 }
 0xd36   :  { %1777 = vrot.lane.b32.xlu0 %v1771_v21, %s11071_s12 }
 0xd37   :  { %1779 = vrot.lane.b32.xlu1 %v1772_v38, %s11071_s12 }
 0xd3a   :  { %1781 = vrot.lane.b32.xlu0 %v1773_v10, %s11071_s12  ;;  %s11077_s12 = smov 97  }
 0xd3b   :  { %1795 = vrot.lane.b32.xlu1 %v1791_v12, %s11161_s27 }
 0xd3e   :  { %1797 = vrot.lane.b32.xlu0 %v1792_v37, %s11161_s27  ;;  %v1823_v37 = vld [vmem:[#allocation2 + $0x2b8] sm:$0xff]  ;;  %s8237_s27 = sld [smem:[#allocation15 + $0x83]] }
 0xd44   :  { %11597 = sst [smem:[#allocation126_spill]] %s8237_s27 }
 0xda8   :  { %v7822_v9 = vpop.permute.xlu0 %1777 }
 0xda9   :  { %11476 = vst [vmem:[#allocation99_spill] sm:$0xff] %v7822_v9  ;;  %v7824_v33 = vpop.permute.xlu1 %1779  ;;  %v1822_v9 = vld [vmem:[#allocation2 + $0x2b0] sm:$0xff] }
 0xdaa   :  { %11477 = vst [vmem:[#allocation100_spill] sm:$0xff] %v7824_v33 }
 0xdac   :  { %v7826_v11 = vpop.permute.xlu0 %1781 }
 0xdad   :  { %11478 = vst [vmem:[#allocation101_spill] sm:$0xff] %v7826_v11  ;;  %v1796_v62 = vpop.permute.xlu1 %1795 }
 0xdae   :  { %v1803_v21 = vmul.f32 %v1796_v62, %v7218_v3 }
 0xdb0   :  { %v1798_v38 = vpop.permute.xlu0 %1797  ;;  %1809 = vrot.lane.b32.xlu1 %v1803_v21, %s11163_s13 }
 0xdb1   :  { %v1799_v20 = vsel %vm896_vm11, %v1796_v62, %v1798_v38  ;;  %v1805_v10 = vmul.f32 %v1798_v38, %v7223_v43 }
 0xdb2   :  { %v1804_v12 = vmul.f32 %v1799_v20, %v7227_v6 }
 0xdb4   :  { %1813 = vrot.lane.b32.xlu1 %v1805_v10, %s11163_s13  ;;  %1811 = vrot.lane.b32.xlu0 %v1804_v12, %s11163_s13  ;;  %s8239_s13 = sld [smem:[#allocation16 + $0x83]] }
 0xdb8   :  { %1828 = vrot.lane.b32.xlu1 %v1823_v37, %s11077_s12  ;;  %1826 = vrot.lane.b32.xlu0 %v1822_v9, %s11077_s12  ;;  %v1855_v37 = vld [vmem:[#allocation2 + $0x2c0] sm:$0xff]  ;;  %s11082_s12 = smov 98  }
 0xdba   :  { %11598 = sst [smem:[#allocation127_spill]] %s8239_s13 }
 0xe22   :  { %v7837_v11 = vpop.permute.xlu1 %1809 }
 0xe23   :  { %11479 = vst [vmem:[#allocation102_spill] sm:$0xff] %v7837_v11 }
 0xe26   :  { %v7839_v21 = vpop.permute.xlu1 %1813  ;;  %v7841_v62 = vpop.permute.xlu0 %1811 }
 0xe27   :  { %11480 = vst [vmem:[#allocation103_spill] sm:$0xff] %v7839_v21  ;;  %11481 = vst [vmem:[#allocation104_spill] sm:$0xff] %v7841_v62  ;;  %v1856_v21 = vld [vmem:[#allocation2 + $0x2c8] sm:$0xff] }
 0xe2a   :  { %v1829_v38 = vpop.permute.xlu1 %1828  ;;  %v1827_v20 = vpop.permute.xlu0 %1826 }
 0xe2b   :  { %v1831_v10 = vsel %vm11079_vm10, %v1827_v20, %v1829_v38  ;;  %v1835_v12 = vmul.f32 %v1827_v20, %v7218_v3  ;;  %v1837_v9 = vmul.f32 %v1829_v38, %v7223_v43  ;;  %vm11085_vm10 = vcmask 801792  }
 0xe2c   :  { %v1836_v33 = vmul.f32 %v1831_v10, %v7227_v6 }
 0xe2d   :  { %1841 = vrot.lane.b32.xlu0 %v1835_v12, %s11092_s20 }
 0xe2e   :  { %1843 = vrot.lane.b32.xlu1 %v1836_v33, %s11092_s20 }
 0xe31   :  { %1845 = vrot.lane.b32.xlu0 %v1837_v9, %s11092_s20  ;;  %s11099_s20 = smov 28  }
 0xe32   :  { %1859 = vrot.lane.b32.xlu1 %v1855_v37, %s11082_s12 }
 0xe35   :  { %1861 = vrot.lane.b32.xlu0 %v1856_v21, %s11082_s12  ;;  %s11089_s12 = smov 99  }
 0xe9f   :  { %v7852_v11 = vpop.permute.xlu0 %1841 }
 0xea0   :  { %11482 = vst [vmem:[#allocation105_spill] sm:$0xff] %v7852_v11  ;;  %v7854_v20 = vpop.permute.xlu1 %1843  ;;  %v1889_v11 = vld [vmem:[#allocation2 + $0x2d8] sm:$0xff] }
 0xea1   :  { %11483 = vst [vmem:[#allocation106_spill] sm:$0xff] %v7854_v20 }
 0xea3   :  { %v7856_v10 = vpop.permute.xlu0 %1845 }
 0xea4   :  { %11484 = vst [vmem:[#allocation107_spill] sm:$0xff] %v7856_v10  ;;  %v1860_v12 = vpop.permute.xlu1 %1859  ;;  %v1888_v10 = vld [vmem:[#allocation2 + $0x2d0] sm:$0xff] }
 0xea5   :  { %v1868_v33 = vmul.f32 %v1860_v12, %v7218_v3 }
 0xea7   :  { %v1862_v38 = vpop.permute.xlu0 %1861  ;;  %1874 = vrot.lane.b32.xlu1 %v1868_v33, %s11087_s28 }
 0xea8   :  { %v1864_v9 = vsel %vm11085_vm10, %v1860_v12, %v1862_v38  ;;  %v1870_v37 = vmul.f32 %v1862_v38, %v7223_v43  ;;  %vm11091_vm10 = vcmask 809984  }
 0xea9   :  { %v1869_v21 = vmul.f32 %v1864_v9, %v7227_v6 }
 0xeab   :  { %1878 = vrot.lane.b32.xlu1 %v1870_v37, %s11087_s28  ;;  %1876 = vrot.lane.b32.xlu0 %v1869_v21, %s11087_s28  ;;  %s11104_s28 = smov 29  }
 0xeaf   :  { %1894 = vrot.lane.b32.xlu1 %v1889_v11, %s11089_s12  ;;  %1892 = vrot.lane.b32.xlu0 %v1888_v10, %s11089_s12  ;;  %v1921_v10 = vld [vmem:[#allocation2 + $0x2e0] sm:$0xff]  ;;  %s11094_s12 = smov 100  }
 0xf19   :  { %v7867_v20 = vpop.permute.xlu1 %1874 }
 0xf1a   :  { %11485 = vst [vmem:[#allocation108_spill] sm:$0xff] %v7867_v20 }
 0xf1d   :  { %v7869_v33 = vpop.permute.xlu1 %1878  ;;  %v7871_v12 = vpop.permute.xlu0 %1876 }
 0xf1e   :  { %11486 = vst [vmem:[#allocation109_spill] sm:$0xff] %v7869_v33  ;;  %11487 = vst [vmem:[#allocation110_spill] sm:$0xff] %v7871_v12  ;;  %v1922_v33 = vld [vmem:[#allocation2 + $0x2e8] sm:$0xff] }
 0xf21   :  { %v1895_v38 = vpop.permute.xlu1 %1894  ;;  %v1893_v9 = vpop.permute.xlu0 %1892 }
 0xf22   :  { %v1897_v37 = vsel %vm11091_vm10, %v1893_v9, %v1895_v38  ;;  %v1901_v21 = vmul.f32 %v1893_v9, %v7218_v3  ;;  %v1903_v11 = vmul.f32 %v1895_v38, %v7223_v43  ;;  %vm11097_vm10 = vcmask 818176  }
 0xf23   :  { %v1902_v62 = vmul.f32 %v1897_v37, %v7227_v6 }
 0xf24   :  { %1907 = vrot.lane.b32.xlu0 %v1901_v21, %s11104_s28 }
 0xf25   :  { %1909 = vrot.lane.b32.xlu1 %v1902_v62, %s11104_s28 }
 0xf28   :  { %1911 = vrot.lane.b32.xlu0 %v1903_v11, %s11104_s28  ;;  %s11151_s28 = smov 26  }
 0xf29   :  { %1925 = vrot.lane.b32.xlu1 %v1921_v10, %s11094_s12 }
 0xf2c   :  { %1927 = vrot.lane.b32.xlu0 %v1922_v33, %s11094_s12  ;;  %s11101_s12 = smov 101  }
 0xf96   :  { %v7882_v20 = vpop.permute.xlu0 %1907 }
 0xf97   :  { %11488 = vst [vmem:[#allocation111_spill] sm:$0xff] %v7882_v20  ;;  %v7884_v9 = vpop.permute.xlu1 %1909  ;;  %v1955_v20 = vld [vmem:[#allocation2 + $0x2f8] sm:$0xff] }
 0xf98   :  { %11489 = vst [vmem:[#allocation112_spill] sm:$0xff] %v7884_v9 }
 0xf9a   :  { %v7886_v37 = vpop.permute.xlu0 %1911 }
 0xf9b   :  { %11490 = vst [vmem:[#allocation113_spill] sm:$0xff] %v7886_v37  ;;  %v1926_v21 = vpop.permute.xlu1 %1925  ;;  %v1954_v37 = vld [vmem:[#allocation2 + $0x2f0] sm:$0xff] }
 0xf9c   :  { %v1934_v62 = vmul.f32 %v1926_v21, %v7218_v3 }
 0xf9e   :  { %v1928_v38 = vpop.permute.xlu0 %1927  ;;  %1940 = vrot.lane.b32.xlu1 %v1934_v62, %s11099_s20 }
 0xf9f   :  { %v1930_v11 = vsel %vm11097_vm10, %v1926_v21, %v1928_v38  ;;  %v1936_v10 = vmul.f32 %v1928_v38, %v7223_v43  ;;  %vm11103_vm10 = vcmask 826368  }
 0xfa0   :  { %v1935_v33 = vmul.f32 %v1930_v11, %v7227_v6 }
 0xfa2   :  { %1944 = vrot.lane.b32.xlu1 %v1936_v10, %s11099_s20  ;;  %1942 = vrot.lane.b32.xlu0 %v1935_v33, %s11099_s20  ;;  %s11155_s20 = smov 27  }
 0xfa6   :  { %1960 = vrot.lane.b32.xlu1 %v1955_v20, %s11101_s12  ;;  %1958 = vrot.lane.b32.xlu0 %v1954_v37, %s11101_s12  ;;  %v1987_v37 = vld [vmem:[#allocation2 + $0x300] sm:$0xff]  ;;  %s11153_s12 = smov 102  }
0x1010   :  { %v7897_v9 = vpop.permute.xlu1 %1940 }
0x1011   :  { %11491 = vst [vmem:[#allocation114_spill] sm:$0xff] %v7897_v9 }
0x1014   :  { %v7899_v62 = vpop.permute.xlu1 %1944  ;;  %v7901_v21 = vpop.permute.xlu0 %1942 }
0x1015   :  { %11492 = vst [vmem:[#allocation115_spill] sm:$0xff] %v7899_v62  ;;  %11493 = vst [vmem:[#allocation116_spill] sm:$0xff] %v7901_v21  ;;  %v1988_v62 = vld [vmem:[#allocation2 + $0x308] sm:$0xff] }
0x1018   :  { %v1961_v38 = vpop.permute.xlu1 %1960  ;;  %v1959_v11 = vpop.permute.xlu0 %1958 }
0x1019   :  { %v1963_v10 = vsel %vm11103_vm10, %v1959_v11, %v1961_v38  ;;  %v1967_v33 = vmul.f32 %v1959_v11, %v7218_v3  ;;  %v1969_v20 = vmul.f32 %v1961_v38, %v7223_v43  ;;  %vm11110_vm10 = vcmask 834560  }
0x101a   :  { %v1968_v12 = vmul.f32 %v1963_v10, %v7227_v6 }
0x101b   :  { %1973 = vrot.lane.b32.xlu0 %v1967_v33, %s11155_s20 }
0x101c   :  { %1975 = vrot.lane.b32.xlu1 %v1968_v12, %s11155_s20 }
0x101f   :  { %1977 = vrot.lane.b32.xlu0 %v1969_v20, %s11155_s20  ;;  %s8233_s20 = sld [smem:[#allocation15 + $0x82]] }
0x1020   :  { %1991 = vrot.lane.b32.xlu1 %v1987_v37, %s11153_s12 }
0x1023   :  { %1993 = vrot.lane.b32.xlu0 %v1988_v62, %s11153_s12  ;;  %s8225_s12 = sld [smem:[#allocation15 + $0x80]] }
0x1025   :  { %11595 = sst [smem:[#allocation124_spill]] %s8233_s20 }
0x1029   :  { %11591 = sst [smem:[#allocation120_spill]] %s8225_s12 }
0x108d   :  { %v7912_v9 = vpop.permute.xlu0 %1973 }
0x108e   :  { %11494 = vst [vmem:[#allocation117_spill] sm:$0xff] %v7912_v9  ;;  %v7914_v11 = vpop.permute.xlu1 %1975  ;;  %v435_v9 = vld [vmem:[#allocation2] sm:$0xff] }
0x108f   :  { %11495 = vst [vmem:[#allocation118_spill] sm:$0xff] %v7914_v11  ;;  %v437_v11 = vmul.f32 %v435_v9, %v7218_v3 }
0x1091   :  { %v7916_v10 = vpop.permute.xlu0 %1977 }
0x1092   :  { %11496 = vst [vmem:[#allocation119_spill] sm:$0xff] %v7916_v10  ;;  %v1992_v33 = vpop.permute.xlu1 %1991  ;;  %v436_v10 = vld [vmem:[#allocation2 + $0x8] sm:$0xff] }
0x1093   :  { %v2000_v12 = vmul.f32 %v1992_v33, %v7218_v3  ;;  %v438_v21 = vmul.f32 %v436_v10, %v7227_v6  ;;  %v501_v3 = vsel %vm11113_vm8, %v7408_v1, %v7372_v42  ;;  %v567_v1 = vsel %vm11115_vm7, %v7422_v41, %v7378_v17 }
0x1095   :  { %v1994_v38 = vpop.permute.xlu0 %1993  ;;  %2006 = vrot.lane.b32.xlu1 %v2000_v12, %s11151_s28  ;;  %v439_v12 = vadd.f32 %v437_v11, %v433_v48 }
0x1096   :  { %v1996_v20 = vsel %vm11110_vm10, %v1992_v33, %v1994_v38  ;;  %v2002_v37 = vmul.f32 %v1994_v38, %v7223_v43  ;;  %v468_v43 = vsel %vm11112_vm9, %v7368_v39, %v7402_v32  ;;  %v469_v33 = vsel %vm11112_vm9, %v7402_v32, %v7370_v30 }
0x1097   :  { %v2001_v62 = vmul.f32 %v1996_v20, %v7227_v6  ;;  %v440_v38 = vadd.f32 %v438_v21, %v434_v7  ;;  %vm11114_vm10 = vcmask 1022976   ;;  %v502_v6 = vsel %vm11113_vm8, %v7372_v42, %v7412_v4 }
0x1098   :  { %v472_v9 = vadd.f32 %v468_v43, %v439_v12  ;;  %v534_v39 = vsel %vm11114_vm10, %v7374_v46, %v7418_v5  ;;  %v535_v30 = vsel %vm11114_vm10, %v7418_v5, %v7376_v47  ;;  %vm11116_vm9 = vcmask 1006592  }
0x1099   :  { %2010 = vrot.lane.b32.xlu1 %v2002_v37, %s11151_s28  ;;  %2008 = vrot.lane.b32.xlu0 %v2001_v62, %s11151_s28  ;;  %v473_v10 = vadd.f32 %v469_v33, %v440_v38  ;;  %v568_v42 = vsel %vm11115_vm7, %v7378_v17, %v7428_v44  ;;  %vm11117_vm8 = vcmask 998400   ;;  %v600_v46 = vsel %vm11116_vm9, %v7380_v31, %v7432_v8  ;;  %s8229_s28 = sld [smem:[#allocation15 + $0x81]] }
0x109a   :  { %v505_v32 = vadd.f32 %v501_v3, %v472_v9  ;;  %v601_v47 = vsel %vm11116_vm9, %v7432_v8, %v7382_v49  ;;  %vm11118_vm10 = vcmask 916480   ;;  %v633_v41 = vsel %vm11117_vm8, %v7439_v13, %v7384_v50 }
0x109b   :  { %v506_v7 = vadd.f32 %v502_v6, %v473_v10  ;;  %v634_v17 = vsel %vm11117_vm8, %v7384_v50, %v7443_v14  ;;  %vm11119_vm7 = vcmask 908288   ;;  %v666_v31 = vsel %vm11118_vm10, %v7386_v51, %v7445_v15 }
0x109c   :  { %v538_v4 = vadd.f32 %v534_v39, %v505_v32  ;;  %v667_v49 = vsel %vm11118_vm10, %v7445_v15, %v7388_v52  ;;  %vm11120_vm9 = vcmask 900096   ;;  %v699_v13 = vsel %vm11119_vm7, %v7447_v16, %v7390_v53  ;;  %v11498_v39 = vld [vmem:[#allocation29_spill] sm:$0xff]  ;;  %v11499_v32 = vld [vmem:[#allocation32_spill] sm:$0xff] }
0x109d   :  { %v539_v48 = vadd.f32 %v535_v30, %v506_v7  ;;  %v700_v50 = vsel %vm11119_vm7, %v7390_v53, %v7449_v18  ;;  %vm11124_vm8 = vcmask 891904   ;;  %v732_v51 = vsel %vm11120_vm9, %v7392_v54, %v7451_v19 }
0x109e   :  { %v571_v5 = vadd.f32 %v567_v1, %v538_v4  ;;  %v733_v52 = vsel %vm11120_vm9, %v7451_v19, %v7394_v55  ;;  %vm11121_vm10 = vcmask 883712   ;;  %v765_v16 = vsel %vm11124_vm8, %v7453_v24, %v7396_v56  ;;  %v11501_v1 = vld [vmem:[#allocation31_spill] sm:$0xff]  ;;  %v11502_v4 = vld [vmem:[#allocation34_spill] sm:$0xff] }
0x109f   :  { %v572_v21 = vadd.f32 %v568_v42, %v539_v48  ;;  %v766_v53 = vsel %vm11124_vm8, %v7396_v56, %v7455_v22  ;;  %vm11122_vm7 = vcmask 875520   ;;  %v798_v54 = vsel %vm11121_vm10, %v7398_v57, %v7457_v25  ;;  %v11503_v48 = vld [vmem:[#allocation33_spill] sm:$0xff]  ;;  %11593 = sst [smem:[#allocation122_spill]] %s8229_s28 }
0x10a0   :  { %v604_v44 = vadd.f32 %v600_v46, %v571_v5  ;;  %v799_v55 = vsel %vm11121_vm10, %v7457_v25, %v7400_v58  ;;  %vm11123_vm9 = vcmask 867328   ;;  %v831_v24 = vsel %vm11122_vm7, %v7459_v23, %v7404_v59 }
0x10a1   :  { %v605_v11 = vadd.f32 %v601_v47, %v572_v21  ;;  %v832_v56 = vsel %vm11122_vm7, %v7404_v59, %v7461_v63  ;;  %v864_v57 = vsel %vm11123_vm9, %v7406_v0, %v7463_v26  ;;  %v865_v58 = vsel %vm11123_vm9, %v7463_v26, %v7410_v2  ;;  %v11504_v47 = vld [vmem:[#allocation35_spill] sm:$0xff] }
0x10a2   :  { %v637_v8 = vadd.f32 %v633_v41, %v604_v44  ;;  %vm11125_vm10 = vcmask 777216   ;;  %v897_v23 = vsel %vm896_vm11, %v7465_v28, %v7414_v40  ;;  %v898_v59 = vsel %vm896_vm11, %v7414_v40, %v7467_v29  ;;  %v11505_v41 = vld [vmem:[#allocation38_spill] sm:$0xff] }
0x10a3   :  { %v638_v20 = vadd.f32 %v634_v17, %v605_v11  ;;  %vm11126_vm7 = vcmask 769024   ;;  %v930_v0 = vsel %vm11125_vm10, %v7416_v45, %v7469_v34  ;;  %v931_v2 = vsel %vm11125_vm10, %v7469_v34, %v7420_v60  ;;  %v11497_v45 = vld [vmem:[#allocation28_spill] sm:$0xff]  ;;  %v11507_v11 = vld [vmem:[#allocation37_spill] sm:$0xff] }
0x10a4   :  { %v670_v14 = vadd.f32 %v666_v31, %v637_v8  ;;  %vm11130_vm9 = vcmask 760832   ;;  %v963_v28 = vsel %vm11126_vm7, %v7471_v35, %v7424_v61  ;;  %v964_v40 = vsel %vm11126_vm7, %v7424_v61, %v7473_v27  ;;  %v11500_v35 = vld [vmem:[#allocation30_spill] sm:$0xff]  ;;  %v11506_v17 = vld [vmem:[#allocation36_spill] sm:$0xff] }
0x10a5   :  { %v671_v37 = vadd.f32 %v667_v49, %v638_v20  ;;  %vm11127_vm8 = vcmask 752640   ;;  %v996_v10 = vsel %vm11130_vm9, %v11497_v45, %v7475_v36  ;;  %v997_v60 = vsel %vm11130_vm9, %v7475_v36, %v11498_v39  ;;  %v11508_v20 = vld [vmem:[#allocation40_spill] sm:$0xff] }
0x10a6   :  { %v703_v15 = vadd.f32 %v699_v13, %v670_v14  ;;  %vm11128_vm10 = vcmask 744448   ;;  %v1029_v7 = vsel %vm11127_vm8, %v11500_v35, %v11499_v32  ;;  %v1030_v61 = vsel %vm11127_vm8, %v11499_v32, %v11501_v1  ;;  %v11509_v13 = vld [vmem:[#allocation39_spill] sm:$0xff]  ;;  %v11510_v14 = vld [vmem:[#allocation41_spill] sm:$0xff] }
0x10a7   :  { %v704_v62 = vadd.f32 %v700_v50, %v671_v37  ;;  %vm11129_vm7 = vcmask 736256   ;;  %v1062_v46 = vsel %vm11128_vm10, %v11503_v48, %v11502_v4  ;;  %v1063_v36 = vsel %vm11128_vm10, %v11502_v4, %v11504_v47  ;;  %v11527_v32 = vld [vmem:[#allocation57_spill] sm:$0xff]  ;;  %v11530_v4 = vld [vmem:[#allocation60_spill] sm:$0xff] }
0x10a8   :  { %v736_v18 = vadd.f32 %v732_v51, %v703_v15  ;;  %v1095_v44 = vsel %vm11129_vm7, %v11506_v17, %v11505_v41  ;;  %v1096_v31 = vsel %vm11129_vm7, %v11505_v41, %v11507_v11  ;;  %vm11131_vm8 = vcmask 646144   ;;  %v11511_v15 = vld [vmem:[#allocation44_spill] sm:$0xff]  ;;  %v11533_v41 = vld [vmem:[#allocation63_spill] sm:$0xff] }
0x10a9   :  { %v737_v43 = vadd.f32 %v733_v52, %v704_v62  ;;  %v1128_v50 = vsel %vm1127_vm12, %v11509_v13, %v11508_v20  ;;  %v1129_v37 = vsel %vm1127_vm12, %v11508_v20, %v11510_v14  ;;  %vm11132_vm10 = vcmask 637952   ;;  %v11512_v62 = vld [vmem:[#allocation42_spill] sm:$0xff] }
0x10aa   :  { %v769_v19 = vadd.f32 %v765_v16, %v736_v18  ;;  %v1161_v16 = vsel %vm11131_vm8, %v11512_v62, %v11511_v15  ;;  %vm11136_vm7 = vcmask 629760   ;;  %vm11133_vm9 = vcmask 621568   ;;  %v11536_v20 = vld [vmem:[#allocation66_spill] sm:$0xff] }
0x10ab   :  { %v770_v33 = vadd.f32 %v766_v53, %v737_v43  ;;  %v11513_v53 = vld [vmem:[#allocation43_spill] sm:$0xff] }
0x10ac   :  { %v802_v22 = vadd.f32 %v798_v54, %v769_v19  ;;  %v1162_v18 = vsel %vm11131_vm8, %v11511_v15, %v11513_v53  ;;  %v11515_v19 = vld [vmem:[#allocation45_spill] sm:$0xff]  ;;  %vm11134_vm8 = vcmask 613376  }
0x10ad   :  { %v803_v12 = vadd.f32 %v799_v55, %v770_v33  ;;  %v11514_v55 = vld [vmem:[#allocation46_spill] sm:$0xff]  ;;  %v11539_v15 = vld [vmem:[#allocation69_spill] sm:$0xff] }
0x10ae   :  { %v835_v25 = vadd.f32 %v831_v24, %v802_v22  ;;  %v1194_v33 = vsel %vm11132_vm10, %v11515_v19, %v11514_v55  ;;  %v11516_v24 = vld [vmem:[#allocation47_spill] sm:$0xff] }
0x10af   :  { %v836_v38 = vadd.f32 %v832_v56, %v803_v12  ;;  %v1195_v56 = vsel %vm11132_vm10, %v11514_v55, %v11516_v24  ;;  %vm11135_vm10 = vcmask 605184   ;;  %v11542_v55 = vld [vmem:[#allocation72_spill] sm:$0xff] }
0x10b0   :  { %v868_v63 = vadd.f32 %v864_v57, %v835_v25  ;;  %v11517_v57 = vld [vmem:[#allocation50_spill] sm:$0xff] }
0x10b1   :  { %v869_v3 = vadd.f32 %v865_v58, %v836_v38  ;;  %v11518_v58 = vld [vmem:[#allocation48_spill] sm:$0xff]  ;;  %v11519_v38 = vld [vmem:[#allocation49_spill] sm:$0xff] }
0x10b2   :  { %v901_v26 = vadd.f32 %v897_v23, %v868_v63  ;;  %v1226_v25 = vsel %vm11136_vm7, %v11518_v58, %v11517_v57  ;;  %v1227_v23 = vsel %vm11136_vm7, %v11517_v57, %v11519_v38  ;;  %vm11139_vm7 = vcmask 490496   ;;  %v11545_v57 = vld [vmem:[#allocation75_spill] sm:$0xff] }
0x10b3   :  { %v902_v6 = vadd.f32 %v898_v59, %v869_v3  ;;  %v11520_v3 = vld [vmem:[#allocation52_spill] sm:$0xff] }
0x10b4   :  { %v934_v29 = vadd.f32 %v930_v0, %v901_v26  ;;  %v11521_v0 = vld [vmem:[#allocation51_spill] sm:$0xff]  ;;  %v11522_v26 = vld [vmem:[#allocation53_spill] sm:$0xff] }
0x10b5   :  { %v935_v9 = vadd.f32 %v931_v2, %v902_v6  ;;  %v1259_v2 = vsel %vm11133_vm9, %v11521_v0, %v11520_v3  ;;  %v1260_v6 = vsel %vm11133_vm9, %v11520_v3, %v11522_v26  ;;  %vm11137_vm9 = vcmask 515072   ;;  %v11548_v3 = vld [vmem:[#allocation78_spill] sm:$0xff] }
0x10b6   :  { %v967_v34 = vadd.f32 %v963_v28, %v934_v29  ;;  %v11523_v29 = vld [vmem:[#allocation56_spill] sm:$0xff] }
0x10b7   :  { %v968_v30 = vadd.f32 %v964_v40, %v935_v9  ;;  %v11524_v9 = vld [vmem:[#allocation54_spill] sm:$0xff] }
0x10b8   :  { %v1000_v27 = vadd.f32 %v996_v10, %v967_v34  ;;  %v1292_v45 = vsel %vm11134_vm8, %v11524_v9, %v11523_v29  ;;  %v11525_v10 = vld [vmem:[#allocation55_spill] sm:$0xff] }
0x10b9   :  { %v1001_v42 = vadd.f32 %v997_v60, %v968_v30  ;;  %v1293_v39 = vsel %vm11134_vm8, %v11523_v29, %v11525_v10  ;;  %v11526_v30 = vld [vmem:[#allocation58_spill] sm:$0xff]  ;;  %vm11138_vm8 = vcmask 506880   ;;  %v11551_v29 = vld [vmem:[#allocation81_spill] sm:$0xff] }
0x10ba   :  { %v1033_v5 = vadd.f32 %v1029_v7, %v1000_v27  ;;  %v1325_v35 = vsel %vm11135_vm10, %v11527_v32, %v11526_v30  ;;  %v11528_v7 = vld [vmem:[#allocation59_spill] sm:$0xff] }
0x10bb   :  { %v1034_v21 = vadd.f32 %v1030_v61, %v1001_v42  ;;  %v1326_v1 = vsel %vm11135_vm10, %v11526_v30, %v11528_v7  ;;  %v11529_v42 = vld [vmem:[#allocation62_spill] sm:$0xff]  ;;  %vm11142_vm10 = vcmask 498688   ;;  %v11554_v30 = vld [vmem:[#allocation84_spill] sm:$0xff] }
0x10bc   :  { %v1066_v49 = vadd.f32 %v1062_v46, %v1033_v5  ;;  %v1357_v48 = vsel %vm1340_vm15, %v11530_v4, %v11529_v42  ;;  %v11531_v46 = vld [vmem:[#allocation61_spill] sm:$0xff] }
0x10bd   :  { %v1067_v8 = vadd.f32 %v1063_v36, %v1034_v21  ;;  %v1358_v47 = vsel %vm1340_vm15, %v11529_v42, %v11531_v46  ;;  %v11532_v21 = vld [vmem:[#allocation64_spill] sm:$0xff]  ;;  %v11557_v42 = vld [vmem:[#allocation87_spill] sm:$0xff] }
0x10be   :  { %v1099_v51 = vadd.f32 %v1095_v44, %v1066_v49  ;;  %v1390_v17 = vsel %vm11137_vm9, %v11533_v41, %v11532_v21  ;;  %v11534_v44 = vld [vmem:[#allocation65_spill] sm:$0xff] }
0x10bf   :  { %v1100_v52 = vadd.f32 %v1096_v31, %v1067_v8  ;;  %v1391_v11 = vsel %vm11137_vm9, %v11532_v21, %v11534_v44  ;;  %v11535_v8 = vld [vmem:[#allocation68_spill] sm:$0xff]  ;;  %vm11140_vm9 = vcmask 482304   ;;  %v11560_v21 = vld [vmem:[#allocation90_spill] sm:$0xff] }
0x10c0   :  { %v1132_v43 = vadd.f32 %v1128_v50, %v1099_v51  ;;  %v1423_v13 = vsel %vm11138_vm8, %v11536_v20, %v11535_v8  ;;  %v11537_v50 = vld [vmem:[#allocation67_spill] sm:$0xff] }
0x10c1   :  { %v1133_v54 = vadd.f32 %v1129_v37, %v1100_v52  ;;  %v1424_v14 = vsel %vm11138_vm8, %v11535_v8, %v11537_v50  ;;  %v11538_v52 = vld [vmem:[#allocation70_spill] sm:$0xff]  ;;  %vm11141_vm8 = vcmask 474112   ;;  %v11563_v8 = vld [vmem:[#allocation93_spill] sm:$0xff] }
0x10c2   :  { %v1165_v22 = vadd.f32 %v1161_v16, %v1132_v43  ;;  %v1456_v62 = vsel %vm11142_vm10, %v11539_v15, %v11538_v52  ;;  %v11540_v16 = vld [vmem:[#allocation71_spill] sm:$0xff] }
0x10c3   :  { %v1166_v12 = vadd.f32 %v1162_v18, %v1133_v54  ;;  %v1457_v53 = vsel %vm11142_vm10, %v11538_v52, %v11540_v16  ;;  %v11541_v54 = vld [vmem:[#allocation74_spill] sm:$0xff]  ;;  %vm11145_vm10 = vcmask 359424   ;;  %v11566_v52 = vld [vmem:[#allocation96_spill] sm:$0xff] }
0x10c4   :  { %v1198_v59 = vadd.f32 %v1194_v33, %v1165_v22  ;;  %v1489_v19 = vsel %vm11139_vm7, %v11542_v55, %v11541_v54  ;;  %v11543_v33 = vld [vmem:[#allocation73_spill] sm:$0xff] }
0x10c5   :  { %v1199_v63 = vadd.f32 %v1195_v56, %v1166_v12  ;;  %v1490_v24 = vsel %vm11139_vm7, %v11541_v54, %v11543_v33  ;;  %v11544_v12 = vld [vmem:[#allocation76_spill] sm:$0xff]  ;;  %vm11143_vm7 = vcmask 384000   ;;  %v11569_v54 = vld [vmem:[#allocation99_spill] sm:$0xff] }
0x10c6   :  { %v1230_v28 = vadd.f32 %v1226_v25, %v1198_v59  ;;  %v1522_v58 = vsel %vm11140_vm9, %v11545_v57, %v11544_v12  ;;  %v11546_v25 = vld [vmem:[#allocation77_spill] sm:$0xff] }
0x10c7   :  { %v1231_v40 = vadd.f32 %v1227_v23, %v1199_v63  ;;  %v1523_v38 = vsel %vm11140_vm9, %v11544_v12, %v11546_v25  ;;  %v11547_v63 = vld [vmem:[#allocation80_spill] sm:$0xff]  ;;  %vm11144_vm9 = vcmask 375808   ;;  %v11572_v12 = vld [vmem:[#allocation102_spill] sm:$0xff] }
0x10c8   :  { %v1263_v60 = vadd.f32 %v1259_v2, %v1230_v28  ;;  %v1555_v0 = vsel %vm11141_vm8, %v11548_v3, %v11547_v63  ;;  %v11549_v2 = vld [vmem:[#allocation79_spill] sm:$0xff] }
0x10c9   :  { %v1264_v34 = vadd.f32 %v1260_v6, %v1231_v40  ;;  %v1556_v26 = vsel %vm11141_vm8, %v11547_v63, %v11549_v2  ;;  %v11550_v40 = vld [vmem:[#allocation82_spill] sm:$0xff]  ;;  %vm11148_vm8 = vcmask 367616   ;;  %v11575_v63 = vld [vmem:[#allocation105_spill] sm:$0xff] }
0x10ca   :  { %v1296_v61 = vadd.f32 %v1292_v45, %v1263_v60  ;;  %v1586_v9 = vsel %vm1110_vm13, %v11551_v29, %v11550_v40  ;;  %v11552_v45 = vld [vmem:[#allocation83_spill] sm:$0xff] }
0x10cb   :  { %v1297_v27 = vadd.f32 %v1293_v39, %v1264_v34  ;;  %v1587_v10 = vsel %vm1110_vm13, %v11550_v40, %v11552_v45  ;;  %v11553_v34 = vld [vmem:[#allocation86_spill] sm:$0xff]  ;;  %v11578_v40 = vld [vmem:[#allocation108_spill] sm:$0xff] }
0x10cc   :  { %v1329_v36 = vadd.f32 %v1325_v35, %v1296_v61  ;;  %v1619_v32 = vsel %vm11143_vm7, %v11554_v30, %v11553_v34  ;;  %v11555_v35 = vld [vmem:[#allocation85_spill] sm:$0xff] }
0x10cd   :  { %v1330_v5 = vadd.f32 %v1326_v1, %v1297_v27  ;;  %v1620_v7 = vsel %vm11143_vm7, %v11553_v34, %v11555_v35  ;;  %v11556_v27 = vld [vmem:[#allocation88_spill] sm:$0xff]  ;;  %vm11146_vm7 = vcmask 351232   ;;  %v11581_v34 = vld [vmem:[#allocation111_spill] sm:$0xff] }
0x10ce   :  { %v1361_v31 = vadd.f32 %v1357_v48, %v1329_v36  ;;  %v1652_v4 = vsel %vm11144_vm9, %v11557_v42, %v11556_v27  ;;  %v11558_v48 = vld [vmem:[#allocation89_spill] sm:$0xff] }
0x10cf   :  { %v1362_v49 = vadd.f32 %v1358_v47, %v1330_v5  ;;  %v1653_v46 = vsel %vm11144_vm9, %v11556_v27, %v11558_v48  ;;  %v11559_v5 = vld [vmem:[#allocation92_spill] sm:$0xff]  ;;  %vm11147_vm9 = vcmask 343040   ;;  %v11584_v27 = vld [vmem:[#allocation114_spill] sm:$0xff] }
0x10d0   :  { %v1394_v37 = vadd.f32 %v1390_v17, %v1361_v31  ;;  %v1685_v41 = vsel %vm11148_vm8, %v11560_v21, %v11559_v5  ;;  %v11561_v17 = vld [vmem:[#allocation91_spill] sm:$0xff]  ;;  %v11587_v21 = vld [vmem:[#allocation117_spill] sm:$0xff] }
0x10d1   :  { %v1395_v51 = vadd.f32 %v1391_v11, %v1362_v49  ;;  %v1686_v44 = vsel %vm11148_vm8, %v11559_v5, %v11561_v17  ;;  %v11562_v49 = vld [vmem:[#allocation94_spill] sm:$0xff]  ;;  %vm1946_vm8 = vcmask 228352   ;;  %v11588_v17 = vld [vmem:[#allocation119_spill] sm:$0xff] }
0x10d2   :  { %v1427_v18 = vadd.f32 %v1423_v13, %v1394_v37  ;;  %v1718_v20 = vsel %vm11145_vm10, %v11563_v8, %v11562_v49  ;;  %v11564_v13 = vld [vmem:[#allocation95_spill] sm:$0xff]  ;;  %v11586_v5 = vld [vmem:[#allocation118_spill] sm:$0xff] }
0x10d3   :  { %v1428_v43 = vadd.f32 %v1424_v14, %v1395_v51  ;;  %v1719_v50 = vsel %vm11145_vm10, %v11562_v49, %v11564_v13  ;;  %v11565_v51 = vld [vmem:[#allocation98_spill] sm:$0xff]  ;;  %vm11149_vm10 = vcmask 252928  }
0x10d4   :  { %v1460_v56 = vadd.f32 %v1456_v62, %v1427_v18  ;;  %v1751_v15 = vsel %vm11146_vm7, %v11566_v52, %v11565_v51  ;;  %v11567_v62 = vld [vmem:[#allocation97_spill] sm:$0xff]  ;;  %v6599_v52 = vld [vmem:[%s10901_s0] sm:$0xff] }
0x10d5   :  { %v1461_v22 = vadd.f32 %v1457_v53, %v1428_v43  ;;  %v1752_v16 = vsel %vm11146_vm7, %v11565_v51, %v11567_v62  ;;  %v11568_v43 = vld [vmem:[#allocation100_spill] sm:$0xff]  ;;  %vm1880_vm7 = vcmask 244736   ;;  %v6600_v62 = vld [vmem:[%s10901_s0 + $0x8] sm:$0xff]  ;;  %s8227_s0 = sld [smem:[#allocation16 + $0x80]] }
0x10d6   :  { %v1493_v23 = vadd.f32 %v1489_v19, %v1460_v56  ;;  %v1784_v55 = vsel %vm11147_vm9, %v11569_v54, %v11568_v43  ;;  %v11570_v19 = vld [vmem:[#allocation101_spill] sm:$0xff] }
0x10d7   :  { %v1494_v59 = vadd.f32 %v1490_v24, %v1461_v22  ;;  %v1785_v33 = vsel %vm11147_vm9, %v11568_v43, %v11570_v19  ;;  %v11571_v22 = vld [vmem:[#allocation104_spill] sm:$0xff]  ;;  %vm11150_vm9 = vcmask 236544  }
0x10d8   :  { %v1526_v6 = vadd.f32 %v1522_v58, %v1493_v23  ;;  %v1815_v57 = vsel %vm879_vm14, %v11572_v12, %v11571_v22  ;;  %v11573_v58 = vld [vmem:[#allocation103_spill] sm:$0xff] }
0x10d9   :  { %v1527_v28 = vadd.f32 %v1523_v38, %v1494_v59  ;;  %v1816_v25 = vsel %vm879_vm14, %v11571_v22, %v11573_v58  ;;  %v11574_v59 = vld [vmem:[#allocation106_spill] sm:$0xff] }
0x10da   :  { %v1559_v39 = vadd.f32 %v1555_v0, %v1526_v6  ;;  %v1848_v3 = vsel %vm11149_vm10, %v11575_v63, %v11574_v59  ;;  %v11576_v0 = vld [vmem:[#allocation107_spill] sm:$0xff] }
0x10db   :  { %v1560_v60 = vadd.f32 %v1556_v26, %v1527_v28  ;;  %v1849_v2 = vsel %vm11149_vm10, %v11574_v59, %v11576_v0  ;;  %v11577_v28 = vld [vmem:[#allocation110_spill] sm:$0xff]  ;;  %vm1979_vm10 = vcmask 220160   ;;  %11592 = sst [smem:[#allocation121_spill]] %s8227_s0 }
0x10dc   :  { %v1590_v1 = vadd.f32 %v1586_v9, %v1559_v39  ;;  %v1881_v29 = vsel %vm1880_vm7, %v11578_v40, %v11577_v28  ;;  %v11579_v9 = vld [vmem:[#allocation109_spill] sm:$0xff] }
0x10dd   :  { %v1591_v61 = vadd.f32 %v1587_v10, %v1560_v60  ;;  %v1882_v45 = vsel %vm1880_vm7, %v11577_v28, %v11579_v9  ;;  %v11580_v60 = vld [vmem:[#allocation112_spill] sm:$0xff] }
0x10de   :  { %v1623_v47 = vadd.f32 %v1619_v32, %v1590_v1  ;;  %v1914_v30 = vsel %vm11150_vm9, %v11581_v34, %v11580_v60  ;;  %v11582_v32 = vld [vmem:[#allocation113_spill] sm:$0xff] }
0x10df   :  { %v1624_v36 = vadd.f32 %v1620_v7, %v1591_v61  ;;  %v1915_v35 = vsel %vm11150_vm9, %v11580_v60, %v11582_v32  ;;  %v11583_v61 = vld [vmem:[#allocation116_spill] sm:$0xff]  ;;  %vm2012_vm9 = vcmask 211968  }
0x10e0   :  { %v1656_v11 = vadd.f32 %v1652_v4, %v1623_v47  ;;  %v1947_v42 = vsel %vm1946_vm8, %v11584_v27, %v11583_v61  ;;  %v11585_v4 = vld [vmem:[#allocation115_spill] sm:$0xff] }
0x10e1   :  { %v1657_v31 = vadd.f32 %v1653_v46, %v1624_v36  ;;  %v1948_v48 = vsel %vm1946_vm8, %v11583_v61, %v11585_v4 }
0x10e2   :  { %v1689_v14 = vadd.f32 %v1685_v41, %v1656_v11  ;;  %v1980_v41 = vsel %vm1979_vm10, %v11587_v21, %v11586_v5 }
0x10e3   :  { %v1690_v37 = vadd.f32 %v1686_v44, %v1657_v31  ;;  %v1981_v44 = vsel %vm1979_vm10, %v11586_v5, %v11588_v17 }
0x10e4   :  { %v1722_v53 = vadd.f32 %v1718_v20, %v1689_v14 }
0x10e5   :  { %v1723_v18 = vadd.f32 %v1719_v50, %v1690_v37 }
0x10e6   :  { %v1755_v24 = vadd.f32 %v1751_v15, %v1722_v53 }
0x10e7   :  { %v1756_v56 = vadd.f32 %v1752_v16, %v1723_v18 }
0x10e8   :  { %v1788_v38 = vadd.f32 %v1784_v55, %v1755_v24 }
0x10e9   :  { %v1789_v23 = vadd.f32 %v1785_v33, %v1756_v56 }
0x10ea   :  { %v1819_v26 = vadd.f32 %v1815_v57, %v1788_v38 }
0x10eb   :  { %v1820_v6 = vadd.f32 %v1816_v25, %v1789_v23 }
0x10ec   :  { %v1852_v10 = vadd.f32 %v1848_v3, %v1819_v26 }
0x10ed   :  { %v1853_v39 = vadd.f32 %v1849_v2, %v1820_v6 }
0x10ee   :  { %v1885_v7 = vadd.f32 %v1881_v29, %v1852_v10 }
0x10ef   :  { %v1886_v1 = vadd.f32 %v1882_v45, %v1853_v39 }
0x10f0   :  { %v1918_v46 = vadd.f32 %v1914_v30, %v1885_v7 }
0x10f1   :  { %v1919_v47 = vadd.f32 %v1915_v35, %v1886_v1 }
0x10f2   :  { %v1951_v11 = vadd.f32 %v1947_v42, %v1918_v46 }
0x10f3   :  { %v1952_v31 = vadd.f32 %v1948_v48, %v1919_v47 }
0x10f4   :  { %v1984_v49 = vadd.f32 %v1980_v41, %v1951_v11 }
0x10f5   :  { %v1985_v8 = vadd.f32 %v1981_v44, %v1952_v31 }
0x1107   :  { %v2007_v36 = vpop.permute.xlu1 %2006 }
0x110b   :  { %v2011_v20 = vpop.permute.xlu1 %2010  ;;  %v2009_v13 = vpop.permute.xlu0 %2008 }
0x110c   :  { %v2013_v50 = vsel %vm2012_vm9, %v2007_v36, %v2009_v13  ;;  %v2014_v14 = vsel %vm2012_vm9, %v2009_v13, %v2011_v20 }
0x110d   :  { %v2017_v37 = vadd.f32 %v2013_v50, %v1984_v49  ;;  %v2018_v51 = vadd.f32 %v2014_v14, %v1985_v8  ;;  %v2126_v49 = vstv %s8225_s12  ;;  %v2130_v8 = vstv %s8227_s0  ;;  %s8350_s0 = sld [smem:[#allocation12 + $0x382]]  ;;  %s11629_s12 = sld [smem:[#allocation142_spill]] }
0x110e   :  { %v2142_v50 = vstv %s8229_s28  ;;  %v2146_v14 = vstv %s8231_s16  ;;  %s8352_s16 = sld [smem:[#allocation12 + $0x203]]  ;;  %s11628_s28 = sld [smem:[#allocation140_spill]] }
0x110f   :  { %v8214_v15 = vadd.f32 %v6599_v52, %v2017_v37  ;;  %v8219_v16 = vadd.f32 %v6600_v62, %v2018_v51  ;;  %v2156_v37 = vstv %s8233_s20  ;;  %v2160_v51 = vstv %s8235_s15  ;;  %s8357_s15 = sld [smem:[#allocation13 + $0x83]] }
0x1110   :  { %v2170_v52 = vstv %s8237_s27  ;;  %v2174_v62 = vstv %s8239_s13  ;;  %s11624_s13 = sld [smem:[#allocation137_spill]]  ;;  %s8359_s27 = sld [smem:[#allocation12 + $0x283]] }
0x1111   :  { %11589 = vst [vmem:[#allocation28_spill] sm:$0xff] %v8214_v15  ;;  %11590 = vst [vmem:[#allocation29_spill] sm:$0xff] %v8219_v16  ;;  %v2023_v53 = vcombine.low %v8214_v15, %v8219_v16  ;;  %v2024_v18 = vcombine.high %v8214_v15, %v8219_v16  ;;  %s11627_s20 = sld [smem:[#allocation139_spill]]  ;;  %v3170_v16 = vld [vmem:[#allocation8 + $0x108] sm:$0xff] }
0x1113   :  { %v6303_v43 = vrot.slane %v2023_v53, 9  ;;  %v6304_v54 = vrot.slane %v2024_v18, 9  ;;  %v6305_v33 = vrot.slane %v2023_v53, 10  ;;  %v6306_v24 = vrot.slane %v2024_v18, 10  ;;  %11621 = sst [smem:[#allocation150_spill]] %s8350_s0  ;;  %s8367_s0 = sld [smem:[#allocation12 + $0x383]] }
0x1114   :  { %v6307_v12 = vrot.slane %v2023_v53, 11  ;;  %v6308_v57 = vrot.slane %v2024_v18, 11  ;;  %11622 = sst [smem:[#allocation151_spill]] %s8352_s16  ;;  %s11630_s16 = sld [smem:[#allocation141_spill]] }
0x1115   :  { %v2035_v55 = vadd.f32 %v6303_v43, %v2023_v53  ;;  %v2036_v19 = vadd.f32 %v6304_v54, %v2024_v18  ;;  %v2186_v43 = vstv %s8249_s9  ;;  %v2229_v54 = vstv %s8255_s6  ;;  %11623 = sst [smem:[#allocation152_spill]] %s8357_s15  ;;  %s11634_s6 = sld [smem:[#allocation143_spill]] }
0x1116   :  { %11625 = sst [smem:[#allocation137_spill]] %s8359_s27  ;;  %s11632_s9 = sld [smem:[#allocation144_spill]] }
0x1117   :  { %v2043_v56 = vadd.f32 %v6305_v33, %v2035_v55  ;;  %v2044_v22 = vadd.f32 %v6306_v24, %v2036_v19  ;;  %v2200_v55 = vstv %s8267_s29  ;;  %v2214_v19 = vstv %s8275_s25  ;;  %s11635_s27 = sld [smem:[#allocation145_spill]]  ;;  %s11636_s25 = sld [smem:[#allocation146_spill]] }
0x1118   :  { %v2279_v33 = vstv %s8257_s1  ;;  %v2329_v24 = vstv %s8269_s26  ;;  %s11637_s1 = sld [smem:[#allocation147_spill]]  ;;  %s11669_s15 = sld [smem:[#allocation149_spill]] }
0x1119   :  { %v2051_v58 = vadd.f32 %v6307_v12, %v2043_v56  ;;  %v2052_v25 = vadd.f32 %v6308_v57, %v2044_v22  ;;  %11633 = sst [smem:[#allocation139_spill]] %s8367_s0  ;;  %v2232_v56 = vstv %s8277_s24  ;;  %v2236_v22 = vstv %s8287_s23  ;;  %s11696_s26 = smov 5  }
0x111a   :  { %v2250_v12 = vstv %s8289_s21  ;;  %v2264_v57 = vstv %s8295_s7  ;;  %s11675_s21 = sld [smem:[#allocation137_spill]]  ;;  %s11686_s24 = sld [smem:[#allocation139_spill]] }
0x111b   :  { %v2053_v38 = vmul.f32 0.25, %v2051_v58  ;;  %v2054_v23 = vmul.f32 0.25, %v2052_v25  ;;  %v2282_v58 = vstv %s8297_s3  ;;  %v2286_v25 = vstv %s8299_s18  ;;  %s11699_s29 = smov 6   ;;  %s11704_s0 = smov 126  }
0x111c   :  { %s11715_s3 = smov 111   ;;  %s11718_s7 = smov 19  }
0x111d   :  { %v8241_v59 = vsub.f32 %v2023_v53, %v2053_v38  ;;  %v8243_v63 = vsub.f32 %v2024_v18, %v2054_v23  ;;  %v2059_v3 = vrot.slane %v2053_v38, 7  ;;  %v2060_v0 = vrot.slane %v2054_v23, 7  ;;  %s11719_s18 = smov 109  }
0x111e   :  { %v2065_v2 = vrot.slane %v2053_v38, 6  ;;  %v2066_v26 = vrot.slane %v2054_v23, 6  ;;  %v2071_v6 = vrot.slane %v2053_v38, 5  ;;  %v2072_v28 = vrot.slane %v2054_v23, 5 }
0x111f   :  { %v8251_v40 = vsub.f32 %v2023_v53, %v2059_v3  ;;  %v8253_v29 = vsub.f32 %v2024_v18, %v2060_v0  ;;  %v2077_v30 = vmul.f32 %v8241_v59, %v8241_v59  ;;  %v2078_v32 = vmul.f32 %v8243_v63, %v8243_v63 }
0x1120   :  { %v8259_v9 = vsub.f32 %v2023_v53, %v2065_v2  ;;  %v8261_v45 = vsub.f32 %v2024_v18, %v2066_v26  ;;  %v8263_v10 = vsub.f32 %v2023_v53, %v2071_v6  ;;  %v8265_v39 = vsub.f32 %v2024_v18, %v2072_v28 }
0x1121   :  { %v2081_v60 = vmul.f32 %v8251_v40, %v8251_v40  ;;  %v2082_v34 = vmul.f32 %v8253_v29, %v8253_v29  ;;  %v2179_v53 = vstv %s8247_s8  ;;  %v2182_v18 = vstv %s8245_s14  ;;  %s11626_s8 = sld [smem:[#allocation138_spill]]  ;;  %s8365_s14 = sld [smem:[#allocation12 + $0x303]] }
0x1122   :  { %v2093_v35 = vmul.f32 %v8259_v9, %v8259_v9  ;;  %v2094_v7 = vmul.f32 %v8261_v45, %v8261_v45  ;;  %v2105_v27 = vmul.f32 %v8263_v10, %v8263_v10  ;;  %v2106_v42 = vmul.f32 %v8265_v39, %v8265_v39 }
0x1123   :  { %v6309_v1 = vrot.slane %v2081_v60, 9  ;;  %v6310_v61 = vrot.slane %v2082_v34, 9  ;;  %v2300_v38 = vstv %s8301_s2  ;;  %v2314_v23 = vstv %s8303_s22  ;;  %s11661_s22 = smov 51   ;;  %s11721_s2 = smov 20  }
0x1124   :  { %v6311_v46 = vrot.slane %v2093_v35, 10  ;;  %v6312_v47 = vrot.slane %v2094_v7, 10  ;;  %v6313_v21 = vrot.slane %v2105_v27, 11  ;;  %v6314_v41 = vrot.slane %v2106_v42, 11 }
0x1125   :  { %v2091_v4 = vadd.f32 %v6309_v1, %v2077_v30  ;;  %v2092_v48 = vadd.f32 %v6310_v61, %v2078_v32  ;;  %v2332_v3 = vstv %s11624_s13  ;;  %v2350_v2 = vstv %s11627_s20  ;;  %s11668_s13 = smov 2   ;;  %s11707_s20 = smov 124  }
0x1126   :  { %v2364_v26 = vstv %s11628_s28  ;;  %v2379_v6 = vstv %s11629_s12  ;;  %v2382_v28 = vstv %s11630_s16  ;;  %v2386_v60 = vstv %s11632_s9  ;;  %s11702_s9 = smov 18   ;;  %s11703_s12 = smov 127  }
0x1127   :  { %v2103_v36 = vadd.f32 %v6311_v46, %v2091_v4  ;;  %v2104_v5 = vadd.f32 %v6312_v47, %v2092_v48  ;;  %11631 = sst [smem:[#allocation138_spill]] %s8365_s14  ;;  %v2336_v0 = vstv %s11626_s8  ;;  %v2429_v34 = vstv %s11634_s6  ;;  %s11672_s14 = sld [smem:[#allocation151_spill]] }
0x1128   :  { %v2400_v30 = vstv %s8321_s17  ;;  %v2414_v32 = vstv %s8323_s30  ;;  %v2432_v35 = vstv %s11635_s27  ;;  %v2436_v7 = vstv %s8327_s19  ;;  %s11664_s17 = smov 1   ;;  %s11670_s19 = sld [smem:[#allocation150_spill]] }
0x1129   :  { %v2115_v17 = vadd.f32 %v6313_v21, %v2103_v36  ;;  %v2116_v44 = vadd.f32 %v6314_v41, %v2104_v5  ;;  %v2450_v1 = vstv %s11636_s25  ;;  %v2464_v61 = vstv %s11637_s1  ;;  %s11680_s23 = sld [smem:[#allocation138_spill]]  ;;  %s11687_s25 = smov 4  }
0x112a   :  { %v2479_v27 = vstv %s8333_s5  ;;  %v2482_v42 = vstv %s8337_s10  ;;  %v2486_v4 = vstv %s8343_s4  ;;  %s11674_s4 = smov 3   ;;  %s11679_s10 = sld [smem:[#allocation152_spill]] }
0x112b   :  { %v2117_v11 = vmul.f32 0.25, %v2115_v17  ;;  %v2118_v31 = vmul.f32 0.25, %v2116_v44  ;;  %s11700_s1 = smov 16   ;;  %s11701_s6 = smov 17  }
0x112c   :  { %s11705_s16 = smov 125   ;;  %s11709_s28 = smov 123  }
0x112d   :  { %v2119_v20 = vadd.f32 1e-06, %v2117_v11  ;;  %v2120_v13 = vadd.f32 1e-06, %v2118_v31  ;;  %s11711_s5 = smov 122   ;;  %s11717_s27 = smov 110  }
0x112e   :  { %s11723_s8 = smov 108   ;;  %s11724_s30 = smov 21  }
0x112f   :  { %6595 = vrsqrt.f32 %v2119_v20 }
0x1130   :  { %6597 = vrsqrt.f32 %v2120_v13 }
0x1139   :  { %v6596_v36 = vpop.eup %6595 }
0x113a   :  { %v6598_v44 = vpop.eup %6597  ;;  %v2123_v11 = vmul.f32 %v6596_v36, %v8241_v59  ;;  %v2135_v31 = vrot.slane %v6596_v36, 7  ;;  %v2149_v20 = vrot.slane %v6596_v36, 6  ;;  %v2163_v13 = vrot.slane %v6596_v36, 5 }
0x113b   :  { %v2124_v46 = vmul.f32 %v6598_v44, %v8243_v63  ;;  %v2136_v47 = vrot.slane %v6598_v44, 7  ;;  %v2150_v5 = vrot.slane %v6598_v44, 6  ;;  %v2164_v21 = vrot.slane %v6598_v44, 5 }
0x113c   :  { %v2127_v17 = vmul.f32 %v2126_v49, %v2123_v11  ;;  %v2139_v59 = vmul.f32 %v2135_v31, %v8251_v40  ;;  %v2153_v41 = vmul.f32 %v2149_v20, %v8259_v9  ;;  %v2167_v36 = vmul.f32 %v2163_v13, %v8263_v10 }
0x113d   :  { %v2128_v63 = vmul.f32 %v2126_v49, %v2124_v46  ;;  %v2140_v48 = vmul.f32 %v2136_v47, %v8253_v29  ;;  %v2154_v44 = vmul.f32 %v2150_v5, %v8261_v45  ;;  %v2168_v11 = vmul.f32 %v2164_v21, %v8265_v39 }
0x113e   :  { %v8415_v40 = vadd.f32 %v2130_v8, %v2127_v17  ;;  %v2143_v9 = vmul.f32 %v2142_v50, %v2139_v59  ;;  %v2157_v10 = vmul.f32 %v2156_v37, %v2153_v41  ;;  %v2171_v49 = vmul.f32 %v2170_v52, %v2167_v36 }
0x113f   :  { %v8425_v29 = vadd.f32 %v2130_v8, %v2128_v63  ;;  %v2144_v45 = vmul.f32 %v2142_v50, %v2140_v48  ;;  %v2158_v39 = vmul.f32 %v2156_v37, %v2154_v44  ;;  %v2172_v46 = vmul.f32 %v2170_v52, %v2168_v11 }
0x1140   :  { %v8435_v47 = vadd.f32 %v2146_v14, %v2143_v9  ;;  %v8439_v5 = vadd.f32 %v2160_v51, %v2157_v10  ;;  %v8443_v21 = vadd.f32 %v2174_v62, %v2171_v49  ;;  %v2180_v8 = vmul.f32 %v2179_v53, %v8415_v40 }
0x1141   :  { %v8450_v50 = vadd.f32 %v2146_v14, %v2144_v45  ;;  %v8454_v37 = vadd.f32 %v2160_v51, %v2158_v39  ;;  %v8458_v52 = vadd.f32 %v2174_v62, %v2172_v46  ;;  %v2181_v48 = vmul.f32 %v2179_v53, %v8425_v29 }
0x1142   :  { %v2183_v41 = vadd.f32 %v2182_v18, %v2180_v8  ;;  %v2187_v17 = vmul.f32 %v2186_v43, %v8435_v47  ;;  %v2201_v14 = vmul.f32 %v2200_v55, %v8439_v5  ;;  %v2215_v51 = vmul.f32 %v2214_v19, %v8443_v21 }
0x1143   :  { %v2184_v62 = vadd.f32 %v2182_v18, %v2181_v48  ;;  %v2188_v53 = vmul.f32 %v2186_v43, %v8450_v50  ;;  %v2202_v31 = vmul.f32 %v2200_v55, %v8454_v37  ;;  %v2216_v20 = vmul.f32 %v2214_v19, %v8458_v52 }
0x1144   :  { %v6324_v13 = vrot.slane %v2187_v17, 9  ;;  %v6327_v59 = vrot.slane %v2201_v14, 10  ;;  %v6330_v36 = vrot.slane %v2215_v51, 11  ;;  %v2230_v63 = vmul.f32 %v2229_v54, %v8415_v40 }
0x1145   :  { %v6325_v18 = vrot.slane %v2188_v53, 9  ;;  %v6328_v44 = vrot.slane %v2202_v31, 10  ;;  %v6331_v11 = vrot.slane %v2216_v20, 11  ;;  %v2231_v43 = vmul.f32 %v2229_v54, %v8425_v29 }
0x1146   :  { %v2197_v55 = vadd.f32 %v6324_v13, %v2183_v41  ;;  %v2233_v9 = vadd.f32 %v2232_v56, %v2230_v63  ;;  %v2237_v19 = vmul.f32 %v2236_v22, %v8435_v47  ;;  %v2238_v10 = vmul.f32 %v2236_v22, %v8450_v50 }
0x1147   :  { %v2198_v49 = vadd.f32 %v6325_v18, %v2184_v62  ;;  %v2234_v45 = vadd.f32 %v2232_v56, %v2231_v43  ;;  %v2251_v39 = vmul.f32 %v2250_v12, %v8439_v5  ;;  %v2252_v54 = vmul.f32 %v2250_v12, %v8454_v37 }
0x1148   :  { %v2211_v46 = vadd.f32 %v6327_v59, %v2197_v55  ;;  %v6335_v8 = vrot.slane %v2237_v19, 9  ;;  %v6336_v48 = vrot.slane %v2238_v10, 9  ;;  %v2265_v41 = vmul.f32 %v2264_v57, %v8443_v21 }
0x1149   :  { %v2212_v22 = vadd.f32 %v6328_v44, %v2198_v49  ;;  %v6338_v17 = vrot.slane %v2251_v39, 10  ;;  %v6339_v56 = vrot.slane %v2252_v54, 10  ;;  %v2266_v14 = vmul.f32 %v2264_v57, %v8458_v52 }
0x114a   :  { %v8513_v12 = vadd.f32 %v6330_v36, %v2211_v46  ;;  %v2247_v51 = vadd.f32 %v6335_v8, %v2233_v9  ;;  %v2248_v62 = vadd.f32 %v6336_v48, %v2234_v45  ;;  %v6341_v53 = vrot.slane %v2265_v41, 11 }
0x114b   :  { %v8515_v31 = vadd.f32 %v6331_v11, %v2212_v22  ;;  %v6342_v20 = vrot.slane %v2266_v14, 11  ;;  %v2280_v13 = vmul.f32 %v2279_v33, %v8415_v40  ;;  %v2281_v59 = vmul.f32 %v2279_v33, %v8425_v29 }
0x114c   :  { %v2261_v63 = vadd.f32 %v6338_v17, %v2247_v51  ;;  %v2262_v18 = vadd.f32 %v6339_v56, %v2248_v62  ;;  %v2287_v57 = vmul.f32 %v2286_v25, %v8435_v47  ;;  %v2288_v36 = vmul.f32 %v2286_v25, %v8450_v50 }
0x114d   :  { %v2283_v44 = vadd.f32 %v2282_v58, %v2280_v13  ;;  %v2284_v11 = vadd.f32 %v2282_v58, %v2281_v59  ;;  %v2301_v43 = vmul.f32 %v2300_v38, %v8439_v5  ;;  %v2302_v33 = vmul.f32 %v2300_v38, %v8454_v37 }
0x114e   :  { %v2275_v55 = vadd.f32 %v6341_v53, %v2261_v63  ;;  %v2276_v9 = vadd.f32 %v6342_v20, %v2262_v18  ;;  %v6346_v19 = vrot.slane %v2287_v57, 9  ;;  %v6347_v10 = vrot.slane %v2288_v36, 9 }
0x114f   :  { %v6349_v25 = vrot.slane %v2301_v43, 10  ;;  %v6350_v49 = vrot.slane %v2302_v33, 10  ;;  %v2315_v45 = vmul.f32 %v2314_v23, %v8443_v21  ;;  %v2316_v58 = vmul.f32 %v2314_v23, %v8458_v52 }
0x1150   :  { %v2297_v39 = vadd.f32 %v6346_v19, %v2283_v44  ;;  %v2298_v54 = vadd.f32 %v6347_v10, %v2284_v11  ;;  %v2330_v38 = vmul.f32 %v2329_v24, %v8415_v40  ;;  %v2331_v46 = vmul.f32 %v2329_v24, %v8425_v29  ;;  %v11659_v11 = vld [vmem:[#allocation27_spill] sm:$0xff] }
0x1151   :  { %v6352_v8 = vrot.slane %v2315_v45, 11  ;;  %v6353_v48 = vrot.slane %v2316_v58, 11  ;;  %v2337_v41 = vmul.f32 %v2336_v0, %v8435_v47  ;;  %v2338_v22 = vmul.f32 %v2336_v0, %v8450_v50  ;;  %v11660_v45 = vld [vmem:[#allocation26_spill] sm:$0xff] }
0x1152   :  { %v2311_v23 = vadd.f32 %v6349_v25, %v2297_v39  ;;  %v2312_v17 = vadd.f32 %v6350_v49, %v2298_v54  ;;  %v2333_v56 = vadd.f32 %v2332_v3, %v2330_v38  ;;  %v2334_v14 = vadd.f32 %v2332_v3, %v2331_v46 }
0x1153   :  { %v6357_v51 = vrot.slane %v2337_v41, 9  ;;  %v6358_v62 = vrot.slane %v2338_v22, 9  ;;  %v2351_v24 = vmul.f32 %v2350_v2, %v8439_v5  ;;  %v2352_v53 = vmul.f32 %v2350_v2, %v8454_v37 }
0x1154   :  { %v2325_v20 = vadd.f32 %v6352_v8, %v2311_v23  ;;  %v2326_v13 = vadd.f32 %v6353_v48, %v2312_v17  ;;  %v2365_v59 = vmul.f32 %v2364_v26, %v8443_v21  ;;  %v2366_v0 = vmul.f32 %v2364_v26, %v8458_v52 }
0x1155   :  { %v2347_v63 = vadd.f32 %v6357_v51, %v2333_v56  ;;  %v2348_v18 = vadd.f32 %v6358_v62, %v2334_v14  ;;  %v6360_v57 = vrot.slane %v2351_v24, 10  ;;  %v6361_v3 = vrot.slane %v2352_v53, 10 }
0x1156   :  { %v6363_v36 = vrot.slane %v2365_v59, 11  ;;  %v6364_v44 = vrot.slane %v2366_v0, 11  ;;  %v2586_v43 = vrot.slane %v8513_v12, %v11659_v11  ;;  %v2594_v2 = vrot.slane %v8515_v31, %v11659_v11 }
0x1157   :  { %v2361_v33 = vadd.f32 %v6360_v57, %v2347_v63  ;;  %v2362_v19 = vadd.f32 %v6361_v3, %v2348_v18  ;;  %v2608_v10 = vrot.slane %v2275_v55, %v11659_v11  ;;  %v2616_v25 = vrot.slane %v2276_v9, %v11659_v11 }
0x1158   :  { %v2630_v26 = vrot.slane %v2325_v20, %v11659_v11  ;;  %v2638_v49 = vrot.slane %v2326_v13, %v11659_v11  ;;  %v2582_v58 = vrot.slane %v8513_v12, %v11660_v45  ;;  %v2590_v39 = vrot.slane %v8515_v31, %v11660_v45 }
0x1159   :  { %v2375_v54 = vadd.f32 %v6363_v36, %v2361_v33  ;;  %v2376_v38 = vadd.f32 %v6364_v44, %v2362_v19  ;;  %v2666_v46 = vsel %vm399_vm0, %v2586_v43, %v2608_v10  ;;  %v2668_v8 = vsel %vm399_vm0, %v2594_v2, %v2616_v25  ;;  %v2705_v33 = vld [vmem:[#allocation8 + $0x18] sm:$0xff] }
0x115a   :  { %v2670_v48 = vsel %vm404_vm1, %v2666_v46, %v2630_v26  ;;  %v2672_v41 = vsel %vm404_vm1, %v2668_v8, %v2638_v49  ;;  %v2604_v22 = vrot.slane %v2275_v55, %v11660_v45  ;;  %v2612_v23 = vrot.slane %v2276_v9, %v11660_v45  ;;  %v2704_v26 = vld [vmem:[#allocation8 + $0x10] sm:$0xff] }
0x115b   :  { %v2652_v12 = vrot.slane %v2375_v54, %v11659_v11  ;;  %v2660_v17 = vrot.slane %v2376_v38, %v11659_v11  ;;  %v2626_v31 = vrot.slane %v2325_v20, %v11660_v45  ;;  %v2634_v56 = vrot.slane %v2326_v13, %v11660_v45 }
0x115c   :  { %v2648_v14 = vrot.slane %v2375_v54, %v11660_v45  ;;  %v2656_v51 = vrot.slane %v2376_v38, %v11660_v45  ;;  %v2665_v55 = vsel %vm399_vm0, %v2582_v58, %v2604_v22  ;;  %v2667_v9 = vsel %vm399_vm0, %v2590_v39, %v2612_v23  ;;  %v2735_v22 = vld [vmem:[#allocation8 + $0x20] sm:$0xff]  ;;  %v3200_v45 = vld [vmem:[#allocation8 + $0x110] sm:$0xff] }
0x115d   :  { %v2674_v62 = vsel %vm11370_vm2, %v2670_v48, %v2652_v12  ;;  %v2676_v24 = vsel %vm11370_vm2, %v2672_v41, %v2660_v17  ;;  %v2669_v53 = vsel %vm404_vm1, %v2665_v55, %v2626_v31  ;;  %v2671_v20 = vsel %vm404_vm1, %v2667_v9, %v2634_v56  ;;  %v2736_v31 = vld [vmem:[#allocation8 + $0x28] sm:$0xff] }
0x115e   :  { %v6410_v13 = vcombine.low %v2674_v62, %v2676_v24  ;;  %v2673_v59 = vsel %vm11370_vm2, %v2669_v53, %v2648_v14  ;;  %v2675_v0 = vsel %vm11370_vm2, %v2671_v20, %v2656_v51  ;;  %v2380_v63 = vmul.f32 %v2379_v6, %v8415_v40 }
0x115f   :  { %v6409_v18 = vcombine.low %v2673_v59, %v2675_v0  ;;  %v2381_v57 = vmul.f32 %v2379_v6, %v8425_v29  ;;  %v2387_v3 = vmul.f32 %v2386_v60, %v8435_v47  ;;  %v2388_v36 = vmul.f32 %v2386_v60, %v8450_v50 }
0x1160   :  { %2687 = vrot.lane.b32.xlu1 %v6410_v13, %s11661_s22  ;;  %v2383_v44 = vadd.f32 %v2382_v28, %v2380_v63  ;;  %v2401_v43 = vmul.f32 %v2400_v30, %v8439_v5  ;;  %v2402_v2 = vmul.f32 %v2400_v30, %v8454_v37  ;;  %v2415_v6 = vmul.f32 %v2414_v32, %v8443_v21  ;;  %v2767_v13 = vld [vmem:[#allocation8 + $0x38] sm:$0xff] }
0x1161   :  { %2685 = vrot.lane.b32.xlu0 %v6409_v18, %s11661_s22  ;;  %v2384_v60 = vadd.f32 %v2382_v28, %v2381_v57  ;;  %v6368_v19 = vrot.slane %v2387_v3, 9  ;;  %v6369_v10 = vrot.slane %v2388_v36, 9  ;;  %v2416_v25 = vmul.f32 %v2414_v32, %v8458_v52  ;;  %v2766_v18 = vld [vmem:[#allocation8 + $0x30] sm:$0xff] }
0x1162   :  { %v6371_v30 = vrot.slane %v2401_v43, 10  ;;  %v6372_v49 = vrot.slane %v2402_v2, 10  ;;  %v6374_v58 = vrot.slane %v2415_v6, 11  ;;  %v2430_v39 = vmul.f32 %v2429_v34, %v8415_v40 }
0x1163   :  { %v2397_v54 = vadd.f32 %v6368_v19, %v2383_v44  ;;  %v2398_v38 = vadd.f32 %v6369_v10, %v2384_v60  ;;  %v6375_v46 = vrot.slane %v2416_v25, 11  ;;  %v2431_v28 = vmul.f32 %v2429_v34, %v8425_v29 }
0x1164   :  { %2710 = vrot.lane.b32.xlu1 %v2705_v33, %s11664_s17  ;;  %v2433_v32 = vadd.f32 %v2432_v35, %v2430_v39  ;;  %v2437_v8 = vmul.f32 %v2436_v7, %v8435_v47  ;;  %v2438_v48 = vmul.f32 %v2436_v7, %v8450_v50  ;;  %v2451_v41 = vmul.f32 %v2450_v1, %v8439_v5 }
0x1165   :  { %2708 = vrot.lane.b32.xlu0 %v2704_v26, %s11664_s17  ;;  %v2411_v23 = vadd.f32 %v6371_v30, %v2397_v54  ;;  %v2412_v34 = vadd.f32 %v6372_v49, %v2398_v38  ;;  %v2434_v12 = vadd.f32 %v2432_v35, %v2431_v28  ;;  %v2452_v17 = vmul.f32 %v2450_v1, %v8454_v37  ;;  %v2798_v38 = vld [vmem:[#allocation8 + $0x48] sm:$0xff] }
0x1166   :  { %v6379_v56 = vrot.slane %v2437_v8, 9  ;;  %v6380_v14 = vrot.slane %v2438_v48, 9  ;;  %v6382_v7 = vrot.slane %v2451_v41, 10  ;;  %v2465_v51 = vmul.f32 %v2464_v61, %v8443_v21 }
0x1167   :  { %v8662_v55 = vadd.f32 %v6374_v58, %v2411_v23  ;;  %v8664_v9 = vadd.f32 %v6375_v46, %v2412_v34  ;;  %v6383_v62 = vrot.slane %v2452_v17, 10  ;;  %v2466_v35 = vmul.f32 %v2464_v61, %v8458_v52 }
0x1168   :  { %2739 = vrot.lane.b32.xlu1 %v2735_v22, %s11668_s13  ;;  %v2447_v1 = vadd.f32 %v6379_v56, %v2433_v32  ;;  %v2448_v24 = vadd.f32 %v6380_v14, %v2434_v12  ;;  %v6385_v53 = vrot.slane %v2465_v51, 11  ;;  %v2480_v20 = vmul.f32 %v2479_v27, %v8415_v40 }
0x1169   :  { %11666 = vst [vmem:[#allocation32_spill] sm:$0xff] %v8662_v55  ;;  %11667 = vst [vmem:[#allocation30_spill] sm:$0xff] %v8664_v9  ;;  %2741 = vrot.lane.b32.xlu0 %v2736_v31, %s11668_s13  ;;  %v6386_v59 = vrot.slane %v2466_v35, 11  ;;  %v2481_v0 = vmul.f32 %v2479_v27, %v8425_v29  ;;  %v2487_v61 = vmul.f32 %v2486_v4, %v8435_v47  ;;  %v11671_v44 = vstv %s11669_s15  ;;  %s11725_s15 = smov 107  }
0x116a   :  { %v2488_v63 = vmul.f32 %v2486_v4, %v8450_v50  ;;  %v2461_v57 = vadd.f32 %v6382_v7, %v2447_v1  ;;  %v2462_v3 = vadd.f32 %v6383_v62, %v2448_v24  ;;  %v2483_v36 = vadd.f32 %v2482_v42, %v2480_v20  ;;  %v2828_v20 = vld [vmem:[#allocation8 + $0x50] sm:$0xff] }
0x116b   :  { %v2501_v43 = vmul.f32 %v11671_v44, %v8439_v5  ;;  %v2484_v2 = vadd.f32 %v2482_v42, %v2481_v0  ;;  %v6390_v6 = vrot.slane %v2487_v61, 9  ;;  %v11673_v33 = vmov %v11671_v44  ;;  %v2797_v42 = vld [vmem:[#allocation8 + $0x40] sm:$0xff] }
0x116c   :  { %v6391_v27 = vrot.slane %v2488_v63, 9  ;;  %v2502_v60 = vmul.f32 %v11673_v33, %v8454_v37  ;;  %2772 = vrot.lane.b32.xlu1 %v2767_v13, %s11674_s4  ;;  %v8694_v4 = vadd.f32 %v6385_v53, %v2461_v57  ;;  %v8696_v19 = vadd.f32 %v6386_v59, %v2462_v3  ;;  %v2859_v44 = vld [vmem:[#allocation8 + $0x60] sm:$0xff] }
0x116d   :  { %v6393_v10 = vrot.slane %v2501_v43, 10  ;;  %v11678_v25 = vstv %s11670_s19  ;;  %2770 = vrot.lane.b32.xlu0 %v2766_v18, %s11674_s4  ;;  %v2497_v30 = vadd.f32 %v6390_v6, %v2483_v36  ;;  %v11682_v28 = vstv %s11672_s14  ;;  %v2921_v33 = vld [vmem:[#allocation8 + $0x80] sm:$0xff]  ;;  %s11727_s19 = smov 22   ;;  %s11729_s14 = smov 106  }
0x116e   :  { %11676 = vst [vmem:[#allocation31_spill] sm:$0xff] %v8694_v4  ;;  %11677 = vst [vmem:[#allocation34_spill] sm:$0xff] %v8696_v19  ;;  %v2515_v26 = vmul.f32 %v11678_v25, %v8443_v21  ;;  %v2498_v49 = vadd.f32 %v6391_v27, %v2484_v2  ;;  %v6394_v58 = vrot.slane %v2502_v60, 10  ;;  %v11681_v39 = vmov %v11678_v25  ;;  %v2860_v2 = vld [vmem:[#allocation8 + $0x68] sm:$0xff]  ;;  %v2952_v25 = vld [vmem:[#allocation8 + $0x90] sm:$0xff] }
0x116f   :  { %v2516_v54 = vmul.f32 %v11681_v39, %v8458_v52  ;;  %v2530_v32 = vmul.f32 %v11682_v28, %v8415_v40  ;;  %v11683_v8 = vmov %v11682_v28  ;;  %v11684_v41 = vstv %s11675_s21  ;;  %v2922_v60 = vld [vmem:[#allocation8 + $0x88] sm:$0xff]  ;;  %s11730_s21 = smov 32   ;;  %v3262_v4 = vld [vmem:[#allocation8 + $0x130] sm:$0xff] }
0x1170   :  { %v6396_v46 = vrot.slane %v2515_v26, 11  ;;  %v2531_v48 = vmul.f32 %v11683_v8, %v8425_v29  ;;  %v2537_v22 = vmul.f32 %v11684_v41, %v8435_v47  ;;  %v2511_v23 = vadd.f32 %v6393_v10, %v2497_v30  ;;  %2801 = vrot.lane.b32.xlu1 %v2797_v42, %s11687_s25  ;;  %v2829_v47 = vld [vmem:[#allocation8 + $0x58] sm:$0xff] }
0x1171   :  { %v2512_v34 = vadd.f32 %v6394_v58, %v2498_v49  ;;  %v6397_v12 = vrot.slane %v2516_v54, 11  ;;  %v11685_v17 = vmov %v11684_v41  ;;  %v11688_v56 = vstv %s11679_s10  ;;  %2803 = vrot.lane.b32.xlu0 %v2798_v38, %s11687_s25  ;;  %v2953_v10 = vld [vmem:[#allocation8 + $0x98] sm:$0xff]  ;;  %s11731_s10 = smov 96  }
0x1172   :  { %v2538_v31 = vmul.f32 %v11685_v17, %v8450_v50  ;;  %v2533_v14 = vadd.f32 %v11688_v56, %v2530_v32  ;;  %v11689_v40 = vmov %v11688_v56  ;;  %v6401_v51 = vrot.slane %v2537_v22, 9 }
0x1173   :  { %v2534_v7 = vadd.f32 %v11689_v40, %v2531_v48  ;;  %v11690_v29 = vstv %s11680_s23  ;;  %v8726_v35 = vadd.f32 %v6396_v46, %v2511_v23  ;;  %v8728_v1 = vadd.f32 %v6397_v12, %v2512_v34  ;;  %s11732_s23 = smov 33  }
0x1174   :  { %v2551_v62 = vmul.f32 %v11690_v29, %v8439_v5  ;;  %v6402_v24 = vrot.slane %v2538_v31, 9  ;;  %v11693_v50 = vmov %v11690_v29  ;;  %v2547_v13 = vadd.f32 %v6401_v51, %v2533_v14  ;;  %2834 = vrot.lane.b32.xlu1 %v2829_v47, %s11696_s26 }
0x1175   :  { %11691 = vst [vmem:[#allocation33_spill] sm:$0xff] %v8726_v35  ;;  %11692 = vst [vmem:[#allocation35_spill] sm:$0xff] %v8728_v1  ;;  %v2552_v53 = vmul.f32 %v11693_v50, %v8454_v37  ;;  %v11694_v0 = vstv %s11686_s24  ;;  %2832 = vrot.lane.b32.xlu0 %v2828_v20, %s11696_s26  ;;  %s11734_s24 = smov 95   ;;  %v3232_v1 = vld [vmem:[#allocation8 + $0x128] sm:$0xff]  ;;  %vm11918_vm2 = vcmask 1022976  }
0x1176   :  { %v6404_v59 = vrot.slane %v2551_v62, 10  ;;  %v2565_v61 = vmul.f32 %v11694_v0, %v8443_v21  ;;  %v11695_v63 = vmov %v11694_v0  ;;  %v2548_v18 = vadd.f32 %v6402_v24, %v2534_v7  ;;  %v2891_v21 = vld [vmem:[#allocation8 + $0x78] sm:$0xff] }
0x1177   :  { %v2566_v5 = vmul.f32 %v11695_v63, %v8458_v52  ;;  %v6405_v57 = vrot.slane %v2552_v53, 10  ;;  %v2890_v52 = vld [vmem:[#allocation8 + $0x70] sm:$0xff] }
0x1178   :  { %v2561_v3 = vadd.f32 %v6404_v59, %v2547_v13  ;;  %v6407_v36 = vrot.slane %v2565_v61, 11  ;;  %2863 = vrot.lane.b32.xlu1 %v2859_v44, %s11699_s29 }
0x1179   :  { %v2562_v43 = vadd.f32 %v6405_v57, %v2548_v18  ;;  %v6408_v37 = vrot.slane %v2566_v5, 11  ;;  %2865 = vrot.lane.b32.xlu0 %v2860_v2, %s11699_s29  ;;  %s9786_s29 = sld [smem:[#allocation12 + $0x583]] }
0x117a   :  { %v8741_v6 = vadd.f32 %v6407_v36, %v2561_v3 }
0x117b   :  { %v8743_v27 = vadd.f32 %v6408_v37, %v2562_v43 }
0x117c   :  { %11697 = vst [vmem:[#allocation38_spill] sm:$0xff] %v8741_v6  ;;  %2896 = vrot.lane.b32.xlu1 %v2891_v21, %s11700_s1 }
0x117d   :  { %11698 = vst [vmem:[#allocation36_spill] sm:$0xff] %v8743_v27  ;;  %2894 = vrot.lane.b32.xlu0 %v2890_v52, %s11700_s1  ;;  %s9779_s1 = sld [smem:[#allocation12 + $0x483]] }
0x1180   :  { %2925 = vrot.lane.b32.xlu1 %v2921_v33, %s11701_s6 }
0x1181   :  { %2927 = vrot.lane.b32.xlu0 %v2922_v60, %s11701_s6  ;;  %s9772_s6 = sld [smem:[#allocation13 + $0x103]] }
0x1184   :  { %2958 = vrot.lane.b32.xlu1 %v2953_v10, %s11702_s9 }
0x1185   :  { %2956 = vrot.lane.b32.xlu0 %v2952_v25, %s11702_s9  ;;  %s9765_s9 = sld [smem:[#allocation12 + $0x502]] }
0x11d2   :  { %v2688_v26 = vpop.permute.xlu1 %2687 }
0x11d3   :  { %v2686_v42 = vpop.permute.xlu0 %2685  ;;  %v8764_v32 = vsel %vm11369_vm3, %v2688_v26, 0.0 }
0x11d4   :  { %v8754_v49 = vsel %vm11369_vm3, 0.0, %v2686_v42  ;;  %v8757_v39 = vsel %vm11369_vm3, %v2686_v42, %v2688_v26 }
0x11d6   :  { %v2711_v30 = vpop.permute.xlu1 %2710 }
0x11d7   :  { %v2709_v58 = vpop.permute.xlu0 %2708  ;;  %v2718_v41 = vmul.f32 %v2711_v30, %v8764_v32 }
0x11d8   :  { %v2712_v54 = vsel %vm11368_vm4, %v2709_v58, %v2711_v30  ;;  %v2716_v38 = vmul.f32 %v2709_v58, %v8754_v49  ;;  %vm11916_vm4 = vcmask 1031168  }
0x11d9   :  { %v2717_v46 = vmul.f32 %v2712_v54, %v8757_v39 }
0x11da   :  { %2722 = vrot.lane.b32.xlu0 %v2716_v38, %s11703_s12  ;;  %v2740_v28 = vpop.permute.xlu1 %2739 }
0x11db   :  { %v2747_v8 = vmul.f32 %v2740_v28, %v8754_v49  ;;  %2724 = vrot.lane.b32.xlu1 %v2717_v46, %s11703_s12  ;;  %v2742_v48 = vpop.permute.xlu0 %2741 }
0x11dc   :  { %v2743_v22 = vsel %vm11267_vm5, %v2740_v28, %v2742_v48  ;;  %v2749_v17 = vmul.f32 %v2742_v48, %v8764_v32  ;;  %vm11706_vm5 = vcmask 31744   ;;  %v2983_v28 = vld [vmem:[#allocation8 + $0xa0] sm:$0xff] }
0x11dd   :  { %v2748_v12 = vmul.f32 %v2743_v22, %v8757_v39 }
0x11de   :  { %2726 = vrot.lane.b32.xlu0 %v2718_v41, %s11703_s12  ;;  %v2773_v23 = vpop.permute.xlu1 %2772 }
0x11df   :  { %2753 = vrot.lane.b32.xlu1 %v2747_v8, %s11704_s0  ;;  %v2771_v34 = vpop.permute.xlu0 %2770  ;;  %v2780_v51 = vmul.f32 %v2773_v23, %v8764_v32  ;;  %v2984_v8 = vld [vmem:[#allocation8 + $0xa8] sm:$0xff] }
0x11e0   :  { %v2774_v31 = vsel %vm11268_vm6, %v2771_v34, %v2773_v23  ;;  %v2778_v56 = vmul.f32 %v2771_v34, %v8754_v49  ;;  %vm11708_vm6 = vcmask 39936  }
0x11e1   :  { %v2779_v14 = vmul.f32 %v2774_v31, %v8757_v39 }
0x11e2   :  { %2755 = vrot.lane.b32.xlu0 %v2748_v12, %s11704_s0  ;;  %v2802_v40 = vpop.permute.xlu1 %2801 }
0x11e3   :  { %2757 = vrot.lane.b32.xlu1 %v2749_v17, %s11704_s0  ;;  %v2804_v7 = vpop.permute.xlu0 %2803  ;;  %v2809_v29 = vmul.f32 %v2802_v40, %v8754_v49 }
0x11e4   :  { %v2805_v62 = vsel %vm11706_vm5, %v2802_v40, %v2804_v7  ;;  %v2811_v53 = vmul.f32 %v2804_v7, %v8764_v32  ;;  %vm11710_vm5 = vcmask 48128  }
0x11e5   :  { %v2810_v50 = vmul.f32 %v2805_v62, %v8757_v39 }
0x11e6   :  { %2784 = vrot.lane.b32.xlu0 %v2778_v56, %s11705_s16  ;;  %v2835_v47 = vpop.permute.xlu1 %2834 }
0x11e7   :  { %2786 = vrot.lane.b32.xlu1 %v2779_v14, %s11705_s16  ;;  %v2833_v24 = vpop.permute.xlu0 %2832  ;;  %v2842_v63 = vmul.f32 %v2835_v47, %v8764_v32 }
0x11e8   :  { %v2836_v20 = vsel %vm11708_vm6, %v2833_v24, %v2835_v47  ;;  %v2840_v13 = vmul.f32 %v2833_v24, %v8754_v49  ;;  %vm11712_vm6 = vcmask 130048  }
0x11e9   :  { %v2841_v59 = vmul.f32 %v2836_v20, %v8757_v39 }
0x11ea   :  { %2788 = vrot.lane.b32.xlu0 %v2780_v51, %s11705_s16  ;;  %v2864_v0 = vpop.permute.xlu1 %2863 }
0x11eb   :  { %2815 = vrot.lane.b32.xlu1 %v2809_v29, %s11707_s20  ;;  %v2866_v61 = vpop.permute.xlu0 %2865  ;;  %v2871_v5 = vmul.f32 %v2864_v0, %v8754_v49 }
0x11ec   :  { %v2867_v18 = vsel %vm11710_vm5, %v2864_v0, %v2866_v61  ;;  %v2873_v44 = vmul.f32 %v2866_v61, %v8764_v32  ;;  %vm11714_vm5 = vcmask 138240  }
0x11ed   :  { %v2872_v36 = vmul.f32 %v2867_v18, %v8757_v39 }
0x11ee   :  { %2817 = vrot.lane.b32.xlu0 %v2810_v50, %s11707_s20  ;;  %v2897_v57 = vpop.permute.xlu1 %2896 }
0x11ef   :  { %2819 = vrot.lane.b32.xlu1 %v2811_v53, %s11707_s20  ;;  %v2895_v3 = vpop.permute.xlu0 %2894  ;;  %v2904_v33 = vmul.f32 %v2897_v57, %v8764_v32 }
0x11f0   :  { %v2898_v43 = vsel %vm11712_vm6, %v2895_v3, %v2897_v57  ;;  %v2902_v37 = vmul.f32 %v2895_v3, %v8754_v49  ;;  %vm11716_vm6 = vcmask 146432  }
0x11f1   :  { %v2903_v2 = vmul.f32 %v2898_v43, %v8757_v39 }
0x11f2   :  { %2846 = vrot.lane.b32.xlu0 %v2840_v13, %s11709_s28  ;;  %v2926_v21 = vpop.permute.xlu1 %2925 }
0x11f3   :  { %2848 = vrot.lane.b32.xlu1 %v2841_v59, %s11709_s28  ;;  %v2928_v52 = vpop.permute.xlu0 %2927  ;;  %v2933_v60 = vmul.f32 %v2926_v21, %v8754_v49 }
0x11f4   :  { %v2929_v10 = vsel %vm11714_vm5, %v2926_v21, %v2928_v52  ;;  %v2935_v30 = vmul.f32 %v2928_v52, %v8764_v32  ;;  %vm11720_vm5 = vcmask 154624   ;;  %v3014_v21 = vld [vmem:[#allocation8 + $0xb0] sm:$0xff] }
0x11f5   :  { %v2934_v42 = vmul.f32 %v2929_v10, %v8757_v39 }
0x11f6   :  { %2850 = vrot.lane.b32.xlu0 %v2842_v63, %s11709_s28  ;;  %v2959_v25 = vpop.permute.xlu1 %2958 }
0x11f7   :  { %2877 = vrot.lane.b32.xlu1 %v2871_v5, %s11711_s5  ;;  %v2957_v26 = vpop.permute.xlu0 %2956  ;;  %v2966_v46 = vmul.f32 %v2959_v25, %v8764_v32 }
0x11f8   :  { %v2960_v58 = vsel %vm11716_vm6, %v2957_v26, %v2959_v25  ;;  %v2964_v54 = vmul.f32 %v2957_v26, %v8754_v49  ;;  %vm11722_vm6 = vcmask 162816  }
0x11f9   :  { %v2965_v38 = vmul.f32 %v2960_v58, %v8757_v39 }
0x11fa   :  { %2879 = vrot.lane.b32.xlu0 %v2872_v36, %s11711_s5 }
0x11fb   :  { %2881 = vrot.lane.b32.xlu1 %v2873_v44, %s11711_s5  ;;  %s9784_s5 = sld [smem:[#allocation12 + $0x503]] }
0x11fe   :  { %2908 = vrot.lane.b32.xlu0 %v2902_v37, %s11713_s11 }
0x11ff   :  { %2910 = vrot.lane.b32.xlu1 %v2903_v2, %s11713_s11  ;;  %v3015_v2 = vld [vmem:[#allocation8 + $0xb8] sm:$0xff] }
0x1202   :  { %2912 = vrot.lane.b32.xlu0 %v2904_v33, %s11713_s11  ;;  %s9777_s11 = sld [smem:[#allocation12 + $0x403]] }
0x1203   :  { %2939 = vrot.lane.b32.xlu1 %v2933_v60, %s11715_s3 }
0x1206   :  { %2941 = vrot.lane.b32.xlu0 %v2934_v42, %s11715_s3 }
0x1207   :  { %2943 = vrot.lane.b32.xlu1 %v2935_v30, %s11715_s3  ;;  %s9770_s3 = sld [smem:[#allocation12 + $0x582]] }
0x120a   :  { %2970 = vrot.lane.b32.xlu0 %v2964_v54, %s11717_s27  ;;  %v3045_v54 = vld [vmem:[#allocation8 + $0xc0] sm:$0xff] }
0x120b   :  { %2972 = vrot.lane.b32.xlu1 %v2965_v38, %s11717_s27  ;;  %v3046_v38 = vld [vmem:[#allocation8 + $0xc8] sm:$0xff] }
0x120e   :  { %2974 = vrot.lane.b32.xlu0 %v2966_v46, %s11717_s27  ;;  %s9763_s27 = sld [smem:[#allocation12 + $0x482]] }
0x120f   :  { %2987 = vrot.lane.b32.xlu1 %v2983_v28, %s11718_s7 }
0x1212   :  { %2989 = vrot.lane.b32.xlu0 %v2984_v8, %s11718_s7  ;;  %s9758_s7 = sld [smem:[#allocation12 + $0x402]] }
0x124c   :  { %v8827_v48 = vpop.permute.xlu0 %2722 }
0x124d   :  { %v8829_v41 = vpop.permute.xlu1 %2724 }
0x1250   :  { %v8831_v22 = vpop.permute.xlu0 %2726 }
0x1251   :  { %v8833_v23 = vpop.permute.xlu1 %2753 }
0x1254   :  { %v8835_v34 = vpop.permute.xlu0 %2755 }
0x1255   :  { %v8837_v12 = vpop.permute.xlu1 %2757 }
0x1258   :  { %v8839_v17 = vpop.permute.xlu0 %2784 }
0x1259   :  { %v8841_v31 = vpop.permute.xlu1 %2786 }
0x125c   :  { %v8843_v56 = vpop.permute.xlu0 %2788 }
0x125d   :  { %v8845_v14 = vpop.permute.xlu1 %2815 }
0x1260   :  { %v8847_v40 = vpop.permute.xlu0 %2817 }
0x1261   :  { %v8849_v7 = vpop.permute.xlu1 %2819 }
0x1264   :  { %v8851_v51 = vpop.permute.xlu0 %2846 }
0x1265   :  { %v8853_v29 = vpop.permute.xlu1 %2848 }
0x1268   :  { %v8855_v62 = vpop.permute.xlu0 %2850 }
0x1269   :  { %v8857_v47 = vpop.permute.xlu1 %2877 }
0x126c   :  { %v8859_v24 = vpop.permute.xlu0 %2879 }
0x126d   :  { %v8861_v50 = vpop.permute.xlu1 %2881 }
0x1270   :  { %v8863_v53 = vpop.permute.xlu0 %2908 }
0x1271   :  { %v8865_v20 = vpop.permute.xlu1 %2910 }
0x1274   :  { %v8867_v13 = vpop.permute.xlu0 %2912 }
0x1275   :  { %v8869_v59 = vpop.permute.xlu1 %2939 }
0x1278   :  { %v8871_v0 = vpop.permute.xlu0 %2941 }
0x1279   :  { %v8873_v61 = vpop.permute.xlu1 %2943 }
0x127c   :  { %v8875_v63 = vpop.permute.xlu0 %2970 }
0x127d   :  { %v8877_v5 = vpop.permute.xlu1 %2972 }
0x1280   :  { %v8879_v18 = vpop.permute.xlu0 %2974 }
0x1281   :  { %v2988_v57 = vpop.permute.xlu1 %2987 }
0x1282   :  { %v2995_v3 = vmul.f32 %v2988_v57, %v8754_v49 }
0x1284   :  { %3001 = vrot.lane.b32.xlu1 %v2995_v3, %s11719_s18  ;;  %v2990_v36 = vpop.permute.xlu0 %2989 }
0x1285   :  { %v2991_v44 = vsel %vm11720_vm5, %v2988_v57, %v2990_v36  ;;  %v2997_v43 = vmul.f32 %v2990_v36, %v8764_v32  ;;  %vm11726_vm5 = vcmask 171008  }
0x1286   :  { %v2996_v37 = vmul.f32 %v2991_v44, %v8757_v39 }
0x1288   :  { %3005 = vrot.lane.b32.xlu1 %v2997_v43, %s11719_s18  ;;  %3003 = vrot.lane.b32.xlu0 %v2996_v37, %s11719_s18  ;;  %s9756_s18 = sld [smem:[#allocation13 + $0x102]] }
0x128c   :  { %3020 = vrot.lane.b32.xlu1 %v3015_v2, %s11721_s2  ;;  %3018 = vrot.lane.b32.xlu0 %v3014_v21, %s11721_s2  ;;  %v3077_v2 = vld [vmem:[#allocation8 + $0xd8] sm:$0xff]  ;;  %v3076_v21 = vld [vmem:[#allocation8 + $0xd0] sm:$0xff]  ;;  %s9751_s2 = sld [smem:[#allocation12 + $0x581]] }
0x12f6   :  { %v8890_v52 = vpop.permute.xlu1 %3001 }
0x12fa   :  { %v8892_v33 = vpop.permute.xlu1 %3005  ;;  %v8894_v60 = vpop.permute.xlu0 %3003 }
0x12fe   :  { %v3021_v10 = vpop.permute.xlu1 %3020  ;;  %v3019_v25 = vpop.permute.xlu0 %3018 }
0x12ff   :  { %v3022_v26 = vsel %vm11722_vm6, %v3019_v25, %v3021_v10  ;;  %v3026_v42 = vmul.f32 %v3019_v25, %v8754_v49  ;;  %v3028_v58 = vmul.f32 %v3021_v10, %v8764_v32  ;;  %vm11728_vm6 = vcmask 179200  }
0x1300   :  { %v3027_v30 = vmul.f32 %v3022_v26, %v8757_v39 }
0x1301   :  { %3032 = vrot.lane.b32.xlu0 %v3026_v42, %s11723_s8 }
0x1302   :  { %3034 = vrot.lane.b32.xlu1 %v3027_v30, %s11723_s8 }
0x1305   :  { %3036 = vrot.lane.b32.xlu0 %v3028_v58, %s11723_s8  ;;  %s9749_s8 = sld [smem:[#allocation12 + $0x501]] }
0x1306   :  { %3049 = vrot.lane.b32.xlu1 %v3045_v54, %s11724_s30 }
0x1309   :  { %3051 = vrot.lane.b32.xlu0 %v3046_v38, %s11724_s30  ;;  %s9744_s30 = sld [smem:[#allocation12 + $0x481]] }
0x1373   :  { %v8905_v46 = vpop.permute.xlu0 %3032 }
0x1374   :  { %v8907_v28 = vpop.permute.xlu1 %3034 }
0x1377   :  { %v8909_v8 = vpop.permute.xlu0 %3036 }
0x1378   :  { %v3050_v57 = vpop.permute.xlu1 %3049 }
0x1379   :  { %v3057_v3 = vmul.f32 %v3050_v57, %v8754_v49 }
0x137b   :  { %v3052_v36 = vpop.permute.xlu0 %3051  ;;  %3063 = vrot.lane.b32.xlu1 %v3057_v3, %s11725_s15  ;;  %v3107_v3 = vld [vmem:[#allocation8 + $0xe0] sm:$0xff] }
0x137c   :  { %v3053_v44 = vsel %vm11726_vm5, %v3050_v57, %v3052_v36  ;;  %v3059_v43 = vmul.f32 %v3052_v36, %v8764_v32  ;;  %v3108_v36 = vld [vmem:[#allocation8 + $0xe8] sm:$0xff]  ;;  %vm11733_vm5 = vcmask 269312  }
0x137d   :  { %v3058_v37 = vmul.f32 %v3053_v44, %v8757_v39 }
0x137f   :  { %3067 = vrot.lane.b32.xlu1 %v3059_v43, %s11725_s15  ;;  %3065 = vrot.lane.b32.xlu0 %v3058_v37, %s11725_s15  ;;  %s11787_s15 = smov 75  }
0x1383   :  { %3082 = vrot.lane.b32.xlu1 %v3077_v2, %s11727_s19  ;;  %3080 = vrot.lane.b32.xlu0 %v3076_v21, %s11727_s19  ;;  %s11765_s19 = smov 79  }
0x13ed   :  { %v8920_v10 = vpop.permute.xlu1 %3063 }
0x13f1   :  { %v8922_v25 = vpop.permute.xlu1 %3067  ;;  %v8924_v26 = vpop.permute.xlu0 %3065 }
0x13f5   :  { %v3083_v42 = vpop.permute.xlu1 %3082  ;;  %v3081_v30 = vpop.permute.xlu0 %3080 }
0x13f6   :  { %v3084_v58 = vsel %vm11728_vm6, %v3081_v30, %v3083_v42  ;;  %v3088_v54 = vmul.f32 %v3081_v30, %v8754_v49  ;;  %v3090_v57 = vmul.f32 %v3083_v42, %v8764_v32  ;;  %vm11737_vm6 = vcmask 277504  }
0x13f7   :  { %v3089_v38 = vmul.f32 %v3084_v58, %v8757_v39 }
0x13f8   :  { %3094 = vrot.lane.b32.xlu0 %v3088_v54, %s11729_s14 }
0x13f9   :  { %3096 = vrot.lane.b32.xlu1 %v3089_v38, %s11729_s14  ;;  %v3139_v38 = vld [vmem:[#allocation8 + $0xf8] sm:$0xff] }
0x13fc   :  { %3098 = vrot.lane.b32.xlu0 %v3090_v57, %s11729_s14  ;;  %v3138_v57 = vld [vmem:[#allocation8 + $0xf0] sm:$0xff]  ;;  %s11736_s14 = smov 94  }
0x13fd   :  { %3111 = vrot.lane.b32.xlu1 %v3107_v3, %s11730_s21 }
0x1400   :  { %3113 = vrot.lane.b32.xlu0 %v3108_v36, %s11730_s21 }
0x146a   :  { %v8935_v44 = vpop.permute.xlu0 %3094 }
0x146b   :  { %v8937_v43 = vpop.permute.xlu1 %3096 }
0x146e   :  { %v8939_v37 = vpop.permute.xlu0 %3098 }
0x146f   :  { %v3112_v2 = vpop.permute.xlu1 %3111 }
0x1470   :  { %v3119_v21 = vmul.f32 %v3112_v2, %v8754_v49 }
0x1472   :  { %v3114_v30 = vpop.permute.xlu0 %3113  ;;  %3125 = vrot.lane.b32.xlu1 %v3119_v21, %s11731_s10 }
0x1473   :  { %v3115_v42 = vsel %vm879_vm14, %v3112_v2, %v3114_v30  ;;  %v3121_v58 = vmul.f32 %v3114_v30, %v8764_v32 }
0x1474   :  { %v3120_v54 = vmul.f32 %v3115_v42, %v8757_v39 }
0x1476   :  { %3129 = vrot.lane.b32.xlu1 %v3121_v58, %s11731_s10  ;;  %3127 = vrot.lane.b32.xlu0 %v3120_v54, %s11731_s10 }
0x147a   :  { %3144 = vrot.lane.b32.xlu1 %v3139_v38, %s11732_s23  ;;  %3142 = vrot.lane.b32.xlu0 %v3138_v57, %s11732_s23  ;;  %v3169_v57 = vld [vmem:[#allocation8 + $0x100] sm:$0xff]  ;;  %s11735_s23 = smov 34  }
0x14e4   :  { %v8950_v3 = vpop.permute.xlu1 %3125 }
0x14e8   :  { %v8952_v36 = vpop.permute.xlu1 %3129  ;;  %v8954_v21 = vpop.permute.xlu0 %3127 }
0x14ec   :  { %v3145_v2 = vpop.permute.xlu1 %3144  ;;  %v3143_v30 = vpop.permute.xlu0 %3142 }
0x14ed   :  { %v3146_v42 = vsel %vm11733_vm5, %v3143_v30, %v3145_v2  ;;  %v3150_v58 = vmul.f32 %v3143_v30, %v8754_v49  ;;  %v3152_v38 = vmul.f32 %v3145_v2, %v8764_v32  ;;  %vm11739_vm5 = vcmask 285696  }
0x14ee   :  { %v3151_v54 = vmul.f32 %v3146_v42, %v8757_v39 }
0x14ef   :  { %3156 = vrot.lane.b32.xlu0 %v3150_v58, %s11734_s24 }
0x14f0   :  { %3158 = vrot.lane.b32.xlu1 %v3151_v54, %s11734_s24 }
0x14f3   :  { %3160 = vrot.lane.b32.xlu0 %v3152_v38, %s11734_s24  ;;  %s11742_s24 = smov 92  }
0x14f4   :  { %3173 = vrot.lane.b32.xlu1 %v3169_v57, %s11735_s23 }
0x14f7   :  { %3175 = vrot.lane.b32.xlu0 %v3170_v16, %s11735_s23  ;;  %v3201_v16 = vld [vmem:[#allocation8 + $0x118] sm:$0xff]  ;;  %s11738_s23 = smov 35  }
0x1561   :  { %v8965_v15 = vpop.permute.xlu0 %3156 }
0x1562   :  { %v8967_v11 = vpop.permute.xlu1 %3158 }
0x1565   :  { %v8969_v30 = vpop.permute.xlu0 %3160 }
0x1566   :  { %v3174_v42 = vpop.permute.xlu1 %3173 }
0x1567   :  { %v3181_v58 = vmul.f32 %v3174_v42, %v8754_v49 }
0x1569   :  { %v3176_v54 = vpop.permute.xlu0 %3175  ;;  %3187 = vrot.lane.b32.xlu1 %v3181_v58, %s11736_s14 }
0x156a   :  { %v3177_v2 = vsel %vm11737_vm6, %v3174_v42, %v3176_v54  ;;  %v3183_v38 = vmul.f32 %v3176_v54, %v8764_v32  ;;  %vm11743_vm6 = vcmask 293888  }
0x156b   :  { %v3182_v57 = vmul.f32 %v3177_v2, %v8757_v39 }
0x156d   :  { %3191 = vrot.lane.b32.xlu1 %v3183_v38, %s11736_s14  ;;  %3189 = vrot.lane.b32.xlu0 %v3182_v57, %s11736_s14  ;;  %s11740_s14 = smov 93  }
0x1571   :  { %3206 = vrot.lane.b32.xlu1 %v3201_v16, %s11738_s23  ;;  %3204 = vrot.lane.b32.xlu0 %v3200_v45, %s11738_s23  ;;  %v3231_v16 = vld [vmem:[#allocation8 + $0x120] sm:$0xff]  ;;  %s11741_s23 = smov 36  }
0x15db   :  { %v8980_v27 = vpop.permute.xlu1 %3187 }
0x15df   :  { %v8982_v6 = vpop.permute.xlu1 %3191  ;;  %v8984_v58 = vpop.permute.xlu0 %3189 }
0x15e3   :  { %v3207_v42 = vpop.permute.xlu1 %3206  ;;  %v3205_v54 = vpop.permute.xlu0 %3204 }
0x15e4   :  { %v3208_v2 = vsel %vm11739_vm5, %v3205_v54, %v3207_v42  ;;  %v3212_v38 = vmul.f32 %v3205_v54, %v8754_v49  ;;  %v3214_v45 = vmul.f32 %v3207_v42, %v8764_v32  ;;  %vm11748_vm5 = vcmask 302080  }
0x15e5   :  { %v3213_v57 = vmul.f32 %v3208_v2, %v8757_v39 }
0x15e6   :  { %3218 = vrot.lane.b32.xlu0 %v3212_v38, %s11740_s14 }
0x15e7   :  { %3220 = vrot.lane.b32.xlu1 %v3213_v57, %s11740_s14 }
0x15ea   :  { %3222 = vrot.lane.b32.xlu0 %v3214_v45, %s11740_s14  ;;  %s11754_s14 = smov 90  }
0x15eb   :  { %3235 = vrot.lane.b32.xlu1 %v3231_v16, %s11741_s23 }
0x15ee   :  { %3237 = vrot.lane.b32.xlu0 %v3232_v1, %s11741_s23  ;;  %v3263_v1 = vld [vmem:[#allocation8 + $0x138] sm:$0xff]  ;;  %s11744_s23 = smov 37  }
0x1658   :  { %v8995_v35 = vpop.permute.xlu0 %3218 }
0x1659   :  { %v8997_v19 = vpop.permute.xlu1 %3220 }
0x165c   :  { %v8999_v54 = vpop.permute.xlu0 %3222 }
0x165d   :  { %v3236_v2 = vpop.permute.xlu1 %3235 }
0x165e   :  { %v3243_v38 = vmul.f32 %v3236_v2, %v8754_v49 }
0x1660   :  { %v3238_v57 = vpop.permute.xlu0 %3237  ;;  %3249 = vrot.lane.b32.xlu1 %v3243_v38, %s11742_s24 }
0x1661   :  { %v3239_v42 = vsel %vm11743_vm6, %v3236_v2, %v3238_v57  ;;  %v3245_v45 = vmul.f32 %v3238_v57, %v8764_v32  ;;  %vm11755_vm6 = vcmask 310272  }
0x1662   :  { %v3244_v16 = vmul.f32 %v3239_v42, %v8757_v39 }
0x1664   :  { %3253 = vrot.lane.b32.xlu1 %v3245_v45, %s11742_s24  ;;  %3251 = vrot.lane.b32.xlu0 %v3244_v16, %s11742_s24  ;;  %s11749_s24 = smov 91  }
0x1668   :  { %3268 = vrot.lane.b32.xlu1 %v3263_v1, %s11744_s23  ;;  %3266 = vrot.lane.b32.xlu0 %v3262_v4, %s11744_s23  ;;  %v3293_v1 = vld [vmem:[#allocation8 + $0x140] sm:$0xff]  ;;  %s11750_s23 = smov 38  }
0x16d2   :  { %v9010_v9 = vpop.permute.xlu1 %3249 }
0x16d3   :  { %11745 = vst [vmem:[#allocation37_spill] sm:$0xff] %v9010_v9 }
0x16d6   :  { %v9012_v55 = vpop.permute.xlu1 %3253  ;;  %v9014_v38 = vpop.permute.xlu0 %3251 }
0x16d7   :  { %11746 = vst [vmem:[#allocation40_spill] sm:$0xff] %v9012_v55  ;;  %11747 = vst [vmem:[#allocation39_spill] sm:$0xff] %v9014_v38  ;;  %v3294_v55 = vld [vmem:[#allocation8 + $0x148] sm:$0xff] }
0x16da   :  { %v3269_v2 = vpop.permute.xlu1 %3268  ;;  %v3267_v57 = vpop.permute.xlu0 %3266 }
0x16db   :  { %v3270_v42 = vsel %vm11748_vm5, %v3267_v57, %v3269_v2  ;;  %v3274_v45 = vmul.f32 %v3267_v57, %v8754_v49  ;;  %v3276_v4 = vmul.f32 %v3269_v2, %v8764_v32  ;;  %vm11766_vm5 = vcmask 400384  }
0x16dc   :  { %v3275_v16 = vmul.f32 %v3270_v42, %v8757_v39 }
0x16dd   :  { %3280 = vrot.lane.b32.xlu0 %v3274_v45, %s11749_s24 }
0x16de   :  { %3282 = vrot.lane.b32.xlu1 %v3275_v16, %s11749_s24 }
0x16e1   :  { %3284 = vrot.lane.b32.xlu0 %v3276_v4, %s11749_s24  ;;  %s11761_s24 = smov 49  }
0x16e2   :  { %3297 = vrot.lane.b32.xlu1 %v3293_v1, %s11750_s23 }
0x16e5   :  { %3299 = vrot.lane.b32.xlu0 %v3294_v55, %s11750_s23  ;;  %v3325_v55 = vld [vmem:[#allocation8 + $0x158] sm:$0xff]  ;;  %s11756_s23 = smov 48  }
0x174f   :  { %v9025_v9 = vpop.permute.xlu0 %3280 }
0x1750   :  { %11751 = vst [vmem:[#allocation41_spill] sm:$0xff] %v9025_v9  ;;  %v9027_v38 = vpop.permute.xlu1 %3282  ;;  %v3324_v9 = vld [vmem:[#allocation8 + $0x150] sm:$0xff] }
0x1751   :  { %11752 = vst [vmem:[#allocation44_spill] sm:$0xff] %v9027_v38 }
0x1753   :  { %v9029_v57 = vpop.permute.xlu0 %3284 }
0x1754   :  { %11753 = vst [vmem:[#allocation42_spill] sm:$0xff] %v9029_v57  ;;  %v3298_v42 = vpop.permute.xlu1 %3297 }
0x1755   :  { %v3305_v45 = vmul.f32 %v3298_v42, %v8754_v49 }
0x1757   :  { %v3300_v16 = vpop.permute.xlu0 %3299  ;;  %3311 = vrot.lane.b32.xlu1 %v3305_v45, %s11754_s14 }
0x1758   :  { %v3301_v2 = vsel %vm11755_vm6, %v3298_v42, %v3300_v16  ;;  %v3307_v4 = vmul.f32 %v3300_v16, %v8764_v32  ;;  %vm11771_vm6 = vcmask 408576  }
0x1759   :  { %v3306_v1 = vmul.f32 %v3301_v2, %v8757_v39 }
0x175b   :  { %3315 = vrot.lane.b32.xlu1 %v3307_v4, %s11754_s14  ;;  %3313 = vrot.lane.b32.xlu0 %v3306_v1, %s11754_s14  ;;  %s11760_s14 = smov 80  }
0x175f   :  { %3330 = vrot.lane.b32.xlu1 %v3325_v55, %s11756_s23  ;;  %3328 = vrot.lane.b32.xlu0 %v3324_v9, %s11756_s23  ;;  %v3355_v55 = vld [vmem:[#allocation8 + $0x160] sm:$0xff] }
0x17c9   :  { %v9040_v57 = vpop.permute.xlu1 %3311 }
0x17ca   :  { %11757 = vst [vmem:[#allocation43_spill] sm:$0xff] %v9040_v57 }
0x17cd   :  { %v9042_v38 = vpop.permute.xlu1 %3315  ;;  %v9044_v45 = vpop.permute.xlu0 %3313 }
0x17ce   :  { %11758 = vst [vmem:[#allocation46_spill] sm:$0xff] %v9042_v38  ;;  %11759 = vst [vmem:[#allocation45_spill] sm:$0xff] %v9044_v45  ;;  %v3356_v38 = vld [vmem:[#allocation8 + $0x168] sm:$0xff] }
0x17d1   :  { %v3331_v42 = vpop.permute.xlu1 %3330  ;;  %v3329_v16 = vpop.permute.xlu0 %3328 }
0x17d2   :  { %v3332_v2 = vsel %vm1110_vm13, %v3329_v16, %v3331_v42  ;;  %v3336_v4 = vmul.f32 %v3329_v16, %v8754_v49  ;;  %v3338_v9 = vmul.f32 %v3331_v42, %v8764_v32 }
0x17d3   :  { %v3337_v1 = vmul.f32 %v3332_v2, %v8757_v39 }
0x17d4   :  { %3342 = vrot.lane.b32.xlu0 %v3336_v4, %s11760_s14 }
0x17d5   :  { %3344 = vrot.lane.b32.xlu1 %v3337_v1, %s11760_s14 }
0x17d8   :  { %3346 = vrot.lane.b32.xlu0 %v3338_v9, %s11760_s14 }
0x17d9   :  { %3359 = vrot.lane.b32.xlu1 %v3355_v55, %s11761_s24 }
0x17dc   :  { %3361 = vrot.lane.b32.xlu0 %v3356_v38, %s11761_s24  ;;  %v3387_v38 = vld [vmem:[#allocation8 + $0x178] sm:$0xff]  ;;  %s11767_s24 = smov 50  }
0x1846   :  { %v9055_v57 = vpop.permute.xlu0 %3342 }
0x1847   :  { %11762 = vst [vmem:[#allocation47_spill] sm:$0xff] %v9055_v57  ;;  %v9057_v45 = vpop.permute.xlu1 %3344  ;;  %v3386_v57 = vld [vmem:[#allocation8 + $0x170] sm:$0xff] }
0x1848   :  { %11763 = vst [vmem:[#allocation50_spill] sm:$0xff] %v9057_v45 }
0x184a   :  { %v9059_v16 = vpop.permute.xlu0 %3346 }
0x184b   :  { %11764 = vst [vmem:[#allocation48_spill] sm:$0xff] %v9059_v16  ;;  %v3360_v2 = vpop.permute.xlu1 %3359 }
0x184c   :  { %v3367_v4 = vmul.f32 %v3360_v2, %v8754_v49 }
0x184e   :  { %v3362_v1 = vpop.permute.xlu0 %3361  ;;  %3373 = vrot.lane.b32.xlu1 %v3367_v4, %s11765_s19 }
0x184f   :  { %v3363_v42 = vsel %vm11766_vm5, %v3360_v2, %v3362_v1  ;;  %v3369_v9 = vmul.f32 %v3362_v1, %v8764_v32  ;;  %vm11781_vm5 = vcmask 424960  }
0x1850   :  { %v3368_v55 = vmul.f32 %v3363_v42, %v8757_v39 }
0x1852   :  { %3377 = vrot.lane.b32.xlu1 %v3369_v9, %s11765_s19  ;;  %3375 = vrot.lane.b32.xlu0 %v3368_v55, %s11765_s19  ;;  %s11772_s19 = smov 78  }
0x1856   :  { %3392 = vrot.lane.b32.xlu1 %v3387_v38, %s11767_s24  ;;  %3390 = vrot.lane.b32.xlu0 %v3386_v57, %s11767_s24  ;;  %v3417_v38 = vld [vmem:[#allocation8 + $0x180] sm:$0xff]  ;;  %s11776_s24 = smov 77  }
0x18c0   :  { %v9070_v16 = vpop.permute.xlu1 %3373 }
0x18c1   :  { %11768 = vst [vmem:[#allocation49_spill] sm:$0xff] %v9070_v16 }
0x18c4   :  { %v9072_v45 = vpop.permute.xlu1 %3377  ;;  %v9074_v4 = vpop.permute.xlu0 %3375 }
0x18c5   :  { %11769 = vst [vmem:[#allocation52_spill] sm:$0xff] %v9072_v45  ;;  %11770 = vst [vmem:[#allocation51_spill] sm:$0xff] %v9074_v4  ;;  %v3418_v45 = vld [vmem:[#allocation8 + $0x188] sm:$0xff] }
0x18c8   :  { %v3393_v2 = vpop.permute.xlu1 %3392  ;;  %v3391_v1 = vpop.permute.xlu0 %3390 }
0x18c9   :  { %v3394_v42 = vsel %vm11771_vm6, %v3391_v1, %v3393_v2  ;;  %v3398_v9 = vmul.f32 %v3391_v1, %v8754_v49  ;;  %v3400_v57 = vmul.f32 %v3393_v2, %v8764_v32  ;;  %vm11788_vm6 = vcmask 433152  }
0x18ca   :  { %v3399_v55 = vmul.f32 %v3394_v42, %v8757_v39 }
0x18cb   :  { %3404 = vrot.lane.b32.xlu0 %v3398_v9, %s11772_s19 }
0x18cc   :  { %3406 = vrot.lane.b32.xlu1 %v3399_v55, %s11772_s19 }
0x18cf   :  { %3408 = vrot.lane.b32.xlu0 %v3400_v57, %s11772_s19  ;;  %s11777_s19 = smov 52  }
0x18d0   :  { %3421 = vrot.lane.b32.xlu1 %v3417_v38, %s11661_s22 }
0x18d3   :  { %3423 = vrot.lane.b32.xlu0 %v3418_v45, %s11661_s22  ;;  %v3449_v45 = vld [vmem:[#allocation8 + $0x198] sm:$0xff] }
0x193d   :  { %v9085_v16 = vpop.permute.xlu0 %3404 }
0x193e   :  { %11773 = vst [vmem:[#allocation53_spill] sm:$0xff] %v9085_v16  ;;  %v9087_v4 = vpop.permute.xlu1 %3406  ;;  %v3448_v16 = vld [vmem:[#allocation8 + $0x190] sm:$0xff] }
0x193f   :  { %11774 = vst [vmem:[#allocation56_spill] sm:$0xff] %v9087_v4 }
0x1941   :  { %v9089_v1 = vpop.permute.xlu0 %3408 }
0x1942   :  { %11775 = vst [vmem:[#allocation54_spill] sm:$0xff] %v9089_v1  ;;  %v3422_v42 = vpop.permute.xlu1 %3421 }
0x1943   :  { %v3429_v9 = vmul.f32 %v3422_v42, %v8754_v49 }
0x1945   :  { %v3424_v55 = vpop.permute.xlu0 %3423  ;;  %3435 = vrot.lane.b32.xlu1 %v3429_v9, %s11776_s24 }
0x1946   :  { %v3425_v2 = vsel %vm11369_vm3, %v3422_v42, %v3424_v55  ;;  %v3431_v57 = vmul.f32 %v3424_v55, %v8764_v32  ;;  %vm11917_vm3 = vmmov %vm11916_vm4 }
0x1947   :  { %v3430_v38 = vmul.f32 %v3425_v2, %v8757_v39 }
0x1949   :  { %3439 = vrot.lane.b32.xlu1 %v3431_v57, %s11776_s24  ;;  %3437 = vrot.lane.b32.xlu0 %v3430_v38, %s11776_s24  ;;  %s11782_s24 = smov 76  }
0x194d   :  { %3454 = vrot.lane.b32.xlu1 %v3449_v45, %s11777_s19  ;;  %3452 = vrot.lane.b32.xlu0 %v3448_v16, %s11777_s19  ;;  %v3479_v45 = vld [vmem:[#allocation8 + $0x1a0] sm:$0xff]  ;;  %s11783_s19 = smov 53  }
0x19b7   :  { %v9100_v1 = vpop.permute.xlu1 %3435 }
0x19b8   :  { %11778 = vst [vmem:[#allocation55_spill] sm:$0xff] %v9100_v1 }
0x19bb   :  { %v9102_v4 = vpop.permute.xlu1 %3439  ;;  %v9104_v9 = vpop.permute.xlu0 %3437 }
0x19bc   :  { %11779 = vst [vmem:[#allocation58_spill] sm:$0xff] %v9102_v4  ;;  %11780 = vst [vmem:[#allocation57_spill] sm:$0xff] %v9104_v9  ;;  %v3480_v4 = vld [vmem:[#allocation8 + $0x1a8] sm:$0xff] }
0x19bf   :  { %v3455_v42 = vpop.permute.xlu1 %3454  ;;  %v3453_v55 = vpop.permute.xlu0 %3452 }
0x19c0   :  { %v3456_v2 = vsel %vm11781_vm5, %v3453_v55, %v3455_v42  ;;  %v3460_v57 = vmul.f32 %v3453_v55, %v8754_v49  ;;  %v3462_v16 = vmul.f32 %v3455_v42, %v8764_v32  ;;  %vm11793_vm5 = vcmask 441344  }
0x19c1   :  { %v3461_v38 = vmul.f32 %v3456_v2, %v8757_v39 }
0x19c2   :  { %3466 = vrot.lane.b32.xlu0 %v3460_v57, %s11782_s24 }
0x19c3   :  { %3468 = vrot.lane.b32.xlu1 %v3461_v38, %s11782_s24 }
0x19c6   :  { %3470 = vrot.lane.b32.xlu0 %v3462_v16, %s11782_s24  ;;  %s11809_s24 = smov 62  }
0x19c7   :  { %3483 = vrot.lane.b32.xlu1 %v3479_v45, %s11783_s19 }
0x19ca   :  { %3485 = vrot.lane.b32.xlu0 %v3480_v4, %s11783_s19  ;;  %v3511_v4 = vld [vmem:[#allocation8 + $0x1b8] sm:$0xff]  ;;  %s11789_s19 = smov 54  }
0x1a34   :  { %v9115_v1 = vpop.permute.xlu0 %3466 }
0x1a35   :  { %11784 = vst [vmem:[#allocation59_spill] sm:$0xff] %v9115_v1  ;;  %v9117_v9 = vpop.permute.xlu1 %3468  ;;  %v3510_v1 = vld [vmem:[#allocation8 + $0x1b0] sm:$0xff] }
0x1a36   :  { %11785 = vst [vmem:[#allocation62_spill] sm:$0xff] %v9117_v9 }
0x1a38   :  { %v9119_v55 = vpop.permute.xlu0 %3470 }
0x1a39   :  { %11786 = vst [vmem:[#allocation60_spill] sm:$0xff] %v9119_v55  ;;  %v3484_v2 = vpop.permute.xlu1 %3483 }
0x1a3a   :  { %v3491_v57 = vmul.f32 %v3484_v2, %v8754_v49 }
0x1a3c   :  { %v3486_v38 = vpop.permute.xlu0 %3485  ;;  %3497 = vrot.lane.b32.xlu1 %v3491_v57, %s11787_s15 }
0x1a3d   :  { %v3487_v42 = vsel %vm11788_vm6, %v3484_v2, %v3486_v38  ;;  %v3493_v16 = vmul.f32 %v3486_v38, %v8764_v32  ;;  %vm11803_vm6 = vcmask 531456  }
0x1a3e   :  { %v3492_v45 = vmul.f32 %v3487_v42, %v8757_v39 }
0x1a40   :  { %3501 = vrot.lane.b32.xlu1 %v3493_v16, %s11787_s15  ;;  %3499 = vrot.lane.b32.xlu0 %v3492_v45, %s11787_s15  ;;  %s11794_s15 = smov 74  }
0x1a44   :  { %3516 = vrot.lane.b32.xlu1 %v3511_v4, %s11789_s19  ;;  %3514 = vrot.lane.b32.xlu0 %v3510_v1, %s11789_s19  ;;  %v3541_v4 = vld [vmem:[#allocation8 + $0x1c0] sm:$0xff]  ;;  %s11795_s19 = smov 64  }
0x1aae   :  { %v9130_v55 = vpop.permute.xlu1 %3497 }
0x1aaf   :  { %11790 = vst [vmem:[#allocation61_spill] sm:$0xff] %v9130_v55 }
0x1ab2   :  { %v9132_v9 = vpop.permute.xlu1 %3501  ;;  %v9134_v57 = vpop.permute.xlu0 %3499 }
0x1ab3   :  { %11791 = vst [vmem:[#allocation64_spill] sm:$0xff] %v9132_v9  ;;  %11792 = vst [vmem:[#allocation63_spill] sm:$0xff] %v9134_v57  ;;  %v3542_v9 = vld [vmem:[#allocation8 + $0x1c8] sm:$0xff] }
0x1ab6   :  { %v3517_v2 = vpop.permute.xlu1 %3516  ;;  %v3515_v38 = vpop.permute.xlu0 %3514 }
0x1ab7   :  { %v3518_v42 = vsel %vm11793_vm5, %v3515_v38, %v3517_v2  ;;  %v3522_v16 = vmul.f32 %v3515_v38, %v8754_v49  ;;  %v3524_v1 = vmul.f32 %v3517_v2, %v8764_v32  ;;  %vm11810_vm5 = vcmask 539648  }
0x1ab8   :  { %v3523_v45 = vmul.f32 %v3518_v42, %v8757_v39 }
0x1ab9   :  { %3528 = vrot.lane.b32.xlu0 %v3522_v16, %s11794_s15 }
0x1aba   :  { %3530 = vrot.lane.b32.xlu1 %v3523_v45, %s11794_s15 }
0x1abd   :  { %3532 = vrot.lane.b32.xlu0 %v3524_v1, %s11794_s15  ;;  %s11799_s15 = smov 65  }
0x1abe   :  { %3545 = vrot.lane.b32.xlu1 %v3541_v4, %s11795_s19 }
0x1ac1   :  { %3547 = vrot.lane.b32.xlu0 %v3542_v9, %s11795_s19  ;;  %v3573_v9 = vld [vmem:[#allocation8 + $0x1d8] sm:$0xff] }
0x1b2b   :  { %v9145_v55 = vpop.permute.xlu0 %3528 }
0x1b2c   :  { %11796 = vst [vmem:[#allocation65_spill] sm:$0xff] %v9145_v55  ;;  %v9147_v57 = vpop.permute.xlu1 %3530  ;;  %v3572_v55 = vld [vmem:[#allocation8 + $0x1d0] sm:$0xff] }
0x1b2d   :  { %11797 = vst [vmem:[#allocation68_spill] sm:$0xff] %v9147_v57 }
0x1b2f   :  { %v9149_v38 = vpop.permute.xlu0 %3532 }
0x1b30   :  { %11798 = vst [vmem:[#allocation66_spill] sm:$0xff] %v9149_v38  ;;  %v3546_v42 = vpop.permute.xlu1 %3545 }
0x1b31   :  { %v3553_v16 = vmul.f32 %v3546_v42, %v8754_v49 }
0x1b33   :  { %v3548_v45 = vpop.permute.xlu0 %3547  ;;  %3559 = vrot.lane.b32.xlu1 %v3553_v16, %s11795_s19 }
0x1b34   :  { %v3549_v2 = vsel %vm1340_vm15, %v3546_v42, %v3548_v45  ;;  %v3555_v1 = vmul.f32 %v3548_v45, %v8764_v32 }
0x1b35   :  { %v3554_v4 = vmul.f32 %v3549_v2, %v8757_v39 }
0x1b37   :  { %3563 = vrot.lane.b32.xlu1 %v3555_v1, %s11795_s19  ;;  %3561 = vrot.lane.b32.xlu0 %v3554_v4, %s11795_s19  ;;  %s11804_s19 = smov 63  }
0x1b3b   :  { %3578 = vrot.lane.b32.xlu1 %v3573_v9, %s11799_s15  ;;  %3576 = vrot.lane.b32.xlu0 %v3572_v55, %s11799_s15  ;;  %v3603_v9 = vld [vmem:[#allocation8 + $0x1e0] sm:$0xff]  ;;  %s11805_s15 = smov 66  }
0x1ba5   :  { %v9160_v38 = vpop.permute.xlu1 %3559 }
0x1ba6   :  { %11800 = vst [vmem:[#allocation67_spill] sm:$0xff] %v9160_v38 }
0x1ba9   :  { %v9162_v57 = vpop.permute.xlu1 %3563  ;;  %v9164_v16 = vpop.permute.xlu0 %3561 }
0x1baa   :  { %11801 = vst [vmem:[#allocation70_spill] sm:$0xff] %v9162_v57  ;;  %11802 = vst [vmem:[#allocation69_spill] sm:$0xff] %v9164_v16  ;;  %v3604_v57 = vld [vmem:[#allocation8 + $0x1e8] sm:$0xff] }
0x1bad   :  { %v3579_v42 = vpop.permute.xlu1 %3578  ;;  %v3577_v45 = vpop.permute.xlu0 %3576 }
0x1bae   :  { %v3580_v2 = vsel %vm11803_vm6, %v3577_v45, %v3579_v42  ;;  %v3584_v1 = vmul.f32 %v3577_v45, %v8754_v49  ;;  %v3586_v55 = vmul.f32 %v3579_v42, %v8764_v32  ;;  %vm11815_vm6 = vcmask 547840  }
0x1baf   :  { %v3585_v4 = vmul.f32 %v3580_v2, %v8757_v39 }
0x1bb0   :  { %3590 = vrot.lane.b32.xlu0 %v3584_v1, %s11804_s19 }
0x1bb1   :  { %3592 = vrot.lane.b32.xlu1 %v3585_v4, %s11804_s19 }
0x1bb4   :  { %3594 = vrot.lane.b32.xlu0 %v3586_v55, %s11804_s19  ;;  %s11821_s19 = smov 60  }
0x1bb5   :  { %3607 = vrot.lane.b32.xlu1 %v3603_v9, %s11805_s15 }
0x1bb8   :  { %3609 = vrot.lane.b32.xlu0 %v3604_v57, %s11805_s15  ;;  %v3635_v57 = vld [vmem:[#allocation8 + $0x1f8] sm:$0xff]  ;;  %s11811_s15 = smov 67  }
0x1c22   :  { %v9175_v38 = vpop.permute.xlu0 %3590 }
0x1c23   :  { %11806 = vst [vmem:[#allocation71_spill] sm:$0xff] %v9175_v38  ;;  %v9177_v16 = vpop.permute.xlu1 %3592  ;;  %v3634_v38 = vld [vmem:[#allocation8 + $0x1f0] sm:$0xff] }
0x1c24   :  { %11807 = vst [vmem:[#allocation74_spill] sm:$0xff] %v9177_v16 }
0x1c26   :  { %v9179_v45 = vpop.permute.xlu0 %3594 }
0x1c27   :  { %11808 = vst [vmem:[#allocation72_spill] sm:$0xff] %v9179_v45  ;;  %v3608_v2 = vpop.permute.xlu1 %3607 }
0x1c28   :  { %v3615_v1 = vmul.f32 %v3608_v2, %v8754_v49 }
0x1c2a   :  { %v3610_v4 = vpop.permute.xlu0 %3609  ;;  %3621 = vrot.lane.b32.xlu1 %v3615_v1, %s11809_s24 }
0x1c2b   :  { %v3611_v42 = vsel %vm11810_vm5, %v3608_v2, %v3610_v4  ;;  %v3617_v55 = vmul.f32 %v3610_v4, %v8764_v32  ;;  %vm11822_vm5 = vcmask 556032  }
0x1c2c   :  { %v3616_v9 = vmul.f32 %v3611_v42, %v8757_v39 }
0x1c2e   :  { %3625 = vrot.lane.b32.xlu1 %v3617_v55, %s11809_s24  ;;  %3623 = vrot.lane.b32.xlu0 %v3616_v9, %s11809_s24  ;;  %s11816_s24 = smov 61  }
0x1c32   :  { %3640 = vrot.lane.b32.xlu1 %v3635_v57, %s11811_s15  ;;  %3638 = vrot.lane.b32.xlu0 %v3634_v38, %s11811_s15  ;;  %v3665_v57 = vld [vmem:[#allocation8 + $0x200] sm:$0xff]  ;;  %s11817_s15 = smov 68  }
0x1c9c   :  { %v9190_v45 = vpop.permute.xlu1 %3621 }
0x1c9d   :  { %11812 = vst [vmem:[#allocation73_spill] sm:$0xff] %v9190_v45 }
0x1ca0   :  { %v9192_v16 = vpop.permute.xlu1 %3625  ;;  %v9194_v1 = vpop.permute.xlu0 %3623 }
0x1ca1   :  { %11813 = vst [vmem:[#allocation76_spill] sm:$0xff] %v9192_v16  ;;  %11814 = vst [vmem:[#allocation75_spill] sm:$0xff] %v9194_v1  ;;  %v3666_v16 = vld [vmem:[#allocation8 + $0x208] sm:$0xff] }
0x1ca4   :  { %v3641_v2 = vpop.permute.xlu1 %3640  ;;  %v3639_v4 = vpop.permute.xlu0 %3638 }
0x1ca5   :  { %v3642_v42 = vsel %vm11815_vm6, %v3639_v4, %v3641_v2  ;;  %v3646_v55 = vmul.f32 %v3639_v4, %v8754_v49  ;;  %v3648_v38 = vmul.f32 %v3641_v2, %v8764_v32  ;;  %vm11827_vm6 = vcmask 564224  }
0x1ca6   :  { %v3647_v9 = vmul.f32 %v3642_v42, %v8757_v39 }
0x1ca7   :  { %3652 = vrot.lane.b32.xlu0 %v3646_v55, %s11816_s24 }
0x1ca8   :  { %3654 = vrot.lane.b32.xlu1 %v3647_v9, %s11816_s24 }
0x1cab   :  { %3656 = vrot.lane.b32.xlu0 %v3648_v38, %s11816_s24  ;;  %s11833_s24 = smov 58  }
0x1cac   :  { %3669 = vrot.lane.b32.xlu1 %v3665_v57, %s11817_s15 }
0x1caf   :  { %3671 = vrot.lane.b32.xlu0 %v3666_v16, %s11817_s15  ;;  %v3697_v16 = vld [vmem:[#allocation8 + $0x218] sm:$0xff]  ;;  %s11823_s15 = smov 69  }
0x1d19   :  { %v9205_v45 = vpop.permute.xlu0 %3652 }
0x1d1a   :  { %11818 = vst [vmem:[#allocation77_spill] sm:$0xff] %v9205_v45  ;;  %v9207_v1 = vpop.permute.xlu1 %3654  ;;  %v3696_v45 = vld [vmem:[#allocation8 + $0x210] sm:$0xff] }
0x1d1b   :  { %11819 = vst [vmem:[#allocation80_spill] sm:$0xff] %v9207_v1 }
0x1d1d   :  { %v9209_v4 = vpop.permute.xlu0 %3656 }
0x1d1e   :  { %11820 = vst [vmem:[#allocation78_spill] sm:$0xff] %v9209_v4  ;;  %v3670_v42 = vpop.permute.xlu1 %3669 }
0x1d1f   :  { %v3677_v55 = vmul.f32 %v3670_v42, %v8754_v49 }
0x1d21   :  { %v3672_v9 = vpop.permute.xlu0 %3671  ;;  %3683 = vrot.lane.b32.xlu1 %v3677_v55, %s11821_s19 }
0x1d22   :  { %v3673_v2 = vsel %vm11822_vm5, %v3670_v42, %v3672_v9  ;;  %v3679_v38 = vmul.f32 %v3672_v9, %v8764_v32  ;;  %vm11834_vm5 = vcmask 572416  }
0x1d23   :  { %v3678_v57 = vmul.f32 %v3673_v2, %v8757_v39 }
0x1d25   :  { %3687 = vrot.lane.b32.xlu1 %v3679_v38, %s11821_s19  ;;  %3685 = vrot.lane.b32.xlu0 %v3678_v57, %s11821_s19  ;;  %s11828_s19 = smov 59  }
0x1d29   :  { %3702 = vrot.lane.b32.xlu1 %v3697_v16, %s11823_s15  ;;  %3700 = vrot.lane.b32.xlu0 %v3696_v45, %s11823_s15  ;;  %v3727_v16 = vld [vmem:[#allocation8 + $0x220] sm:$0xff]  ;;  %s11829_s15 = smov 70  }
0x1d93   :  { %v9220_v4 = vpop.permute.xlu1 %3683 }
0x1d94   :  { %11824 = vst [vmem:[#allocation79_spill] sm:$0xff] %v9220_v4 }
0x1d97   :  { %v9222_v1 = vpop.permute.xlu1 %3687  ;;  %v9224_v55 = vpop.permute.xlu0 %3685 }
0x1d98   :  { %11825 = vst [vmem:[#allocation82_spill] sm:$0xff] %v9222_v1  ;;  %11826 = vst [vmem:[#allocation81_spill] sm:$0xff] %v9224_v55  ;;  %v3728_v1 = vld [vmem:[#allocation8 + $0x228] sm:$0xff] }
0x1d9b   :  { %v3703_v42 = vpop.permute.xlu1 %3702  ;;  %v3701_v9 = vpop.permute.xlu0 %3700 }
0x1d9c   :  { %v3704_v2 = vsel %vm11827_vm6, %v3701_v9, %v3703_v42  ;;  %v3708_v38 = vmul.f32 %v3701_v9, %v8754_v49  ;;  %v3710_v45 = vmul.f32 %v3703_v42, %v8764_v32  ;;  %vm11843_vm6 = vcmask 662528  }
0x1d9d   :  { %v3709_v57 = vmul.f32 %v3704_v2, %v8757_v39 }
0x1d9e   :  { %3714 = vrot.lane.b32.xlu0 %v3708_v38, %s11828_s19 }
0x1d9f   :  { %3716 = vrot.lane.b32.xlu1 %v3709_v57, %s11828_s19 }
0x1da2   :  { %3718 = vrot.lane.b32.xlu0 %v3710_v45, %s11828_s19  ;;  %s11854_s19 = smov 45  }
0x1da3   :  { %3731 = vrot.lane.b32.xlu1 %v3727_v16, %s11829_s15 }
0x1da6   :  { %3733 = vrot.lane.b32.xlu0 %v3728_v1, %s11829_s15  ;;  %v3759_v1 = vld [vmem:[#allocation8 + $0x238] sm:$0xff]  ;;  %s11842_s15 = smov 47  }
0x1e10   :  { %v9235_v4 = vpop.permute.xlu0 %3714 }
0x1e11   :  { %11830 = vst [vmem:[#allocation83_spill] sm:$0xff] %v9235_v4  ;;  %v9237_v55 = vpop.permute.xlu1 %3716  ;;  %v3758_v4 = vld [vmem:[#allocation8 + $0x230] sm:$0xff] }
0x1e12   :  { %11831 = vst [vmem:[#allocation86_spill] sm:$0xff] %v9237_v55 }
0x1e14   :  { %v9239_v9 = vpop.permute.xlu0 %3718 }
0x1e15   :  { %11832 = vst [vmem:[#allocation84_spill] sm:$0xff] %v9239_v9  ;;  %v3732_v2 = vpop.permute.xlu1 %3731 }
0x1e16   :  { %v3739_v38 = vmul.f32 %v3732_v2, %v8754_v49 }
0x1e18   :  { %v3734_v57 = vpop.permute.xlu0 %3733  ;;  %3745 = vrot.lane.b32.xlu1 %v3739_v38, %s11833_s24 }
0x1e19   :  { %v3735_v42 = vsel %vm11834_vm5, %v3732_v2, %v3734_v57  ;;  %v3741_v45 = vmul.f32 %v3734_v57, %v8764_v32  ;;  %vm11848_vm5 = vcmask 670720  }
0x1e1a   :  { %v3740_v16 = vmul.f32 %v3735_v42, %v8757_v39 }
0x1e1c   :  { %3749 = vrot.lane.b32.xlu1 %v3741_v45, %s11833_s24  ;;  %3747 = vrot.lane.b32.xlu0 %v3740_v16, %s11833_s24  ;;  %s11838_s24 = smov 81  }
0x1e20   :  { %3764 = vrot.lane.b32.xlu1 %v3759_v1, %s11760_s14  ;;  %3762 = vrot.lane.b32.xlu0 %v3758_v4, %s11760_s14  ;;  %v3789_v1 = vld [vmem:[#allocation8 + $0x240] sm:$0xff]  ;;  %s11913_s14 = sld [smem:[#allocation161_spill]] }
0x1e8a   :  { %v9250_v9 = vpop.permute.xlu1 %3745 }
0x1e8b   :  { %11835 = vst [vmem:[#allocation85_spill] sm:$0xff] %v9250_v9 }
0x1e8e   :  { %v9252_v55 = vpop.permute.xlu1 %3749  ;;  %v9254_v38 = vpop.permute.xlu0 %3747 }
0x1e8f   :  { %11836 = vst [vmem:[#allocation88_spill] sm:$0xff] %v9252_v55  ;;  %11837 = vst [vmem:[#allocation87_spill] sm:$0xff] %v9254_v38  ;;  %v3790_v55 = vld [vmem:[#allocation8 + $0x248] sm:$0xff] }
0x1e92   :  { %v3765_v2 = vpop.permute.xlu1 %3764  ;;  %v3763_v57 = vpop.permute.xlu0 %3762 }
0x1e93   :  { %v3766_v42 = vsel %vm1127_vm12, %v3763_v57, %v3765_v2  ;;  %v3770_v45 = vmul.f32 %v3763_v57, %v8754_v49  ;;  %v3772_v4 = vmul.f32 %v3765_v2, %v8764_v32 }
0x1e94   :  { %v3771_v16 = vmul.f32 %v3766_v42, %v8757_v39 }
0x1e95   :  { %3776 = vrot.lane.b32.xlu0 %v3770_v45, %s11756_s23 }
0x1e96   :  { %3778 = vrot.lane.b32.xlu1 %v3771_v16, %s11756_s23 }
0x1e99   :  { %3780 = vrot.lane.b32.xlu0 %v3772_v4, %s11756_s23  ;;  %s9730_s23 = sld [smem:[#allocation12 + $0x500]] }
0x1e9a   :  { %3793 = vrot.lane.b32.xlu1 %v3789_v1, %s11838_s24 }
0x1e9d   :  { %3795 = vrot.lane.b32.xlu0 %v3790_v55, %s11838_s24  ;;  %v3821_v55 = vld [vmem:[#allocation8 + $0x258] sm:$0xff]  ;;  %s11844_s24 = smov 82  }
0x1f07   :  { %v9265_v9 = vpop.permute.xlu0 %3776 }
0x1f08   :  { %11839 = vst [vmem:[#allocation89_spill] sm:$0xff] %v9265_v9  ;;  %v9267_v38 = vpop.permute.xlu1 %3778  ;;  %v3820_v9 = vld [vmem:[#allocation8 + $0x250] sm:$0xff] }
0x1f09   :  { %11840 = vst [vmem:[#allocation92_spill] sm:$0xff] %v9267_v38 }
0x1f0b   :  { %v9269_v57 = vpop.permute.xlu0 %3780 }
0x1f0c   :  { %11841 = vst [vmem:[#allocation90_spill] sm:$0xff] %v9269_v57  ;;  %v3794_v42 = vpop.permute.xlu1 %3793 }
0x1f0d   :  { %v3801_v45 = vmul.f32 %v3794_v42, %v8754_v49 }
0x1f0f   :  { %v3796_v16 = vpop.permute.xlu0 %3795  ;;  %3807 = vrot.lane.b32.xlu1 %v3801_v45, %s11842_s15 }
0x1f10   :  { %v3797_v2 = vsel %vm11843_vm6, %v3794_v42, %v3796_v16  ;;  %v3803_v4 = vmul.f32 %v3796_v16, %v8764_v32  ;;  %vm11855_vm6 = vcmask 678912  }
0x1f11   :  { %v3802_v1 = vmul.f32 %v3797_v2, %v8757_v39 }
0x1f13   :  { %3811 = vrot.lane.b32.xlu1 %v3803_v4, %s11842_s15  ;;  %3809 = vrot.lane.b32.xlu0 %v3802_v1, %s11842_s15  ;;  %s11849_s15 = smov 46  }
0x1f17   :  { %3826 = vrot.lane.b32.xlu1 %v3821_v55, %s11844_s24  ;;  %3824 = vrot.lane.b32.xlu0 %v3820_v9, %s11844_s24  ;;  %v3851_v55 = vld [vmem:[#allocation8 + $0x260] sm:$0xff]  ;;  %s11850_s24 = smov 83  }
0x1f81   :  { %v9280_v57 = vpop.permute.xlu1 %3807 }
0x1f82   :  { %11845 = vst [vmem:[#allocation91_spill] sm:$0xff] %v9280_v57 }
0x1f85   :  { %v9282_v38 = vpop.permute.xlu1 %3811  ;;  %v9284_v45 = vpop.permute.xlu0 %3809 }
0x1f86   :  { %11846 = vst [vmem:[#allocation94_spill] sm:$0xff] %v9282_v38  ;;  %11847 = vst [vmem:[#allocation93_spill] sm:$0xff] %v9284_v45  ;;  %v3852_v38 = vld [vmem:[#allocation8 + $0x268] sm:$0xff] }
0x1f89   :  { %v3827_v42 = vpop.permute.xlu1 %3826  ;;  %v3825_v16 = vpop.permute.xlu0 %3824 }
0x1f8a   :  { %v3828_v2 = vsel %vm11848_vm5, %v3825_v16, %v3827_v42  ;;  %v3832_v4 = vmul.f32 %v3825_v16, %v8754_v49  ;;  %v3834_v9 = vmul.f32 %v3827_v42, %v8764_v32  ;;  %vm11860_vm5 = vcmask 687104  }
0x1f8b   :  { %v3833_v1 = vmul.f32 %v3828_v2, %v8757_v39 }
0x1f8c   :  { %3838 = vrot.lane.b32.xlu0 %v3832_v4, %s11849_s15 }
0x1f8d   :  { %3840 = vrot.lane.b32.xlu1 %v3833_v1, %s11849_s15 }
0x1f90   :  { %3842 = vrot.lane.b32.xlu0 %v3834_v9, %s11849_s15  ;;  %s11856_s15 = smov 84  }
0x1f91   :  { %3855 = vrot.lane.b32.xlu1 %v3851_v55, %s11850_s24 }
0x1f94   :  { %3857 = vrot.lane.b32.xlu0 %v3852_v38, %s11850_s24  ;;  %v3883_v38 = vld [vmem:[#allocation8 + $0x278] sm:$0xff]  ;;  %s11866_s24 = smov 43  }
0x1ffe   :  { %v9295_v57 = vpop.permute.xlu0 %3838 }
0x1fff   :  { %11851 = vst [vmem:[#allocation95_spill] sm:$0xff] %v9295_v57  ;;  %v9297_v45 = vpop.permute.xlu1 %3840  ;;  %v3882_v57 = vld [vmem:[#allocation8 + $0x270] sm:$0xff] }
0x2000   :  { %11852 = vst [vmem:[#allocation98_spill] sm:$0xff] %v9297_v45 }
0x2002   :  { %v9299_v16 = vpop.permute.xlu0 %3842 }
0x2003   :  { %11853 = vst [vmem:[#allocation96_spill] sm:$0xff] %v9299_v16  ;;  %v3856_v2 = vpop.permute.xlu1 %3855 }
0x2004   :  { %v3863_v4 = vmul.f32 %v3856_v2, %v8754_v49 }
0x2006   :  { %v3858_v1 = vpop.permute.xlu0 %3857  ;;  %3869 = vrot.lane.b32.xlu1 %v3863_v4, %s11854_s19 }
0x2007   :  { %v3859_v42 = vsel %vm11855_vm6, %v3856_v2, %v3858_v1  ;;  %v3865_v9 = vmul.f32 %v3858_v1, %v8764_v32  ;;  %vm11867_vm6 = vcmask 695296  }
0x2008   :  { %v3864_v55 = vmul.f32 %v3859_v42, %v8757_v39 }
0x200a   :  { %3873 = vrot.lane.b32.xlu1 %v3865_v9, %s11854_s19  ;;  %3871 = vrot.lane.b32.xlu0 %v3864_v55, %s11854_s19  ;;  %s11861_s19 = smov 44  }
0x200e   :  { %3888 = vrot.lane.b32.xlu1 %v3883_v38, %s11856_s15  ;;  %3886 = vrot.lane.b32.xlu0 %v3882_v57, %s11856_s15  ;;  %v3913_v38 = vld [vmem:[#allocation8 + $0x280] sm:$0xff]  ;;  %s11862_s15 = smov 85  }
0x2078   :  { %v9310_v16 = vpop.permute.xlu1 %3869 }
0x2079   :  { %11857 = vst [vmem:[#allocation97_spill] sm:$0xff] %v9310_v16 }
0x207c   :  { %v9312_v45 = vpop.permute.xlu1 %3873  ;;  %v9314_v4 = vpop.permute.xlu0 %3871 }
0x207d   :  { %11858 = vst [vmem:[#allocation100_spill] sm:$0xff] %v9312_v45  ;;  %11859 = vst [vmem:[#allocation99_spill] sm:$0xff] %v9314_v4  ;;  %v3914_v45 = vld [vmem:[#allocation8 + $0x288] sm:$0xff] }
0x2080   :  { %v3889_v2 = vpop.permute.xlu1 %3888  ;;  %v3887_v1 = vpop.permute.xlu0 %3886 }
0x2081   :  { %v3890_v42 = vsel %vm11860_vm5, %v3887_v1, %v3889_v2  ;;  %v3894_v9 = vmul.f32 %v3887_v1, %v8754_v49  ;;  %v3896_v57 = vmul.f32 %v3889_v2, %v8764_v32  ;;  %vm11872_vm5 = vcmask 703488  }
0x2082   :  { %v3895_v55 = vmul.f32 %v3890_v42, %v8757_v39 }
0x2083   :  { %3900 = vrot.lane.b32.xlu0 %v3894_v9, %s11861_s19 }
0x2084   :  { %3902 = vrot.lane.b32.xlu1 %v3895_v55, %s11861_s19 }
0x2087   :  { %3904 = vrot.lane.b32.xlu0 %v3896_v57, %s11861_s19  ;;  %s11868_s19 = smov 86  }
0x2088   :  { %3917 = vrot.lane.b32.xlu1 %v3913_v38, %s11862_s15 }
0x208b   :  { %3919 = vrot.lane.b32.xlu0 %v3914_v45, %s11862_s15  ;;  %v3945_v45 = vld [vmem:[#allocation8 + $0x298] sm:$0xff]  ;;  %s11887_s15 = smov 30  }
0x20f5   :  { %v9325_v16 = vpop.permute.xlu0 %3900 }
0x20f6   :  { %11863 = vst [vmem:[#allocation101_spill] sm:$0xff] %v9325_v16  ;;  %v9327_v4 = vpop.permute.xlu1 %3902  ;;  %v3944_v16 = vld [vmem:[#allocation8 + $0x290] sm:$0xff] }
0x20f7   :  { %11864 = vst [vmem:[#allocation104_spill] sm:$0xff] %v9327_v4 }
0x20f9   :  { %v9329_v1 = vpop.permute.xlu0 %3904 }
0x20fa   :  { %11865 = vst [vmem:[#allocation102_spill] sm:$0xff] %v9329_v1  ;;  %v3918_v42 = vpop.permute.xlu1 %3917 }
0x20fb   :  { %v3925_v9 = vmul.f32 %v3918_v42, %v8754_v49 }
0x20fd   :  { %v3920_v55 = vpop.permute.xlu0 %3919  ;;  %3931 = vrot.lane.b32.xlu1 %v3925_v9, %s11866_s24 }
0x20fe   :  { %v3921_v2 = vsel %vm11867_vm6, %v3918_v42, %v3920_v55  ;;  %v3927_v57 = vmul.f32 %v3920_v55, %v8764_v32  ;;  %vm11881_vm6 = vcmask 793600  }
0x20ff   :  { %v3926_v38 = vmul.f32 %v3921_v2, %v8757_v39 }
0x2101   :  { %3935 = vrot.lane.b32.xlu1 %v3927_v57, %s11866_s24  ;;  %3933 = vrot.lane.b32.xlu0 %v3926_v38, %s11866_s24  ;;  %s11873_s24 = smov 42  }
0x2105   :  { %3950 = vrot.lane.b32.xlu1 %v3945_v45, %s11868_s19  ;;  %3948 = vrot.lane.b32.xlu0 %v3944_v16, %s11868_s19  ;;  %v3975_v45 = vld [vmem:[#allocation8 + $0x2a0] sm:$0xff]  ;;  %s11882_s19 = smov 31  }
0x216f   :  { %v9340_v1 = vpop.permute.xlu1 %3931 }
0x2170   :  { %11869 = vst [vmem:[#allocation103_spill] sm:$0xff] %v9340_v1 }
0x2173   :  { %v9342_v4 = vpop.permute.xlu1 %3935  ;;  %v9344_v9 = vpop.permute.xlu0 %3933 }
0x2174   :  { %11870 = vst [vmem:[#allocation106_spill] sm:$0xff] %v9342_v4  ;;  %11871 = vst [vmem:[#allocation105_spill] sm:$0xff] %v9344_v9  ;;  %v3976_v4 = vld [vmem:[#allocation8 + $0x2a8] sm:$0xff] }
0x2177   :  { %v3951_v42 = vpop.permute.xlu1 %3950  ;;  %v3949_v55 = vpop.permute.xlu0 %3948 }
0x2178   :  { %v3952_v2 = vsel %vm11872_vm5, %v3949_v55, %v3951_v42  ;;  %v3956_v57 = vmul.f32 %v3949_v55, %v8754_v49  ;;  %v3958_v16 = vmul.f32 %v3951_v42, %v8764_v32  ;;  %vm11888_vm5 = vcmask 801792  }
0x2179   :  { %v3957_v38 = vmul.f32 %v3952_v2, %v8757_v39 }
0x217a   :  { %3962 = vrot.lane.b32.xlu0 %v3956_v57, %s11873_s24 }
0x217b   :  { %3964 = vrot.lane.b32.xlu1 %v3957_v38, %s11873_s24 }
0x217e   :  { %3966 = vrot.lane.b32.xlu0 %v3958_v16, %s11873_s24  ;;  %s11877_s24 = smov 97  }
0x217f   :  { %3979 = vrot.lane.b32.xlu1 %v3975_v45, %s11731_s10 }
0x2182   :  { %3981 = vrot.lane.b32.xlu0 %v3976_v4, %s11731_s10  ;;  %v4007_v4 = vld [vmem:[#allocation8 + $0x2b8] sm:$0xff]  ;;  %s9728_s10 = sld [smem:[#allocation12 + $0x480]] }
0x21ec   :  { %v9355_v1 = vpop.permute.xlu0 %3962 }
0x21ed   :  { %11874 = vst [vmem:[#allocation107_spill] sm:$0xff] %v9355_v1  ;;  %v9357_v9 = vpop.permute.xlu1 %3964  ;;  %v4006_v1 = vld [vmem:[#allocation8 + $0x2b0] sm:$0xff] }
0x21ee   :  { %11875 = vst [vmem:[#allocation110_spill] sm:$0xff] %v9357_v9 }
0x21f0   :  { %v9359_v55 = vpop.permute.xlu0 %3966 }
0x21f1   :  { %11876 = vst [vmem:[#allocation108_spill] sm:$0xff] %v9359_v55  ;;  %v3980_v2 = vpop.permute.xlu1 %3979 }
0x21f2   :  { %v3987_v57 = vmul.f32 %v3980_v2, %v8754_v49 }
0x21f4   :  { %v3982_v38 = vpop.permute.xlu0 %3981  ;;  %3993 = vrot.lane.b32.xlu1 %v3987_v57, %s11730_s21 }
0x21f5   :  { %v3983_v42 = vsel %vm896_vm11, %v3980_v2, %v3982_v38  ;;  %v3989_v16 = vmul.f32 %v3982_v38, %v8764_v32 }
0x21f6   :  { %v3988_v45 = vmul.f32 %v3983_v42, %v8757_v39 }
0x21f8   :  { %3997 = vrot.lane.b32.xlu1 %v3989_v16, %s11730_s21  ;;  %3995 = vrot.lane.b32.xlu0 %v3988_v45, %s11730_s21  ;;  %s9742_s21 = sld [smem:[#allocation12 + $0x401]] }
0x21fc   :  { %4012 = vrot.lane.b32.xlu1 %v4007_v4, %s11877_s24  ;;  %4010 = vrot.lane.b32.xlu0 %v4006_v1, %s11877_s24  ;;  %v4037_v4 = vld [vmem:[#allocation8 + $0x2c0] sm:$0xff]  ;;  %s11883_s24 = smov 98  }
0x2266   :  { %v9370_v55 = vpop.permute.xlu1 %3993 }
0x2267   :  { %11878 = vst [vmem:[#allocation109_spill] sm:$0xff] %v9370_v55 }
0x226a   :  { %v9372_v9 = vpop.permute.xlu1 %3997  ;;  %v9374_v57 = vpop.permute.xlu0 %3995 }
0x226b   :  { %11879 = vst [vmem:[#allocation112_spill] sm:$0xff] %v9372_v9  ;;  %11880 = vst [vmem:[#allocation111_spill] sm:$0xff] %v9374_v57  ;;  %v4038_v9 = vld [vmem:[#allocation8 + $0x2c8] sm:$0xff] }
0x226e   :  { %v4013_v2 = vpop.permute.xlu1 %4012  ;;  %v4011_v38 = vpop.permute.xlu0 %4010 }
0x226f   :  { %v4014_v42 = vsel %vm11881_vm6, %v4011_v38, %v4013_v2  ;;  %v4018_v16 = vmul.f32 %v4011_v38, %v8754_v49  ;;  %v4020_v1 = vmul.f32 %v4013_v2, %v8764_v32  ;;  %vm11893_vm6 = vcmask 809984  }
0x2270   :  { %v4019_v45 = vmul.f32 %v4014_v42, %v8757_v39 }
0x2271   :  { %4024 = vrot.lane.b32.xlu0 %v4018_v16, %s11882_s19 }
0x2272   :  { %4026 = vrot.lane.b32.xlu1 %v4019_v45, %s11882_s19 }
0x2275   :  { %4028 = vrot.lane.b32.xlu0 %v4020_v1, %s11882_s19  ;;  %s11889_s19 = smov 99  }
0x2276   :  { %4041 = vrot.lane.b32.xlu1 %v4037_v4, %s11883_s24 }
0x2279   :  { %4043 = vrot.lane.b32.xlu0 %v4038_v9, %s11883_s24  ;;  %v4069_v9 = vld [vmem:[#allocation8 + $0x2d8] sm:$0xff]  ;;  %s11899_s24 = smov 28  }
0x22e3   :  { %v9385_v55 = vpop.permute.xlu0 %4024 }
0x22e4   :  { %11884 = vst [vmem:[#allocation113_spill] sm:$0xff] %v9385_v55  ;;  %v9387_v57 = vpop.permute.xlu1 %4026  ;;  %v4068_v55 = vld [vmem:[#allocation8 + $0x2d0] sm:$0xff] }
0x22e5   :  { %11885 = vst [vmem:[#allocation116_spill] sm:$0xff] %v9387_v57 }
0x22e7   :  { %v9389_v38 = vpop.permute.xlu0 %4028 }
0x22e8   :  { %11886 = vst [vmem:[#allocation114_spill] sm:$0xff] %v9389_v38  ;;  %v4042_v42 = vpop.permute.xlu1 %4041 }
0x22e9   :  { %v4049_v16 = vmul.f32 %v4042_v42, %v8754_v49 }
0x22eb   :  { %v4044_v45 = vpop.permute.xlu0 %4043  ;;  %4055 = vrot.lane.b32.xlu1 %v4049_v16, %s11887_s15 }
0x22ec   :  { %v4045_v2 = vsel %vm11888_vm5, %v4042_v42, %v4044_v45  ;;  %v4051_v1 = vmul.f32 %v4044_v45, %v8764_v32  ;;  %vm11900_vm5 = vcmask 818176  }
0x22ed   :  { %v4050_v4 = vmul.f32 %v4045_v2, %v8757_v39 }
0x22ef   :  { %4059 = vrot.lane.b32.xlu1 %v4051_v1, %s11887_s15  ;;  %4057 = vrot.lane.b32.xlu0 %v4050_v4, %s11887_s15  ;;  %s11894_s15 = smov 29  }
0x22f3   :  { %4074 = vrot.lane.b32.xlu1 %v4069_v9, %s11889_s19  ;;  %4072 = vrot.lane.b32.xlu0 %v4068_v55, %s11889_s19  ;;  %v4099_v9 = vld [vmem:[#allocation8 + $0x2e0] sm:$0xff]  ;;  %s11895_s19 = smov 100  }
0x235d   :  { %v9400_v38 = vpop.permute.xlu1 %4055 }
0x235e   :  { %11890 = vst [vmem:[#allocation115_spill] sm:$0xff] %v9400_v38 }
0x2361   :  { %v9402_v57 = vpop.permute.xlu1 %4059  ;;  %v9404_v16 = vpop.permute.xlu0 %4057 }
0x2362   :  { %11891 = vst [vmem:[#allocation118_spill] sm:$0xff] %v9402_v57  ;;  %11892 = vst [vmem:[#allocation117_spill] sm:$0xff] %v9404_v16  ;;  %v4100_v57 = vld [vmem:[#allocation8 + $0x2e8] sm:$0xff] }
0x2365   :  { %v4075_v42 = vpop.permute.xlu1 %4074  ;;  %v4073_v45 = vpop.permute.xlu0 %4072 }
0x2366   :  { %v4076_v2 = vsel %vm11893_vm6, %v4073_v45, %v4075_v42  ;;  %v4080_v1 = vmul.f32 %v4073_v45, %v8754_v49  ;;  %v4082_v55 = vmul.f32 %v4075_v42, %v8764_v32  ;;  %vm11905_vm6 = vcmask 826368  }
0x2367   :  { %v4081_v4 = vmul.f32 %v4076_v2, %v8757_v39 }
0x2368   :  { %4086 = vrot.lane.b32.xlu0 %v4080_v1, %s11894_s15 }
0x2369   :  { %4088 = vrot.lane.b32.xlu1 %v4081_v4, %s11894_s15 }
0x236c   :  { %4090 = vrot.lane.b32.xlu0 %v4082_v55, %s11894_s15  ;;  %s11901_s15 = smov 101  }
0x236d   :  { %4103 = vrot.lane.b32.xlu1 %v4099_v9, %s11895_s19 }
0x2370   :  { %4105 = vrot.lane.b32.xlu0 %v4100_v57, %s11895_s19  ;;  %v4131_v57 = vld [vmem:[#allocation8 + $0x2f8] sm:$0xff]  ;;  %s11911_s19 = smov 26  }
0x23da   :  { %v9415_v38 = vpop.permute.xlu0 %4086 }
0x23db   :  { %11896 = vst [vmem:[#allocation119_spill] sm:$0xff] %v9415_v38  ;;  %v9417_v16 = vpop.permute.xlu1 %4088  ;;  %v4130_v38 = vld [vmem:[#allocation8 + $0x2f0] sm:$0xff] }
0x23dc   :  { %11897 = vst [vmem:[#allocation153_spill] sm:$0xff] %v9417_v16 }
0x23de   :  { %v9419_v45 = vpop.permute.xlu0 %4090 }
0x23df   :  { %11898 = vst [vmem:[#allocation154_spill] sm:$0xff] %v9419_v45  ;;  %v4104_v2 = vpop.permute.xlu1 %4103 }
0x23e0   :  { %v4111_v1 = vmul.f32 %v4104_v2, %v8754_v49 }
0x23e2   :  { %v4106_v4 = vpop.permute.xlu0 %4105  ;;  %4117 = vrot.lane.b32.xlu1 %v4111_v1, %s11899_s24 }
0x23e3   :  { %v4107_v42 = vsel %vm11900_vm5, %v4104_v2, %v4106_v4  ;;  %v4113_v55 = vmul.f32 %v4106_v4, %v8764_v32  ;;  %vm11912_vm5 = vcmask 834560  }
0x23e4   :  { %v4112_v9 = vmul.f32 %v4107_v42, %v8757_v39 }
0x23e6   :  { %4121 = vrot.lane.b32.xlu1 %v4113_v55, %s11899_s24  ;;  %4119 = vrot.lane.b32.xlu0 %v4112_v9, %s11899_s24  ;;  %s11906_s24 = smov 27  }
0x23ea   :  { %4136 = vrot.lane.b32.xlu1 %v4131_v57, %s11901_s15  ;;  %4134 = vrot.lane.b32.xlu0 %v4130_v38, %s11901_s15  ;;  %v4161_v57 = vld [vmem:[#allocation8 + $0x300] sm:$0xff]  ;;  %s11907_s15 = smov 102  }
0x2454   :  { %v9430_v45 = vpop.permute.xlu1 %4117 }
0x2455   :  { %11902 = vst [vmem:[#allocation155_spill] sm:$0xff] %v9430_v45 }
0x2458   :  { %v9432_v16 = vpop.permute.xlu1 %4121  ;;  %v9434_v1 = vpop.permute.xlu0 %4119 }
0x2459   :  { %11903 = vst [vmem:[#allocation156_spill] sm:$0xff] %v9432_v16  ;;  %11904 = vst [vmem:[#allocation157_spill] sm:$0xff] %v9434_v1  ;;  %v4162_v16 = vld [vmem:[#allocation8 + $0x308] sm:$0xff] }
0x245c   :  { %v4137_v2 = vpop.permute.xlu1 %4136  ;;  %v4135_v4 = vpop.permute.xlu0 %4134 }
0x245d   :  { %v4138_v42 = vsel %vm11905_vm6, %v4135_v4, %v4137_v2  ;;  %v4142_v55 = vmul.f32 %v4135_v4, %v8754_v49  ;;  %v4144_v38 = vmul.f32 %v4137_v2, %v8764_v32  ;;  %vm11914_vm6 = vcmask 1039360  }
0x245e   :  { %v4143_v9 = vmul.f32 %v4138_v42, %v8757_v39 }
0x245f   :  { %4148 = vrot.lane.b32.xlu0 %v4142_v55, %s11906_s24 }
0x2460   :  { %4150 = vrot.lane.b32.xlu1 %v4143_v9, %s11906_s24 }
0x2463   :  { %4152 = vrot.lane.b32.xlu0 %v4144_v38, %s11906_s24  ;;  %s9735_s24 = sld [smem:[#allocation12 + $0x580]] }
0x2464   :  { %4165 = vrot.lane.b32.xlu1 %v4161_v57, %s11907_s15 }
0x2467   :  { %4167 = vrot.lane.b32.xlu0 %v4162_v16, %s11907_s15  ;;  %v2697_v16 = vld [vmem:[#allocation8] sm:$0xff]  ;;  %s9721_s15 = sld [smem:[#allocation13 + $0x100]] }
0x24d1   :  { %v9445_v45 = vpop.permute.xlu0 %4148 }
0x24d2   :  { %11908 = vst [vmem:[#allocation158_spill] sm:$0xff] %v9445_v45  ;;  %v9447_v1 = vpop.permute.xlu1 %4150  ;;  %v2698_v45 = vld [vmem:[#allocation8 + $0x8] sm:$0xff] }
0x24d3   :  { %11909 = vst [vmem:[#allocation159_spill] sm:$0xff] %v9447_v1  ;;  %v2695_v1 = vld [vmem:[%s11913_s14] sm:$0xff] }
0x24d5   :  { %v9449_v4 = vpop.permute.xlu0 %4152 }
0x24d6   :  { %11910 = vst [vmem:[#allocation160_spill] sm:$0xff] %v9449_v4  ;;  %v4166_v42 = vpop.permute.xlu1 %4165  ;;  %v2699_v4 = vmul.f32 %v2697_v16, %v8754_v49 }
0x24d7   :  { %v4173_v55 = vmul.f32 %v4166_v42, %v8754_v49 }
0x24d9   :  { %v4168_v9 = vpop.permute.xlu0 %4167  ;;  %4179 = vrot.lane.b32.xlu1 %v4173_v55, %s11911_s19  ;;  %v2700_v55 = vmul.f32 %v2698_v45, %v8757_v39 }
0x24da   :  { %v4169_v2 = vsel %vm11912_vm5, %v4166_v42, %v4168_v9  ;;  %v4175_v38 = vmul.f32 %v4168_v9, %v8764_v32  ;;  %v2696_v32 = vld [vmem:[%s11913_s14 + $0x8] sm:$0xff]  ;;  %v2728_v42 = vsel %vm11914_vm6, %v8827_v48, %v8829_v41  ;;  %v2701_v9 = vadd.f32 %v2699_v4, %v2695_v1  ;;  %vm11915_vm5 = vmmov %vm11914_vm6  ;;  %s9723_s14 = sld [smem:[#allocation12 + $0x400]] }
0x24db   :  { %v4174_v57 = vmul.f32 %v4169_v2, %v8757_v39  ;;  %v2729_v2 = vsel %vm11915_vm5, %v8829_v41, %v8831_v22  ;;  %v2702_v49 = vadd.f32 %v2700_v55, %v2696_v32  ;;  %v2760_v39 = vsel %vm11917_vm3, %v8835_v34, %v8837_v12  ;;  %vm11919_vm6 = vmmov %vm11918_vm2 }
0x24dc   :  { %v2790_v48 = vsel %vm11918_vm2, %v8839_v17, %v8841_v31  ;;  %v2791_v41 = vsel %vm11919_vm6, %v8841_v31, %v8843_v56  ;;  %vm11920_vm5 = vcmask 1014784   ;;  %vm11922_vm3 = vcmask 1006592  }
0x24dd   :  { %4183 = vrot.lane.b32.xlu1 %v4175_v38, %s11911_s19  ;;  %4181 = vrot.lane.b32.xlu0 %v4174_v57, %s11911_s19  ;;  %v2759_v38 = vsel %vm11916_vm4, %v8833_v23, %v8835_v34  ;;  %v2732_v57 = vadd.f32 %v2728_v42, %v2701_v9  ;;  %v2733_v45 = vadd.f32 %v2729_v2, %v2702_v49  ;;  %vm11921_vm4 = vmmov %vm11920_vm5  ;;  %vm11924_vm6 = vcmask 998400   ;;  %s9737_s19 = sld [smem:[#allocation13 + $0x101]] }
0x24de   :  { %v2821_v23 = vsel %vm11920_vm5, %v8845_v14, %v8847_v40  ;;  %v2822_v34 = vsel %vm11921_vm4, %v8847_v40, %v8849_v7  ;;  %v2852_v17 = vsel %vm11922_vm3, %v8851_v51, %v8853_v29  ;;  %vm11923_vm2 = vmmov %vm11922_vm3  ;;  %v2883_v14 = vsel %vm11924_vm6, %v8857_v47, %v8859_v24 }
0x24df   :  { %v2763_v1 = vadd.f32 %v2759_v38, %v2732_v57  ;;  %v2764_v22 = vadd.f32 %v2760_v39, %v2733_v45  ;;  %v2853_v31 = vsel %vm11923_vm2, %v8853_v29, %v8855_v62  ;;  %vm11925_vm5 = vmmov %vm11924_vm6  ;;  %vm11926_vm4 = vcmask 916480  }
0x24e0   :  { %v2884_v40 = vsel %vm11925_vm5, %v8859_v24, %v8861_v50  ;;  %v2914_v51 = vsel %vm11926_vm4, %v8863_v53, %v8865_v20  ;;  %vm11927_vm3 = vmmov %vm11926_vm4  ;;  %vm11928_vm2 = vcmask 908288   ;;  %vm11930_vm5 = vcmask 900096  }
0x24e1   :  { %v2794_v4 = vadd.f32 %v2790_v48, %v2763_v1  ;;  %v2795_v12 = vadd.f32 %v2791_v41, %v2764_v22  ;;  %v2915_v29 = vsel %vm11927_vm3, %v8865_v20, %v8867_v13  ;;  %v2945_v47 = vsel %vm11928_vm2, %v8869_v59, %v8871_v0  ;;  %vm11929_vm6 = vmmov %vm11928_vm2  ;;  %v11946_v41 = vld [vmem:[#allocation39_spill] sm:$0xff]  ;;  %v11947_v22 = vld [vmem:[#allocation37_spill] sm:$0xff] }
0x24e2   :  { %v2946_v24 = vsel %vm11929_vm6, %v8871_v0, %v8873_v61  ;;  %v2976_v53 = vsel %vm11930_vm5, %v8875_v63, %v8877_v5  ;;  %vm11931_vm4 = vmmov %vm11930_vm5  ;;  %vm11932_vm3 = vcmask 891904   ;;  %vm11934_vm6 = vcmask 883712  }
0x24e3   :  { %v2825_v16 = vadd.f32 %v2821_v23, %v2794_v4  ;;  %v2826_v56 = vadd.f32 %v2822_v34, %v2795_v12  ;;  %v2977_v20 = vsel %vm11931_vm4, %v8877_v5, %v8879_v18  ;;  %v3007_v59 = vsel %vm11932_vm3, %v8890_v52, %v8894_v60  ;;  %vm11933_vm2 = vmmov %vm11932_vm3  ;;  %v11949_v4 = vld [vmem:[#allocation40_spill] sm:$0xff]  ;;  %v11952_v12 = vld [vmem:[#allocation41_spill] sm:$0xff] }
0x24e4   :  { %v3008_v0 = vsel %vm11933_vm2, %v8894_v60, %v8892_v33  ;;  %v3038_v63 = vsel %vm11934_vm6, %v8905_v46, %v8907_v28  ;;  %vm11935_vm5 = vmmov %vm11934_vm6  ;;  %vm11936_vm4 = vcmask 875520   ;;  %vm11938_vm2 = vcmask 867328   ;;  %v11951_v34 = vld [vmem:[#allocation44_spill] sm:$0xff] }
0x24e5   :  { %v2856_v55 = vadd.f32 %v2852_v17, %v2825_v16  ;;  %v2857_v7 = vadd.f32 %v2853_v31, %v2826_v56  ;;  %v3039_v5 = vsel %vm11935_vm5, %v8907_v28, %v8909_v8  ;;  %v3069_v52 = vsel %vm11936_vm4, %v8920_v10, %v8924_v26  ;;  %vm11937_vm3 = vmmov %vm11936_vm4  ;;  %v11954_v16 = vld [vmem:[#allocation42_spill] sm:$0xff]  ;;  %v11956_v31 = vld [vmem:[#allocation45_spill] sm:$0xff] }
0x24e6   :  { %v3070_v33 = vsel %vm11937_vm3, %v8924_v26, %v8922_v25  ;;  %v3100_v46 = vsel %vm11938_vm2, %v8935_v44, %v8937_v43  ;;  %vm11939_vm6 = vmmov %vm11938_vm2  ;;  %v3131_v10 = vsel %vm896_vm11, %v8950_v3, %v8954_v21  ;;  %v3132_v25 = vsel %vm896_vm11, %v8954_v21, %v8952_v36  ;;  %v11957_v56 = vld [vmem:[#allocation43_spill] sm:$0xff] }
0x24e7   :  { %v2887_v32 = vadd.f32 %v2883_v14, %v2856_v55  ;;  %v2888_v62 = vadd.f32 %v2884_v40, %v2857_v7  ;;  %v3101_v28 = vsel %vm11939_vm6, %v8937_v43, %v8939_v37  ;;  %vm11940_vm5 = vcmask 777216   ;;  %v11959_v40 = vld [vmem:[#allocation46_spill] sm:$0xff] }
0x24e8   :  { %v3162_v44 = vsel %vm11940_vm5, %v8965_v15, %v8967_v11  ;;  %vm11941_vm4 = vmmov %vm11940_vm5  ;;  %vm11942_vm3 = vcmask 769024   ;;  %vm11944_vm6 = vcmask 760832  }
0x24e9   :  { %v2918_v42 = vadd.f32 %v2914_v51, %v2887_v32  ;;  %v2919_v50 = vadd.f32 %v2915_v29, %v2888_v62  ;;  %v3163_v43 = vsel %vm11941_vm4, %v8967_v11, %v8969_v30  ;;  %v3193_v3 = vsel %vm11942_vm3, %v8980_v27, %v8984_v58  ;;  %vm11943_vm2 = vmmov %vm11942_vm3  ;;  %v11961_v32 = vld [vmem:[#allocation50_spill] sm:$0xff]  ;;  %v11962_v29 = vld [vmem:[#allocation47_spill] sm:$0xff] }
0x24ea   :  { %v3194_v36 = vsel %vm11943_vm2, %v8984_v58, %v8982_v6  ;;  %v3224_v15 = vsel %vm11944_vm6, %v8995_v35, %v8997_v19  ;;  %vm11945_vm5 = vmmov %vm11944_vm6  ;;  %vm11948_vm4 = vcmask 752640   ;;  %vm11953_vm2 = vcmask 744448  }
0x24eb   :  { %v2949_v9 = vadd.f32 %v2945_v47, %v2918_v42  ;;  %v2950_v13 = vadd.f32 %v2946_v24, %v2919_v50  ;;  %v3225_v11 = vsel %vm11945_vm5, %v8997_v19, %v8999_v54  ;;  %v3255_v27 = vsel %vm11948_vm4, %v11947_v22, %v11946_v41  ;;  %vm11950_vm3 = vmmov %vm11948_vm4  ;;  %v11963_v42 = vld [vmem:[#allocation48_spill] sm:$0xff] }
0x24ec   :  { %v3256_v6 = vsel %vm11950_vm3, %v11946_v41, %v11949_v4  ;;  %v3286_v35 = vsel %vm11953_vm2, %v11952_v12, %v11951_v34  ;;  %vm11955_vm6 = vmmov %vm11953_vm2  ;;  %vm11958_vm5 = vcmask 736256   ;;  %v3348_v62 = vsel %vm1127_vm12, %v11962_v29, %v11961_v32  ;;  %v11990_v41 = vld [vmem:[#allocation65_spill] sm:$0xff] }
0x24ed   :  { %v2980_v2 = vadd.f32 %v2976_v53, %v2949_v9  ;;  %v2981_v61 = vadd.f32 %v2977_v20, %v2950_v13  ;;  %v3287_v19 = vsel %vm11955_vm6, %v11951_v34, %v11954_v16  ;;  %v3317_v14 = vsel %vm11958_vm5, %v11957_v56, %v11956_v31  ;;  %vm11960_vm4 = vmmov %vm11958_vm5  ;;  %v11964_v53 = vld [vmem:[#allocation51_spill] sm:$0xff]  ;;  %v11965_v9 = vld [vmem:[#allocation49_spill] sm:$0xff] }
0x24ee   :  { %v3318_v7 = vsel %vm11960_vm4, %v11956_v31, %v11959_v40  ;;  %v3349_v24 = vsel %vm1127_vm12, %v11961_v32, %v11963_v42  ;;  %vm11966_vm3 = vcmask 646144   ;;  %vm11971_vm6 = vcmask 637952   ;;  %v11995_v34 = vld [vmem:[#allocation67_spill] sm:$0xff]  ;;  %v12003_v32 = vld [vmem:[#allocation73_spill] sm:$0xff] }
0x24ef   :  { %v3011_v49 = vadd.f32 %v3007_v59, %v2980_v2  ;;  %v3012_v18 = vadd.f32 %v3008_v0, %v2981_v61  ;;  %v3379_v20 = vsel %vm11966_vm3, %v11965_v9, %v11964_v53  ;;  %v11967_v59 = vld [vmem:[#allocation52_spill] sm:$0xff]  ;;  %vm11968_vm2 = vmmov %vm11966_vm3  ;;  %vm11976_vm4 = vcmask 629760   ;;  %v11998_v31 = vld [vmem:[#allocation71_spill] sm:$0xff] }
0x24f0   :  { %v3380_v2 = vsel %vm11968_vm2, %v11964_v53, %v11967_v59  ;;  %v11969_v61 = vld [vmem:[#allocation56_spill] sm:$0xff]  ;;  %vm11973_vm5 = vmmov %vm11971_vm6  ;;  %vm11981_vm2 = vcmask 621568   ;;  %v12008_v53 = vld [vmem:[#allocation77_spill] sm:$0xff] }
0x24f1   :  { %v3042_v38 = vadd.f32 %v3038_v63, %v3011_v49  ;;  %v3043_v60 = vadd.f32 %v3039_v5, %v3012_v18  ;;  %v11970_v63 = vld [vmem:[#allocation53_spill] sm:$0xff]  ;;  %v11972_v18 = vld [vmem:[#allocation54_spill] sm:$0xff]  ;;  %vm11978_vm3 = vmmov %vm11976_vm4 }
0x24f2   :  { %v3410_v49 = vsel %vm11971_vm6, %v11970_v63, %v11969_v61  ;;  %vm11983_vm6 = vmmov %vm11981_vm2 }
0x24f3   :  { %v3073_v57 = vadd.f32 %v3069_v52, %v3042_v38  ;;  %v3074_v8 = vadd.f32 %v3070_v33, %v3043_v60  ;;  %v3411_v52 = vsel %vm11973_vm5, %v11969_v61, %v11972_v18  ;;  %v11974_v33 = vld [vmem:[#allocation57_spill] sm:$0xff]  ;;  %v11975_v60 = vld [vmem:[#allocation55_spill] sm:$0xff]  ;;  %vm11986_vm5 = vcmask 613376  }
0x24f4   :  { %v12013_v61 = vld [vmem:[#allocation79_spill] sm:$0xff] }
0x24f5   :  { %v3104_v39 = vadd.f32 %v3100_v46, %v3073_v57  ;;  %v3105_v26 = vadd.f32 %v3101_v28, %v3074_v8  ;;  %v3441_v46 = vsel %vm11976_vm4, %v11975_v60, %v11974_v33  ;;  %v11977_v28 = vld [vmem:[#allocation58_spill] sm:$0xff]  ;;  %vm11988_vm4 = vmmov %vm11986_vm5 }
0x24f6   :  { %v3442_v8 = vsel %vm11978_vm3, %v11974_v33, %v11977_v28  ;;  %vm11991_vm3 = vcmask 605184   ;;  %v12018_v33 = vld [vmem:[#allocation83_spill] sm:$0xff] }
0x24f7   :  { %v3135_v45 = vadd.f32 %v3131_v10, %v3104_v39  ;;  %v3136_v37 = vadd.f32 %v3132_v25, %v3105_v26  ;;  %v11979_v39 = vld [vmem:[#allocation62_spill] sm:$0xff]  ;;  %v11980_v25 = vld [vmem:[#allocation59_spill] sm:$0xff] }
0x24f8   :  { %v3472_v26 = vsel %vm11981_vm2, %v11980_v25, %v11979_v39  ;;  %vm11993_vm2 = vmmov %vm11991_vm3 }
0x24f9   :  { %v3166_v48 = vadd.f32 %v3162_v44, %v3135_v45  ;;  %v3167_v21 = vadd.f32 %v3163_v43, %v3136_v37  ;;  %v11982_v45 = vld [vmem:[#allocation60_spill] sm:$0xff] }
0x24fa   :  { %v3473_v43 = vsel %vm11983_vm6, %v11979_v39, %v11982_v45  ;;  %vm11999_vm6 = vcmask 515072   ;;  %v12023_v39 = vld [vmem:[#allocation85_spill] sm:$0xff] }
0x24fb   :  { %v3197_v1 = vadd.f32 %v3193_v3, %v3166_v48  ;;  %v3198_v30 = vadd.f32 %v3194_v36, %v3167_v21  ;;  %v11984_v3 = vld [vmem:[#allocation63_spill] sm:$0xff]  ;;  %v11985_v48 = vld [vmem:[#allocation61_spill] sm:$0xff] }
0x24fc   :  { %v3503_v36 = vsel %vm11986_vm5, %v11985_v48, %v11984_v3  ;;  %vm12001_vm5 = vmmov %vm11999_vm6 }
0x24fd   :  { %v3228_v23 = vadd.f32 %v3224_v15, %v3197_v1  ;;  %v3229_v58 = vadd.f32 %v3225_v11, %v3198_v30  ;;  %v11987_v15 = vld [vmem:[#allocation64_spill] sm:$0xff] }
0x24fe   :  { %v3504_v1 = vsel %vm11988_vm4, %v11984_v3, %v11987_v15  ;;  %v11989_v30 = vld [vmem:[#allocation68_spill] sm:$0xff]  ;;  %vm12004_vm4 = vcmask 506880   ;;  %v12028_v3 = vld [vmem:[#allocation89_spill] sm:$0xff] }
0x24ff   :  { %v3259_v17 = vadd.f32 %v3255_v27, %v3228_v23  ;;  %v3260_v54 = vadd.f32 %v3256_v6, %v3229_v58  ;;  %v3534_v22 = vsel %vm11991_vm3, %v11990_v41, %v11989_v30  ;;  %v11992_v23 = vld [vmem:[#allocation66_spill] sm:$0xff]  ;;  %v11994_v58 = vld [vmem:[#allocation69_spill] sm:$0xff]  ;;  %vm12006_vm3 = vmmov %vm12004_vm4 }
0x2500   :  { %v3535_v4 = vsel %vm11993_vm2, %v11989_v30, %v11992_v23  ;;  %v3565_v12 = vsel %vm1340_vm15, %v11995_v34, %v11994_v58  ;;  %vm12009_vm2 = vcmask 498688   ;;  %v12031_v30 = vld [vmem:[#allocation91_spill] sm:$0xff] }
0x2501   :  { %v3290_v55 = vadd.f32 %v3286_v35, %v3259_v17  ;;  %v3291_v51 = vadd.f32 %v3287_v19, %v3260_v54  ;;  %v11996_v17 = vld [vmem:[#allocation70_spill] sm:$0xff] }
0x2502   :  { %v3566_v16 = vsel %vm1340_vm15, %v11994_v58, %v11996_v17  ;;  %v11997_v54 = vld [vmem:[#allocation74_spill] sm:$0xff]  ;;  %v12036_v58 = vld [vmem:[#allocation95_spill] sm:$0xff] }
0x2503   :  { %v3321_v47 = vadd.f32 %v3317_v14, %v3290_v55  ;;  %v3322_v50 = vadd.f32 %v3318_v7, %v3291_v51  ;;  %v3596_v56 = vsel %vm11999_vm6, %v11998_v31, %v11997_v54  ;;  %v12000_v55 = vld [vmem:[#allocation72_spill] sm:$0xff]  ;;  %v12002_v51 = vld [vmem:[#allocation75_spill] sm:$0xff]  ;;  %vm12011_vm6 = vmmov %vm12009_vm2 }
0x2504   :  { %v3597_v40 = vsel %vm12001_vm5, %v11997_v54, %v12000_v55  ;;  %v3627_v29 = vsel %vm12004_vm4, %v12003_v32, %v12002_v51  ;;  %vm12014_vm5 = vcmask 490496   ;;  %v12041_v54 = vld [vmem:[#allocation97_spill] sm:$0xff] }
0x2505   :  { %v3352_v13 = vadd.f32 %v3348_v62, %v3321_v47  ;;  %v3353_v0 = vadd.f32 %v3349_v24, %v3322_v50  ;;  %v12005_v47 = vld [vmem:[#allocation76_spill] sm:$0xff]  ;;  %vm12016_vm4 = vmmov %vm12014_vm5 }
0x2506   :  { %v3628_v42 = vsel %vm12006_vm3, %v12002_v51, %v12005_v47  ;;  %v12007_v50 = vld [vmem:[#allocation80_spill] sm:$0xff]  ;;  %vm12019_vm3 = vcmask 482304   ;;  %v12046_v51 = vld [vmem:[#allocation101_spill] sm:$0xff] }
0x2507   :  { %v3383_v5 = vadd.f32 %v3379_v20, %v3352_v13  ;;  %v3384_v38 = vadd.f32 %v3380_v2, %v3353_v0  ;;  %v3658_v9 = vsel %vm12009_vm2, %v12008_v53, %v12007_v50  ;;  %v12010_v13 = vld [vmem:[#allocation78_spill] sm:$0xff]  ;;  %v12012_v0 = vld [vmem:[#allocation81_spill] sm:$0xff]  ;;  %vm12021_vm2 = vmmov %vm12019_vm3 }
0x2508   :  { %v3659_v59 = vsel %vm12011_vm6, %v12007_v50, %v12010_v13  ;;  %v3689_v63 = vsel %vm12014_vm5, %v12013_v61, %v12012_v0  ;;  %vm12024_vm6 = vcmask 474112   ;;  %v12051_v50 = vld [vmem:[#allocation103_spill] sm:$0xff] }
0x2509   :  { %v3414_v57 = vadd.f32 %v3410_v49, %v3383_v5  ;;  %v3415_v10 = vadd.f32 %v3411_v52, %v3384_v38  ;;  %v12015_v5 = vld [vmem:[#allocation82_spill] sm:$0xff]  ;;  %vm12026_vm5 = vmmov %vm12024_vm6 }
0x250a   :  { %v3690_v18 = vsel %vm12016_vm4, %v12012_v0, %v12015_v5  ;;  %v12017_v38 = vld [vmem:[#allocation86_spill] sm:$0xff]  ;;  %vm12032_vm4 = vcmask 384000   ;;  %v12056_v0 = vld [vmem:[#allocation107_spill] sm:$0xff] }
0x250b   :  { %v3445_v44 = vadd.f32 %v3441_v46, %v3414_v57  ;;  %v3446_v37 = vadd.f32 %v3442_v8, %v3415_v10  ;;  %v3720_v60 = vsel %vm12019_vm3, %v12018_v33, %v12017_v38  ;;  %v12020_v57 = vld [vmem:[#allocation84_spill] sm:$0xff]  ;;  %v12022_v10 = vld [vmem:[#allocation87_spill] sm:$0xff]  ;;  %vm12034_vm3 = vmmov %vm12032_vm4 }
0x250c   :  { %v3721_v28 = vsel %vm12021_vm2, %v12017_v38, %v12020_v57  ;;  %v3751_v25 = vsel %vm12024_vm6, %v12023_v39, %v12022_v10  ;;  %vm12037_vm2 = vcmask 375808   ;;  %v12061_v38 = vld [vmem:[#allocation109_spill] sm:$0xff] }
0x250d   :  { %v3476_v21 = vadd.f32 %v3472_v26, %v3445_v44  ;;  %v3477_v11 = vadd.f32 %v3473_v43, %v3446_v37  ;;  %v12025_v44 = vld [vmem:[#allocation88_spill] sm:$0xff]  ;;  %vm12039_vm6 = vmmov %vm12037_vm2 }
0x250e   :  { %v3752_v45 = vsel %vm12026_vm5, %v12022_v10, %v12025_v44  ;;  %v12027_v37 = vld [vmem:[#allocation92_spill] sm:$0xff]  ;;  %vm12042_vm5 = vcmask 367616   ;;  %v12064_v10 = vld [vmem:[#allocation113_spill] sm:$0xff] }
0x250f   :  { %v3507_v27 = vadd.f32 %v3503_v36, %v3476_v21  ;;  %v3508_v6 = vadd.f32 %v3504_v1, %v3477_v11  ;;  %v3782_v48 = vsel %vm1110_vm13, %v12028_v3, %v12027_v37  ;;  %v12029_v21 = vld [vmem:[#allocation90_spill] sm:$0xff]  ;;  %v12030_v11 = vld [vmem:[#allocation93_spill] sm:$0xff] }
0x2510   :  { %v3783_v15 = vsel %vm1110_vm13, %v12027_v37, %v12029_v21  ;;  %v3813_v41 = vsel %vm12032_vm4, %v12031_v30, %v12030_v11  ;;  %vm12044_vm4 = vmmov %vm12042_vm5  ;;  %v12069_v37 = vld [vmem:[#allocation115_spill] sm:$0xff] }
0x2511   :  { %v3538_v35 = vadd.f32 %v3534_v22, %v3507_v27  ;;  %v3539_v19 = vadd.f32 %v3535_v4, %v3508_v6  ;;  %v12033_v27 = vld [vmem:[#allocation94_spill] sm:$0xff] }
0x2512   :  { %v3814_v23 = vsel %vm12034_vm3, %v12030_v11, %v12033_v27  ;;  %v12035_v6 = vld [vmem:[#allocation98_spill] sm:$0xff]  ;;  %vm12047_vm3 = vcmask 359424   ;;  %v12072_v11 = vld [vmem:[#allocation119_spill] sm:$0xff] }
0x2513   :  { %v3569_v14 = vadd.f32 %v3565_v12, %v3538_v35  ;;  %v3570_v7 = vadd.f32 %v3566_v16, %v3539_v19  ;;  %v3844_v34 = vsel %vm12037_vm2, %v12036_v58, %v12035_v6  ;;  %v12038_v35 = vld [vmem:[#allocation96_spill] sm:$0xff]  ;;  %v12040_v19 = vld [vmem:[#allocation99_spill] sm:$0xff]  ;;  %vm12049_vm2 = vmmov %vm12047_vm3 }
0x2514   :  { %v3845_v17 = vsel %vm12039_vm6, %v12035_v6, %v12038_v35  ;;  %v3875_v31 = vsel %vm12042_vm5, %v12041_v54, %v12040_v19  ;;  %vm12052_vm6 = vcmask 351232   ;;  %v12077_v6 = vld [vmem:[#allocation155_spill] sm:$0xff] }
0x2515   :  { %v3600_v62 = vadd.f32 %v3596_v56, %v3569_v14  ;;  %v3601_v24 = vadd.f32 %v3597_v40, %v3570_v7  ;;  %v12043_v14 = vld [vmem:[#allocation100_spill] sm:$0xff]  ;;  %vm12054_vm5 = vmmov %vm12052_vm6 }
0x2516   :  { %v3876_v55 = vsel %vm12044_vm4, %v12040_v19, %v12043_v14  ;;  %v12045_v7 = vld [vmem:[#allocation104_spill] sm:$0xff]  ;;  %vm12057_vm4 = vcmask 343040   ;;  %v12080_v19 = vld [vmem:[#allocation158_spill] sm:$0xff]  ;;  %v12081_v14 = vld [vmem:[#allocation160_spill] sm:$0xff] }
0x2517   :  { %v3631_v20 = vadd.f32 %v3627_v29, %v3600_v62  ;;  %v3632_v2 = vadd.f32 %v3628_v42, %v3601_v24  ;;  %v3906_v32 = vsel %vm12047_vm3, %v12046_v51, %v12045_v7  ;;  %v12048_v62 = vld [vmem:[#allocation102_spill] sm:$0xff]  ;;  %v12050_v24 = vld [vmem:[#allocation105_spill] sm:$0xff]  ;;  %vm12059_vm3 = vmmov %vm12057_vm4  ;;  %v4225_v51 = vstv %s9723_s14  ;;  %s9900_s14 = sld [smem:[#allocation13 + $0x183]] }
0x2518   :  { %v3907_v47 = vsel %vm12049_vm2, %v12045_v7, %v12048_v62  ;;  %v3937_v53 = vsel %vm12052_vm6, %v12051_v50, %v12050_v24  ;;  %vm12065_vm2 = vcmask 252928   ;;  %v4254_v50 = vstv %s9737_s19  ;;  %s9888_s19 = sld [smem:[#allocation12 + $0x702]] }
0x2519   :  { %v3662_v49 = vadd.f32 %v3658_v9, %v3631_v20  ;;  %v3663_v52 = vadd.f32 %v3659_v59, %v3632_v2  ;;  %v12053_v20 = vld [vmem:[#allocation106_spill] sm:$0xff]  ;;  %vm12067_vm6 = vmmov %vm12065_vm2 }
0x251a   :  { %v3938_v13 = vsel %vm12054_vm5, %v12050_v24, %v12053_v20  ;;  %v12055_v2 = vld [vmem:[#allocation110_spill] sm:$0xff]  ;;  %vm12073_vm5 = vcmask 236544   ;;  %v4244_v24 = vstv %s9735_s24  ;;  %v4258_v20 = vstv %s9744_s30  ;;  %s9886_s30 = sld [smem:[#allocation12 + $0x682]]  ;;  %s9910_s24 = sld [smem:[#allocation12 + $0x783]] }
0x251b   :  { %v3693_v46 = vadd.f32 %v3689_v63, %v3662_v49  ;;  %v3694_v8 = vadd.f32 %v3690_v18, %v3663_v52  ;;  %v3968_v61 = vsel %vm12057_vm4, %v12056_v0, %v12055_v2  ;;  %v12058_v49 = vld [vmem:[#allocation108_spill] sm:$0xff]  ;;  %v12060_v52 = vld [vmem:[#allocation111_spill] sm:$0xff]  ;;  %vm12075_vm4 = vmmov %vm12073_vm5  ;;  %v4270_v0 = vstv %s9751_s2  ;;  %s9878_s2 = sld [smem:[#allocation13 + $0x182]] }
0x251c   :  { %v3969_v5 = vsel %vm12059_vm3, %v12055_v2, %v12058_v49  ;;  %v3999_v33 = vsel %vm879_vm14, %v12061_v38, %v12060_v52  ;;  %v4264_v2 = vstv %s9749_s8  ;;  %v4277_v49 = vstv %s9758_s7  ;;  %s9856_s7 = sld [smem:[#allocation13 + $0x181]]  ;;  %s9880_s8 = sld [smem:[#allocation12 + $0x602]] }
0x251d   :  { %v3724_v26 = vadd.f32 %v3720_v60, %v3693_v46  ;;  %v3725_v43 = vadd.f32 %v3721_v28, %v3694_v8  ;;  %v12062_v46 = vld [vmem:[#allocation112_spill] sm:$0xff]  ;;  %v4296_v38 = vstv %s9770_s3  ;;  %s9848_s3 = sld [smem:[#allocation12 + $0x700]]  ;;  %vm12092_vm3 = vcmask 1042432  }
0x251e   :  { %v4000_v57 = vsel %vm879_vm14, %v12060_v52, %v12062_v46  ;;  %v12063_v8 = vld [vmem:[#allocation116_spill] sm:$0xff]  ;;  %v4290_v52 = vstv %s9765_s9  ;;  %s9834_s9 = sld [smem:[#allocation13 + $0x180]] }
0x251f   :  { %v3755_v36 = vadd.f32 %v3751_v25, %v3724_v26  ;;  %v3756_v1 = vadd.f32 %v3752_v45, %v3725_v43  ;;  %v4030_v39 = vsel %vm12065_vm2, %v12064_v10, %v12063_v8  ;;  %v12066_v26 = vld [vmem:[#allocation114_spill] sm:$0xff]  ;;  %v12068_v43 = vld [vmem:[#allocation117_spill] sm:$0xff]  ;;  %v4322_v10 = vstv %s9786_s29  ;;  %s9872_s29 = sld [smem:[#allocation12 + $0x701]]  ;;  %vm12093_vm2 = vmmov %vm12092_vm3 }
0x2520   :  { %v4031_v44 = vsel %vm12067_vm6, %v12063_v8, %v12066_v26  ;;  %v4061_v3 = vsel %vm1880_vm7, %v12069_v37, %v12068_v43  ;;  %v4316_v8 = vstv %s9784_s5  ;;  %v12083_v26 = vld [vmem:[#allocation30_spill] sm:$0xff]  ;;  %s9864_s5 = sld [smem:[#allocation12 + $0x681]]  ;;  %vm12094_vm6 = vmmov %vm12093_vm2 }
0x2521   :  { %v3786_v22 = vadd.f32 %v3782_v48, %v3755_v36  ;;  %v3787_v4 = vadd.f32 %v3783_v15, %v3756_v1  ;;  %v12070_v36 = vld [vmem:[#allocation118_spill] sm:$0xff]  ;;  %v12071_v1 = vld [vmem:[#allocation153_spill] sm:$0xff] }
0x2522   :  { %v4062_v21 = vsel %vm1880_vm7, %v12068_v43, %v12070_v36  ;;  %v4092_v30 = vsel %vm12073_vm5, %v12072_v11, %v12071_v1  ;;  %vm12095_vm5 = vmmov %vm12093_vm2 }
0x2523   :  { %v3817_v12 = vadd.f32 %v3813_v41, %v3786_v22  ;;  %v3818_v16 = vadd.f32 %v3814_v23, %v3787_v4  ;;  %v12074_v22 = vld [vmem:[#allocation154_spill] sm:$0xff]  ;;  %v12076_v4 = vld [vmem:[#allocation157_spill] sm:$0xff] }
0x2524   :  { %v4093_v27 = vsel %vm12075_vm4, %v12071_v1, %v12074_v22  ;;  %v4123_v58 = vsel %vm1946_vm8, %v12077_v6, %v12076_v4  ;;  %v12085_v1 = vld [vmem:[#allocation34_spill] sm:$0xff]  ;;  %v12086_v22 = vld [vmem:[#allocation33_spill] sm:$0xff]  ;;  %vm12100_vm4 = vmmov %vm12093_vm2 }
0x2525   :  { %v3848_v56 = vadd.f32 %v3844_v34, %v3817_v12  ;;  %v3849_v40 = vadd.f32 %v3845_v17, %v3818_v16  ;;  %v12078_v12 = vld [vmem:[#allocation156_spill] sm:$0xff]  ;;  %v12079_v16 = vld [vmem:[#allocation159_spill] sm:$0xff] }
0x2526   :  { %v4124_v35 = vsel %vm1946_vm8, %v12076_v4, %v12078_v12  ;;  %v4154_v54 = vsel %vm1979_vm10, %v12080_v19, %v12079_v16  ;;  %v12088_v6 = vld [vmem:[#allocation38_spill] sm:$0xff] }
0x2527   :  { %v3879_v29 = vadd.f32 %v3875_v31, %v3848_v56  ;;  %v3880_v42 = vadd.f32 %v3876_v55, %v3849_v40  ;;  %v4155_v55 = vsel %vm1979_vm10, %v12079_v16, %v12081_v14 }
0x2529   :  { %v3910_v9 = vadd.f32 %v3906_v32, %v3879_v29  ;;  %v3911_v59 = vadd.f32 %v3907_v47, %v3880_v42  ;;  %v4228_v32 = vstv %s9721_s15  ;;  %v4232_v29 = vstv %s9728_s10  ;;  %s9894_s15 = sld [smem:[#allocation12 + $0x603]] }
0x252a   :  { %v4238_v42 = vstv %s9730_s23  ;;  %s9902_s10 = sld [smem:[#allocation12 + $0x683]] }
0x252b   :  { %v3941_v63 = vadd.f32 %v3937_v53, %v3910_v9  ;;  %v3942_v18 = vadd.f32 %v3938_v13, %v3911_v59  ;;  %v4251_v9 = vstv %s9742_s21  ;;  %s9892_s21 = sld [smem:[#allocation12 + $0x782]]  ;;  %s9908_s23 = sld [smem:[#allocation12 + $0x703]] }
0x252d   :  { %v3972_v60 = vadd.f32 %v3968_v61, %v3941_v63  ;;  %v3973_v28 = vadd.f32 %v3969_v5, %v3942_v18  ;;  %v4280_v5 = vstv %s9756_s18  ;;  %v4284_v18 = vstv %s9763_s27  ;;  %s9836_s27 = sld [smem:[#allocation12 + $0x600]]  ;;  %s9874_s18 = sld [smem:[#allocation12 + $0x781]] }
0x252f   :  { %v4003_v25 = vadd.f32 %v3999_v33, %v3972_v60  ;;  %v4004_v45 = vadd.f32 %v4000_v57, %v3973_v28  ;;  %v4306_v33 = vstv %s9772_s6  ;;  %v4303_v57 = vstv %s9777_s11  ;;  %s9846_s11 = sld [smem:[#allocation12 + $0x680]]  ;;  %s9862_s6 = sld [smem:[#allocation12 + $0x601]] }
0x2530   :  { %v4310_v28 = vstv %s9779_s1  ;;  %s9854_s1 = sld [smem:[#allocation12 + $0x780]] }
0x2531   :  { %v4034_v48 = vadd.f32 %v4030_v39, %v4003_v25  ;;  %v4035_v15 = vadd.f32 %v4031_v44, %v4004_v45  ;;  %v12082_v39 = vld [vmem:[#allocation32_spill] sm:$0xff] }
0x2533   :  { %v4065_v41 = vadd.f32 %v4061_v3, %v4034_v48  ;;  %v4066_v23 = vadd.f32 %v4062_v21, %v4035_v15  ;;  %v12084_v21 = vld [vmem:[#allocation31_spill] sm:$0xff] }
0x2535   :  { %v4096_v34 = vadd.f32 %v4092_v30, %v4065_v41  ;;  %v4097_v17 = vadd.f32 %v4093_v27, %v4066_v23  ;;  %v12087_v23 = vld [vmem:[#allocation35_spill] sm:$0xff] }
0x2537   :  { %v4127_v56 = vadd.f32 %v4123_v58, %v4096_v34  ;;  %v4128_v40 = vadd.f32 %v4124_v35, %v4097_v17  ;;  %v12089_v34 = vld [vmem:[#allocation36_spill] sm:$0xff] }
0x2539   :  { %v4158_v7 = vadd.f32 %v4154_v54, %v4127_v56  ;;  %v4159_v62 = vadd.f32 %v4155_v55, %v4128_v40 }
0x254b   :  { %v4180_v31 = vpop.permute.xlu1 %4179 }
0x254f   :  { %v4184_v47 = vpop.permute.xlu1 %4183  ;;  %v4182_v53 = vpop.permute.xlu0 %4181 }
0x2550   :  { %v4185_v13 = vsel %vm2012_vm9, %v4180_v31, %v4182_v53  ;;  %v4186_v59 = vsel %vm2012_vm9, %v4182_v53, %v4184_v47 }
0x2551   :  { %v4189_v61 = vadd.f32 %v4185_v13, %v4158_v7  ;;  %v4190_v63 = vadd.f32 %v4186_v59, %v4159_v62 }
0x2553   :  { %v4193_v60 = vcombine.low %v4189_v61, %v4190_v63  ;;  %v4194_v46 = vcombine.high %v4189_v61, %v4190_v63 }
0x2555   :  { %v4197_v25 = vmul.f32 %v4193_v60, %v12082_v39  ;;  %v4198_v44 = vmul.f32 %v4194_v46, %v12083_v26  ;;  %v6411_v45 = vrot.slane %v4193_v60, 9  ;;  %v6412_v43 = vrot.slane %v4194_v46, 9 }
0x2556   :  { %v6413_v37 = vrot.slane %v4193_v60, 10  ;;  %v6414_v3 = vrot.slane %v4194_v46, 10  ;;  %v6415_v48 = vrot.slane %v4193_v60, 11  ;;  %v6416_v36 = vrot.slane %v4194_v46, 11 }
0x2557   :  { %v4205_v15 = vmul.f32 %v6411_v45, %v12084_v21  ;;  %v4206_v11 = vmul.f32 %v6412_v43, %v12085_v1  ;;  %v4226_v30 = vmul.f32 %v4225_v51, %v4197_v25  ;;  %v4227_v41 = vmul.f32 %v4225_v51, %v4198_v44 }
0x2558   :  { %v4213_v27 = vmul.f32 %v6413_v37, %v12086_v22  ;;  %v4214_v4 = vmul.f32 %v6414_v3, %v12087_v23  ;;  %v4221_v58 = vmul.f32 %v6415_v48, %v12088_v6  ;;  %v4222_v12 = vmul.f32 %v6416_v36, %v12089_v34 }
0x2559   :  { %v4229_v35 = vadd.f32 %v4228_v32, %v4226_v30  ;;  %v4230_v17 = vadd.f32 %v4228_v32, %v4227_v41  ;;  %v4233_v16 = vmul.f32 %v4232_v29, %v4205_v15  ;;  %v4234_v19 = vmul.f32 %v4232_v29, %v4206_v11 }
0x255a   :  { %v4239_v54 = vmul.f32 %v4238_v42, %v4213_v27  ;;  %v4240_v31 = vmul.f32 %v4238_v42, %v4214_v4  ;;  %v4245_v56 = vmul.f32 %v4244_v24, %v4221_v58  ;;  %v4246_v14 = vmul.f32 %v4244_v24, %v4222_v12 }
0x255b   :  { %v4235_v55 = vadd.f32 %v4233_v16, %v4229_v35  ;;  %v4236_v40 = vadd.f32 %v4234_v19, %v4230_v17  ;;  %v4252_v7 = vmul.f32 %v4251_v9, %v4197_v25  ;;  %v4253_v51 = vmul.f32 %v4251_v9, %v4198_v44  ;;  %v12090_v35 = vld [vmem:[#allocation26_spill] sm:$0xff] }
0x255c   :  { %v4259_v62 = vmul.f32 %v4258_v20, %v4205_v15  ;;  %v4260_v47 = vmul.f32 %v4258_v20, %v4206_v11  ;;  %v4265_v53 = vmul.f32 %v4264_v2, %v4213_v27  ;;  %v4266_v13 = vmul.f32 %v4264_v2, %v4214_v4 }
0x255d   :  { %v4241_v59 = vadd.f32 %v4239_v54, %v4235_v55  ;;  %v4242_v61 = vadd.f32 %v4240_v31, %v4236_v40  ;;  %v4255_v63 = vadd.f32 %v4254_v50, %v4252_v7  ;;  %v4256_v60 = vadd.f32 %v4254_v50, %v4253_v51 }
0x255e   :  { %v4271_v46 = vmul.f32 %v4270_v0, %v4221_v58  ;;  %v4272_v32 = vmul.f32 %v4270_v0, %v4222_v12  ;;  %v4278_v39 = vmul.f32 %v4277_v49, %v4197_v25  ;;  %v4279_v29 = vmul.f32 %v4277_v49, %v4198_v44 }
0x255f   :  { %v9818_v42 = vadd.f32 %v4245_v56, %v4241_v59  ;;  %v9820_v24 = vadd.f32 %v4246_v14, %v4242_v61  ;;  %v4261_v26 = vadd.f32 %v4259_v62, %v4255_v63  ;;  %v4262_v9 = vadd.f32 %v4260_v47, %v4256_v60 }
0x2560   :  { %v4281_v20 = vadd.f32 %v4280_v5, %v4278_v39  ;;  %v4282_v2 = vadd.f32 %v4280_v5, %v4279_v29  ;;  %v4285_v45 = vmul.f32 %v4284_v18, %v4205_v15  ;;  %v4286_v43 = vmul.f32 %v4284_v18, %v4206_v11 }
0x2561   :  { %v4267_v50 = vadd.f32 %v4265_v53, %v4261_v26  ;;  %v4268_v0 = vadd.f32 %v4266_v13, %v4262_v9  ;;  %v4291_v37 = vmul.f32 %v4290_v52, %v4213_v27  ;;  %v4292_v49 = vmul.f32 %v4290_v52, %v4214_v4 }
0x2562   :  { %v4287_v3 = vadd.f32 %v4285_v45, %v4281_v20  ;;  %v4288_v48 = vadd.f32 %v4286_v43, %v4282_v2  ;;  %v4297_v36 = vmul.f32 %v4296_v38, %v4221_v58  ;;  %v4298_v21 = vmul.f32 %v4296_v38, %v4222_v12 }
0x2563   :  { %v4273_v1 = vadd.f32 %v4271_v46, %v4267_v50  ;;  %v4274_v5 = vadd.f32 %v4272_v32, %v4268_v0  ;;  %v4304_v30 = vmul.f32 %v4303_v57, %v4197_v25  ;;  %v4305_v18 = vmul.f32 %v4303_v57, %v4198_v44 }
0x2564   :  { %v4293_v41 = vadd.f32 %v4291_v37, %v4287_v3  ;;  %v4294_v22 = vadd.f32 %v4292_v49, %v4288_v48  ;;  %v4311_v52 = vmul.f32 %v4310_v28, %v4205_v15  ;;  %v4312_v23 = vmul.f32 %v4310_v28, %v4206_v11 }
0x2565   :  { %v4307_v38 = vadd.f32 %v4306_v33, %v4304_v30  ;;  %v4308_v6 = vadd.f32 %v4306_v33, %v4305_v18  ;;  %v4317_v25 = vmul.f32 %v4316_v8, %v4213_v27  ;;  %v4318_v34 = vmul.f32 %v4316_v8, %v4214_v4  ;;  %v12091_v8 = vld [vmem:[#allocation27_spill] sm:$0xff] }
0x2566   :  { %v4299_v57 = vadd.f32 %v4297_v36, %v4293_v41  ;;  %v4300_v44 = vadd.f32 %v4298_v21, %v4294_v22  ;;  %v4323_v28 = vmul.f32 %v4322_v10, %v4221_v58  ;;  %v4324_v15 = vmul.f32 %v4322_v10, %v4222_v12  ;;  %v12096_v36 = vld [vmem:[#allocation28_spill] sm:$0xff] }
0x2567   :  { %v4313_v11 = vadd.f32 %v4311_v52, %v4307_v38  ;;  %v4314_v33 = vadd.f32 %v4312_v23, %v4308_v6  ;;  %v4332_v27 = vrot.slane %v9818_v42, %v12090_v35  ;;  %v4336_v4 = vrot.slane %v9818_v42, %v12091_v8 }
0x2568   :  { %v4340_v58 = vrot.slane %v9820_v24, %v12090_v35  ;;  %v4344_v10 = vrot.slane %v9820_v24, %v12091_v8  ;;  %v4354_v12 = vrot.slane %v4273_v1, %v12090_v35  ;;  %v4358_v17 = vrot.slane %v4273_v1, %v12091_v8  ;;  %v12098_v1 = vld [vmem:[#allocation29_spill] sm:$0xff] }
0x2569   :  { %v4319_v16 = vadd.f32 %v4317_v25, %v4313_v11  ;;  %v4320_v19 = vadd.f32 %v4318_v34, %v4314_v33  ;;  %v4362_v54 = vrot.slane %v4274_v5, %v12090_v35  ;;  %v4366_v31 = vrot.slane %v4274_v5, %v12091_v8 }
0x256a   :  { %v4376_v56 = vrot.slane %v4299_v57, %v12090_v35  ;;  %v4380_v14 = vrot.slane %v4299_v57, %v12091_v8  ;;  %v4384_v55 = vrot.slane %v4300_v44, %v12090_v35  ;;  %v4388_v40 = vrot.slane %v4300_v44, %v12091_v8 }
0x256b   :  { %v4325_v7 = vadd.f32 %v4323_v28, %v4319_v16  ;;  %v4326_v51 = vadd.f32 %v4324_v15, %v4320_v19  ;;  %v4415_v62 = vsel %vm399_vm0, %v4332_v27, %v4354_v12  ;;  %v4416_v47 = vsel %vm399_vm0, %v4336_v4, %v4358_v17 }
0x256c   :  { %v4417_v53 = vsel %vm399_vm0, %v4340_v58, %v4362_v54  ;;  %v4418_v13 = vsel %vm399_vm0, %v4344_v10, %v4366_v31  ;;  %v4419_v59 = vsel %vm404_vm1, %v4415_v62, %v4376_v56  ;;  %v4420_v61 = vsel %vm404_vm1, %v4416_v47, %v4380_v14 }
0x256d   :  { %v4398_v63 = vrot.slane %v4325_v7, %v12090_v35  ;;  %v4402_v60 = vrot.slane %v4325_v7, %v12091_v8  ;;  %v4406_v46 = vrot.slane %v4326_v51, %v12090_v35  ;;  %v4410_v32 = vrot.slane %v4326_v51, %v12091_v8 }
0x256e   :  { %v4421_v39 = vsel %vm404_vm1, %v4417_v53, %v4384_v55  ;;  %v4422_v29 = vsel %vm404_vm1, %v4418_v13, %v4388_v40  ;;  %v4447_v42 = vstv %s9836_s27  ;;  %v4450_v24 = vstv %s9834_s9  ;;  %s12127_s9 = smov 20   ;;  %s12129_s27 = smov 108  }
0x256f   :  { %v4423_v26 = vsel %vm12092_vm3, %v4419_v59, %v4398_v63  ;;  %v4424_v9 = vsel %vm12093_vm2, %v4420_v61, %v4402_v60  ;;  %v4425_v20 = vsel %vm12094_vm6, %v4421_v39, %v4406_v46  ;;  %v4426_v2 = vsel %vm12095_vm5, %v4422_v29, %v4410_v32  ;;  %vm12101_vm3 = vmmov %vm12093_vm2 }
0x2570   :  { %v6437_v45 = vcombine.low %v4423_v26, %v4425_v20  ;;  %v6438_v43 = vcombine.low %v4424_v9, %v4426_v2  ;;  %v4454_v50 = vstv %s9846_s11  ;;  %v4468_v0 = vstv %s9848_s3  ;;  %vm12102_vm6 = vmmov %vm12093_vm2  ;;  %s12130_s11 = smov 21   ;;  %s12131_s3 = smov 107  }
0x2571   :  { %v4482_v37 = vstv %s9854_s1  ;;  %v4497_v49 = vstv %s9862_s6  ;;  %v4500_v3 = vstv %s9856_s7  ;;  %v4504_v48 = vstv %s9864_s5  ;;  %s12133_s1 = smov 22   ;;  %s12135_s7 = smov 106  }
0x2572   :  { %v9927_v21 = vadd.f32 %v6437_v45, %v12096_v36  ;;  %v9930_v5 = vadd.f32 %v6438_v43, %v12098_v1  ;;  %v4518_v30 = vstv %s9872_s29  ;;  %v4532_v18 = vstv %s9874_s18  ;;  %s12136_s6 = smov 32   ;;  %s12137_s5 = smov 96  }
0x2573   :  { %v4547_v41 = vstv %s9880_s8  ;;  %v4550_v22 = vstv %s9878_s2  ;;  %v4554_v52 = vstv %s9886_s30  ;;  %v4568_v23 = vstv %s9888_s19  ;;  %s12138_s29 = smov 33   ;;  %s12140_s18 = smov 95  }
0x2574   :  { %12097 = vst [vmem:[#allocation39_spill] sm:$0xff] %v9927_v21  ;;  %12099 = vst [vmem:[#allocation37_spill] sm:$0xff] %v9930_v5  ;;  %v9940_v38 = vcombine.low %v9927_v21, %v9930_v5  ;;  %v9944_v6 = vcombine.high %v9927_v21, %v9930_v5  ;;  %v4582_v25 = vstv %s9892_s21  ;;  %v4597_v34 = vstv %s9894_s15  ;;  %s12141_s2 = smov 34   ;;  %s12142_s8 = smov 94  }
0x2575   :  { %v4600_v57 = vstv %s9900_s14  ;;  %v4604_v44 = vstv %s9902_s10  ;;  %v4618_v28 = vstv %s9908_s23  ;;  %v4632_v15 = vstv %s9910_s24  ;;  %s12144_s30 = smov 35   ;;  %s12146_s19 = smov 93  }
0x2576   :  { %v4448_v11 = vmul.f32 %v4447_v42, %v9940_v38  ;;  %v4449_v33 = vmul.f32 %v4447_v42, %v9944_v6  ;;  %v4455_v27 = vmul.f32 %v4454_v50, %v9940_v38  ;;  %v4456_v4 = vmul.f32 %v4454_v50, %v9944_v6  ;;  %s12147_s21 = smov 36   ;;  %s12149_s15 = smov 92  }
0x2577   :  { %v4469_v58 = vmul.f32 %v4468_v0, %v9940_v38  ;;  %v4470_v10 = vmul.f32 %v4468_v0, %v9944_v6  ;;  %v4483_v12 = vmul.f32 %v4482_v37, %v9940_v38  ;;  %v4484_v17 = vmul.f32 %v4482_v37, %v9944_v6  ;;  %s12151_s14 = smov 37   ;;  %s12156_s10 = smov 91  }
0x2578   :  { %v4451_v16 = vadd.f32 %v4450_v24, %v4448_v11  ;;  %v4452_v19 = vadd.f32 %v4450_v24, %v4449_v33  ;;  %v6442_v54 = vrot.slane %v4455_v27, 9  ;;  %v6443_v31 = vrot.slane %v4456_v4, 9  ;;  %s12157_s23 = smov 38   ;;  %s12161_s24 = smov 90  }
0x2579   :  { %v6445_v56 = vrot.slane %v4469_v58, 10  ;;  %v6446_v14 = vrot.slane %v4470_v10, 10  ;;  %v6448_v55 = vrot.slane %v4483_v12, 11  ;;  %v6449_v40 = vrot.slane %v4484_v17, 11 }
0x257a   :  { %v4465_v7 = vadd.f32 %v6442_v54, %v4451_v16  ;;  %v4466_v51 = vadd.f32 %v6443_v31, %v4452_v19  ;;  %v4498_v62 = vmul.f32 %v4497_v49, %v9940_v38  ;;  %v4499_v47 = vmul.f32 %v4497_v49, %v9944_v6 }
0x257b   :  { %v4505_v53 = vmul.f32 %v4504_v48, %v9940_v38  ;;  %v4506_v13 = vmul.f32 %v4504_v48, %v9944_v6  ;;  %v4519_v59 = vmul.f32 %v4518_v30, %v9940_v38  ;;  %v4520_v61 = vmul.f32 %v4518_v30, %v9944_v6 }
0x257c   :  { %v4479_v63 = vadd.f32 %v6445_v56, %v4465_v7  ;;  %v4480_v60 = vadd.f32 %v6446_v14, %v4466_v51  ;;  %v4501_v46 = vadd.f32 %v4500_v3, %v4498_v62  ;;  %v4502_v32 = vadd.f32 %v4500_v3, %v4499_v47 }
0x257d   :  { %v6453_v39 = vrot.slane %v4505_v53, 9  ;;  %v6454_v29 = vrot.slane %v4506_v13, 9  ;;  %v6456_v42 = vrot.slane %v4519_v59, 10  ;;  %v6457_v24 = vrot.slane %v4520_v61, 10 }
0x257e   :  { %v9966_v26 = vadd.f32 %v6448_v55, %v4479_v63  ;;  %v9968_v9 = vadd.f32 %v6449_v40, %v4480_v60  ;;  %v4533_v20 = vmul.f32 %v4532_v18, %v9940_v38  ;;  %v4534_v2 = vmul.f32 %v4532_v18, %v9944_v6 }
0x257f   :  { %v4515_v45 = vadd.f32 %v6453_v39, %v4501_v46  ;;  %v4516_v43 = vadd.f32 %v6454_v29, %v4502_v32  ;;  %v4548_v50 = vmul.f32 %v4547_v41, %v9940_v38  ;;  %v4549_v0 = vmul.f32 %v4547_v41, %v9944_v6 }
0x2580   :  { %v6459_v37 = vrot.slane %v4533_v20, 11  ;;  %v6460_v49 = vrot.slane %v4534_v2, 11  ;;  %v4555_v3 = vmul.f32 %v4554_v52, %v9940_v38  ;;  %v4556_v48 = vmul.f32 %v4554_v52, %v9944_v6 }
0x2581   :  { %v4529_v36 = vadd.f32 %v6456_v42, %v4515_v45  ;;  %v4530_v1 = vadd.f32 %v6457_v24, %v4516_v43  ;;  %v4551_v30 = vadd.f32 %v4550_v22, %v4548_v50  ;;  %v4552_v11 = vadd.f32 %v4550_v22, %v4549_v0 }
0x2582   :  { %v6464_v33 = vrot.slane %v4555_v3, 9  ;;  %v6465_v18 = vrot.slane %v4556_v48, 9  ;;  %v4569_v27 = vmul.f32 %v4568_v23, %v9940_v38  ;;  %v4570_v4 = vmul.f32 %v4568_v23, %v9944_v6 }
0x2583   :  { %v4543_v41 = vadd.f32 %v6459_v37, %v4529_v36  ;;  %v4544_v58 = vadd.f32 %v6460_v49, %v4530_v1  ;;  %v4583_v52 = vmul.f32 %v4582_v25, %v9940_v38  ;;  %v4584_v10 = vmul.f32 %v4582_v25, %v9944_v6 }
0x2584   :  { %v4565_v22 = vadd.f32 %v6464_v33, %v4551_v30  ;;  %v4566_v12 = vadd.f32 %v6465_v18, %v4552_v11  ;;  %v6467_v17 = vrot.slane %v4569_v27, 10  ;;  %v6468_v16 = vrot.slane %v4570_v4, 10 }
0x2585   :  { %v6470_v19 = vrot.slane %v4583_v52, 11  ;;  %v6471_v54 = vrot.slane %v4584_v10, 11  ;;  %v4598_v23 = vmul.f32 %v4597_v34, %v9940_v38  ;;  %v4599_v31 = vmul.f32 %v4597_v34, %v9944_v6 }
0x2586   :  { %v4579_v56 = vadd.f32 %v6467_v17, %v4565_v22  ;;  %v4580_v14 = vadd.f32 %v6468_v16, %v4566_v12  ;;  %v4605_v25 = vmul.f32 %v4604_v44, %v9940_v38  ;;  %v4606_v55 = vmul.f32 %v4604_v44, %v9944_v6  ;;  %v4772_v12 = vld [vmem:[#allocation9 + $0x10] sm:$0xff] }
0x2587   :  { %v4601_v40 = vadd.f32 %v4600_v57, %v4598_v23  ;;  %v4602_v7 = vadd.f32 %v4600_v57, %v4599_v31  ;;  %v4619_v51 = vmul.f32 %v4618_v28, %v9940_v38  ;;  %v4620_v62 = vmul.f32 %v4618_v28, %v9944_v6 }
0x2588   :  { %v4593_v34 = vadd.f32 %v6470_v19, %v4579_v56  ;;  %v4594_v47 = vadd.f32 %v6471_v54, %v4580_v14  ;;  %v6475_v53 = vrot.slane %v4605_v25, 9  ;;  %v6476_v13 = vrot.slane %v4606_v55, 9 }
0x2589   :  { %v6478_v59 = vrot.slane %v4619_v51, 10  ;;  %v6479_v61 = vrot.slane %v4620_v62, 10  ;;  %v4633_v63 = vmul.f32 %v4632_v15, %v9940_v38  ;;  %v4634_v44 = vmul.f32 %v4632_v15, %v9944_v6  ;;  %v4804_v51 = vld [vmem:[#allocation9 + $0x28] sm:$0xff] }
0x258a   :  { %v4615_v60 = vadd.f32 %v6475_v53, %v4601_v40  ;;  %v4616_v57 = vadd.f32 %v6476_v13, %v4602_v7  ;;  %v4654_v46 = vrot.slane %v9966_v26, %v12091_v8  ;;  %v4662_v28 = vrot.slane %v9968_v9, %v12091_v8  ;;  %v4803_v7 = vld [vmem:[#allocation9 + $0x20] sm:$0xff] }
0x258b   :  { %v6481_v32 = vrot.slane %v4633_v63, 11  ;;  %v6482_v39 = vrot.slane %v4634_v44, 11  ;;  %v4676_v29 = vrot.slane %v4543_v41, %v12091_v8  ;;  %v4684_v42 = vrot.slane %v4544_v58, %v12091_v8 }
0x258c   :  { %v4629_v24 = vadd.f32 %v6478_v59, %v4615_v60  ;;  %v4630_v20 = vadd.f32 %v6479_v61, %v4616_v57  ;;  %v4698_v38 = vrot.slane %v4593_v34, %v12091_v8  ;;  %v4706_v6 = vrot.slane %v4594_v47, %v12091_v8  ;;  %v4835_v60 = vld [vmem:[#allocation9 + $0x38] sm:$0xff]  ;;  %v4834_v57 = vld [vmem:[#allocation9 + $0x30] sm:$0xff] }
0x258d   :  { %v4734_v15 = vsel %vm399_vm0, %v4654_v46, %v4676_v29  ;;  %v4736_v2 = vsel %vm399_vm0, %v4662_v28, %v4684_v42  ;;  %v4650_v45 = vrot.slane %v9966_v26, %v12090_v35  ;;  %v4658_v43 = vrot.slane %v9968_v9, %v12090_v35 }
0x258e   :  { %v4643_v50 = vadd.f32 %v6481_v32, %v4629_v24  ;;  %v4644_v0 = vadd.f32 %v6482_v39, %v4630_v20  ;;  %v4738_v37 = vsel %vm404_vm1, %v4734_v15, %v4698_v38  ;;  %v4740_v49 = vsel %vm404_vm1, %v4736_v2, %v4706_v6  ;;  %v4865_v6 = vld [vmem:[#allocation9 + $0x40] sm:$0xff]  ;;  %v4866_v15 = vld [vmem:[#allocation9 + $0x48] sm:$0xff] }
0x258f   :  { %v4672_v3 = vrot.slane %v4543_v41, %v12090_v35  ;;  %v4680_v48 = vrot.slane %v4544_v58, %v12090_v35  ;;  %v4694_v36 = vrot.slane %v4593_v34, %v12090_v35  ;;  %v4702_v1 = vrot.slane %v4594_v47, %v12090_v35 }
0x2590   :  { %v4720_v30 = vrot.slane %v4643_v50, %v12091_v8  ;;  %v4728_v26 = vrot.slane %v4644_v0, %v12091_v8  ;;  %v4716_v9 = vrot.slane %v4643_v50, %v12090_v35  ;;  %v4724_v11 = vrot.slane %v4644_v0, %v12090_v35  ;;  %v4773_v35 = vld [vmem:[#allocation9 + $0x18] sm:$0xff] }
0x2591   :  { %v4733_v33 = vsel %vm399_vm0, %v4650_v45, %v4672_v3  ;;  %v4735_v18 = vsel %vm399_vm0, %v4658_v43, %v4680_v48  ;;  %vm12103_vm0 = vcmask 416768   ;;  %vm12105_vm5 = vcmask 7168  }
0x2592   :  { %v4742_v27 = vsel %vm12100_vm4, %v4738_v37, %v4720_v30  ;;  %v4744_v4 = vsel %vm12101_vm3, %v4740_v49, %v4728_v26  ;;  %v4737_v41 = vsel %vm404_vm1, %v4733_v33, %v4694_v36  ;;  %v4739_v58 = vsel %vm404_vm1, %v4735_v18, %v4702_v1  ;;  %vm12104_vm1 = vmmov %vm12103_vm0  ;;  %v4897_v36 = vld [vmem:[#allocation9 + $0x58] sm:$0xff]  ;;  %v4896_v1 = vld [vmem:[#allocation9 + $0x50] sm:$0xff] }
0x2593   :  { %v6484_v52 = vcombine.low %v4742_v27, %v4744_v4  ;;  %v4741_v10 = vsel %vm12093_vm2, %v4737_v41, %v4716_v9  ;;  %v4743_v8 = vsel %vm12102_vm6, %v4739_v58, %v4724_v11  ;;  %vm12106_vm4 = vmmov %vm12103_vm0  ;;  %vm12108_vm3 = vcmask 15360   ;;  %v4927_v58 = vld [vmem:[#allocation9 + $0x60] sm:$0xff] }
0x2594   :  { %v6483_v22 = vcombine.low %v4741_v10, %v4743_v8  ;;  %vm12109_vm2 = vcmask 23552   ;;  %vm12110_vm6 = vcmask 31744  }
0x2595   :  { %4755 = vrot.lane.b32.xlu1 %v6484_v52, %s11661_s22  ;;  %v4928_v52 = vld [vmem:[#allocation9 + $0x68] sm:$0xff] }
0x2596   :  { %4753 = vrot.lane.b32.xlu0 %v6483_v22, %s11661_s22 }
0x2599   :  { %4778 = vrot.lane.b32.xlu1 %v4773_v35, %s11664_s17 }
0x259a   :  { %4776 = vrot.lane.b32.xlu0 %v4772_v12, %s11664_s17  ;;  %s12112_s17 = smov 6  }
0x2607   :  { %v4756_v17 = vpop.permute.xlu1 %4755 }
0x2608   :  { %v4754_v16 = vpop.permute.xlu0 %4753  ;;  %v10055_v55 = vsel %vm12106_vm4, %v4756_v17, 0.0  ;;  %vm12120_vm4 = vcmask 138240  }
0x2609   :  { %v10045_v54 = vsel %vm12103_vm0, 0.0, %v4754_v16  ;;  %v10048_v31 = vsel %vm12104_vm1, %v4754_v16, %v4756_v17  ;;  %12107 = vst [vmem:[#allocation40_spill] sm:$0xff] %v10055_v55  ;;  %vm12111_vm0 = vcmask 39936   ;;  %vm12114_vm1 = vcmask 48128  }
0x260b   :  { %v4779_v19 = vpop.permute.xlu1 %4778 }
0x260c   :  { %v4777_v23 = vpop.permute.xlu0 %4776  ;;  %v4786_v40 = vmul.f32 %v4779_v19, %v10055_v55 }
0x260d   :  { %v4780_v56 = vsel %vm12105_vm5, %v4777_v23, %v4779_v19  ;;  %v4784_v14 = vmul.f32 %v4777_v23, %v10045_v54  ;;  %vm12116_vm5 = vcmask 130048  }
0x260e   :  { %v4785_v25 = vmul.f32 %v4780_v56, %v10048_v31  ;;  %v4959_v56 = vld [vmem:[#allocation9 + $0x78] sm:$0xff] }
0x260f   :  { %4790 = vrot.lane.b32.xlu0 %v4784_v14, %s11703_s12  ;;  %v4958_v14 = vld [vmem:[#allocation9 + $0x70] sm:$0xff] }
0x2610   :  { %4792 = vrot.lane.b32.xlu1 %v4785_v25, %s11703_s12 }
0x2613   :  { %4794 = vrot.lane.b32.xlu0 %v4786_v40, %s11703_s12  ;;  %s12119_s12 = smov 111  }
0x2614   :  { %4807 = vrot.lane.b32.xlu1 %v4803_v7, %s11668_s13 }
0x2617   :  { %4809 = vrot.lane.b32.xlu0 %v4804_v51, %s11668_s13  ;;  %s12113_s13 = smov 122  }
0x2681   :  { %v10062_v62 = vpop.permute.xlu0 %4790 }
0x2682   :  { %v10064_v34 = vpop.permute.xlu1 %4792 }
0x2685   :  { %v10066_v47 = vpop.permute.xlu0 %4794 }
0x2686   :  { %v4808_v53 = vpop.permute.xlu1 %4807 }
0x2687   :  { %v4815_v13 = vmul.f32 %v4808_v53, %v10045_v54 }
0x2689   :  { %v4810_v59 = vpop.permute.xlu0 %4809  ;;  %4821 = vrot.lane.b32.xlu1 %v4815_v13, %s11704_s0 }
0x268a   :  { %v4811_v61 = vsel %vm12108_vm3, %v4808_v53, %v4810_v59  ;;  %v4817_v63 = vmul.f32 %v4810_v59, %v10055_v55  ;;  %vm12122_vm3 = vcmask 146432  }
0x268b   :  { %v4816_v44 = vmul.f32 %v4811_v61, %v10048_v31 }
0x268d   :  { %4825 = vrot.lane.b32.xlu1 %v4817_v63, %s11704_s0  ;;  %4823 = vrot.lane.b32.xlu0 %v4816_v44, %s11704_s0  ;;  %v4989_v44 = vld [vmem:[#allocation9 + $0x80] sm:$0xff]  ;;  %s12121_s0 = smov 18  }
0x2691   :  { %4840 = vrot.lane.b32.xlu1 %v4835_v60, %s11674_s4  ;;  %4838 = vrot.lane.b32.xlu0 %v4834_v57, %s11674_s4  ;;  %s12115_s4 = smov 16   ;;  %v4990_v60 = vld [vmem:[#allocation9 + $0x88] sm:$0xff] }
0x26fb   :  { %v10077_v46 = vpop.permute.xlu1 %4821 }
0x26ff   :  { %v10079_v28 = vpop.permute.xlu1 %4825  ;;  %v10081_v32 = vpop.permute.xlu0 %4823 }
0x2703   :  { %v4841_v39 = vpop.permute.xlu1 %4840  ;;  %v4839_v29 = vpop.permute.xlu0 %4838 }
0x2704   :  { %v4842_v42 = vsel %vm12109_vm2, %v4839_v29, %v4841_v39  ;;  %v4846_v24 = vmul.f32 %v4839_v29, %v10045_v54  ;;  %v4848_v38 = vmul.f32 %v4841_v39, %v10055_v55  ;;  %vm12126_vm2 = vcmask 154624  }
0x2705   :  { %v4847_v20 = vmul.f32 %v4842_v42, %v10048_v31 }
0x2706   :  { %4852 = vrot.lane.b32.xlu0 %v4846_v24, %s11705_s16 }
0x2707   :  { %4854 = vrot.lane.b32.xlu1 %v4847_v20, %s11705_s16 }
0x270a   :  { %4856 = vrot.lane.b32.xlu0 %v4848_v38, %s11705_s16  ;;  %s12123_s16 = smov 110  }
0x270b   :  { %4869 = vrot.lane.b32.xlu1 %v4865_v6, %s11687_s25 }
0x270e   :  { %4871 = vrot.lane.b32.xlu0 %v4866_v15, %s11687_s25  ;;  %s12117_s25 = smov 112  }
0x2778   :  { %v10092_v2 = vpop.permute.xlu0 %4852 }
0x2779   :  { %v10094_v45 = vpop.permute.xlu1 %4854 }
0x277c   :  { %v10096_v43 = vpop.permute.xlu0 %4856 }
0x277d   :  { %v4870_v50 = vpop.permute.xlu1 %4869 }
0x277e   :  { %v4877_v0 = vmul.f32 %v4870_v50, %v10045_v54 }
0x2780   :  { %v4872_v37 = vpop.permute.xlu0 %4871  ;;  %4883 = vrot.lane.b32.xlu1 %v4877_v0, %s11707_s20  ;;  %v5020_v0 = vld [vmem:[#allocation9 + $0x90] sm:$0xff] }
0x2781   :  { %v4873_v49 = vsel %vm12110_vm6, %v4870_v50, %v4872_v37  ;;  %v4879_v3 = vmul.f32 %v4872_v37, %v10055_v55  ;;  %v5021_v50 = vld [vmem:[#allocation9 + $0x98] sm:$0xff]  ;;  %vm12128_vm6 = vcmask 162816  }
0x2782   :  { %v4878_v48 = vmul.f32 %v4873_v49, %v10048_v31 }
0x2784   :  { %4887 = vrot.lane.b32.xlu1 %v4879_v3, %s11707_s20  ;;  %4885 = vrot.lane.b32.xlu0 %v4878_v48, %s11707_s20  ;;  %s12124_s20 = smov 19  }
0x2788   :  { %4902 = vrot.lane.b32.xlu1 %v4897_v36, %s11696_s26  ;;  %4900 = vrot.lane.b32.xlu0 %v4896_v1, %s11696_s26  ;;  %s12118_s26 = smov 17  }
0x27f2   :  { %v10107_v30 = vpop.permute.xlu1 %4883 }
0x27f6   :  { %v10109_v26 = vpop.permute.xlu1 %4887  ;;  %v10111_v9 = vpop.permute.xlu0 %4885 }
0x27fa   :  { %v4903_v11 = vpop.permute.xlu1 %4902  ;;  %v4901_v33 = vpop.permute.xlu0 %4900 }
0x27fb   :  { %v4904_v18 = vsel %vm12111_vm0, %v4901_v33, %v4903_v11  ;;  %v4908_v27 = vmul.f32 %v4901_v33, %v10045_v54  ;;  %v4910_v41 = vmul.f32 %v4903_v11, %v10055_v55  ;;  %vm12132_vm0 = vcmask 171008  }
0x27fc   :  { %v4909_v4 = vmul.f32 %v4904_v18, %v10048_v31 }
0x27fd   :  { %4914 = vrot.lane.b32.xlu0 %v4908_v27, %s11709_s28  ;;  %v5051_v27 = vld [vmem:[#allocation9 + $0xa0] sm:$0xff] }
0x27fe   :  { %4916 = vrot.lane.b32.xlu1 %v4909_v4, %s11709_s28  ;;  %v5052_v4 = vld [vmem:[#allocation9 + $0xa8] sm:$0xff] }
0x2801   :  { %4918 = vrot.lane.b32.xlu0 %v4910_v41, %s11709_s28  ;;  %s12125_s28 = smov 109  }
0x2802   :  { %4931 = vrot.lane.b32.xlu1 %v4927_v58, %s12112_s17 }
0x2805   :  { %4933 = vrot.lane.b32.xlu0 %v4928_v52, %s12112_s17  ;;  %s12163_s17 = smov 48  }
0x286f   :  { %v10122_v10 = vpop.permute.xlu0 %4914 }
0x2870   :  { %v10124_v8 = vpop.permute.xlu1 %4916 }
0x2873   :  { %v10126_v22 = vpop.permute.xlu0 %4918 }
0x2874   :  { %v4932_v35 = vpop.permute.xlu1 %4931 }
0x2875   :  { %v4939_v12 = vmul.f32 %v4932_v35, %v10045_v54 }
0x2877   :  { %v4934_v17 = vpop.permute.xlu0 %4933  ;;  %4945 = vrot.lane.b32.xlu1 %v4939_v12, %s12113_s13 }
0x2878   :  { %v4935_v16 = vsel %vm12114_vm1, %v4932_v35, %v4934_v17  ;;  %v4941_v19 = vmul.f32 %v4934_v17, %v10055_v55  ;;  %vm12134_vm1 = vcmask 179200  }
0x2879   :  { %v4940_v23 = vmul.f32 %v4935_v16, %v10048_v31 }
0x287b   :  { %4949 = vrot.lane.b32.xlu1 %v4941_v19, %s12113_s13  ;;  %4947 = vrot.lane.b32.xlu0 %v4940_v23, %s12113_s13  ;;  %s12167_s13 = smov 80  }
0x287f   :  { %4964 = vrot.lane.b32.xlu1 %v4959_v56, %s12115_s4  ;;  %4962 = vrot.lane.b32.xlu0 %v4958_v14, %s12115_s4  ;;  %v5083_v56 = vld [vmem:[#allocation9 + $0xb8] sm:$0xff]  ;;  %v5082_v14 = vld [vmem:[#allocation9 + $0xb0] sm:$0xff]  ;;  %s12168_s4 = smov 49  }
0x28e9   :  { %v10137_v25 = vpop.permute.xlu1 %4945 }
0x28ed   :  { %v10139_v40 = vpop.permute.xlu1 %4949  ;;  %v10141_v7 = vpop.permute.xlu0 %4947 }
0x28f1   :  { %v4965_v51 = vpop.permute.xlu1 %4964  ;;  %v4963_v53 = vpop.permute.xlu0 %4962 }
0x28f2   :  { %v4966_v13 = vsel %vm12116_vm5, %v4963_v53, %v4965_v51  ;;  %v4970_v59 = vmul.f32 %v4963_v53, %v10045_v54  ;;  %v4972_v63 = vmul.f32 %v4965_v51, %v10055_v55  ;;  %vm12139_vm5 = vcmask 269312  }
0x28f3   :  { %v4971_v61 = vmul.f32 %v4966_v13, %v10048_v31 }
0x28f4   :  { %4976 = vrot.lane.b32.xlu0 %v4970_v59, %s12117_s25 }
0x28f5   :  { %4978 = vrot.lane.b32.xlu1 %v4971_v61, %s12117_s25 }
0x28f8   :  { %4980 = vrot.lane.b32.xlu0 %v4972_v63, %s12117_s25  ;;  %s12172_s25 = smov 79  }
0x28f9   :  { %4993 = vrot.lane.b32.xlu1 %v4989_v44, %s12118_s26 }
0x28fc   :  { %4995 = vrot.lane.b32.xlu0 %v4990_v60, %s12118_s26  ;;  %s12174_s26 = smov 50  }
0x2966   :  { %v10152_v57 = vpop.permute.xlu0 %4976 }
0x2967   :  { %v10154_v39 = vpop.permute.xlu1 %4978 }
0x296a   :  { %v10156_v29 = vpop.permute.xlu0 %4980 }
0x296b   :  { %v4994_v42 = vpop.permute.xlu1 %4993 }
0x296c   :  { %v5001_v24 = vmul.f32 %v4994_v42, %v10045_v54 }
0x296e   :  { %v4996_v20 = vpop.permute.xlu0 %4995  ;;  %5007 = vrot.lane.b32.xlu1 %v5001_v24, %s12119_s12  ;;  %v5113_v24 = vld [vmem:[#allocation9 + $0xc0] sm:$0xff] }
0x296f   :  { %v4997_v38 = vsel %vm12120_vm4, %v4994_v42, %v4996_v20  ;;  %v5003_v6 = vmul.f32 %v4996_v20, %v10055_v55  ;;  %v5114_v20 = vld [vmem:[#allocation9 + $0xc8] sm:$0xff]  ;;  %vm12143_vm4 = vcmask 277504  }
0x2970   :  { %v5002_v15 = vmul.f32 %v4997_v38, %v10048_v31 }
0x2972   :  { %5011 = vrot.lane.b32.xlu1 %v5003_v6, %s12119_s12  ;;  %5009 = vrot.lane.b32.xlu0 %v5002_v15, %s12119_s12  ;;  %s12179_s12 = smov 78  }
0x2976   :  { %5026 = vrot.lane.b32.xlu1 %v5021_v50, %s12121_s0  ;;  %5024 = vrot.lane.b32.xlu0 %v5020_v0, %s12121_s0  ;;  %s12183_s0 = smov 77  }
0x29e0   :  { %v10167_v37 = vpop.permute.xlu1 %5007 }
0x29e4   :  { %v10169_v49 = vpop.permute.xlu1 %5011  ;;  %v10171_v3 = vpop.permute.xlu0 %5009 }
0x29e8   :  { %v5027_v48 = vpop.permute.xlu1 %5026  ;;  %v5025_v36 = vpop.permute.xlu0 %5024 }
0x29e9   :  { %v5028_v1 = vsel %vm12122_vm3, %v5025_v36, %v5027_v48  ;;  %v5032_v11 = vmul.f32 %v5025_v36, %v10045_v54  ;;  %v5034_v18 = vmul.f32 %v5027_v48, %v10055_v55  ;;  %vm12145_vm3 = vcmask 285696  }
0x29ea   :  { %v5033_v33 = vmul.f32 %v5028_v1, %v10048_v31 }
0x29eb   :  { %5038 = vrot.lane.b32.xlu0 %v5032_v11, %s12123_s16 }
0x29ec   :  { %5040 = vrot.lane.b32.xlu1 %v5033_v33, %s12123_s16  ;;  %v5145_v33 = vld [vmem:[#allocation9 + $0xd8] sm:$0xff] }
0x29ef   :  { %5042 = vrot.lane.b32.xlu0 %v5034_v18, %s12123_s16  ;;  %v5144_v18 = vld [vmem:[#allocation9 + $0xd0] sm:$0xff]  ;;  %s12190_s16 = smov 76  }
0x29f0   :  { %5055 = vrot.lane.b32.xlu1 %v5051_v27, %s12124_s20 }
0x29f3   :  { %5057 = vrot.lane.b32.xlu0 %v5052_v4, %s12124_s20  ;;  %s12191_s20 = smov 53  }
0x2a5d   :  { %v10182_v41 = vpop.permute.xlu0 %5038 }
0x2a5e   :  { %v10184_v58 = vpop.permute.xlu1 %5040 }
0x2a61   :  { %v10186_v52 = vpop.permute.xlu0 %5042 }
0x2a62   :  { %v5056_v35 = vpop.permute.xlu1 %5055 }
0x2a63   :  { %v5063_v12 = vmul.f32 %v5056_v35, %v10045_v54 }
0x2a65   :  { %v5058_v17 = vpop.permute.xlu0 %5057  ;;  %5069 = vrot.lane.b32.xlu1 %v5063_v12, %s12125_s28 }
0x2a66   :  { %v5059_v16 = vsel %vm12126_vm2, %v5056_v35, %v5058_v17  ;;  %v5065_v19 = vmul.f32 %v5058_v17, %v10055_v55  ;;  %vm12150_vm2 = vcmask 293888  }
0x2a67   :  { %v5064_v23 = vmul.f32 %v5059_v16, %v10048_v31 }
0x2a69   :  { %5073 = vrot.lane.b32.xlu1 %v5065_v19, %s12125_s28  ;;  %5071 = vrot.lane.b32.xlu0 %v5064_v23, %s12125_s28  ;;  %s12195_s28 = smov 75  }
0x2a6d   :  { %5088 = vrot.lane.b32.xlu1 %v5083_v56, %s12127_s9  ;;  %5086 = vrot.lane.b32.xlu0 %v5082_v14, %s12127_s9  ;;  %v5175_v14 = vld [vmem:[#allocation9 + $0xe0] sm:$0xff]  ;;  %s12197_s9 = smov 54  }
0x2ad7   :  { %v10197_v51 = vpop.permute.xlu1 %5069 }
0x2adb   :  { %v10199_v53 = vpop.permute.xlu1 %5073  ;;  %v10201_v13 = vpop.permute.xlu0 %5071 }
0x2adf   :  { %v5089_v59 = vpop.permute.xlu1 %5088  ;;  %v5087_v61 = vpop.permute.xlu0 %5086 }
0x2ae0   :  { %v5090_v63 = vsel %vm12128_vm6, %v5087_v61, %v5089_v59  ;;  %v5094_v44 = vmul.f32 %v5087_v61, %v10045_v54  ;;  %v5096_v42 = vmul.f32 %v5089_v59, %v10055_v55  ;;  %v5176_v59 = vld [vmem:[#allocation9 + $0xe8] sm:$0xff]  ;;  %vm12155_vm6 = vcmask 302080  }
0x2ae1   :  { %v5095_v60 = vmul.f32 %v5090_v63, %v10048_v31 }
0x2ae2   :  { %5100 = vrot.lane.b32.xlu0 %v5094_v44, %s12129_s27 }
0x2ae3   :  { %5102 = vrot.lane.b32.xlu1 %v5095_v60, %s12129_s27 }
0x2ae6   :  { %5104 = vrot.lane.b32.xlu0 %v5096_v42, %s12129_s27  ;;  %s12202_s27 = smov 74  }
0x2ae7   :  { %5117 = vrot.lane.b32.xlu1 %v5113_v24, %s12130_s11 }
0x2aea   :  { %5119 = vrot.lane.b32.xlu0 %v5114_v20, %s12130_s11  ;;  %s12203_s11 = smov 64  }
0x2b54   :  { %v10212_v38 = vpop.permute.xlu0 %5100 }
0x2b55   :  { %v10214_v6 = vpop.permute.xlu1 %5102 }
0x2b58   :  { %v10216_v15 = vpop.permute.xlu0 %5104 }
0x2b59   :  { %v5118_v50 = vpop.permute.xlu1 %5117 }
0x2b5a   :  { %v5125_v0 = vmul.f32 %v5118_v50, %v10045_v54 }
0x2b5c   :  { %v5120_v48 = vpop.permute.xlu0 %5119  ;;  %5131 = vrot.lane.b32.xlu1 %v5125_v0, %s12131_s3 }
0x2b5d   :  { %v5121_v36 = vsel %vm12132_vm0, %v5118_v50, %v5120_v48  ;;  %v5127_v1 = vmul.f32 %v5120_v48, %v10055_v55  ;;  %v5207_v48 = vld [vmem:[#allocation9 + $0xf8] sm:$0xff]  ;;  %vm12162_vm0 = vcmask 310272  }
0x2b5e   :  { %v5126_v11 = vmul.f32 %v5121_v36, %v10048_v31  ;;  %v5206_v36 = vld [vmem:[#allocation9 + $0xf0] sm:$0xff] }
0x2b60   :  { %5135 = vrot.lane.b32.xlu1 %v5127_v1, %s12131_s3  ;;  %5133 = vrot.lane.b32.xlu0 %v5126_v11, %s12131_s3  ;;  %s12207_s3 = smov 65  }
0x2b64   :  { %5150 = vrot.lane.b32.xlu1 %v5145_v33, %s12133_s1  ;;  %5148 = vrot.lane.b32.xlu0 %v5144_v18, %s12133_s1  ;;  %s12212_s1 = smov 63  }
0x2bce   :  { %v10227_v27 = vpop.permute.xlu1 %5131 }
0x2bd2   :  { %v10229_v4 = vpop.permute.xlu1 %5135  ;;  %v10231_v35 = vpop.permute.xlu0 %5133 }
0x2bd6   :  { %v5151_v12 = vpop.permute.xlu1 %5150  ;;  %v5149_v17 = vpop.permute.xlu0 %5148 }
0x2bd7   :  { %v5152_v16 = vsel %vm12134_vm1, %v5149_v17, %v5151_v12  ;;  %v5156_v19 = vmul.f32 %v5149_v17, %v10045_v54  ;;  %v5158_v56 = vmul.f32 %v5151_v12, %v10055_v55  ;;  %vm12173_vm1 = vcmask 400384  }
0x2bd8   :  { %v5157_v23 = vmul.f32 %v5152_v16, %v10048_v31 }
0x2bd9   :  { %5162 = vrot.lane.b32.xlu0 %v5156_v19, %s12135_s7 }
0x2bda   :  { %5164 = vrot.lane.b32.xlu1 %v5157_v23, %s12135_s7 }
0x2bdd   :  { %5166 = vrot.lane.b32.xlu0 %v5158_v56, %s12135_s7  ;;  %v5237_v56 = vld [vmem:[#allocation9 + $0x100] sm:$0xff]  ;;  %s12213_s7 = smov 66  }
0x2bde   :  { %5179 = vrot.lane.b32.xlu1 %v5175_v14, %s12136_s6  ;;  %v5238_v14 = vld [vmem:[#allocation9 + $0x108] sm:$0xff] }
0x2be1   :  { %5181 = vrot.lane.b32.xlu0 %v5176_v59, %s12136_s6 }
0x2c4b   :  { %v10242_v61 = vpop.permute.xlu0 %5162 }
0x2c4c   :  { %v10244_v63 = vpop.permute.xlu1 %5164 }
0x2c4f   :  { %v10246_v44 = vpop.permute.xlu0 %5166 }
0x2c50   :  { %v5180_v60 = vpop.permute.xlu1 %5179 }
0x2c51   :  { %v5187_v42 = vmul.f32 %v5180_v60, %v10045_v54 }
0x2c53   :  { %v5182_v24 = vpop.permute.xlu0 %5181  ;;  %5193 = vrot.lane.b32.xlu1 %v5187_v42, %s12137_s5 }
0x2c54   :  { %v5183_v20 = vsel %vm879_vm14, %v5180_v60, %v5182_v24  ;;  %v5189_v50 = vmul.f32 %v5182_v24, %v10055_v55 }
0x2c55   :  { %v5188_v0 = vmul.f32 %v5183_v20, %v10048_v31 }
0x2c57   :  { %5197 = vrot.lane.b32.xlu1 %v5189_v50, %s12137_s5  ;;  %5195 = vrot.lane.b32.xlu0 %v5188_v0, %s12137_s5 }
0x2c5b   :  { %5212 = vrot.lane.b32.xlu1 %v5207_v48, %s12138_s29  ;;  %5210 = vrot.lane.b32.xlu0 %v5206_v36, %s12138_s29  ;;  %s12218_s29 = smov 62  }
0x2cc5   :  { %v10257_v1 = vpop.permute.xlu1 %5193 }
0x2cc9   :  { %v10259_v11 = vpop.permute.xlu1 %5197  ;;  %v10261_v33 = vpop.permute.xlu0 %5195 }
0x2ccd   :  { %v5213_v18 = vpop.permute.xlu1 %5212  ;;  %v5211_v12 = vpop.permute.xlu0 %5210 }
0x2cce   :  { %v5214_v17 = vsel %vm12139_vm5, %v5211_v12, %v5213_v18  ;;  %v5218_v16 = vmul.f32 %v5211_v12, %v10045_v54  ;;  %v5220_v23 = vmul.f32 %v5213_v18, %v10055_v55  ;;  %v5269_v18 = vld [vmem:[#allocation9 + $0x118] sm:$0xff]  ;;  %v5268_v12 = vld [vmem:[#allocation9 + $0x110] sm:$0xff]  ;;  %vm12178_vm5 = vcmask 408576  }
0x2ccf   :  { %v5219_v19 = vmul.f32 %v5214_v17, %v10048_v31 }
0x2cd0   :  { %5224 = vrot.lane.b32.xlu0 %v5218_v16, %s12140_s18 }
0x2cd1   :  { %5226 = vrot.lane.b32.xlu1 %v5219_v19, %s12140_s18 }
0x2cd4   :  { %5228 = vrot.lane.b32.xlu0 %v5220_v23, %s12140_s18  ;;  %s12220_s18 = smov 67  }
0x2cd5   :  { %5241 = vrot.lane.b32.xlu1 %v5237_v56, %s12141_s2 }
0x2cd8   :  { %5243 = vrot.lane.b32.xlu0 %v5238_v14, %s12141_s2  ;;  %s12310_s2 = smov 61  }
0x2d42   :  { %v10272_v59 = vpop.permute.xlu0 %5224 }
0x2d43   :  { %v10274_v60 = vpop.permute.xlu1 %5226 }
0x2d46   :  { %v10276_v42 = vpop.permute.xlu0 %5228 }
0x2d47   :  { %v5242_v24 = vpop.permute.xlu1 %5241 }
0x2d48   :  { %v5249_v20 = vmul.f32 %v5242_v24, %v10045_v54 }
0x2d4a   :  { %v5244_v50 = vpop.permute.xlu0 %5243  ;;  %5255 = vrot.lane.b32.xlu1 %v5249_v20, %s12142_s8 }
0x2d4b   :  { %v5245_v0 = vsel %vm12143_vm4, %v5242_v24, %v5244_v50  ;;  %v5251_v48 = vmul.f32 %v5244_v50, %v10055_v55  ;;  %vm12184_vm4 = vcmask 416768  }
0x2d4c   :  { %v5250_v36 = vmul.f32 %v5245_v0, %v10048_v31  ;;  %v5299_v0 = vld [vmem:[#allocation9 + $0x120] sm:$0xff] }
0x2d4e   :  { %5259 = vrot.lane.b32.xlu1 %v5251_v48, %s12142_s8  ;;  %5257 = vrot.lane.b32.xlu0 %v5250_v36, %s12142_s8  ;;  %v5300_v48 = vld [vmem:[#allocation9 + $0x128] sm:$0xff]  ;;  %s12312_s8 = smov 68  }
0x2d52   :  { %5274 = vrot.lane.b32.xlu1 %v5269_v18, %s12144_s30  ;;  %5272 = vrot.lane.b32.xlu0 %v5268_v12, %s12144_s30  ;;  %s12315_s30 = smov 60  }
0x2dbc   :  { %v10287_v17 = vpop.permute.xlu1 %5255 }
0x2dc0   :  { %v10289_v16 = vpop.permute.xlu1 %5259  ;;  %v10291_v19 = vpop.permute.xlu0 %5257 }
0x2dc4   :  { %v5275_v23 = vpop.permute.xlu1 %5274  ;;  %v5273_v56 = vpop.permute.xlu0 %5272 }
0x2dc5   :  { %v5276_v14 = vsel %vm12145_vm3, %v5273_v56, %v5275_v23  ;;  %v5280_v24 = vmul.f32 %v5273_v56, %v10045_v54  ;;  %v5282_v50 = vmul.f32 %v5275_v23, %v10055_v55  ;;  %vm12189_vm3 = vcmask 424960  }
0x2dc6   :  { %v5281_v20 = vmul.f32 %v5276_v14, %v10048_v31 }
0x2dc7   :  { %5286 = vrot.lane.b32.xlu0 %v5280_v24, %s12146_s19 }
0x2dc8   :  { %5288 = vrot.lane.b32.xlu1 %v5281_v20, %s12146_s19 }
0x2dcb   :  { %5290 = vrot.lane.b32.xlu0 %v5282_v50, %s12146_s19  ;;  %s12317_s19 = smov 69  }
0x2dcc   :  { %5303 = vrot.lane.b32.xlu1 %v5299_v0, %s12147_s21  ;;  %v5331_v0 = vld [vmem:[#allocation9 + $0x138] sm:$0xff] }
0x2dcf   :  { %5305 = vrot.lane.b32.xlu0 %v5300_v48, %s12147_s21  ;;  %v5330_v48 = vld [vmem:[#allocation9 + $0x130] sm:$0xff]  ;;  %s12321_s21 = smov 59  }
0x2e39   :  { %v10302_v36 = vpop.permute.xlu0 %5286 }
0x2e3a   :  { %v10304_v18 = vpop.permute.xlu1 %5288 }
0x2e3d   :  { %v10306_v12 = vpop.permute.xlu0 %5290 }
0x2e3e   :  { %12148 = vst [vmem:[#allocation44_spill] sm:$0xff] %v10306_v12  ;;  %v5304_v56 = vpop.permute.xlu1 %5303 }
0x2e3f   :  { %v5311_v14 = vmul.f32 %v5304_v56, %v10045_v54 }
0x2e41   :  { %v5306_v24 = vpop.permute.xlu0 %5305  ;;  %5317 = vrot.lane.b32.xlu1 %v5311_v14, %s12149_s15 }
0x2e42   :  { %v5307_v23 = vsel %vm12150_vm2, %v5304_v56, %v5306_v24  ;;  %v5313_v20 = vmul.f32 %v5306_v24, %v10055_v55  ;;  %vm12196_vm2 = vcmask 433152  }
0x2e43   :  { %v5312_v50 = vmul.f32 %v5307_v23, %v10048_v31 }
0x2e45   :  { %5321 = vrot.lane.b32.xlu1 %v5313_v20, %s12149_s15  ;;  %5319 = vrot.lane.b32.xlu0 %v5312_v50, %s12149_s15  ;;  %s12322_s15 = smov 70  }
0x2e49   :  { %5336 = vrot.lane.b32.xlu1 %v5331_v0, %s12151_s14  ;;  %5334 = vrot.lane.b32.xlu0 %v5330_v48, %s12151_s14  ;;  %v5361_v48 = vld [vmem:[#allocation9 + $0x140] sm:$0xff]  ;;  %s12323_s14 = smov 81  }
0x2eb3   :  { %v10317_v5 = vpop.permute.xlu1 %5317 }
0x2eb4   :  { %12152 = vst [vmem:[#allocation41_spill] sm:$0xff] %v10317_v5 }
0x2eb7   :  { %v10319_v21 = vpop.permute.xlu1 %5321  ;;  %v10321_v14 = vpop.permute.xlu0 %5319 }
0x2eb8   :  { %12153 = vst [vmem:[#allocation42_spill] sm:$0xff] %v10319_v21  ;;  %12154 = vst [vmem:[#allocation45_spill] sm:$0xff] %v10321_v14  ;;  %v5362_v21 = vld [vmem:[#allocation9 + $0x148] sm:$0xff] }
0x2ebb   :  { %v5337_v56 = vpop.permute.xlu1 %5336  ;;  %v5335_v24 = vpop.permute.xlu0 %5334 }
0x2ebc   :  { %v5338_v23 = vsel %vm12155_vm6, %v5335_v24, %v5337_v56  ;;  %v5342_v20 = vmul.f32 %v5335_v24, %v10045_v54  ;;  %v5344_v0 = vmul.f32 %v5337_v56, %v10055_v55  ;;  %vm12201_vm6 = vcmask 441344  }
0x2ebd   :  { %v5343_v50 = vmul.f32 %v5338_v23, %v10048_v31 }
0x2ebe   :  { %5348 = vrot.lane.b32.xlu0 %v5342_v20, %s12156_s10 }
0x2ebf   :  { %5350 = vrot.lane.b32.xlu1 %v5343_v50, %s12156_s10 }
0x2ec2   :  { %5352 = vrot.lane.b32.xlu0 %v5344_v0, %s12156_s10  ;;  %s12324_s10 = smov 82  }
0x2ec3   :  { %5365 = vrot.lane.b32.xlu1 %v5361_v48, %s12157_s23 }
0x2ec6   :  { %5367 = vrot.lane.b32.xlu0 %v5362_v21, %s12157_s23  ;;  %v5393_v21 = vld [vmem:[#allocation9 + $0x158] sm:$0xff]  ;;  %s12325_s23 = smov 83  }
0x2f30   :  { %v10332_v5 = vpop.permute.xlu0 %5348 }
0x2f31   :  { %12158 = vst [vmem:[#allocation43_spill] sm:$0xff] %v10332_v5  ;;  %v10334_v14 = vpop.permute.xlu1 %5350  ;;  %v5392_v5 = vld [vmem:[#allocation9 + $0x150] sm:$0xff] }
0x2f32   :  { %12159 = vst [vmem:[#allocation46_spill] sm:$0xff] %v10334_v14 }
0x2f34   :  { %v10336_v24 = vpop.permute.xlu0 %5352 }
0x2f35   :  { %12160 = vst [vmem:[#allocation50_spill] sm:$0xff] %v10336_v24  ;;  %v5366_v23 = vpop.permute.xlu1 %5365 }
0x2f36   :  { %v5373_v20 = vmul.f32 %v5366_v23, %v10045_v54 }
0x2f38   :  { %v5368_v50 = vpop.permute.xlu0 %5367  ;;  %5379 = vrot.lane.b32.xlu1 %v5373_v20, %s12161_s24 }
0x2f39   :  { %v5369_v56 = vsel %vm12162_vm0, %v5366_v23, %v5368_v50  ;;  %v5375_v0 = vmul.f32 %v5368_v50, %v10055_v55  ;;  %vm12211_vm0 = vcmask 531456  }
0x2f3a   :  { %v5374_v48 = vmul.f32 %v5369_v56, %v10048_v31 }
0x2f3c   :  { %5383 = vrot.lane.b32.xlu1 %v5375_v0, %s12161_s24  ;;  %5381 = vrot.lane.b32.xlu0 %v5374_v48, %s12161_s24  ;;  %s12326_s24 = smov 84  }
0x2f40   :  { %5398 = vrot.lane.b32.xlu1 %v5393_v21, %s12163_s17  ;;  %5396 = vrot.lane.b32.xlu0 %v5392_v5, %s12163_s17  ;;  %v5423_v21 = vld [vmem:[#allocation9 + $0x160] sm:$0xff] }
0x2faa   :  { %v10347_v24 = vpop.permute.xlu1 %5379 }
0x2fab   :  { %12164 = vst [vmem:[#allocation47_spill] sm:$0xff] %v10347_v24 }
0x2fae   :  { %v10349_v14 = vpop.permute.xlu1 %5383  ;;  %v10351_v20 = vpop.permute.xlu0 %5381 }
0x2faf   :  { %12165 = vst [vmem:[#allocation48_spill] sm:$0xff] %v10349_v14  ;;  %12166 = vst [vmem:[#allocation51_spill] sm:$0xff] %v10351_v20  ;;  %v5424_v14 = vld [vmem:[#allocation9 + $0x168] sm:$0xff] }
0x2fb2   :  { %v5399_v23 = vpop.permute.xlu1 %5398  ;;  %v5397_v50 = vpop.permute.xlu0 %5396 }
0x2fb3   :  { %v5400_v56 = vsel %vm1110_vm13, %v5397_v50, %v5399_v23  ;;  %v5404_v0 = vmul.f32 %v5397_v50, %v10045_v54  ;;  %v5406_v5 = vmul.f32 %v5399_v23, %v10055_v55 }
0x2fb4   :  { %v5405_v48 = vmul.f32 %v5400_v56, %v10048_v31 }
0x2fb5   :  { %5410 = vrot.lane.b32.xlu0 %v5404_v0, %s12167_s13 }
0x2fb6   :  { %5412 = vrot.lane.b32.xlu1 %v5405_v48, %s12167_s13 }
0x2fb9   :  { %5414 = vrot.lane.b32.xlu0 %v5406_v5, %s12167_s13 }
0x2fba   :  { %5427 = vrot.lane.b32.xlu1 %v5423_v21, %s12168_s4 }
0x2fbd   :  { %5429 = vrot.lane.b32.xlu0 %v5424_v14, %s12168_s4  ;;  %v5455_v14 = vld [vmem:[#allocation9 + $0x178] sm:$0xff]  ;;  %s12328_s4 = smov 86  }
0x3027   :  { %v10362_v24 = vpop.permute.xlu0 %5410 }
0x3028   :  { %12169 = vst [vmem:[#allocation49_spill] sm:$0xff] %v10362_v24  ;;  %v10364_v20 = vpop.permute.xlu1 %5412  ;;  %v5454_v24 = vld [vmem:[#allocation9 + $0x170] sm:$0xff] }
0x3029   :  { %12170 = vst [vmem:[#allocation52_spill] sm:$0xff] %v10364_v20 }
0x302b   :  { %v10366_v50 = vpop.permute.xlu0 %5414 }
0x302c   :  { %12171 = vst [vmem:[#allocation56_spill] sm:$0xff] %v10366_v50  ;;  %v5428_v56 = vpop.permute.xlu1 %5427 }
0x302d   :  { %v5435_v0 = vmul.f32 %v5428_v56, %v10045_v54 }
0x302f   :  { %v5430_v48 = vpop.permute.xlu0 %5429  ;;  %5441 = vrot.lane.b32.xlu1 %v5435_v0, %s12172_s25 }
0x3030   :  { %v5431_v23 = vsel %vm12173_vm1, %v5428_v56, %v5430_v48  ;;  %v5437_v5 = vmul.f32 %v5430_v48, %v10055_v55  ;;  %vm12214_vm1 = vcmask 515072  }
0x3031   :  { %v5436_v21 = vmul.f32 %v5431_v23, %v10048_v31 }
0x3033   :  { %5445 = vrot.lane.b32.xlu1 %v5437_v5, %s12172_s25  ;;  %5443 = vrot.lane.b32.xlu0 %v5436_v21, %s12172_s25  ;;  %s12329_s25 = smov 97  }
0x3037   :  { %5460 = vrot.lane.b32.xlu1 %v5455_v14, %s12174_s26  ;;  %5458 = vrot.lane.b32.xlu0 %v5454_v24, %s12174_s26  ;;  %v5485_v14 = vld [vmem:[#allocation9 + $0x180] sm:$0xff]  ;;  %s12330_s26 = smov 98  }
0x30a1   :  { %v10377_v50 = vpop.permute.xlu1 %5441 }
0x30a2   :  { %12175 = vst [vmem:[#allocation53_spill] sm:$0xff] %v10377_v50 }
0x30a5   :  { %v10379_v20 = vpop.permute.xlu1 %5445  ;;  %v10381_v0 = vpop.permute.xlu0 %5443 }
0x30a6   :  { %12176 = vst [vmem:[#allocation54_spill] sm:$0xff] %v10379_v20  ;;  %12177 = vst [vmem:[#allocation57_spill] sm:$0xff] %v10381_v0  ;;  %v5486_v20 = vld [vmem:[#allocation9 + $0x188] sm:$0xff] }
0x30a9   :  { %v5461_v56 = vpop.permute.xlu1 %5460  ;;  %v5459_v48 = vpop.permute.xlu0 %5458 }
0x30aa   :  { %v5462_v23 = vsel %vm12178_vm5, %v5459_v48, %v5461_v56  ;;  %v5466_v5 = vmul.f32 %v5459_v48, %v10045_v54  ;;  %v5468_v24 = vmul.f32 %v5461_v56, %v10055_v55  ;;  %vm12216_vm5 = vmmov %vm12214_vm1 }
0x30ab   :  { %v5467_v21 = vmul.f32 %v5462_v23, %v10048_v31 }
0x30ac   :  { %5472 = vrot.lane.b32.xlu0 %v5466_v5, %s12179_s12 }
0x30ad   :  { %5474 = vrot.lane.b32.xlu1 %v5467_v21, %s12179_s12 }
0x30b0   :  { %5476 = vrot.lane.b32.xlu0 %v5468_v24, %s12179_s12  ;;  %s12331_s12 = smov 99  }
0x30b1   :  { %5489 = vrot.lane.b32.xlu1 %v5485_v14, %s11661_s22 }
0x30b4   :  { %5491 = vrot.lane.b32.xlu0 %v5486_v20, %s11661_s22  ;;  %v5517_v20 = vld [vmem:[#allocation9 + $0x198] sm:$0xff]  ;;  %s12185_s22 = smov 52  }
0x311e   :  { %v10392_v50 = vpop.permute.xlu0 %5472 }
0x311f   :  { %12180 = vst [vmem:[#allocation55_spill] sm:$0xff] %v10392_v50  ;;  %v10394_v0 = vpop.permute.xlu1 %5474  ;;  %v5516_v50 = vld [vmem:[#allocation9 + $0x190] sm:$0xff] }
0x3120   :  { %12181 = vst [vmem:[#allocation58_spill] sm:$0xff] %v10394_v0 }
0x3122   :  { %v10396_v48 = vpop.permute.xlu0 %5476 }
0x3123   :  { %12182 = vst [vmem:[#allocation62_spill] sm:$0xff] %v10396_v48  ;;  %v5490_v23 = vpop.permute.xlu1 %5489 }
0x3124   :  { %v5497_v5 = vmul.f32 %v5490_v23, %v10045_v54 }
0x3126   :  { %v5492_v21 = vpop.permute.xlu0 %5491  ;;  %5503 = vrot.lane.b32.xlu1 %v5497_v5, %s12183_s0 }
0x3127   :  { %v5493_v56 = vsel %vm12184_vm4, %v5490_v23, %v5492_v21  ;;  %v5499_v24 = vmul.f32 %v5492_v21, %v10055_v55  ;;  %vm12219_vm4 = vcmask 539648  }
0x3128   :  { %v5498_v14 = vmul.f32 %v5493_v56, %v10048_v31 }
0x312a   :  { %5507 = vrot.lane.b32.xlu1 %v5499_v24, %s12183_s0  ;;  %5505 = vrot.lane.b32.xlu0 %v5498_v14, %s12183_s0  ;;  %s12333_s0 = smov 101  }
0x312e   :  { %5522 = vrot.lane.b32.xlu1 %v5517_v20, %s12185_s22  ;;  %5520 = vrot.lane.b32.xlu0 %v5516_v50, %s12185_s22  ;;  %v5547_v20 = vld [vmem:[#allocation9 + $0x1a0] sm:$0xff]  ;;  %s12334_s22 = smov 102  }
0x3198   :  { %v10407_v48 = vpop.permute.xlu1 %5503 }
0x3199   :  { %12186 = vst [vmem:[#allocation59_spill] sm:$0xff] %v10407_v48 }
0x319c   :  { %v10409_v0 = vpop.permute.xlu1 %5507  ;;  %v10411_v5 = vpop.permute.xlu0 %5505 }
0x319d   :  { %12187 = vst [vmem:[#allocation60_spill] sm:$0xff] %v10409_v0  ;;  %12188 = vst [vmem:[#allocation63_spill] sm:$0xff] %v10411_v5  ;;  %v5548_v0 = vld [vmem:[#allocation9 + $0x1a8] sm:$0xff] }
0x31a0   :  { %v5523_v23 = vpop.permute.xlu1 %5522  ;;  %v5521_v21 = vpop.permute.xlu0 %5520 }
0x31a1   :  { %v5524_v56 = vsel %vm12189_vm3, %v5521_v21, %v5523_v23  ;;  %v5528_v24 = vmul.f32 %v5521_v21, %v10045_v54  ;;  %v5530_v50 = vmul.f32 %v5523_v23, %v10055_v55  ;;  %vm12221_vm3 = vcmask 1039360  }
0x31a2   :  { %v5529_v14 = vmul.f32 %v5524_v56, %v10048_v31 }
0x31a3   :  { %5534 = vrot.lane.b32.xlu0 %v5528_v24, %s12190_s16 }
0x31a4   :  { %5536 = vrot.lane.b32.xlu1 %v5529_v14, %s12190_s16 }
0x31a7   :  { %5538 = vrot.lane.b32.xlu0 %v5530_v50, %s12190_s16  ;;  %s12337_s16 = smov 58  }
0x31a8   :  { %5551 = vrot.lane.b32.xlu1 %v5547_v20, %s12191_s20 }
0x31ab   :  { %5553 = vrot.lane.b32.xlu0 %v5548_v0, %s12191_s20  ;;  %v5579_v0 = vld [vmem:[#allocation9 + $0x1b8] sm:$0xff]  ;;  %s12339_s20 = smov 47  }
0x3215   :  { %v10422_v48 = vpop.permute.xlu0 %5534 }
0x3216   :  { %12192 = vst [vmem:[#allocation61_spill] sm:$0xff] %v10422_v48  ;;  %v10424_v5 = vpop.permute.xlu1 %5536  ;;  %v5578_v48 = vld [vmem:[#allocation9 + $0x1b0] sm:$0xff] }
0x3217   :  { %12193 = vst [vmem:[#allocation64_spill] sm:$0xff] %v10424_v5 }
0x3219   :  { %v10426_v21 = vpop.permute.xlu0 %5538 }
0x321a   :  { %12194 = vst [vmem:[#allocation68_spill] sm:$0xff] %v10426_v21  ;;  %v5552_v56 = vpop.permute.xlu1 %5551 }
0x321b   :  { %v5559_v24 = vmul.f32 %v5552_v56, %v10045_v54 }
0x321d   :  { %v5554_v14 = vpop.permute.xlu0 %5553  ;;  %5565 = vrot.lane.b32.xlu1 %v5559_v24, %s12195_s28 }
0x321e   :  { %v5555_v23 = vsel %vm12196_vm2, %v5552_v56, %v5554_v14  ;;  %v5561_v50 = vmul.f32 %v5554_v14, %v10055_v55  ;;  %vm12222_vm2 = vmmov %vm12221_vm3 }
0x321f   :  { %v5560_v20 = vmul.f32 %v5555_v23, %v10048_v31 }
0x3221   :  { %5569 = vrot.lane.b32.xlu1 %v5561_v50, %s12195_s28  ;;  %5567 = vrot.lane.b32.xlu0 %v5560_v20, %s12195_s28  ;;  %s12343_s28 = smov 45  }
0x3225   :  { %5584 = vrot.lane.b32.xlu1 %v5579_v0, %s12197_s9  ;;  %5582 = vrot.lane.b32.xlu0 %v5578_v48, %s12197_s9  ;;  %v5609_v0 = vld [vmem:[#allocation9 + $0x1c0] sm:$0xff]  ;;  %s12345_s9 = smov 44  }
0x328f   :  { %v10437_v21 = vpop.permute.xlu1 %5565 }
0x3290   :  { %12198 = vst [vmem:[#allocation65_spill] sm:$0xff] %v10437_v21 }
0x3293   :  { %v10439_v5 = vpop.permute.xlu1 %5569  ;;  %v10441_v24 = vpop.permute.xlu0 %5567 }
0x3294   :  { %12199 = vst [vmem:[#allocation66_spill] sm:$0xff] %v10439_v5  ;;  %12200 = vst [vmem:[#allocation69_spill] sm:$0xff] %v10441_v24  ;;  %v5610_v5 = vld [vmem:[#allocation9 + $0x1c8] sm:$0xff] }
0x3297   :  { %v5585_v56 = vpop.permute.xlu1 %5584  ;;  %v5583_v14 = vpop.permute.xlu0 %5582 }
0x3298   :  { %v5586_v23 = vsel %vm12201_vm6, %v5583_v14, %v5585_v56  ;;  %v5590_v50 = vmul.f32 %v5583_v14, %v10045_v54  ;;  %v5592_v48 = vmul.f32 %v5585_v56, %v10055_v55  ;;  %vm12223_vm6 = vcmask 1031168  }
0x3299   :  { %v5591_v20 = vmul.f32 %v5586_v23, %v10048_v31 }
0x329a   :  { %5596 = vrot.lane.b32.xlu0 %v5590_v50, %s12202_s27 }
0x329b   :  { %5598 = vrot.lane.b32.xlu1 %v5591_v20, %s12202_s27 }
0x329e   :  { %5600 = vrot.lane.b32.xlu0 %v5592_v48, %s12202_s27  ;;  %s12347_s27 = smov 43  }
0x329f   :  { %5613 = vrot.lane.b32.xlu1 %v5609_v0, %s12203_s11 }
0x32a2   :  { %5615 = vrot.lane.b32.xlu0 %v5610_v5, %s12203_s11  ;;  %v5641_v5 = vld [vmem:[#allocation9 + $0x1d8] sm:$0xff] }
0x330c   :  { %v10452_v21 = vpop.permute.xlu0 %5596 }
0x330d   :  { %12204 = vst [vmem:[#allocation67_spill] sm:$0xff] %v10452_v21  ;;  %v10454_v24 = vpop.permute.xlu1 %5598  ;;  %v5640_v21 = vld [vmem:[#allocation9 + $0x1d0] sm:$0xff] }
0x330e   :  { %12205 = vst [vmem:[#allocation70_spill] sm:$0xff] %v10454_v24 }
0x3310   :  { %v10456_v14 = vpop.permute.xlu0 %5600 }
0x3311   :  { %12206 = vst [vmem:[#allocation74_spill] sm:$0xff] %v10456_v14  ;;  %v5614_v23 = vpop.permute.xlu1 %5613 }
0x3312   :  { %v5621_v50 = vmul.f32 %v5614_v23, %v10045_v54 }
0x3314   :  { %v5616_v20 = vpop.permute.xlu0 %5615  ;;  %5627 = vrot.lane.b32.xlu1 %v5621_v50, %s12203_s11 }
0x3315   :  { %v5617_v56 = vsel %vm1340_vm15, %v5614_v23, %v5616_v20  ;;  %v5623_v48 = vmul.f32 %v5616_v20, %v10055_v55 }
0x3316   :  { %v5622_v0 = vmul.f32 %v5617_v56, %v10048_v31 }
0x3318   :  { %5631 = vrot.lane.b32.xlu1 %v5623_v48, %s12203_s11  ;;  %5629 = vrot.lane.b32.xlu0 %v5622_v0, %s12203_s11  ;;  %s12349_s11 = smov 42  }
0x331c   :  { %5646 = vrot.lane.b32.xlu1 %v5641_v5, %s12207_s3  ;;  %5644 = vrot.lane.b32.xlu0 %v5640_v21, %s12207_s3  ;;  %v5671_v5 = vld [vmem:[#allocation9 + $0x1e0] sm:$0xff]  ;;  %s12351_s3 = smov 31  }
0x3386   :  { %v10467_v14 = vpop.permute.xlu1 %5627 }
0x3387   :  { %12208 = vst [vmem:[#allocation71_spill] sm:$0xff] %v10467_v14 }
0x338a   :  { %v10469_v24 = vpop.permute.xlu1 %5631  ;;  %v10471_v50 = vpop.permute.xlu0 %5629 }
0x338b   :  { %12209 = vst [vmem:[#allocation72_spill] sm:$0xff] %v10469_v24  ;;  %12210 = vst [vmem:[#allocation75_spill] sm:$0xff] %v10471_v50  ;;  %v5672_v24 = vld [vmem:[#allocation9 + $0x1e8] sm:$0xff] }
0x338e   :  { %v5647_v23 = vpop.permute.xlu1 %5646  ;;  %v5645_v20 = vpop.permute.xlu0 %5644 }
0x338f   :  { %v5648_v56 = vsel %vm12211_vm0, %v5645_v20, %v5647_v23  ;;  %v5652_v48 = vmul.f32 %v5645_v20, %v10045_v54  ;;  %v5654_v21 = vmul.f32 %v5647_v23, %v10055_v55  ;;  %vm12224_vm0 = vmmov %vm12223_vm6 }
0x3390   :  { %v5653_v0 = vmul.f32 %v5648_v56, %v10048_v31 }
0x3391   :  { %5658 = vrot.lane.b32.xlu0 %v5652_v48, %s12212_s1 }
0x3392   :  { %5660 = vrot.lane.b32.xlu1 %v5653_v0, %s12212_s1 }
0x3395   :  { %5662 = vrot.lane.b32.xlu0 %v5654_v21, %s12212_s1  ;;  %s12355_s1 = smov 29  }
0x3396   :  { %5675 = vrot.lane.b32.xlu1 %v5671_v5, %s12213_s7 }
0x3399   :  { %5677 = vrot.lane.b32.xlu0 %v5672_v24, %s12213_s7  ;;  %s12357_s7 = smov 28  }
0x3403   :  { %v5659_v14 = vpop.permute.xlu0 %5658 }
0x3404   :  { %v5661_v50 = vpop.permute.xlu1 %5660 }
0x3405   :  { %v10483_v20 = vsel %vm12214_vm1, %v5659_v14, %v5661_v50  ;;  %v5703_v14 = vld [vmem:[#allocation9 + $0x1f8] sm:$0xff]  ;;  %vm12225_vm1 = vcmask 1022976  }
0x3406   :  { %12215 = vst [vmem:[#allocation73_spill] sm:$0xff] %v10483_v20  ;;  %v5702_v20 = vld [vmem:[#allocation9 + $0x1f0] sm:$0xff] }
0x3407   :  { %v5663_v56 = vpop.permute.xlu0 %5662 }
0x3408   :  { %v10486_v48 = vsel %vm12216_vm5, %v5661_v50, %v5663_v56  ;;  %v5676_v0 = vpop.permute.xlu1 %5675  ;;  %v4765_v50 = vld [vmem:[#allocation9] sm:$0xff]  ;;  %v4766_v56 = vld [vmem:[#allocation9 + $0x8] sm:$0xff]  ;;  %vm12226_vm5 = vmmov %vm12225_vm1 }
0x3409   :  { %12217 = vst [vmem:[#allocation76_spill] sm:$0xff] %v10486_v48  ;;  %v5683_v23 = vmul.f32 %v5676_v0, %v10045_v54  ;;  %v4763_v48 = vld [vmem:[#allocation11] sm:$0xff] }
0x340b   :  { %v5678_v12 = vpop.permute.xlu0 %5677  ;;  %5689 = vrot.lane.b32.xlu1 %v5683_v23, %s12218_s29  ;;  %v4767_v23 = vmul.f32 %v4765_v50, %v10045_v54  ;;  %v4828_v50 = vsel %vm12224_vm0, %v10081_v32, %v10079_v28  ;;  %vm12231_vm0 = vcmask 998400  }
0x340c   :  { %v5679_v21 = vsel %vm12219_vm4, %v5676_v0, %v5678_v12  ;;  %v5685_v5 = vmul.f32 %v5678_v12, %v10055_v55  ;;  %v4768_v0 = vmul.f32 %v4766_v56, %v10048_v31  ;;  %v4764_v12 = vld [vmem:[#allocation11 + $0x8] sm:$0xff]  ;;  %vm12227_vm4 = vcmask 1014784  }
0x340d   :  { %v5684_v24 = vmul.f32 %v5679_v21, %v10048_v31  ;;  %v4796_v21 = vsel %vm12221_vm3, %v10062_v62, %v10064_v34  ;;  %v4858_v62 = vsel %vm12225_vm1, %v10092_v2, %v10094_v45  ;;  %vm12228_vm3 = vmmov %vm12227_vm4 }
0x340e   :  { %v4890_v28 = vsel %vm12228_vm3, %v10111_v9, %v10109_v26  ;;  %vm12232_vm1 = vmmov %vm12231_vm0  ;;  %vm12235_vm3 = vcmask 908288  }
0x340f   :  { %5693 = vrot.lane.b32.xlu1 %v5685_v5, %s12218_s29  ;;  %5691 = vrot.lane.b32.xlu0 %v5684_v24, %s12218_s29  ;;  %v4797_v5 = vsel %vm12222_vm2, %v10064_v34, %v10066_v47  ;;  %v4769_v24 = vadd.f32 %v4767_v23, %v4763_v48  ;;  %v4859_v34 = vsel %vm12226_vm5, %v10094_v45, %v10096_v43  ;;  %vm12229_vm2 = vcmask 1006592   ;;  %s12359_s29 = smov 27  }
0x3410   :  { %v4920_v2 = vsel %vm12229_vm2, %v10122_v10, %v10124_v8  ;;  %v4952_v26 = vsel %vm12232_vm1, %v10141_v7, %v10139_v40  ;;  %vm12233_vm5 = vcmask 916480   ;;  %vm12239_vm1 = vcmask 891904  }
0x3411   :  { %v4800_v56 = vadd.f32 %v4796_v21, %v4769_v24  ;;  %v4982_v10 = vsel %vm12233_vm5, %v10152_v57, %v10154_v39 }
0x3413   :  { %5708 = vrot.lane.b32.xlu1 %v5703_v14, %s12220_s18  ;;  %5706 = vrot.lane.b32.xlu0 %v5702_v20, %s12220_s18  ;;  %v4770_v14 = vadd.f32 %v4768_v0, %v4764_v12  ;;  %v4827_v20 = vsel %vm12223_vm6, %v10077_v46, %v10081_v32  ;;  %v4889_v46 = vsel %vm12227_vm4, %v10107_v30, %v10111_v9  ;;  %vm12230_vm6 = vmmov %vm12229_vm2  ;;  %s12361_s18 = smov 26  }
0x3414   :  { %v4831_v47 = vadd.f32 %v4827_v20, %v4800_v56  ;;  %v4921_v45 = vsel %vm12230_vm6, %v10124_v8, %v10126_v22  ;;  %v4951_v30 = vsel %vm12231_vm0, %v10137_v25, %v10141_v7  ;;  %vm12234_vm4 = vmmov %vm12233_vm5  ;;  %v5013_v25 = vsel %vm12235_vm3, %v10167_v37, %v10171_v3 }
0x3415   :  { %v4801_v55 = vadd.f32 %v4797_v5, %v4770_v14  ;;  %v4983_v8 = vsel %vm12234_vm4, %v10154_v39, %v10156_v29  ;;  %vm12236_vm2 = vmmov %vm12235_vm3  ;;  %vm12237_vm6 = vcmask 900096   ;;  %v5075_v37 = vsel %vm12239_vm1, %v10197_v51, %v10201_v13 }
0x3416   :  { %v4862_v32 = vadd.f32 %v4858_v62, %v4831_v47  ;;  %v5014_v40 = vsel %vm12236_vm2, %v10171_v3, %v10169_v49  ;;  %v5044_v57 = vsel %vm12237_vm6, %v10182_v41, %v10184_v58  ;;  %vm12238_vm0 = vmmov %vm12237_vm6  ;;  %vm12241_vm4 = vcmask 883712   ;;  %v12252_v47 = vld [vmem:[#allocation44_spill] sm:$0xff] }
0x3417   :  { %v4832_v48 = vadd.f32 %v4828_v50, %v4801_v55  ;;  %v5045_v39 = vsel %vm12238_vm0, %v10184_v58, %v10186_v52  ;;  %vm12240_vm5 = vmmov %vm12239_vm1  ;;  %v5106_v41 = vsel %vm12241_vm4, %v10212_v38, %v10214_v6  ;;  %vm12243_vm2 = vcmask 875520  }
0x3418   :  { %v4893_v43 = vadd.f32 %v4889_v46, %v4862_v32  ;;  %v5076_v49 = vsel %vm12240_vm5, %v10201_v13, %v10199_v53  ;;  %vm12242_vm3 = vmmov %vm12241_vm4  ;;  %v5137_v51 = vsel %vm12243_vm2, %v10227_v27, %v10231_v35  ;;  %vm12245_vm0 = vcmask 867328   ;;  %v12254_v46 = vld [vmem:[#allocation45_spill] sm:$0xff]  ;;  %v12257_v32 = vld [vmem:[#allocation42_spill] sm:$0xff] }
0x3419   :  { %v4863_v23 = vadd.f32 %v4859_v34, %v4832_v48  ;;  %v5107_v58 = vsel %vm12242_vm3, %v10214_v6, %v10216_v15  ;;  %vm12244_vm6 = vmmov %vm12243_vm2  ;;  %v5168_v38 = vsel %vm12245_vm0, %v10242_v61, %v10244_v63  ;;  %v5199_v27 = vsel %vm896_vm11, %v10257_v1, %v10261_v33 }
0x341a   :  { %v4924_v9 = vadd.f32 %v4920_v2, %v4893_v43  ;;  %v5138_v53 = vsel %vm12244_vm6, %v10231_v35, %v10229_v4  ;;  %vm12246_vm1 = vmmov %vm12245_vm0  ;;  %v5200_v4 = vsel %vm896_vm11, %v10261_v33, %v10259_v11  ;;  %vm12247_vm5 = vcmask 777216   ;;  %v12259_v2 = vld [vmem:[#allocation46_spill] sm:$0xff] }
0x341b   :  { %v4894_v55 = vadd.f32 %v4890_v28, %v4863_v23  ;;  %v5169_v6 = vsel %vm12246_vm1, %v10244_v63, %v10246_v44  ;;  %v5230_v61 = vsel %vm12247_vm5, %v10272_v59, %v10274_v60  ;;  %vm12248_vm4 = vmmov %vm12247_vm5  ;;  %vm12249_vm3 = vcmask 769024   ;;  %v12255_v28 = vld [vmem:[#allocation41_spill] sm:$0xff]  ;;  %v12262_v43 = vld [vmem:[#allocation50_spill] sm:$0xff] }
0x341c   :  { %v4955_v22 = vadd.f32 %v4951_v30, %v4924_v9  ;;  %v5231_v63 = vsel %vm12248_vm4, %v10274_v60, %v10276_v42  ;;  %v5261_v1 = vsel %vm12249_vm3, %v10287_v17, %v10291_v19  ;;  %vm12250_vm2 = vmmov %vm12249_vm3  ;;  %vm12251_vm6 = vcmask 760832   ;;  %v12265_v9 = vld [vmem:[#allocation47_spill] sm:$0xff] }
0x341d   :  { %v4925_v0 = vadd.f32 %v4921_v45, %v4894_v55  ;;  %v5262_v11 = vsel %vm12250_vm2, %v10291_v19, %v10289_v16  ;;  %v5292_v59 = vsel %vm12251_vm6, %v10302_v36, %v10304_v18  ;;  %vm12253_vm0 = vmmov %vm12251_vm6  ;;  %vm12256_vm1 = vcmask 752640   ;;  %v12260_v45 = vld [vmem:[#allocation43_spill] sm:$0xff] }
0x341e   :  { %v4986_v7 = vadd.f32 %v4982_v10, %v4955_v22  ;;  %v5293_v60 = vsel %vm12253_vm0, %v10304_v18, %v12252_v47  ;;  %v5323_v17 = vsel %vm12256_vm1, %v12255_v28, %v12254_v46  ;;  %vm12258_vm5 = vmmov %vm12256_vm1  ;;  %vm12261_vm4 = vcmask 744448   ;;  %v12267_v10 = vld [vmem:[#allocation48_spill] sm:$0xff]  ;;  %v12297_v28 = vld [vmem:[#allocation70_spill] sm:$0xff] }
0x341f   :  { %v4956_v12 = vadd.f32 %v4952_v26, %v4925_v0  ;;  %v5324_v16 = vsel %vm12258_vm5, %v12254_v46, %v12257_v32  ;;  %v5354_v36 = vsel %vm12261_vm4, %v12260_v45, %v12259_v2  ;;  %vm12263_vm3 = vmmov %vm12261_vm4  ;;  %v12264_v26 = vld [vmem:[#allocation51_spill] sm:$0xff]  ;;  %vm12266_vm2 = vcmask 736256  }
0x3420   :  { %v5017_v29 = vadd.f32 %v5013_v25, %v4986_v7  ;;  %v5355_v18 = vsel %vm12263_vm3, %v12259_v2, %v12262_v43  ;;  %v5385_v0 = vsel %vm12266_vm2, %v12265_v9, %v12264_v26  ;;  %vm12268_vm6 = vmmov %vm12266_vm2  ;;  %v12269_v25 = vld [vmem:[#allocation52_spill] sm:$0xff]  ;;  %vm12274_vm0 = vcmask 646144   ;;  %v12302_v45 = vld [vmem:[#allocation75_spill] sm:$0xff] }
0x3421   :  { %v4987_v21 = vadd.f32 %v4983_v8, %v4956_v12  ;;  %v5386_v8 = vsel %vm12268_vm6, %v12264_v26, %v12267_v10  ;;  %vm12276_vm1 = vmmov %vm12274_vm0  ;;  %vm12279_vm5 = vcmask 637952   ;;  %vm12284_vm3 = vcmask 629760  }
0x3422   :  { %v5048_v3 = vadd.f32 %v5044_v57, %v5017_v29  ;;  %vm12281_vm4 = vmmov %vm12279_vm5  ;;  %vm12289_vm6 = vcmask 621568  }
0x3423   :  { %v5018_v5 = vadd.f32 %v5014_v40, %v4987_v21  ;;  %v12270_v40 = vld [vmem:[#allocation49_spill] sm:$0xff]  ;;  %v12271_v21 = vld [vmem:[#allocation56_spill] sm:$0xff]  ;;  %vm12286_vm2 = vmmov %vm12284_vm3 }
0x3424   :  { %v5079_v52 = vadd.f32 %v5075_v37, %v5048_v3  ;;  %v5416_v7 = vsel %vm1127_vm12, %v12270_v40, %v12269_v25  ;;  %v5417_v57 = vsel %vm1127_vm12, %v12269_v25, %v12271_v21  ;;  %v12273_v37 = vld [vmem:[#allocation53_spill] sm:$0xff]  ;;  %v12275_v3 = vld [vmem:[#allocation54_spill] sm:$0xff] }
0x3425   :  { %v5049_v24 = vadd.f32 %v5045_v39, %v5018_v5  ;;  %v12272_v5 = vld [vmem:[#allocation57_spill] sm:$0xff] }
0x3426   :  { %v5110_v13 = vadd.f32 %v5106_v41, %v5079_v52  ;;  %v12277_v52 = vld [vmem:[#allocation58_spill] sm:$0xff] }
0x3427   :  { %v5080_v14 = vadd.f32 %v5076_v49, %v5049_v24  ;;  %v5447_v49 = vsel %vm12274_vm0, %v12273_v37, %v12272_v5  ;;  %v5448_v24 = vsel %vm12276_vm1, %v12272_v5, %v12275_v3  ;;  %vm12291_vm0 = vmmov %vm12289_vm6  ;;  %vm12294_vm1 = vcmask 613376  }
0x3428   :  { %v5141_v15 = vadd.f32 %v5137_v51, %v5110_v13 }
0x3429   :  { %v5111_v20 = vadd.f32 %v5107_v58, %v5080_v14  ;;  %v12278_v14 = vld [vmem:[#allocation55_spill] sm:$0xff] }
0x342a   :  { %v5172_v35 = vadd.f32 %v5168_v38, %v5141_v15  ;;  %v5478_v51 = vsel %vm12279_vm5, %v12278_v14, %v12277_v52  ;;  %v12283_v15 = vld [vmem:[#allocation59_spill] sm:$0xff]  ;;  %vm12296_vm5 = vmmov %vm12294_vm1  ;;  %v5734_v14 = vld [vmem:[#allocation9 + $0x208] sm:$0xff] }
0x342b   :  { %v5142_v50 = vadd.f32 %v5138_v53, %v5111_v20  ;;  %v12280_v53 = vld [vmem:[#allocation62_spill] sm:$0xff] }
0x342c   :  { %v5203_v44 = vadd.f32 %v5199_v27, %v5172_v35  ;;  %v5479_v13 = vsel %vm12281_vm4, %v12277_v52, %v12280_v53  ;;  %v12285_v27 = vld [vmem:[#allocation60_spill] sm:$0xff]  ;;  %vm12299_vm4 = vcmask 605184  }
0x342d   :  { %v5173_v56 = vadd.f32 %v5169_v6, %v5142_v50  ;;  %v12282_v6 = vld [vmem:[#allocation63_spill] sm:$0xff]  ;;  %v5733_v52 = vld [vmem:[#allocation9 + $0x200] sm:$0xff] }
0x342e   :  { %v5234_v33 = vadd.f32 %v5230_v61, %v5203_v44  ;;  %v5509_v50 = vsel %vm12284_vm3, %v12283_v15, %v12282_v6  ;;  %v12287_v61 = vld [vmem:[#allocation64_spill] sm:$0xff]  ;;  %vm12301_vm3 = vmmov %vm12299_vm4 }
0x342f   :  { %v5204_v62 = vadd.f32 %v5200_v4, %v5173_v56  ;;  %v5510_v4 = vsel %vm12286_vm2, %v12282_v6, %v12285_v27  ;;  %vm12307_vm2 = vcmask 506880  }
0x3430   :  { %v5265_v42 = vadd.f32 %v5261_v1, %v5234_v33 }
0x3431   :  { %v5235_v34 = vadd.f32 %v5231_v63, %v5204_v62  ;;  %v12288_v63 = vld [vmem:[#allocation61_spill] sm:$0xff]  ;;  %v12290_v62 = vld [vmem:[#allocation68_spill] sm:$0xff] }
0x3432   :  { %v5296_v19 = vadd.f32 %v5292_v59, %v5265_v42  ;;  %v5540_v44 = vsel %vm12289_vm6, %v12288_v63, %v12287_v61  ;;  %v5541_v1 = vsel %vm12291_vm0, %v12287_v61, %v12290_v62  ;;  %v12293_v59 = vld [vmem:[#allocation65_spill] sm:$0xff]  ;;  %vm12308_vm6 = vmmov %vm12307_vm2  ;;  %vm12313_vm0 = vcmask 498688   ;;  %v5765_v63 = vld [vmem:[#allocation9 + $0x218] sm:$0xff] }
0x3433   :  { %v5266_v48 = vadd.f32 %v5262_v11, %v5235_v34  ;;  %v12292_v34 = vld [vmem:[#allocation69_spill] sm:$0xff] }
0x3434   :  { %v5327_v55 = vadd.f32 %v5323_v17, %v5296_v19  ;;  %v5571_v47 = vsel %vm12294_vm1, %v12293_v59, %v12292_v34  ;;  %v12298_v17 = vld [vmem:[#allocation67_spill] sm:$0xff]  ;;  %vm12314_vm1 = vmmov %vm12313_vm0 }
0x3435   :  { %v5297_v23 = vadd.f32 %v5293_v60, %v5266_v48  ;;  %v12295_v60 = vld [vmem:[#allocation66_spill] sm:$0xff]  ;;  %v5602_v32 = vsel %vm12299_vm4, %v12298_v17, %v12297_v28  ;;  %vm12318_vm4 = vcmask 490496   ;;  %v5795_v17 = vld [vmem:[#allocation9 + $0x220] sm:$0xff] }
0x3436   :  { %v5358_v22 = vadd.f32 %v5354_v36, %v5327_v55  ;;  %v5572_v42 = vsel %vm12296_vm5, %v12292_v34, %v12295_v60  ;;  %v12303_v36 = vld [vmem:[#allocation71_spill] sm:$0xff]  ;;  %vm12316_vm5 = vcmask 556032  }
0x3437   :  { %v5328_v30 = vadd.f32 %v5324_v16, %v5297_v23  ;;  %v12300_v16 = vld [vmem:[#allocation74_spill] sm:$0xff]  ;;  %v5633_v43 = vsel %vm1340_vm15, %v12303_v36, %v12302_v45  ;;  %v5889_v36 = vld [vmem:[#allocation9 + $0x258] sm:$0xff] }
0x3438   :  { %v5389_v39 = vadd.f32 %v5385_v0, %v5358_v22  ;;  %v5603_v19 = vsel %vm12301_vm3, %v12297_v28, %v12300_v16  ;;  %vm12319_vm3 = vmmov %vm12318_vm4  ;;  %v5826_v16 = vld [vmem:[#allocation9 + $0x230] sm:$0xff] }
0x3439   :  { %v5359_v12 = vadd.f32 %v5355_v18, %v5328_v30  ;;  %v12304_v18 = vld [vmem:[#allocation72_spill] sm:$0xff] }
0x343a   :  { %v5420_v41 = vadd.f32 %v5416_v7, %v5389_v39  ;;  %v5634_v55 = vsel %vm1340_vm15, %v12302_v45, %v12304_v18  ;;  %vm12309_vm15 = vcmask 547840   ;;  %v5888_v45 = vld [vmem:[#allocation9 + $0x250] sm:$0xff]  ;;  %v5920_v18 = vld [vmem:[#allocation9 + $0x268] sm:$0xff] }
0x343b   :  { %v5390_v29 = vadd.f32 %v5386_v8, %v5359_v12  ;;  %v12305_v8 = vld [vmem:[#allocation73_spill] sm:$0xff]  ;;  %v12306_v12 = vld [vmem:[#allocation76_spill] sm:$0xff] }
0x343c   :  { %v5451_v20 = vadd.f32 %v5447_v49, %v5420_v41  ;;  %v12311_v41 = vld [vmem:[#allocation40_spill] sm:$0xff] }
0x343d   :  { %v5421_v58 = vadd.f32 %v5417_v57, %v5390_v29 }
0x343e   :  { %v5482_v35 = vadd.f32 %v5478_v51, %v5451_v20 }
0x343f   :  { %v5452_v38 = vadd.f32 %v5448_v24, %v5421_v58 }
0x3440   :  { %v5513_v11 = vadd.f32 %v5509_v50, %v5482_v35 }
0x3441   :  { %v5483_v56 = vadd.f32 %v5479_v13, %v5452_v38 }
0x3442   :  { %v5544_v48 = vadd.f32 %v5540_v44, %v5513_v11  ;;  %v5764_v44 = vld [vmem:[#allocation9 + $0x210] sm:$0xff] }
0x3443   :  { %v5514_v33 = vadd.f32 %v5510_v4, %v5483_v56 }
0x3444   :  { %v5575_v23 = vadd.f32 %v5571_v47, %v5544_v48 }
0x3445   :  { %v5545_v46 = vadd.f32 %v5541_v1, %v5514_v33 }
0x3446   :  { %v5606_v30 = vadd.f32 %v5602_v32, %v5575_v23  ;;  %v5796_v32 = vld [vmem:[#allocation9 + $0x228] sm:$0xff]  ;;  %v5857_v23 = vld [vmem:[#allocation9 + $0x240] sm:$0xff] }
0x3447   :  { %v5576_v2 = vadd.f32 %v5572_v42, %v5545_v46 }
0x3448   :  { %v5637_v0 = vadd.f32 %v5633_v43, %v5606_v30  ;;  %v5919_v43 = vld [vmem:[#allocation9 + $0x260] sm:$0xff]  ;;  %v5951_v30 = vld [vmem:[#allocation9 + $0x278] sm:$0xff] }
0x3449   :  { %v5607_v26 = vadd.f32 %v5603_v19, %v5576_v2  ;;  %v5827_v19 = vld [vmem:[#allocation9 + $0x238] sm:$0xff]  ;;  %v5858_v2 = vld [vmem:[#allocation9 + $0x248] sm:$0xff] }
0x344a   :  { %v5668_v22 = vadd.f32 %v12305_v8, %v5637_v0  ;;  %v6012_v0 = vld [vmem:[#allocation9 + $0x290] sm:$0xff]  ;;  %v6043_v8 = vld [vmem:[#allocation9 + $0x2a0] sm:$0xff] }
0x344b   :  { %v5638_v10 = vadd.f32 %v5634_v55, %v5607_v26  ;;  %v5950_v55 = vld [vmem:[#allocation9 + $0x270] sm:$0xff]  ;;  %v5981_v26 = vld [vmem:[#allocation9 + $0x280] sm:$0xff] }
0x344d   :  { %v5669_v25 = vadd.f32 %v12306_v12, %v5638_v10  ;;  %v6013_v10 = vld [vmem:[#allocation9 + $0x298] sm:$0xff]  ;;  %v6074_v12 = vld [vmem:[#allocation9 + $0x2b0] sm:$0xff] }
0x347d   :  { %v5690_v9 = vpop.permute.xlu1 %5689 }
0x3481   :  { %v5694_v40 = vpop.permute.xlu1 %5693  ;;  %v5692_v7 = vpop.permute.xlu0 %5691 }
0x3482   :  { %v5695_v21 = vsel %vm12307_vm2, %v5690_v9, %v5692_v7  ;;  %v5696_v57 = vsel %vm12308_vm6, %v5692_v7, %v5694_v40  ;;  %vm12320_vm2 = vcmask 564224   ;;  %v5982_v9 = vld [vmem:[#allocation9 + $0x288] sm:$0xff]  ;;  %v6105_v40 = vld [vmem:[#allocation9 + $0x2c0] sm:$0xff]  ;;  %vm12335_vm6 = vcmask 482304  }
0x3483   :  { %v5699_v39 = vadd.f32 %v5695_v21, %v5668_v22  ;;  %v5700_v29 = vadd.f32 %v5696_v57, %v5669_v25  ;;  %v6044_v22 = vld [vmem:[#allocation9 + $0x2a8] sm:$0xff]  ;;  %v6075_v25 = vld [vmem:[#allocation9 + $0x2b8] sm:$0xff]  ;;  %v6136_v21 = vld [vmem:[#allocation9 + $0x2d0] sm:$0xff] }
0x3484   :  { %v6106_v7 = vld [vmem:[#allocation9 + $0x2c8] sm:$0xff]  ;;  %v6137_v57 = vld [vmem:[#allocation9 + $0x2d8] sm:$0xff] }
0x3485   :  { %v5709_v5 = vpop.permute.xlu1 %5708  ;;  %v5707_v37 = vpop.permute.xlu0 %5706 }
0x3486   :  { %v5710_v49 = vsel %vm12309_vm15, %v5707_v37, %v5709_v5  ;;  %v5714_v3 = vmul.f32 %v5707_v37, %v10045_v54  ;;  %v5716_v58 = vmul.f32 %v5709_v5, %v12311_v41  ;;  %v6198_v5 = vld [vmem:[#allocation9 + $0x2f0] sm:$0xff]  ;;  %v6199_v37 = vld [vmem:[#allocation9 + $0x2f8] sm:$0xff]  ;;  %vm12336_vm15 = vcmask 572416  }
0x3487   :  { %v5715_v24 = vmul.f32 %v5710_v49, %v10048_v31  ;;  %v6229_v49 = vld [vmem:[#allocation9 + $0x300] sm:$0xff] }
0x3488   :  { %5720 = vrot.lane.b32.xlu0 %v5714_v3, %s12310_s2  ;;  %v6230_v3 = vld [vmem:[#allocation9 + $0x308] sm:$0xff] }
0x3489   :  { %5722 = vrot.lane.b32.xlu1 %v5715_v24, %s12310_s2 }
0x348c   :  { %5724 = vrot.lane.b32.xlu0 %v5716_v58, %s12310_s2  ;;  %s6898_s2 = smov [#allocation18]  }
0x348d   :  { %5737 = vrot.lane.b32.xlu1 %v5733_v52, %s12312_s8 }
0x3490   :  { %5739 = vrot.lane.b32.xlu0 %v5734_v14, %s12312_s8  ;;  %s6269_s8 = sshll.u32 %s6898_s2, 4  ;;  %s6270_s8 = int_to_ptr.vmem [resolvable:$true] %s6269_s8 }
0x3491   :  { %p6764_p5 = scmp.lt.s32.totalorder %s6270_s8, %s6270_s8 }
0x34fa   :  { %v5721_v51 = vpop.permute.xlu0 %5720 }
0x34fb   :  { %v5723_v53 = vpop.permute.xlu1 %5722 }
0x34fc   :  { %v5726_v13 = vsel %vm12313_vm0, %v5721_v51, %v5723_v53  ;;  %vm12338_vm0 = vcmask 662528  }
0x34fd   :  { %v5730_v20 = vadd.f32 %v5726_v13, %v5699_v39  ;;  %v6167_v39 = vld [vmem:[#allocation9 + $0x2e0] sm:$0xff] }
0x34fe   :  { %v5725_v38 = vpop.permute.xlu0 %5724 }
0x34ff   :  { %v5727_v6 = vsel %vm12314_vm1, %v5723_v53, %v5725_v38  ;;  %v5738_v15 = vpop.permute.xlu1 %5737  ;;  %vm12342_vm1 = vcmask 678912  }
0x3500   :  { %v5731_v50 = vadd.f32 %v5727_v6, %v5700_v29  ;;  %v5745_v27 = vmul.f32 %v5738_v15, %v10045_v54  ;;  %v6168_v29 = vld [vmem:[#allocation9 + $0x2e8] sm:$0xff] }
0x3502   :  { %v5740_v4 = vpop.permute.xlu0 %5739  ;;  %5751 = vrot.lane.b32.xlu1 %v5745_v27, %s12315_s30 }
0x3503   :  { %v5741_v35 = vsel %vm12316_vm5, %v5738_v15, %v5740_v4  ;;  %v5747_v56 = vmul.f32 %v5740_v4, %v12311_v41  ;;  %vm12344_vm5 = vcmask 687104  }
0x3504   :  { %v5746_v61 = vmul.f32 %v5741_v35, %v10048_v31 }
0x3506   :  { %5755 = vrot.lane.b32.xlu1 %v5747_v56, %s12315_s30  ;;  %5753 = vrot.lane.b32.xlu0 %v5746_v61, %s12315_s30  ;;  %s6759_s30 = scalar_lea.vmem %s6270_s8, 256 }
0x3507   :  { %p6760_p4 = scmp.ne.s32.totalorder %s6270_s8, %s6759_s30  ;;  %p6765_p6 = scmp.lt.s32.totalorder %s6759_s30, %s6759_s30 }
0x3509   :  { %p6766_p7 = por %p6765_p6, %p6764_p5 }
0x350a   :  { %5770 = vrot.lane.b32.xlu1 %v5765_v63, %s12317_s19  ;;  %5768 = vrot.lane.b32.xlu0 %v5764_v44, %s12317_s19 }
0x350b   :  { %p6767_p8 = pnand %p6766_p7, %p6760_p4 }
0x3574   :  { %v5752_v62 = vpop.permute.xlu1 %5751 }
0x3578   :  { %v5756_v1 = vpop.permute.xlu1 %5755  ;;  %v5754_v11 = vpop.permute.xlu0 %5753 }
0x3579   :  { %v5757_v33 = vsel %vm12318_vm4, %v5752_v62, %v5754_v11  ;;  %v5758_v34 = vsel %vm12319_vm3, %v5754_v11, %v5756_v1  ;;  %vm12346_vm4 = vcmask 695296   ;;  %vm12348_vm3 = vcmask 703488  }
0x357a   :  { %v10693_v59 = vadd.f32 %v5757_v33, %v5730_v20  ;;  %v10695_v47 = vadd.f32 %v5758_v34, %v5731_v50 }
0x357c   :  { %v10697_v60 = vpop.permute.xlu1 %5770  ;;  %v5769_v42 = vpop.permute.xlu0 %5768 }
0x357d   :  { %v5772_v48 = vsel %vm12320_vm2, %v5769_v42, %v10697_v60  ;;  %v5776_v46 = vmul.f32 %v5769_v42, %v10045_v54  ;;  %v5778_v24 = vmul.f32 %v10697_v60, %v12311_v41  ;;  %vm12350_vm2 = vcmask 793600  }
0x357e   :  { %v5777_v28 = vmul.f32 %v5772_v48, %v10048_v31 }
0x357f   :  { %5782 = vrot.lane.b32.xlu0 %v5776_v46, %s12321_s21 }
0x3580   :  { %5784 = vrot.lane.b32.xlu1 %v5777_v28, %s12321_s21 }
0x3583   :  { %5799 = vrot.lane.b32.xlu0 %v5795_v17, %s12322_s15 }
0x3584   :  { %5801 = vrot.lane.b32.xlu1 %v5796_v32, %s12322_s15 }
0x3587   :  { %5830 = vrot.lane.b32.xlu0 %v5826_v16, %s12167_s13 }
0x3588   :  { %5832 = vrot.lane.b32.xlu1 %v5827_v19, %s12167_s13  ;;  %s12327_s13 = smov 85  }
0x358b   :  { %5861 = vrot.lane.b32.xlu0 %v5857_v23, %s12323_s14 }
0x358c   :  { %5863 = vrot.lane.b32.xlu1 %v5858_v2, %s12323_s14 }
0x358f   :  { %5892 = vrot.lane.b32.xlu0 %v5888_v45, %s12324_s10 }
0x3590   :  { %5894 = vrot.lane.b32.xlu1 %v5889_v36, %s12324_s10 }
0x3593   :  { %5923 = vrot.lane.b32.xlu0 %v5919_v43, %s12325_s23 }
0x3594   :  { %5925 = vrot.lane.b32.xlu1 %v5920_v18, %s12325_s23 }
0x3597   :  { %5954 = vrot.lane.b32.xlu0 %v5950_v55, %s12326_s24 }
0x3598   :  { %5956 = vrot.lane.b32.xlu1 %v5951_v30, %s12326_s24 }
0x359b   :  { %5985 = vrot.lane.b32.xlu0 %v5981_v26, %s12327_s13 }
0x359c   :  { %5987 = vrot.lane.b32.xlu1 %v5982_v9, %s12327_s13 }
0x359f   :  { %6016 = vrot.lane.b32.xlu0 %v6012_v0, %s12328_s4 }
0x35a0   :  { %6018 = vrot.lane.b32.xlu1 %v6013_v10, %s12328_s4 }
0x35a3   :  { %6047 = vrot.lane.b32.xlu0 %v6043_v8, %s12137_s5 }
0x35a4   :  { %6049 = vrot.lane.b32.xlu1 %v6044_v22, %s12137_s5  ;;  %s12332_s5 = smov 100  }
0x35a7   :  { %6078 = vrot.lane.b32.xlu0 %v6074_v12, %s12329_s25 }
0x35a8   :  { %6080 = vrot.lane.b32.xlu1 %v6075_v25, %s12329_s25 }
0x35ab   :  { %6109 = vrot.lane.b32.xlu0 %v6105_v40, %s12330_s26 }
0x35ac   :  { %6111 = vrot.lane.b32.xlu1 %v6106_v7, %s12330_s26 }
0x35af   :  { %6140 = vrot.lane.b32.xlu0 %v6136_v21, %s12331_s12 }
0x35b0   :  { %6142 = vrot.lane.b32.xlu1 %v6137_v57, %s12331_s12 }
0x35b3   :  { %6171 = vrot.lane.b32.xlu0 %v6167_v39, %s12332_s5 }
0x35b4   :  { %6173 = vrot.lane.b32.xlu1 %v6168_v29, %s12332_s5 }
0x35b7   :  { %6202 = vrot.lane.b32.xlu0 %v6198_v5, %s12333_s0 }
0x35b8   :  { %6204 = vrot.lane.b32.xlu1 %v6199_v37, %s12333_s0 }
0x35bb   :  { %6233 = vrot.lane.b32.xlu0 %v6229_v49, %s12334_s22 }
0x35bc   :  { %6235 = vrot.lane.b32.xlu1 %v6230_v3, %s12334_s22 }
0x35bf   :  { %5786 = vrot.lane.b32.xlu0 %v5778_v24, %s12321_s21 }
0x35f1   :  { %v5783_v58 = vpop.permute.xlu0 %5782 }
0x35f2   :  { %v10738_v52 = vpop.permute.xlu1 %5784 }
0x35f3   :  { %v5788_v14 = vsel %vm12335_vm6, %v5783_v58, %v10738_v52 }
0x35f4   :  { %v10743_v51 = vadd.f32 %v5788_v14, %v10693_v59 }
0x35f5   :  { %v5800_v53 = vpop.permute.xlu0 %5799 }
0x35f6   :  { %v5807_v13 = vmul.f32 %v5800_v53, %v10045_v54  ;;  %v5802_v20 = vpop.permute.xlu1 %5801 }
0x35f7   :  { %v5803_v38 = vsel %vm12336_vm15, %v5800_v53, %v5802_v20  ;;  %v5809_v50 = vmul.f32 %v5802_v20, %v12311_v41  ;;  %vm12354_vm15 = vcmask 809984  }
0x35f8   :  { %v5808_v6 = vmul.f32 %v5803_v38, %v10048_v31  ;;  %5813 = vrot.lane.b32.xlu1 %v5807_v13, %s12337_s16 }
0x35f9   :  { %v5831_v15 = vpop.permute.xlu0 %5830 }
0x35fa   :  { %5815 = vrot.lane.b32.xlu0 %v5808_v6, %s12337_s16  ;;  %v5833_v27 = vpop.permute.xlu1 %5832  ;;  %v5838_v35 = vmul.f32 %v5831_v15, %v10045_v54 }
0x35fb   :  { %v5834_v4 = vsel %vm1127_vm12, %v5831_v15, %v5833_v27  ;;  %v5840_v44 = vmul.f32 %v5833_v27, %v12311_v41  ;;  %vm12340_vm12 = vcmask 670720  }
0x35fc   :  { %5817 = vrot.lane.b32.xlu1 %v5809_v50, %s12337_s16  ;;  %v5839_v61 = vmul.f32 %v5834_v4, %v10048_v31 }
0x35fd   :  { %v5862_v56 = vpop.permute.xlu0 %5861 }
0x35fe   :  { %5844 = vrot.lane.b32.xlu0 %v5838_v35, %s12163_s17  ;;  %v5864_v63 = vpop.permute.xlu1 %5863  ;;  %v5869_v11 = vmul.f32 %v5862_v56, %v10045_v54 }
0x35ff   :  { %v5865_v62 = vsel %vm12338_vm0, %v5862_v56, %v5864_v63  ;;  %v5871_v60 = vmul.f32 %v5864_v63, %v12311_v41  ;;  %vm12356_vm0 = vcmask 818176  }
0x3600   :  { %5846 = vrot.lane.b32.xlu1 %v5839_v61, %s12163_s17  ;;  %v5870_v33 = vmul.f32 %v5865_v62, %v10048_v31 }
0x3601   :  { %v5893_v1 = vpop.permute.xlu0 %5892 }
0x3602   :  { %5848 = vrot.lane.b32.xlu0 %v5840_v44, %s12163_s17  ;;  %v5895_v34 = vpop.permute.xlu1 %5894  ;;  %v5900_v48 = vmul.f32 %v5893_v1, %v10045_v54  ;;  %s12341_s17 = smov 46  }
0x3603   :  { %v5896_v42 = vsel %vm12340_vm12, %v5893_v1, %v5895_v34  ;;  %v5902_v32 = vmul.f32 %v5895_v34, %v12311_v41  ;;  %vm12358_vm12 = vcmask 826368  }
0x3604   :  { %5875 = vrot.lane.b32.xlu1 %v5869_v11, %s12339_s20  ;;  %v5901_v28 = vmul.f32 %v5896_v42, %v10048_v31 }
0x3605   :  { %v5924_v59 = vpop.permute.xlu0 %5923 }
0x3606   :  { %5877 = vrot.lane.b32.xlu0 %v5870_v33, %s12339_s20  ;;  %v5926_v17 = vpop.permute.xlu1 %5925  ;;  %v5931_v23 = vmul.f32 %v5924_v59, %v10045_v54 }
0x3607   :  { %v5927_v16 = vsel %vm12342_vm1, %v5924_v59, %v5926_v17  ;;  %v5933_v43 = vmul.f32 %v5926_v17, %v12311_v41  ;;  %vm12360_vm1 = vcmask 834560  }
0x3608   :  { %5879 = vrot.lane.b32.xlu1 %v5871_v60, %s12339_s20  ;;  %v5932_v2 = vmul.f32 %v5927_v16, %v10048_v31 }
0x3609   :  { %v5955_v46 = vpop.permute.xlu0 %5954 }
0x360a   :  { %5906 = vrot.lane.b32.xlu0 %v5900_v48, %s12341_s17  ;;  %v5957_v45 = vpop.permute.xlu1 %5956  ;;  %v5962_v55 = vmul.f32 %v5955_v46, %v10045_v54 }
0x360b   :  { %v5958_v18 = vsel %vm12344_vm5, %v5955_v46, %v5957_v45  ;;  %v5964_v0 = vmul.f32 %v5957_v45, %v12311_v41  ;;  %vm12362_vm5 = vcmask 474112  }
0x360c   :  { %5908 = vrot.lane.b32.xlu1 %v5901_v28, %s12341_s17  ;;  %v5963_v26 = vmul.f32 %v5958_v18, %v10048_v31 }
0x360d   :  { %v5986_v19 = vpop.permute.xlu0 %5985 }
0x360e   :  { %5910 = vrot.lane.b32.xlu0 %v5902_v32, %s12341_s17  ;;  %v5988_v9 = vpop.permute.xlu1 %5987  ;;  %v5993_v22 = vmul.f32 %v5986_v19, %v10045_v54 }
0x360f   :  { %v5989_v10 = vsel %vm12346_vm4, %v5986_v19, %v5988_v9  ;;  %v5995_v7 = vmul.f32 %v5988_v9, %v12311_v41  ;;  %vm12363_vm4 = vmmov %vm12362_vm5 }
0x3610   :  { %5937 = vrot.lane.b32.xlu1 %v5931_v23, %s12343_s28  ;;  %v5994_v12 = vmul.f32 %v5989_v10, %v10048_v31 }
0x3611   :  { %v6017_v36 = vpop.permute.xlu0 %6016 }
0x3612   :  { %5939 = vrot.lane.b32.xlu0 %v5932_v2, %s12343_s28  ;;  %v6019_v25 = vpop.permute.xlu1 %6018  ;;  %v6024_v57 = vmul.f32 %v6017_v36, %v10045_v54 }
0x3613   :  { %v6020_v21 = vsel %vm12348_vm3, %v6017_v36, %v6019_v25  ;;  %v6026_v37 = vmul.f32 %v6019_v25, %v12311_v41  ;;  %vm12364_vm3 = vcmask 384000  }
0x3614   :  { %5941 = vrot.lane.b32.xlu1 %v5933_v43, %s12343_s28  ;;  %v6025_v29 = vmul.f32 %v6020_v21, %v10048_v31 }
0x3615   :  { %v6048_v30 = vpop.permute.xlu0 %6047 }
0x3616   :  { %5968 = vrot.lane.b32.xlu0 %v5962_v55, %s12345_s9  ;;  %v6050_v5 = vpop.permute.xlu1 %6049  ;;  %v6055_v24 = vmul.f32 %v6048_v30, %v10045_v54 }
0x3617   :  { %v6051_v49 = vsel %vm896_vm11, %v6048_v30, %v6050_v5  ;;  %v6057_v13 = vmul.f32 %v6050_v5, %v12311_v41  ;;  %vm12352_vm11 = vcmask 801792  }
0x3618   :  { %5970 = vrot.lane.b32.xlu1 %v5963_v26, %s12345_s9  ;;  %v6056_v58 = vmul.f32 %v6051_v49, %v10048_v31 }
0x3619   :  { %v6079_v8 = vpop.permute.xlu0 %6078 }
0x361a   :  { %5972 = vrot.lane.b32.xlu0 %v5964_v0, %s12345_s9  ;;  %v6081_v14 = vpop.permute.xlu1 %6080  ;;  %v6086_v38 = vmul.f32 %v6079_v8, %v10045_v54 }
0x361b   :  { %v6082_v20 = vsel %vm12350_vm2, %v6079_v8, %v6081_v14  ;;  %v6088_v27 = vmul.f32 %v6081_v14, %v12311_v41  ;;  %vm12365_vm2 = vmmov %vm12364_vm3 }
0x361c   :  { %5999 = vrot.lane.b32.xlu1 %v5993_v22, %s12347_s27  ;;  %v6087_v15 = vmul.f32 %v6082_v20, %v10048_v31 }
0x361d   :  { %v6110_v40 = vpop.permute.xlu0 %6109 }
0x361e   :  { %6001 = vrot.lane.b32.xlu0 %v5994_v12, %s12347_s27  ;;  %v6112_v50 = vpop.permute.xlu1 %6111  ;;  %v6117_v56 = vmul.f32 %v6110_v40, %v10045_v54 }
0x361f   :  { %v6113_v4 = vsel %vm12352_vm11, %v6110_v40, %v6112_v50  ;;  %v6119_v1 = vmul.f32 %v6112_v50, %v12311_v41  ;;  %vm12366_vm11 = vcmask 375808  }
0x3620   :  { %6003 = vrot.lane.b32.xlu1 %v5995_v7, %s12347_s27  ;;  %v6118_v44 = vmul.f32 %v6113_v4, %v10048_v31 }
0x3621   :  { %v6141_v39 = vpop.permute.xlu0 %6140 }
0x3622   :  { %6030 = vrot.lane.b32.xlu0 %v6024_v57, %s12349_s11  ;;  %v6143_v62 = vpop.permute.xlu1 %6142  ;;  %v6148_v33 = vmul.f32 %v6141_v39, %v10045_v54 }
0x3623   :  { %v6144_v11 = vsel %vm12354_vm15, %v6141_v39, %v6143_v62  ;;  %vm12368_vm15 = vcmask 367616  }
0x3624   :  { %6032 = vrot.lane.b32.xlu1 %v6025_v29, %s12349_s11 }
0x3625   :  { %v6172_v3 = vpop.permute.xlu0 %6171 }
0x3626   :  { %6034 = vrot.lane.b32.xlu0 %v6026_v37, %s12349_s11  ;;  %v6174_v34 = vpop.permute.xlu1 %6173  ;;  %v6179_v60 = vmul.f32 %v6172_v3, %v10045_v54 }
0x3627   :  { %v6175_v59 = vsel %vm12356_vm0, %v6172_v3, %v6174_v34  ;;  %v6181_v46 = vmul.f32 %v6174_v34, %v12311_v41  ;;  %vm12370_vm0 = vcmask 359424  }
0x3628   :  { %6061 = vrot.lane.b32.xlu1 %v6055_v24, %s12136_s6  ;;  %v6180_v42 = vmul.f32 %v6175_v59, %v10048_v31 }
0x3629   :  { %v6203_v53 = vpop.permute.xlu0 %6202 }
0x362a   :  { %6063 = vrot.lane.b32.xlu0 %v6056_v58, %s12136_s6  ;;  %v6205_v48 = vpop.permute.xlu1 %6204  ;;  %v6210_v17 = vmul.f32 %v6203_v53, %v10045_v54 }
0x362b   :  { %v6206_v28 = vsel %vm12358_vm12, %v6203_v53, %v6205_v48  ;;  %v6212_v19 = vmul.f32 %v6205_v48, %v12311_v41  ;;  %vm12371_vm12 = vmmov %vm12370_vm0 }
0x362c   :  { %6065 = vrot.lane.b32.xlu1 %v6057_v13, %s12136_s6  ;;  %s12353_s6 = smov 30   ;;  %v6211_v32 = vmul.f32 %v6206_v28, %v10048_v31 }
0x362d   :  { %v6234_v6 = vpop.permute.xlu0 %6233 }
0x362e   :  { %6092 = vrot.lane.b32.xlu0 %v6086_v38, %s12351_s3  ;;  %v6236_v16 = vpop.permute.xlu1 %6235  ;;  %v6241_v2 = vmul.f32 %v6234_v6, %v10045_v54 }
0x362f   :  { %v6237_v23 = vsel %vm12360_vm1, %v6234_v6, %v6236_v16  ;;  %v6243_v36 = vmul.f32 %v6236_v16, %v12311_v41  ;;  %vm12372_vm1 = vcmask 351232  }
0x3630   :  { %6094 = vrot.lane.b32.xlu1 %v6087_v15, %s12351_s3  ;;  %v6242_v45 = vmul.f32 %v6237_v23, %v10048_v31 }
0x3631   :  { %v5787_v35 = vpop.permute.xlu0 %5786 }
0x3632   :  { %v5789_v61 = vsel %vm12335_vm6, %v10738_v52, %v5787_v35  ;;  %6096 = vrot.lane.b32.xlu0 %v6088_v27, %s12351_s3  ;;  %v6149_v52 = vmul.f32 %v6144_v11, %v10048_v31  ;;  %vm12367_vm6 = vmmov %vm12366_vm11 }
0x3633   :  { %v10820_v63 = vadd.f32 %v5789_v61, %v10695_v47  ;;  %v6150_v47 = vmul.f32 %v6143_v62, %v12311_v41 }
0x3634   :  { %6123 = vrot.lane.b32.xlu1 %v6117_v56, %s12353_s6 }
0x3636   :  { %6125 = vrot.lane.b32.xlu0 %v6118_v44, %s12353_s6 }
0x3638   :  { %6127 = vrot.lane.b32.xlu1 %v6119_v1, %s12353_s6 }
0x363a   :  { %6154 = vrot.lane.b32.xlu0 %v6148_v33, %s12355_s1 }
0x363c   :  { %6156 = vrot.lane.b32.xlu1 %v6149_v52, %s12355_s1 }
0x363e   :  { %6158 = vrot.lane.b32.xlu0 %v6150_v47, %s12355_s1 }
0x3640   :  { %6185 = vrot.lane.b32.xlu1 %v6179_v60, %s12357_s7 }
0x3642   :  { %6187 = vrot.lane.b32.xlu0 %v6180_v42, %s12357_s7 }
0x3644   :  { %6189 = vrot.lane.b32.xlu1 %v6181_v46, %s12357_s7 }
0x3646   :  { %6216 = vrot.lane.b32.xlu0 %v6210_v17, %s12359_s29 }
0x3648   :  { %6218 = vrot.lane.b32.xlu1 %v6211_v32, %s12359_s29 }
0x364a   :  { %6220 = vrot.lane.b32.xlu0 %v6212_v19, %s12359_s29 }
0x364c   :  { %6247 = vrot.lane.b32.xlu1 %v6241_v2, %s12361_s18 }
0x364e   :  { %6249 = vrot.lane.b32.xlu0 %v6242_v45, %s12361_s18 }
0x3650   :  { %6251 = vrot.lane.b32.xlu1 %v6243_v36, %s12361_s18 }
0x366a   :  { %v5814_v43 = vpop.permute.xlu1 %5813 }
0x366c   :  { %v5816_v18 = vpop.permute.xlu0 %5815 }
0x366d   :  { %v5819_v13 = vsel %vm12362_vm5, %v5814_v43, %v5816_v18  ;;  %vm12373_vm5 = vmmov %vm12372_vm1 }
0x366e   :  { %v5818_v55 = vpop.permute.xlu1 %5817  ;;  %v5823_v15 = vadd.f32 %v5819_v13, %v10743_v51 }
0x366f   :  { %v5820_v38 = vsel %vm12363_vm4, %v5816_v18, %v5818_v55  ;;  %vm12374_vm4 = vcmask 343040  }
0x3670   :  { %v5845_v30 = vpop.permute.xlu0 %5844  ;;  %v5824_v35 = vadd.f32 %v5820_v38, %v10820_v63 }
0x3672   :  { %v5847_v26 = vpop.permute.xlu1 %5846 }
0x3673   :  { %v5850_v6 = vsel %vm1110_vm13, %v5845_v30, %v5847_v26 }
0x3674   :  { %v5849_v9 = vpop.permute.xlu0 %5848  ;;  %v5854_v56 = vadd.f32 %v5850_v6, %v5823_v15 }
0x3675   :  { %v5851_v27 = vsel %vm1110_vm13, %v5847_v26, %v5849_v9  ;;  %vm12369_vm13 = vmmov %vm12368_vm15 }
0x3676   :  { %v5876_v0 = vpop.permute.xlu1 %5875  ;;  %v5855_v1 = vadd.f32 %v5851_v27, %v5824_v35 }
0x3678   :  { %v5878_v54 = vpop.permute.xlu0 %5877 }
0x3679   :  { %v5881_v4 = vsel %vm12364_vm3, %v5876_v0, %v5878_v54  ;;  %vm12375_vm3 = vmmov %vm12374_vm4 }
0x367a   :  { %v5880_v10 = vpop.permute.xlu1 %5879  ;;  %v5885_v11 = vadd.f32 %v5881_v4, %v5854_v56 }
0x367b   :  { %v5882_v44 = vsel %vm12365_vm2, %v5878_v54, %v5880_v10  ;;  %vm12376_vm2 = vcmask 252928  }
0x367c   :  { %v5907_v8 = vpop.permute.xlu0 %5906  ;;  %v5886_v34 = vadd.f32 %v5882_v44, %v5855_v1 }
0x367e   :  { %v5909_v22 = vpop.permute.xlu1 %5908 }
0x367f   :  { %v5912_v62 = vsel %vm12366_vm11, %v5907_v8, %v5909_v22  ;;  %vm12377_vm11 = vmmov %vm12376_vm2 }
0x3680   :  { %v5911_v31 = vpop.permute.xlu0 %5910  ;;  %v5916_v47 = vadd.f32 %v5912_v62, %v5885_v11  ;;  %v12380_v62 = vld [vmem:[#allocation39_spill] sm:$0xff]  ;;  %v12381_v11 = vld [vmem:[#allocation37_spill] sm:$0xff] }
0x3681   :  { %v5913_v52 = vsel %vm12367_vm6, %v5909_v22, %v5911_v31  ;;  %vm12378_vm6 = vcmask 236544  }
0x3682   :  { %v5938_v12 = vpop.permute.xlu1 %5937  ;;  %v5917_v42 = vadd.f32 %v5913_v52, %v5886_v34 }
0x3684   :  { %v5940_v25 = vpop.permute.xlu0 %5939 }
0x3685   :  { %v5943_v51 = vsel %vm12368_vm15, %v5938_v12, %v5940_v25 }
0x3686   :  { %v5942_v40 = vpop.permute.xlu1 %5941  ;;  %v5947_v48 = vadd.f32 %v5943_v51, %v5916_v47 }
0x3687   :  { %v5944_v60 = vsel %vm12369_vm13, %v5940_v25, %v5942_v40 }
0x3688   :  { %v5969_v41 = vpop.permute.xlu0 %5968  ;;  %v5948_v32 = vadd.f32 %v5944_v60, %v5917_v42 }
0x368a   :  { %v5971_v7 = vpop.permute.xlu1 %5970 }
0x368b   :  { %v5974_v63 = vsel %vm12370_vm0, %v5969_v41, %v5971_v7 }
0x368c   :  { %v5973_v21 = vpop.permute.xlu0 %5972  ;;  %v5978_v16 = vadd.f32 %v5974_v63, %v5947_v48 }
0x368d   :  { %v5975_v28 = vsel %vm12371_vm12, %v5971_v7, %v5973_v21 }
0x368e   :  { %v6000_v57 = vpop.permute.xlu1 %5999  ;;  %v5979_v45 = vadd.f32 %v5975_v28, %v5948_v32 }
0x3690   :  { %v6002_v39 = vpop.permute.xlu0 %6001 }
0x3691   :  { %v6005_v17 = vsel %vm12372_vm1, %v6000_v57, %v6002_v39 }
0x3692   :  { %v6004_v29 = vpop.permute.xlu1 %6003  ;;  %v6009_v36 = vadd.f32 %v6005_v17, %v5978_v16 }
0x3693   :  { %v6006_v23 = vsel %vm12373_vm5, %v6002_v39, %v6004_v29 }
0x3694   :  { %v6031_v5 = vpop.permute.xlu0 %6030  ;;  %v6010_v30 = vadd.f32 %v6006_v23, %v5979_v45 }
0x3696   :  { %v6033_v37 = vpop.permute.xlu1 %6032 }
0x3697   :  { %v6036_v2 = vsel %vm12374_vm4, %v6031_v5, %v6033_v37 }
0x3698   :  { %v6035_v49 = vpop.permute.xlu0 %6034  ;;  %v6040_v26 = vadd.f32 %v6036_v2, %v6009_v36 }
0x3699   :  { %v6037_v18 = vsel %vm12375_vm3, %v6033_v37, %v6035_v49 }
0x369a   :  { %v6062_v3 = vpop.permute.xlu1 %6061  ;;  %v6041_v10 = vadd.f32 %v6037_v18, %v6010_v30 }
0x369c   :  { %v6064_v24 = vpop.permute.xlu0 %6063 }
0x369d   :  { %v6067_v55 = vsel %vm879_vm14, %v6062_v3, %v6064_v24 }
0x369e   :  { %v6066_v58 = vpop.permute.xlu1 %6065  ;;  %v6071_v8 = vadd.f32 %v6067_v55, %v6040_v26 }
0x369f   :  { %v6068_v0 = vsel %vm879_vm14, %v6064_v24, %v6066_v58  ;;  %vm12379_vm14 = vmmov %vm12378_vm6 }
0x36a0   :  { %v6093_v14 = vpop.permute.xlu0 %6092  ;;  %v6072_v25 = vadd.f32 %v6068_v0, %v6041_v10 }
0x36a2   :  { %v6095_v53 = vpop.permute.xlu1 %6094 }
0x36a3   :  { %v6098_v54 = vsel %vm12376_vm2, %v6093_v14, %v6095_v53 }
0x36a4   :  { %v6097_v20 = vpop.permute.xlu0 %6096  ;;  %v6102_v40 = vadd.f32 %v6098_v54, %v6071_v8 }
0x36a5   :  { %v6099_v31 = vsel %vm12377_vm11, %v6095_v53, %v6097_v20 }
0x36a6   :  { %v6124_v50 = vpop.permute.xlu1 %6123  ;;  %v6103_v57 = vadd.f32 %v6099_v31, %v6072_v25 }
0x36a8   :  { %v6126_v61 = vpop.permute.xlu0 %6125 }
0x36a9   :  { %v6129_v12 = vsel %vm1880_vm7, %v6124_v50, %v6126_v61 }
0x36aa   :  { %v6128_v33 = vpop.permute.xlu1 %6127  ;;  %v6133_v39 = vadd.f32 %v6129_v12, %v6102_v40 }
0x36ab   :  { %v6130_v7 = vsel %vm1880_vm7, %v6126_v61, %v6128_v33 }
0x36ac   :  { %v6155_v59 = vpop.permute.xlu0 %6154  ;;  %v6134_v49 = vadd.f32 %v6130_v7, %v6103_v57 }
0x36ae   :  { %v6157_v46 = vpop.permute.xlu1 %6156 }
0x36af   :  { %v6160_v21 = vsel %vm12378_vm6, %v6155_v59, %v6157_v46 }
0x36b0   :  { %v6159_v19 = vpop.permute.xlu0 %6158  ;;  %v6164_v3 = vadd.f32 %v6160_v21, %v6133_v39 }
0x36b1   :  { %v6161_v5 = vsel %vm12379_vm14, %v6157_v46, %v6159_v19 }
0x36b2   :  { %v6186_v43 = vpop.permute.xlu1 %6185  ;;  %v6165_v53 = vadd.f32 %v6161_v5, %v6134_v49 }
0x36b4   :  { %v6188_v9 = vpop.permute.xlu0 %6187 }
0x36b5   :  { %v6191_v37 = vsel %vm1946_vm8, %v6186_v43, %v6188_v9 }
0x36b6   :  { %v6190_v22 = vpop.permute.xlu1 %6189  ;;  %v6195_v13 = vadd.f32 %v6191_v37, %v6164_v3 }
0x36b7   :  { %v6192_v58 = vsel %vm1946_vm8, %v6188_v9, %v6190_v22 }
0x36b8   :  { %v6217_v41 = vpop.permute.xlu0 %6216  ;;  %v6196_v6 = vadd.f32 %v6192_v58, %v6165_v53 }
0x36ba   :  { %v6219_v29 = vpop.permute.xlu1 %6218 }
0x36bb   :  { %v6222_v14 = vsel %vm1979_vm10, %v6217_v41, %v6219_v29 }
0x36bc   :  { %v6221_v24 = vpop.permute.xlu0 %6220  ;;  %v6226_v15 = vadd.f32 %v6222_v14, %v6195_v13 }
0x36bd   :  { %v6223_v38 = vsel %vm1979_vm10, %v6219_v29, %v6221_v24 }
0x36be   :  { %v6248_v20 = vpop.permute.xlu1 %6247  ;;  %v6227_v4 = vadd.f32 %v6223_v38, %v6196_v6 }
0x36c0   :  { %v6250_v50 = vpop.permute.xlu0 %6249 }
0x36c1   :  { %v6253_v27 = vsel %vm2012_vm9, %v6248_v20, %v6250_v50 }
0x36c2   :  { %v6257_v35 = vadd.f32 %v6253_v27, %v6226_v15  ;;  %v6252_v56 = vpop.permute.xlu1 %6251 }
0x36c3   :  { %v6254_v61 = vsel %vm2012_vm9, %v6250_v50, %v6252_v56 }
0x36c4   :  { %v6258_v44 = vadd.f32 %v6254_v61, %v6227_v4  ;;  %v6259_v1 = vadd.f32 %v6257_v35, %v12380_v62 }
0x36c6   :  { %v6260_v33 = vadd.f32 %v6258_v44, %v12381_v11  ;;  %6261 = vst [vmem:[#allocation18] sm:$0xff] %v6259_v1 }
0x36c8   :  { %6262 = vst [vmem:[#allocation18 + $0x8] sm:$0xff] %v6260_v33 }
0x36c9   :  { %6770 = shalt.err (!%p6767_p8)
}
0x36ca   :  { %s12382_s15 = sld [smem:[#allocation162_spill]] }
0x36d0   :  { %s6771_s14 = scalar_lea.hbm %s12382_s15, 256 }
0x36d1   :  { %p6772_p9 = scmp.ne.s32.totalorder %s12382_s15, %s6771_s14  ;;  %p6775_p10 = scmp.lt.u32.totalorder %s6771_s14, %s12382_s15 }
0x36d3   :  { %p6777_p11 = pnand %p6775_p10, %p6772_p9 }
0x36d5   :  { %6780 = shalt.err (!%p6777_p11)
}
0x36d6   :  { %6272 = dma.vmem_to_hbm [thread:$0]  %s6270_s8, 256, %s12382_s15, [#allocation4]  }
0x36d7   :  { %6793 = dma.done.wait [#allocation4], 256  }
0x36d8   :  { %6794 = vsyncadd [#allocation4], 4294967040 }
0x36d9   :  { %6276 = vsyncpa [#allocation3], 1 }
0x36da   :  { %6277 = vsyncpa [#allocation7], 1 }
0x36db   :  { %6278 = vsyncpa [#allocation10], 1 }
0x36dc   :  { %6279 = vsyncpa [#allocation4], 1 }
0x36dd   :  { %6280 = vsyncpa [#allocation5], 1 }
0x36de   :  { %6281 = vsyncpa [#allocation14], 1 }
0x36df   :  { %6282 = vsyncpa [#allocation17], 1 }

</bundles_post_ra>
